<compile_context>
chip_gen: v7x
topology: tpu7x:2x2x1
jax: 0.10.0
libtpu: 0.0.40
codegen_flags: <defaults>
</compile_context>

<pallas_src>
import math
import functools

import numpy as np
import jax
import jax.numpy as jnp
from jax.experimental import pallas as pl
from jax.experimental.pallas import tpu as pltpu

CP = 128  # padded channel / lane width used for every layer


# ---------------------------------------------------------------------------
# Fused forward kernel
# ---------------------------------------------------------------------------
def _make_kernel(n_batch, np_rows, oh2, oh3, n_mlp):
    """Build the fused NatureCatEncoder forward kernel for static sizes.

    n_batch : real batch size
    np_rows : batch rows padded up to a multiple of 8 (state / output rows)
    oh2     : conv2 output spatial size (6 for 64x64 inputs)
    oh3     : conv3 output spatial size (4 for 64x64 inputs)
    n_mlp   : number of Linear+ReLU layers in MLPBase
    """
    m2 = oh2 * oh2 * n_batch          # rows of the (h2, w2, n) activation frame
    assert (oh3 - 1) * (oh2 + 1) * n_batch + np_rows <= m2

    def kernel(*refs):
        (patches_ref, state_ref,
         w1_ref, b1_ref, w2_ref, b2_ref, w3_ref, b3_ref, wp_ref, bp_ref) = refs[:10]
        mlp_refs = refs[10:10 + 2 * n_mlp]
        i = 10 + 2 * n_mlp
        woa_ref, wob_ref, bo_ref = refs[i], refs[i + 1], refs[i + 2]
        out_ref = refs[i + 3]
        a1_ref = refs[i + 4]      # VMEM scratch: conv1 output (replicated rows), bf16
        frame_ref = refs[i + 5]   # VMEM scratch: zero-padded (h2, w2, n) frame, f32

        f32, bf16 = jnp.float32, jnp.bfloat16

        # ---- conv1 + ReLU : one matmul over the replicated im2col patches ----
        a1 = jnp.dot(patches_ref[...], w1_ref[...], preferred_element_type=f32)
        a1_ref[...] = jnp.maximum(a1 + b1_ref[...], 0.0).astype(bf16)

        # ---- conv2 + ReLU : 16 kernel positions == 16 contiguous row blocks ----
        acc2 = jnp.zeros((m2, CP), f32)
        for kk in range(16):
            lhs = a1_ref[kk * m2:(kk + 1) * m2, :]
            rhs = w2_ref[kk * CP:(kk + 1) * CP, :]
            acc2 = acc2 + jnp.dot(lhs, rhs, preferred_element_type=f32)
        a2 = jnp.maximum(acc2 + b2_ref[...], 0.0)                    # (m2, CP) f32

        # ---- conv3 + ReLU : shifted accumulation over the padded frame ----
        frame_ref[0:m2, :] = a2
        frame_ref[m2:, :] = jnp.zeros((frame_ref.shape[0] - m2, CP), f32)
        acc3 = jnp.zeros((m2, CP), f32)
        for i3 in range(3):
            for j3 in range(3):
                shift = (i3 * oh2 + j3) * n_batch
                kk = i3 * 3 + j3
                lhs = frame_ref[shift:shift + m2, :].astype(bf16)
                rhs = w3_ref[kk * CP:(kk + 1) * CP, :]
                acc3 = acc3 + jnp.dot(lhs, rhs, preferred_element_type=f32)
        a3 = jnp.maximum(acc3 + b3_ref[...], 0.0)                    # (m2, CP) f32

        # ---- flatten + RLProjection (Linear + ReLU) ----
        # One matmul per conv3 spatial position against the permuted,
        # zero-padded projection weight.  Result rows >= n_batch are padding
        # and are sliced off by the wrapper.
        frame_ref[0:m2, :] = a3
        accp = jnp.zeros((np_rows, CP), f32)
        for oh in range(oh3):
            for ow in range(oh3):
                p = oh * oh3 + ow
                r = (oh * oh2 + ow) * n_batch
                lhs = frame_ref[r:r + np_rows, :].astype(bf16)
                rhs = wp_ref[p * CP:(p + 1) * CP, :]
                accp = accp + jnp.dot(lhs, rhs, preferred_element_type=f32)
        vis = jnp.maximum(accp + bp_ref[...], 0.0).astype(bf16)      # (np_rows, CP)

        # ---- MLPBase on the state input (Linear + ReLU stack) ----
        s = state_ref[...]
        for li in range(n_mlp):
            w = mlp_refs[2 * li][...]
            b = mlp_refs[2 * li + 1][...]
            s = jnp.maximum(jnp.dot(s, w, preferred_element_type=f32) + b,
                            0.0).astype(bf16)

        # ---- out_lienar on concat([visual, state]), split-weight form ----
        o = (jnp.dot(vis, woa_ref[...], preferred_element_type=f32)
             + jnp.dot(s, wob_ref[...], preferred_element_type=f32)
             + bo_ref[...])
        out_ref[...] = jnp.maximum(o, 0.0)

    return kernel


# ---------------------------------------------------------------------------
# XLA glue: conv1 im2col on the kernel input (rows (n, oh, ow), torch feature
# order (c, i, j) so it matches weight.reshape(cout, cin*kh*kw)).
# ---------------------------------------------------------------------------
def _im2col(x, kh, kw, stride):
    n, c, h, w = x.shape
    oh = (h - kh) // stride + 1
    ow = (w - kw) // stride + 1
    cols = []
    for i in range(kh):
        for j in range(kw):
            cols.append(x[:, :, i:i + stride * oh:stride, j:j + stride * ow:stride])
    p = jnp.stack(cols, axis=2)                       # (N, C, kh*kw, OH, OW)
    p = p.reshape(n, c * kh * kw, oh, ow)
    p = p.transpose(0, 2, 3, 1).reshape(n * oh * ow, c * kh * kw)
    return p, oh, ow


# ---------------------------------------------------------------------------
# Forward wrapper (single pallas_call)
# ---------------------------------------------------------------------------
def nature_cat_encoder(x, packed, cfg):
    n = x.shape[0]
    state_dim = cfg["state_dim"]
    cin = cfg["in_channels"]
    wh = int(round(math.sqrt(cfg["visual_dim"] // cin)))
    hidden = cfg["hidden_dims"]
    hd = hidden[-1]

    state_x = x[:, :state_dim]
    vis_x = x[:, state_dim:].reshape(n, cin, wh, wh)

    patches_std, oh1, ow1 = _im2col(vis_x, 8, 8, 4)
    oh2 = (oh1 - 4) // 2 + 1
    oh3 = oh2 - 3 + 1
    assert oh3 * oh3 * 64 == 1024, "NatureEncoder projection expects 64x64 input"

    # Replicate / reorder patch rows to (i2, j2, h2, w2, n): conv1's output
    # then directly provides conv2's 16 kernel-position blocks contiguously.
    i2, j2, h2, w2, nn = np.meshgrid(np.arange(4), np.arange(4), np.arange(oh2),
                                     np.arange(oh2), np.arange(n), indexing="ij")
    row_idx = (nn * (oh1 * ow1) + (2 * h2 + i2) * ow1
               + (2 * w2 + j2)).reshape(-1).astype(np.int32)
    patches = patches_std.astype(jnp.bfloat16)[row_idx]      # (16*oh2*oh2*n, cin*64)

    np_rows = ((n + 7) // 8) * 8
    state_p = jnp.zeros((np_rows, CP), jnp.bfloat16)
    state_p = state_p.at[:n, :state_dim].set(state_x.astype(jnp.bfloat16))

    m2 = oh2 * oh2 * n
    frame_rows = -(-(m2 + (2 * oh2 + 2) * n) // 8) * 8

    kernel = _make_kernel(n, np_rows, oh2, oh3, len(hidden))
    args = [patches, state_p,
            packed["w1"], packed["b1"], packed["w2"], packed["b2"],
            packed["w3"], packed["b3"], packed["wp"], packed["bp"]]
    for wm, bm in packed["mlp"]:
        args += [wm, bm]
    args += [packed["woA"], packed["woB"], packed["bo"]]

    out = pl.pallas_call(
        kernel,
        out_shape=jax.ShapeDtypeStruct((np_rows, CP), jnp.float32),
        in_specs=[pl.BlockSpec(memory_space=pltpu.MemorySpace.VMEM)] * len(args),
        out_specs=pl.BlockSpec(memory_space=pltpu.MemorySpace.VMEM),
        scratch_shapes=[pltpu.VMEM((16 * m2, CP), jnp.bfloat16),
                        pltpu.VMEM((frame_rows, CP), jnp.float32)],
    )(*args)
    return out[:n, :2 * hd]


# ---------------------------------------------------------------------------
# Parameter init (PyTorch layout) and one-time packing to kernel layout
# ---------------------------------------------------------------------------
def init_raw_params(key, cfg):
    cin = cfg["in_channels"]
    hidden = cfg["hidden_dims"]
    hd = hidden[-1]
    ks = jax.random.split(key, 12)

    def conv(k, cout, c, kk):
        return jax.random.normal(k, (cout, c, kk, kk), jnp.float32) / math.sqrt(c * kk * kk)

    def lin(k, dout, din):
        return jax.random.normal(k, (dout, din), jnp.float32) / math.sqrt(din)

    def bias(k, d):
        return 0.01 * jax.random.normal(k, (d,), jnp.float32)

    raw = {
        "c1w": conv(ks[0], 32, cin, 8), "c1b": bias(ks[1], 32),
        "c2w": conv(ks[2], 64, 32, 4),  "c2b": bias(ks[3], 64),
        "c3w": conv(ks[4], 64, 64, 3),  "c3b": bias(ks[5], 64),
        "pw": lin(ks[6], hd, 1024),     "pb": bias(ks[7], hd),
        "ow": lin(ks[8], 2 * hd, 2 * hd), "ob": bias(ks[9], 2 * hd),
    }
    mlp = []
    d = cfg["state_dim"]
    mk = jax.random.split(ks[10], 2 * len(hidden))
    for li, hdim in enumerate(hidden):
        mlp.append((lin(mk[2 * li], hdim, d), bias(mk[2 * li + 1], hdim)))
        d = hdim
    raw["mlp"] = mlp
    return raw


def pack_params(raw, cfg):
    """Permute / zero-pad PyTorch-layout params ONCE into kernel-ready bf16."""
    bf = jnp.bfloat16
    hidden = cfg["hidden_dims"]
    hd = hidden[-1]
    assert 2 * hd <= CP and max(hidden) <= CP and cfg["state_dim"] <= CP

    def bias(v):
        return jnp.pad(v, (0, CP - v.shape[0])).reshape(1, CP).astype(jnp.float32)

    def conv_stack(w):  # (cout, cin, k, k) -> (k*k*CP, CP), block = kernel pos (i, j)
        k = w.shape[2]
        t = jnp.transpose(w, (2, 3, 1, 0)).reshape(k * k, w.shape[1], w.shape[0])
        t = jnp.pad(t, ((0, 0), (0, CP - w.shape[1]), (0, CP - w.shape[0])))
        return t.reshape(k * k * CP, CP).astype(bf)

    packed = {}
    c1 = raw["c1w"]
    packed["w1"] = jnp.pad(c1.reshape(c1.shape[0], -1).T,
                           ((0, 0), (0, CP - c1.shape[0]))).astype(bf)
    packed["b1"] = bias(raw["c1b"])
    packed["w2"] = conv_stack(raw["c2w"])
    packed["b2"] = bias(raw["c2b"])
    packed["w3"] = conv_stack(raw["c3w"])
    packed["b3"] = bias(raw["c3b"])

    # Visual projection: torch flatten index = c*16 + (oh*4 + ow); regroup into
    # 16 per-spatial-position (channel, out) blocks and zero-pad each to CPxCP.
    pw = raw["pw"]                                    # (hd, 1024)
    t = pw.reshape(hd, 64, 16).transpose(2, 1, 0)     # (pos, channel, out)
    t = jnp.pad(t, ((0, 0), (0, CP - 64), (0, CP - hd)))
    packed["wp"] = t.reshape(16 * CP, CP).astype(bf)
    packed["bp"] = bias(raw["pb"])

    packed["mlp"] = []
    for wm, bm in raw["mlp"]:
        wpad = jnp.pad(wm.T, ((0, CP - wm.shape[1]), (0, CP - wm.shape[0])))
        packed["mlp"].append((wpad.astype(bf), bias(bm)))

    ow = raw["ow"]                                    # (2hd, 2hd)
    packed["woA"] = jnp.pad(ow[:, :hd].T, ((0, CP - hd), (0, CP - 2 * hd))).astype(bf)
    packed["woB"] = jnp.pad(ow[:, hd:].T, ((0, CP - hd), (0, CP - 2 * hd))).astype(bf)
    packed["bo"] = bias(raw["ob"])
    return packed


# ---------------------------------------------------------------------------
if __name__ == "__main__":
    # NatureEncoder's output_dim=1024 fixes the visual input at 64x64 per
    # channel; other sizes are kept small.
    cfg = dict(in_channels=4, visual_dim=4 * 64 * 64, state_dim=16,
               hidden_dims=[32, 32])

    batch = 2
    key = jax.random.PRNGKey(0)
    k_params, k_x = jax.random.split(key)
    raw = init_raw_params(k_params, cfg)
    packed = pack_params(raw, cfg)     # padding / permuting hoisted out of forward

    x = jax.random.normal(k_x, (batch, cfg["state_dim"] + cfg["visual_dim"]),
                          jnp.float32)

    fwd = jax.jit(functools.partial(nature_cat_encoder, cfg=cfg))
    out = fwd(x, packed)
    jax.block_until_ready(out)

    expected = (batch, 2 * cfg["hidden_dims"][-1])
    assert out.shape == expected, (out.shape, expected)
    assert jnp.isfinite(out).all()
    print("KERNEL_OK")
</pallas_src>

<mosaic_0001>
module attributes {stable_mosaic.version = 11 : i64} {
  func.func @kernel(%arg0: memref<1152x256xbf16, #tpu.memory_space<vmem>>, %arg1: memref<8x128xbf16, #tpu.memory_space<vmem>>, %arg2: memref<256x128xbf16, #tpu.memory_space<vmem>>, %arg3: memref<1x128xf32, #tpu.memory_space<vmem>>, %arg4: memref<2048x128xbf16, #tpu.memory_space<vmem>>, %arg5: memref<1x128xf32, #tpu.memory_space<vmem>>, %arg6: memref<1152x128xbf16, #tpu.memory_space<vmem>>, %arg7: memref<1x128xf32, #tpu.memory_space<vmem>>, %arg8: memref<2048x128xbf16, #tpu.memory_space<vmem>>, %arg9: memref<1x128xf32, #tpu.memory_space<vmem>>, %arg10: memref<128x128xbf16, #tpu.memory_space<vmem>>, %arg11: memref<1x128xf32, #tpu.memory_space<vmem>>, %arg12: memref<128x128xbf16, #tpu.memory_space<vmem>>, %arg13: memref<1x128xf32, #tpu.memory_space<vmem>>, %arg14: memref<128x128xbf16, #tpu.memory_space<vmem>>, %arg15: memref<128x128xbf16, #tpu.memory_space<vmem>>, %arg16: memref<1x128xf32, #tpu.memory_space<vmem>>, %arg17: memref<8x128xf32, #tpu.memory_space<vmem>>, %arg18: memref<1152x128xbf16, #tpu.memory_space<vmem>>, %arg19: memref<104x128xf32, #tpu.memory_space<vmem>>) attributes {dimension_semantics = [], scalar_prefetch = 0 : i64, scratch_operands = 2 : i64, tpu.core_type = #tpu.core_type<tc>} {
    %c0 = arith.constant 0 : index
    %c0_0 = arith.constant 0 : index
    %0 = vector.load %arg0[%c0, %c0_0] : memref<1152x256xbf16, #tpu.memory_space<vmem>>, vector<1152x256xbf16>
    %c0_1 = arith.constant 0 : index
    %c0_2 = arith.constant 0 : index
    %1 = vector.load %arg2[%c0_1, %c0_2] : memref<256x128xbf16, #tpu.memory_space<vmem>>, vector<256x128xbf16>
    %cst = arith.constant dense<0.000000e+00> : vector<1152x128xf32>
    %2 = tpu.matmul %0, %1, %cst {dimension_numbers = #tpu.dot_dimension_numbers<[1], [0], [0], [1], [0, 0, 1, 1], [], []>} : vector<1152x256xbf16>, vector<256x128xbf16>, vector<1152x128xf32> -> vector<1152x128xf32>
    %c0_3 = arith.constant 0 : index
    %c0_4 = arith.constant 0 : index
    %3 = vector.load %arg3[%c0_3, %c0_4] : memref<1x128xf32, #tpu.memory_space<vmem>>, vector<1x128xf32>
    %4 = vector.broadcast %3 : vector<1x128xf32> to vector<1152x128xf32>
    %5 = arith.addf %2, %4 : vector<1152x128xf32>
    %cst_5 = arith.constant 0.000000e+00 : f32
    %6 = vector.broadcast %cst_5 : f32 to vector<1152x128xf32>
    %7 = arith.maximumf %5, %6 : vector<1152x128xf32>
    %8 = arith.truncf %7 : vector<1152x128xf32> to vector<1152x128xbf16>
    %c0_6 = arith.constant 0 : index
    %c0_7 = arith.constant 0 : index
    %9 = vector.load %arg18[%c0_6, %c0_7] : memref<1152x128xbf16, #tpu.memory_space<vmem>>, vector<1152x128xbf16>
    tpu.vector_store %arg18[%c0_6, %c0_7], %8 {strides = array<i32>} : memref<1152x128xbf16, #tpu.memory_space<vmem>>, vector<1152x128xbf16>,
    %cst_8 = arith.constant 0.000000e+00 : f32
    %10 = vector.broadcast %cst_8 : f32 to vector<72x128xf32>
    %c0_9 = arith.constant 0 : index
    %c0_10 = arith.constant 0 : index
    %11 = vector.load %arg18[%c0_9, %c0_10] : memref<1152x128xbf16, #tpu.memory_space<vmem>>, vector<72x128xbf16>
    %c0_11 = arith.constant 0 : index
    %c0_12 = arith.constant 0 : index
    %12 = vector.load %arg4[%c0_11, %c0_12] : memref<2048x128xbf16, #tpu.memory_space<vmem>>, vector<128x128xbf16>
    %cst_13 = arith.constant dense<0.000000e+00> : vector<72x128xf32>
    %13 = tpu.matmul %11, %12, %cst_13 {dimension_numbers = #tpu.dot_dimension_numbers<[1], [0], [0], [1], [0, 0, 1, 1], [], []>} : vector<72x128xbf16>, vector<128x128xbf16>, vector<72x128xf32> -> vector<72x128xf32>
    %14 = arith.addf %10, %13 : vector<72x128xf32>
    %c72 = arith.constant 72 : index
    %c0_14 = arith.constant 0 : index
    %15 = vector.load %arg18[%c72, %c0_14] : memref<1152x128xbf16, #tpu.memory_space<vmem>>, vector<72x128xbf16>
    %c128 = arith.constant 128 : index
    %c0_15 = arith.constant 0 : index
    %16 = vector.load %arg4[%c128, %c0_15] : memref<2048x128xbf16, #tpu.memory_space<vmem>>, vector<128x128xbf16>
    %cst_16 = arith.constant dense<0.000000e+00> : vector<72x128xf32>
    %17 = tpu.matmul %15, %16, %cst_16 {dimension_numbers = #tpu.dot_dimension_numbers<[1], [0], [0], [1], [0, 0, 1, 1], [], []>} : vector<72x128xbf16>, vector<128x128xbf16>, vector<72x128xf32> -> vector<72x128xf32>
    %18 = arith.addf %14, %17 : vector<72x128xf32>
    %c144 = arith.constant 144 : index
    %c0_17 = arith.constant 0 : index
    %19 = vector.load %arg18[%c144, %c0_17] : memref<1152x128xbf16, #tpu.memory_space<vmem>>, vector<72x128xbf16>
    %c256 = arith.constant 256 : index
    %c0_18 = arith.constant 0 : index
    %20 = vector.load %arg4[%c256, %c0_18] : memref<2048x128xbf16, #tpu.memory_space<vmem>>, vector<128x128xbf16>
    %cst_19 = arith.constant dense<0.000000e+00> : vector<72x128xf32>
    %21 = tpu.matmul %19, %20, %cst_19 {dimension_numbers = #tpu.dot_dimension_numbers<[1], [0], [0], [1], [0, 0, 1, 1], [], []>} : vector<72x128xbf16>, vector<128x128xbf16>, vector<72x128xf32> -> vector<72x128xf32>
    %22 = arith.addf %18, %21 : vector<72x128xf32>
    %c216 = arith.constant 216 : index
    %c0_20 = arith.constant 0 : index
    %23 = vector.load %arg18[%c216, %c0_20] : memref<1152x128xbf16, #tpu.memory_space<vmem>>, vector<72x128xbf16>
    %c384 = arith.constant 384 : index
    %c0_21 = arith.constant 0 : index
    %24 = vector.load %arg4[%c384, %c0_21] : memref<2048x128xbf16, #tpu.memory_space<vmem>>, vector<128x128xbf16>
    %cst_22 = arith.constant dense<0.000000e+00> : vector<72x128xf32>
    %25 = tpu.matmul %23, %24, %cst_22 {dimension_numbers = #tpu.dot_dimension_numbers<[1], [0], [0], [1], [0, 0, 1, 1], [], []>} : vector<72x128xbf16>, vector<128x128xbf16>, vector<72x128xf32> -> vector<72x128xf32>
    %26 = arith.addf %22, %25 : vector<72x128xf32>
    %c288 = arith.constant 288 : index
    %c0_23 = arith.constant 0 : index
    %27 = vector.load %arg18[%c288, %c0_23] : memref<1152x128xbf16, #tpu.memory_space<vmem>>, vector<72x128xbf16>
    %c512 = arith.constant 512 : index
    %c0_24 = arith.constant 0 : index
    %28 = vector.load %arg4[%c512, %c0_24] : memref<2048x128xbf16, #tpu.memory_space<vmem>>, vector<128x128xbf16>
    %cst_25 = arith.constant dense<0.000000e+00> : vector<72x128xf32>
    %29 = tpu.matmul %27, %28, %cst_25 {dimension_numbers = #tpu.dot_dimension_numbers<[1], [0], [0], [1], [0, 0, 1, 1], [], []>} : vector<72x128xbf16>, vector<128x128xbf16>, vector<72x128xf32> -> vector<72x128xf32>
    %30 = arith.addf %26, %29 : vector<72x128xf32>
    %c360 = arith.constant 360 : index
    %c0_26 = arith.constant 0 : index
    %31 = vector.load %arg18[%c360, %c0_26] : memref<1152x128xbf16, #tpu.memory_space<vmem>>, vector<72x128xbf16>
    %c640 = arith.constant 640 : index
    %c0_27 = arith.constant 0 : index
    %32 = vector.load %arg4[%c640, %c0_27] : memref<2048x128xbf16, #tpu.memory_space<vmem>>, vector<128x128xbf16>
    %cst_28 = arith.constant dense<0.000000e+00> : vector<72x128xf32>
    %33 = tpu.matmul %31, %32, %cst_28 {dimension_numbers = #tpu.dot_dimension_numbers<[1], [0], [0], [1], [0, 0, 1, 1], [], []>} : vector<72x128xbf16>, vector<128x128xbf16>, vector<72x128xf32> -> vector<72x128xf32>
    %34 = arith.addf %30, %33 : vector<72x128xf32>
    %c432 = arith.constant 432 : index
    %c0_29 = arith.constant 0 : index
    %35 = vector.load %arg18[%c432, %c0_29] : memref<1152x128xbf16, #tpu.memory_space<vmem>>, vector<72x128xbf16>
    %c768 = arith.constant 768 : index
    %c0_30 = arith.constant 0 : index
    %36 = vector.load %arg4[%c768, %c0_30] : memref<2048x128xbf16, #tpu.memory_space<vmem>>, vector<128x128xbf16>
    %cst_31 = arith.constant dense<0.000000e+00> : vector<72x128xf32>
    %37 = tpu.matmul %35, %36, %cst_31 {dimension_numbers = #tpu.dot_dimension_numbers<[1], [0], [0], [1], [0, 0, 1, 1], [], []>} : vector<72x128xbf16>, vector<128x128xbf16>, vector<72x128xf32> -> vector<72x128xf32>
    %38 = arith.addf %34, %37 : vector<72x128xf32>
    %c504 = arith.constant 504 : index
    %c0_32 = arith.constant 0 : index
    %39 = vector.load %arg18[%c504, %c0_32] : memref<1152x128xbf16, #tpu.memory_space<vmem>>, vector<72x128xbf16>
    %c896 = arith.constant 896 : index
    %c0_33 = arith.constant 0 : index
    %40 = vector.load %arg4[%c896, %c0_33] : memref<2048x128xbf16, #tpu.memory_space<vmem>>, vector<128x128xbf16>
    %cst_34 = arith.constant dense<0.000000e+00> : vector<72x128xf32>
    %41 = tpu.matmul %39, %40, %cst_34 {dimension_numbers = #tpu.dot_dimension_numbers<[1], [0], [0], [1], [0, 0, 1, 1], [], []>} : vector<72x128xbf16>, vector<128x128xbf16>, vector<72x128xf32> -> vector<72x128xf32>
    %42 = arith.addf %38, %41 : vector<72x128xf32>
    %c576 = arith.constant 576 : index
    %c0_35 = arith.constant 0 : index
    %43 = vector.load %arg18[%c576, %c0_35] : memref<1152x128xbf16, #tpu.memory_space<vmem>>, vector<72x128xbf16>
    %c1024 = arith.constant 1024 : index
    %c0_36 = arith.constant 0 : index
    %44 = vector.load %arg4[%c1024, %c0_36] : memref<2048x128xbf16, #tpu.memory_space<vmem>>, vector<128x128xbf16>
    %cst_37 = arith.constant dense<0.000000e+00> : vector<72x128xf32>
    %45 = tpu.matmul %43, %44, %cst_37 {dimension_numbers = #tpu.dot_dimension_numbers<[1], [0], [0], [1], [0, 0, 1, 1], [], []>} : vector<72x128xbf16>, vector<128x128xbf16>, vector<72x128xf32> -> vector<72x128xf32>
    %46 = arith.addf %42, %45 : vector<72x128xf32>
    %c648 = arith.constant 648 : index
    %c0_38 = arith.constant 0 : index
    %47 = vector.load %arg18[%c648, %c0_38] : memref<1152x128xbf16, #tpu.memory_space<vmem>>, vector<72x128xbf16>
    %c1152 = arith.constant 1152 : index
    %c0_39 = arith.constant 0 : index
    %48 = vector.load %arg4[%c1152, %c0_39] : memref<2048x128xbf16, #tpu.memory_space<vmem>>, vector<128x128xbf16>
    %cst_40 = arith.constant dense<0.000000e+00> : vector<72x128xf32>
    %49 = tpu.matmul %47, %48, %cst_40 {dimension_numbers = #tpu.dot_dimension_numbers<[1], [0], [0], [1], [0, 0, 1, 1], [], []>} : vector<72x128xbf16>, vector<128x128xbf16>, vector<72x128xf32> -> vector<72x128xf32>
    %50 = arith.addf %46, %49 : vector<72x128xf32>
    %c720 = arith.constant 720 : index
    %c0_41 = arith.constant 0 : index
    %51 = vector.load %arg18[%c720, %c0_41] : memref<1152x128xbf16, #tpu.memory_space<vmem>>, vector<72x128xbf16>
    %c1280 = arith.constant 1280 : index
    %c0_42 = arith.constant 0 : index
    %52 = vector.load %arg4[%c1280, %c0_42] : memref<2048x128xbf16, #tpu.memory_space<vmem>>, vector<128x128xbf16>
    %cst_43 = arith.constant dense<0.000000e+00> : vector<72x128xf32>
    %53 = tpu.matmul %51, %52, %cst_43 {dimension_numbers = #tpu.dot_dimension_numbers<[1], [0], [0], [1], [0, 0, 1, 1], [], []>} : vector<72x128xbf16>, vector<128x128xbf16>, vector<72x128xf32> -> vector<72x128xf32>
    %54 = arith.addf %50, %53 : vector<72x128xf32>
    %c792 = arith.constant 792 : index
    %c0_44 = arith.constant 0 : index
    %55 = vector.load %arg18[%c792, %c0_44] : memref<1152x128xbf16, #tpu.memory_space<vmem>>, vector<72x128xbf16>
    %c1408 = arith.constant 1408 : index
    %c0_45 = arith.constant 0 : index
    %56 = vector.load %arg4[%c1408, %c0_45] : memref<2048x128xbf16, #tpu.memory_space<vmem>>, vector<128x128xbf16>
    %cst_46 = arith.constant dense<0.000000e+00> : vector<72x128xf32>
    %57 = tpu.matmul %55, %56, %cst_46 {dimension_numbers = #tpu.dot_dimension_numbers<[1], [0], [0], [1], [0, 0, 1, 1], [], []>} : vector<72x128xbf16>, vector<128x128xbf16>, vector<72x128xf32> -> vector<72x128xf32>
    %58 = arith.addf %54, %57 : vector<72x128xf32>
    %c864 = arith.constant 864 : index
    %c0_47 = arith.constant 0 : index
    %59 = vector.load %arg18[%c864, %c0_47] : memref<1152x128xbf16, #tpu.memory_space<vmem>>, vector<72x128xbf16>
    %c1536 = arith.constant 1536 : index
    %c0_48 = arith.constant 0 : index
    %60 = vector.load %arg4[%c1536, %c0_48] : memref<2048x128xbf16, #tpu.memory_space<vmem>>, vector<128x128xbf16>
    %cst_49 = arith.constant dense<0.000000e+00> : vector<72x128xf32>
    %61 = tpu.matmul %59, %60, %cst_49 {dimension_numbers = #tpu.dot_dimension_numbers<[1], [0], [0], [1], [0, 0, 1, 1], [], []>} : vector<72x128xbf16>, vector<128x128xbf16>, vector<72x128xf32> -> vector<72x128xf32>
    %62 = arith.addf %58, %61 : vector<72x128xf32>
    %c936 = arith.constant 936 : index
    %c0_50 = arith.constant 0 : index
    %63 = vector.load %arg18[%c936, %c0_50] : memref<1152x128xbf16, #tpu.memory_space<vmem>>, vector<72x128xbf16>
    %c1664 = arith.constant 1664 : index
    %c0_51 = arith.constant 0 : index
    %64 = vector.load %arg4[%c1664, %c0_51] : memref<2048x128xbf16, #tpu.memory_space<vmem>>, vector<128x128xbf16>
    %cst_52 = arith.constant dense<0.000000e+00> : vector<72x128xf32>
    %65 = tpu.matmul %63, %64, %cst_52 {dimension_numbers = #tpu.dot_dimension_numbers<[1], [0], [0], [1], [0, 0, 1, 1], [], []>} : vector<72x128xbf16>, vector<128x128xbf16>, vector<72x128xf32> -> vector<72x128xf32>
    %66 = arith.addf %62, %65 : vector<72x128xf32>
    %c1008 = arith.constant 1008 : index
    %c0_53 = arith.constant 0 : index
    %67 = vector.load %arg18[%c1008, %c0_53] : memref<1152x128xbf16, #tpu.memory_space<vmem>>, vector<72x128xbf16>
    %c1792 = arith.constant 1792 : index
    %c0_54 = arith.constant 0 : index
    %68 = vector.load %arg4[%c1792, %c0_54] : memref<2048x128xbf16, #tpu.memory_space<vmem>>, vector<128x128xbf16>
    %cst_55 = arith.constant dense<0.000000e+00> : vector<72x128xf32>
    %69 = tpu.matmul %67, %68, %cst_55 {dimension_numbers = #tpu.dot_dimension_numbers<[1], [0], [0], [1], [0, 0, 1, 1], [], []>} : vector<72x128xbf16>, vector<128x128xbf16>, vector<72x128xf32> -> vector<72x128xf32>
    %70 = arith.addf %66, %69 : vector<72x128xf32>
    %c1080 = arith.constant 1080 : index
    %c0_56 = arith.constant 0 : index
    %71 = vector.load %arg18[%c1080, %c0_56] : memref<1152x128xbf16, #tpu.memory_space<vmem>>, vector<72x128xbf16>
    %c1920 = arith.constant 1920 : index
    %c0_57 = arith.constant 0 : index
    %72 = vector.load %arg4[%c1920, %c0_57] : memref<2048x128xbf16, #tpu.memory_space<vmem>>, vector<128x128xbf16>
    %cst_58 = arith.constant dense<0.000000e+00> : vector<72x128xf32>
    %73 = tpu.matmul %71, %72, %cst_58 {dimension_numbers = #tpu.dot_dimension_numbers<[1], [0], [0], [1], [0, 0, 1, 1], [], []>} : vector<72x128xbf16>, vector<128x128xbf16>, vector<72x128xf32> -> vector<72x128xf32>
    %74 = arith.addf %70, %73 : vector<72x128xf32>
    %c0_59 = arith.constant 0 : index
    %c0_60 = arith.constant 0 : index
    %75 = vector.load %arg5[%c0_59, %c0_60] : memref<1x128xf32, #tpu.memory_space<vmem>>, vector<1x128xf32>
    %76 = vector.broadcast %75 : vector<1x128xf32> to vector<72x128xf32>
    %77 = arith.addf %74, %76 : vector<72x128xf32>
    %cst_61 = arith.constant 0.000000e+00 : f32
    %78 = vector.broadcast %cst_61 : f32 to vector<72x128xf32>
    %79 = arith.maximumf %77, %78 : vector<72x128xf32>
    %c0_62 = arith.constant 0 : index
    %c0_63 = arith.constant 0 : index
    %80 = vector.load %arg19[%c0_62, %c0_63] : memref<104x128xf32, #tpu.memory_space<vmem>>, vector<72x128xf32>
    tpu.vector_store %arg19[%c0_62, %c0_63], %79 {strides = array<i32>} : memref<104x128xf32, #tpu.memory_space<vmem>>, vector<72x128xf32>,
    %cst_64 = arith.constant 0.000000e+00 : f32
    %81 = vector.broadcast %cst_64 : f32 to vector<32x128xf32>
    %c72_65 = arith.constant 72 : index
    %c0_66 = arith.constant 0 : index
    %82 = vector.load %arg19[%c72_65, %c0_66] : memref<104x128xf32, #tpu.memory_space<vmem>>, vector<32x128xf32>
    tpu.vector_store %arg19[%c72_65, %c0_66], %81 {strides = array<i32>} : memref<104x128xf32, #tpu.memory_space<vmem>>, vector<32x128xf32>,
    %cst_67 = arith.constant 0.000000e+00 : f32
    %83 = vector.broadcast %cst_67 : f32 to vector<72x128xf32>
    %c0_68 = arith.constant 0 : index
    %c0_69 = arith.constant 0 : index
    %84 = vector.load %arg19[%c0_68, %c0_69] : memref<104x128xf32, #tpu.memory_space<vmem>>, vector<72x128xf32>
    %85 = arith.truncf %84 : vector<72x128xf32> to vector<72x128xbf16>
    %c0_70 = arith.constant 0 : index
    %c0_71 = arith.constant 0 : index
    %86 = vector.load %arg6[%c0_70, %c0_71] : memref<1152x128xbf16, #tpu.memory_space<vmem>>, vector<128x128xbf16>
    %cst_72 = arith.constant dense<0.000000e+00> : vector<72x128xf32>
    %87 = tpu.matmul %85, %86, %cst_72 {dimension_numbers = #tpu.dot_dimension_numbers<[1], [0], [0], [1], [0, 0, 1, 1], [], []>} : vector<72x128xbf16>, vector<128x128xbf16>, vector<72x128xf32> -> vector<72x128xf32>
    %88 = arith.addf %83, %87 : vector<72x128xf32>
    %c2 = arith.constant 2 : index
    %c0_73 = arith.constant 0 : index
    %89 = vector.load %arg19[%c2, %c0_73] : memref<104x128xf32, #tpu.memory_space<vmem>>, vector<72x128xf32>
    %90 = arith.truncf %89 : vector<72x128xf32> to vector<72x128xbf16>
    %c128_74 = arith.constant 128 : index
    %c0_75 = arith.constant 0 : index
    %91 = vector.load %arg6[%c128_74, %c0_75] : memref<1152x128xbf16, #tpu.memory_space<vmem>>, vector<128x128xbf16>
    %cst_76 = arith.constant dense<0.000000e+00> : vector<72x128xf32>
    %92 = tpu.matmul %90, %91, %cst_76 {dimension_numbers = #tpu.dot_dimension_numbers<[1], [0], [0], [1], [0, 0, 1, 1], [], []>} : vector<72x128xbf16>, vector<128x128xbf16>, vector<72x128xf32> -> vector<72x128xf32>
    %93 = arith.addf %88, %92 : vector<72x128xf32>
    %c4 = arith.constant 4 : index
    %c0_77 = arith.constant 0 : index
    %94 = vector.load %arg19[%c4, %c0_77] : memref<104x128xf32, #tpu.memory_space<vmem>>, vector<72x128xf32>
    %95 = arith.truncf %94 : vector<72x128xf32> to vector<72x128xbf16>
    %c256_78 = arith.constant 256 : index
    %c0_79 = arith.constant 0 : index
    %96 = vector.load %arg6[%c256_78, %c0_79] : memref<1152x128xbf16, #tpu.memory_space<vmem>>, vector<128x128xbf16>
    %cst_80 = arith.constant dense<0.000000e+00> : vector<72x128xf32>
    %97 = tpu.matmul %95, %96, %cst_80 {dimension_numbers = #tpu.dot_dimension_numbers<[1], [0], [0], [1], [0, 0, 1, 1], [], []>} : vector<72x128xbf16>, vector<128x128xbf16>, vector<72x128xf32> -> vector<72x128xf32>
    %98 = arith.addf %93, %97 : vector<72x128xf32>
    %c12 = arith.constant 12 : index
    %c0_81 = arith.constant 0 : index
    %99 = vector.load %arg19[%c12, %c0_81] : memref<104x128xf32, #tpu.memory_space<vmem>>, vector<72x128xf32>
    %100 = arith.truncf %99 : vector<72x128xf32> to vector<72x128xbf16>
    %c384_82 = arith.constant 384 : index
    %c0_83 = arith.constant 0 : index
    %101 = vector.load %arg6[%c384_82, %c0_83] : memref<1152x128xbf16, #tpu.memory_space<vmem>>, vector<128x128xbf16>
    %cst_84 = arith.constant dense<0.000000e+00> : vector<72x128xf32>
    %102 = tpu.matmul %100, %101, %cst_84 {dimension_numbers = #tpu.dot_dimension_numbers<[1], [0], [0], [1], [0, 0, 1, 1], [], []>} : vector<72x128xbf16>, vector<128x128xbf16>, vector<72x128xf32> -> vector<72x128xf32>
    %103 = arith.addf %98, %102 : vector<72x128xf32>
    %c14 = arith.constant 14 : index
    %c0_85 = arith.constant 0 : index
    %104 = vector.load %arg19[%c14, %c0_85] : memref<104x128xf32, #tpu.memory_space<vmem>>, vector<72x128xf32>
    %105 = arith.truncf %104 : vector<72x128xf32> to vector<72x128xbf16>
    %c512_86 = arith.constant 512 : index
    %c0_87 = arith.constant 0 : index
    %106 = vector.load %arg6[%c512_86, %c0_87] : memref<1152x128xbf16, #tpu.memory_space<vmem>>, vector<128x128xbf16>
    %cst_88 = arith.constant dense<0.000000e+00> : vector<72x128xf32>
    %107 = tpu.matmul %105, %106, %cst_88 {dimension_numbers = #tpu.dot_dimension_numbers<[1], [0], [0], [1], [0, 0, 1, 1], [], []>} : vector<72x128xbf16>, vector<128x128xbf16>, vector<72x128xf32> -> vector<72x128xf32>
    %108 = arith.addf %103, %107 : vector<72x128xf32>
    %c16 = arith.constant 16 : index
    %c0_89 = arith.constant 0 : index
    %109 = vector.load %arg19[%c16, %c0_89] : memref<104x128xf32, #tpu.memory_space<vmem>>, vector<72x128xf32>
    %110 = arith.truncf %109 : vector<72x128xf32> to vector<72x128xbf16>
    %c640_90 = arith.constant 640 : index
    %c0_91 = arith.constant 0 : index
    %111 = vector.load %arg6[%c640_90, %c0_91] : memref<1152x128xbf16, #tpu.memory_space<vmem>>, vector<128x128xbf16>
    %cst_92 = arith.constant dense<0.000000e+00> : vector<72x128xf32>
    %112 = tpu.matmul %110, %111, %cst_92 {dimension_numbers = #tpu.dot_dimension_numbers<[1], [0], [0], [1], [0, 0, 1, 1], [], []>} : vector<72x128xbf16>, vector<128x128xbf16>, vector<72x128xf32> -> vector<72x128xf32>
    %113 = arith.addf %108, %112 : vector<72x128xf32>
    %c24 = arith.constant 24 : index
    %c0_93 = arith.constant 0 : index
    %114 = vector.load %arg19[%c24, %c0_93] : memref<104x128xf32, #tpu.memory_space<vmem>>, vector<72x128xf32>
    %115 = arith.truncf %114 : vector<72x128xf32> to vector<72x128xbf16>
    %c768_94 = arith.constant 768 : index
    %c0_95 = arith.constant 0 : index
    %116 = vector.load %arg6[%c768_94, %c0_95] : memref<1152x128xbf16, #tpu.memory_space<vmem>>, vector<128x128xbf16>
    %cst_96 = arith.constant dense<0.000000e+00> : vector<72x128xf32>
    %117 = tpu.matmul %115, %116, %cst_96 {dimension_numbers = #tpu.dot_dimension_numbers<[1], [0], [0], [1], [0, 0, 1, 1], [], []>} : vector<72x128xbf16>, vector<128x128xbf16>, vector<72x128xf32> -> vector<72x128xf32>
    %118 = arith.addf %113, %117 : vector<72x128xf32>
    %c26 = arith.constant 26 : index
    %c0_97 = arith.constant 0 : index
    %119 = vector.load %arg19[%c26, %c0_97] : memref<104x128xf32, #tpu.memory_space<vmem>>, vector<72x128xf32>
    %120 = arith.truncf %119 : vector<72x128xf32> to vector<72x128xbf16>
    %c896_98 = arith.constant 896 : index
    %c0_99 = arith.constant 0 : index
    %121 = vector.load %arg6[%c896_98, %c0_99] : memref<1152x128xbf16, #tpu.memory_space<vmem>>, vector<128x128xbf16>
    %cst_100 = arith.constant dense<0.000000e+00> : vector<72x128xf32>
    %122 = tpu.matmul %120, %121, %cst_100 {dimension_numbers = #tpu.dot_dimension_numbers<[1], [0], [0], [1], [0, 0, 1, 1], [], []>} : vector<72x128xbf16>, vector<128x128xbf16>, vector<72x128xf32> -> vector<72x128xf32>
    %123 = arith.addf %118, %122 : vector<72x128xf32>
    %c28 = arith.constant 28 : index
    %c0_101 = arith.constant 0 : index
    %124 = vector.load %arg19[%c28, %c0_101] : memref<104x128xf32, #tpu.memory_space<vmem>>, vector<72x128xf32>
    %125 = arith.truncf %124 : vector<72x128xf32> to vector<72x128xbf16>
    %c1024_102 = arith.constant 1024 : index
    %c0_103 = arith.constant 0 : index
    %126 = vector.load %arg6[%c1024_102, %c0_103] : memref<1152x128xbf16, #tpu.memory_space<vmem>>, vector<128x128xbf16>
    %cst_104 = arith.constant dense<0.000000e+00> : vector<72x128xf32>
    %127 = tpu.matmul %125, %126, %cst_104 {dimension_numbers = #tpu.dot_dimension_numbers<[1], [0], [0], [1], [0, 0, 1, 1], [], []>} : vector<72x128xbf16>, vector<128x128xbf16>, vector<72x128xf32> -> vector<72x128xf32>
    %128 = arith.addf %123, %127 : vector<72x128xf32>
    %c0_105 = arith.constant 0 : index
    %c0_106 = arith.constant 0 : index
    %129 = vector.load %arg7[%c0_105, %c0_106] : memref<1x128xf32, #tpu.memory_space<vmem>>, vector<1x128xf32>
    %130 = vector.broadcast %129 : vector<1x128xf32> to vector<72x128xf32>
    %131 = arith.addf %128, %130 : vector<72x128xf32>
    %cst_107 = arith.constant 0.000000e+00 : f32
    %132 = vector.broadcast %cst_107 : f32 to vector<72x128xf32>
    %133 = arith.maximumf %131, %132 : vector<72x128xf32>
    %c0_108 = arith.constant 0 : index
    %c0_109 = arith.constant 0 : index
    %134 = vector.load %arg19[%c0_108, %c0_109] : memref<104x128xf32, #tpu.memory_space<vmem>>, vector<72x128xf32>
    tpu.vector_store %arg19[%c0_108, %c0_109], %133 {strides = array<i32>} : memref<104x128xf32, #tpu.memory_space<vmem>>, vector<72x128xf32>,
    %cst_110 = arith.constant 0.000000e+00 : f32
    %135 = vector.broadcast %cst_110 : f32 to vector<8x128xf32>
    %c0_111 = arith.constant 0 : index
    %c0_112 = arith.constant 0 : index
    %136 = vector.load %arg19[%c0_111, %c0_112] : memref<104x128xf32, #tpu.memory_space<vmem>>, vector<8x128xf32>
    %137 = arith.truncf %136 : vector<8x128xf32> to vector<8x128xbf16>
    %c0_113 = arith.constant 0 : index
    %c0_114 = arith.constant 0 : index
    %138 = vector.load %arg8[%c0_113, %c0_114] : memref<2048x128xbf16, #tpu.memory_space<vmem>>, vector<128x128xbf16>
    %cst_115 = arith.constant dense<0.000000e+00> : vector<8x128xf32>
    %139 = tpu.matmul %137, %138, %cst_115 {dimension_numbers = #tpu.dot_dimension_numbers<[1], [0], [0], [1], [0, 0, 1, 1], [], []>} : vector<8x128xbf16>, vector<128x128xbf16>, vector<8x128xf32> -> vector<8x128xf32>
    %140 = arith.addf %135, %139 : vector<8x128xf32>
    %c2_116 = arith.constant 2 : index
    %c0_117 = arith.constant 0 : index
    %141 = vector.load %arg19[%c2_116, %c0_117] : memref<104x128xf32, #tpu.memory_space<vmem>>, vector<8x128xf32>
    %142 = arith.truncf %141 : vector<8x128xf32> to vector<8x128xbf16>
    %c128_118 = arith.constant 128 : index
    %c0_119 = arith.constant 0 : index
    %143 = vector.load %arg8[%c128_118, %c0_119] : memref<2048x128xbf16, #tpu.memory_space<vmem>>, vector<128x128xbf16>
    %cst_120 = arith.constant dense<0.000000e+00> : vector<8x128xf32>
    %144 = tpu.matmul %142, %143, %cst_120 {dimension_numbers = #tpu.dot_dimension_numbers<[1], [0], [0], [1], [0, 0, 1, 1], [], []>} : vector<8x128xbf16>, vector<128x128xbf16>, vector<8x128xf32> -> vector<8x128xf32>
    %145 = arith.addf %140, %144 : vector<8x128xf32>
    %c4_121 = arith.constant 4 : index
    %c0_122 = arith.constant 0 : index
    %146 = vector.load %arg19[%c4_121, %c0_122] : memref<104x128xf32, #tpu.memory_space<vmem>>, vector<8x128xf32>
    %147 = arith.truncf %146 : vector<8x128xf32> to vector<8x128xbf16>
    %c256_123 = arith.constant 256 : index
    %c0_124 = arith.constant 0 : index
    %148 = vector.load %arg8[%c256_123, %c0_124] : memref<2048x128xbf16, #tpu.memory_space<vmem>>, vector<128x128xbf16>
    %cst_125 = arith.constant dense<0.000000e+00> : vector<8x128xf32>
    %149 = tpu.matmul %147, %148, %cst_125 {dimension_numbers = #tpu.dot_dimension_numbers<[1], [0], [0], [1], [0, 0, 1, 1], [], []>} : vector<8x128xbf16>, vector<128x128xbf16>, vector<8x128xf32> -> vector<8x128xf32>
    %150 = arith.addf %145, %149 : vector<8x128xf32>
    %c6 = arith.constant 6 : index
    %c0_126 = arith.constant 0 : index
    %151 = vector.load %arg19[%c6, %c0_126] : memref<104x128xf32, #tpu.memory_space<vmem>>, vector<8x128xf32>
    %152 = arith.truncf %151 : vector<8x128xf32> to vector<8x128xbf16>
    %c384_127 = arith.constant 384 : index
    %c0_128 = arith.constant 0 : index
    %153 = vector.load %arg8[%c384_127, %c0_128] : memref<2048x128xbf16, #tpu.memory_space<vmem>>, vector<128x128xbf16>
    %cst_129 = arith.constant dense<0.000000e+00> : vector<8x128xf32>
    %154 = tpu.matmul %152, %153, %cst_129 {dimension_numbers = #tpu.dot_dimension_numbers<[1], [0], [0], [1], [0, 0, 1, 1], [], []>} : vector<8x128xbf16>, vector<128x128xbf16>, vector<8x128xf32> -> vector<8x128xf32>
    %155 = arith.addf %150, %154 : vector<8x128xf32>
    %c12_130 = arith.constant 12 : index
    %c0_131 = arith.constant 0 : index
    %156 = vector.load %arg19[%c12_130, %c0_131] : memref<104x128xf32, #tpu.memory_space<vmem>>, vector<8x128xf32>
    %157 = arith.truncf %156 : vector<8x128xf32> to vector<8x128xbf16>
    %c512_132 = arith.constant 512 : index
    %c0_133 = arith.constant 0 : index
    %158 = vector.load %arg8[%c512_132, %c0_133] : memref<2048x128xbf16, #tpu.memory_space<vmem>>, vector<128x128xbf16>
    %cst_134 = arith.constant dense<0.000000e+00> : vector<8x128xf32>
    %159 = tpu.matmul %157, %158, %cst_134 {dimension_numbers = #tpu.dot_dimension_numbers<[1], [0], [0], [1], [0, 0, 1, 1], [], []>} : vector<8x128xbf16>, vector<128x128xbf16>, vector<8x128xf32> -> vector<8x128xf32>
    %160 = arith.addf %155, %159 : vector<8x128xf32>
    %c14_135 = arith.constant 14 : index
    %c0_136 = arith.constant 0 : index
    %161 = vector.load %arg19[%c14_135, %c0_136] : memref<104x128xf32, #tpu.memory_space<vmem>>, vector<8x128xf32>
    %162 = arith.truncf %161 : vector<8x128xf32> to vector<8x128xbf16>
    %c640_137 = arith.constant 640 : index
    %c0_138 = arith.constant 0 : index
    %163 = vector.load %arg8[%c640_137, %c0_138] : memref<2048x128xbf16, #tpu.memory_space<vmem>>, vector<128x128xbf16>
    %cst_139 = arith.constant dense<0.000000e+00> : vector<8x128xf32>
    %164 = tpu.matmul %162, %163, %cst_139 {dimension_numbers = #tpu.dot_dimension_numbers<[1], [0], [0], [1], [0, 0, 1, 1], [], []>} : vector<8x128xbf16>, vector<128x128xbf16>, vector<8x128xf32> -> vector<8x128xf32>
    %165 = arith.addf %160, %164 : vector<8x128xf32>
    %c16_140 = arith.constant 16 : index
    %c0_141 = arith.constant 0 : index
    %166 = vector.load %arg19[%c16_140, %c0_141] : memref<104x128xf32, #tpu.memory_space<vmem>>, vector<8x128xf32>
    %167 = arith.truncf %166 : vector<8x128xf32> to vector<8x128xbf16>
    %c768_142 = arith.constant 768 : index
    %c0_143 = arith.constant 0 : index
    %168 = vector.load %arg8[%c768_142, %c0_143] : memref<2048x128xbf16, #tpu.memory_space<vmem>>, vector<128x128xbf16>
    %cst_144 = arith.constant dense<0.000000e+00> : vector<8x128xf32>
    %169 = tpu.matmul %167, %168, %cst_144 {dimension_numbers = #tpu.dot_dimension_numbers<[1], [0], [0], [1], [0, 0, 1, 1], [], []>} : vector<8x128xbf16>, vector<128x128xbf16>, vector<8x128xf32> -> vector<8x128xf32>
    %170 = arith.addf %165, %169 : vector<8x128xf32>
    %c18 = arith.constant 18 : index
    %c0_145 = arith.constant 0 : index
    %171 = vector.load %arg19[%c18, %c0_145] : memref<104x128xf32, #tpu.memory_space<vmem>>, vector<8x128xf32>
    %172 = arith.truncf %171 : vector<8x128xf32> to vector<8x128xbf16>
    %c896_146 = arith.constant 896 : index
    %c0_147 = arith.constant 0 : index
    %173 = vector.load %arg8[%c896_146, %c0_147] : memref<2048x128xbf16, #tpu.memory_space<vmem>>, vector<128x128xbf16>
    %cst_148 = arith.constant dense<0.000000e+00> : vector<8x128xf32>
    %174 = tpu.matmul %172, %173, %cst_148 {dimension_numbers = #tpu.dot_dimension_numbers<[1], [0], [0], [1], [0, 0, 1, 1], [], []>} : vector<8x128xbf16>, vector<128x128xbf16>, vector<8x128xf32> -> vector<8x128xf32>
    %175 = arith.addf %170, %174 : vector<8x128xf32>
    %c24_149 = arith.constant 24 : index
    %c0_150 = arith.constant 0 : index
    %176 = vector.load %arg19[%c24_149, %c0_150] : memref<104x128xf32, #tpu.memory_space<vmem>>, vector<8x128xf32>
    %177 = arith.truncf %176 : vector<8x128xf32> to vector<8x128xbf16>
    %c1024_151 = arith.constant 1024 : index
    %c0_152 = arith.constant 0 : index
    %178 = vector.load %arg8[%c1024_151, %c0_152] : memref<2048x128xbf16, #tpu.memory_space<vmem>>, vector<128x128xbf16>
    %cst_153 = arith.constant dense<0.000000e+00> : vector<8x128xf32>
    %179 = tpu.matmul %177, %178, %cst_153 {dimension_numbers = #tpu.dot_dimension_numbers<[1], [0], [0], [1], [0, 0, 1, 1], [], []>} : vector<8x128xbf16>, vector<128x128xbf16>, vector<8x128xf32> -> vector<8x128xf32>
    %180 = arith.addf %175, %179 : vector<8x128xf32>
    %c26_154 = arith.constant 26 : index
    %c0_155 = arith.constant 0 : index
    %181 = vector.load %arg19[%c26_154, %c0_155] : memref<104x128xf32, #tpu.memory_space<vmem>>, vector<8x128xf32>
    %182 = arith.truncf %181 : vector<8x128xf32> to vector<8x128xbf16>
    %c1152_156 = arith.constant 1152 : index
    %c0_157 = arith.constant 0 : index
    %183 = vector.load %arg8[%c1152_156, %c0_157] : memref<2048x128xbf16, #tpu.memory_space<vmem>>, vector<128x128xbf16>
    %cst_158 = arith.constant dense<0.000000e+00> : vector<8x128xf32>
    %184 = tpu.matmul %182, %183, %cst_158 {dimension_numbers = #tpu.dot_dimension_numbers<[1], [0], [0], [1], [0, 0, 1, 1], [], []>} : vector<8x128xbf16>, vector<128x128xbf16>, vector<8x128xf32> -> vector<8x128xf32>
    %185 = arith.addf %180, %184 : vector<8x128xf32>
    %c28_159 = arith.constant 28 : index
    %c0_160 = arith.constant 0 : index
    %186 = vector.load %arg19[%c28_159, %c0_160] : memref<104x128xf32, #tpu.memory_space<vmem>>, vector<8x128xf32>
    %187 = arith.truncf %186 : vector<8x128xf32> to vector<8x128xbf16>
    %c1280_161 = arith.constant 1280 : index
    %c0_162 = arith.constant 0 : index
    %188 = vector.load %arg8[%c1280_161, %c0_162] : memref<2048x128xbf16, #tpu.memory_space<vmem>>, vector<128x128xbf16>
    %cst_163 = arith.constant dense<0.000000e+00> : vector<8x128xf32>
    %189 = tpu.matmul %187, %188, %cst_163 {dimension_numbers = #tpu.dot_dimension_numbers<[1], [0], [0], [1], [0, 0, 1, 1], [], []>} : vector<8x128xbf16>, vector<128x128xbf16>, vector<8x128xf32> -> vector<8x128xf32>
    %190 = arith.addf %185, %189 : vector<8x128xf32>
    %c30 = arith.constant 30 : index
    %c0_164 = arith.constant 0 : index
    %191 = vector.load %arg19[%c30, %c0_164] : memref<104x128xf32, #tpu.memory_space<vmem>>, vector<8x128xf32>
    %192 = arith.truncf %191 : vector<8x128xf32> to vector<8x128xbf16>
    %c1408_165 = arith.constant 1408 : index
    %c0_166 = arith.constant 0 : index
    %193 = vector.load %arg8[%c1408_165, %c0_166] : memref<2048x128xbf16, #tpu.memory_space<vmem>>, vector<128x128xbf16>
    %cst_167 = arith.constant dense<0.000000e+00> : vector<8x128xf32>
    %194 = tpu.matmul %192, %193, %cst_167 {dimension_numbers = #tpu.dot_dimension_numbers<[1], [0], [0], [1], [0, 0, 1, 1], [], []>} : vector<8x128xbf16>, vector<128x128xbf16>, vector<8x128xf32> -> vector<8x128xf32>
    %195 = arith.addf %190, %194 : vector<8x128xf32>
    %c36 = arith.constant 36 : index
    %c0_168 = arith.constant 0 : index
    %196 = vector.load %arg19[%c36, %c0_168] : memref<104x128xf32, #tpu.memory_space<vmem>>, vector<8x128xf32>
    %197 = arith.truncf %196 : vector<8x128xf32> to vector<8x128xbf16>
    %c1536_169 = arith.constant 1536 : index
    %c0_170 = arith.constant 0 : index
    %198 = vector.load %arg8[%c1536_169, %c0_170] : memref<2048x128xbf16, #tpu.memory_space<vmem>>, vector<128x128xbf16>
    %cst_171 = arith.constant dense<0.000000e+00> : vector<8x128xf32>
    %199 = tpu.matmul %197, %198, %cst_171 {dimension_numbers = #tpu.dot_dimension_numbers<[1], [0], [0], [1], [0, 0, 1, 1], [], []>} : vector<8x128xbf16>, vector<128x128xbf16>, vector<8x128xf32> -> vector<8x128xf32>
    %200 = arith.addf %195, %199 : vector<8x128xf32>
    %c38 = arith.constant 38 : index
    %c0_172 = arith.constant 0 : index
    %201 = vector.load %arg19[%c38, %c0_172] : memref<104x128xf32, #tpu.memory_space<vmem>>, vector<8x128xf32>
    %202 = arith.truncf %201 : vector<8x128xf32> to vector<8x128xbf16>
    %c1664_173 = arith.constant 1664 : index
    %c0_174 = arith.constant 0 : index
    %203 = vector.load %arg8[%c1664_173, %c0_174] : memref<2048x128xbf16, #tpu.memory_space<vmem>>, vector<128x128xbf16>
    %cst_175 = arith.constant dense<0.000000e+00> : vector<8x128xf32>
    %204 = tpu.matmul %202, %203, %cst_175 {dimension_numbers = #tpu.dot_dimension_numbers<[1], [0], [0], [1], [0, 0, 1, 1], [], []>} : vector<8x128xbf16>, vector<128x128xbf16>, vector<8x128xf32> -> vector<8x128xf32>
    %205 = arith.addf %200, %204 : vector<8x128xf32>
    %c40 = arith.constant 40 : index
    %c0_176 = arith.constant 0 : index
    %206 = vector.load %arg19[%c40, %c0_176] : memref<104x128xf32, #tpu.memory_space<vmem>>, vector<8x128xf32>
    %207 = arith.truncf %206 : vector<8x128xf32> to vector<8x128xbf16>
    %c1792_177 = arith.constant 1792 : index
    %c0_178 = arith.constant 0 : index
    %208 = vector.load %arg8[%c1792_177, %c0_178] : memref<2048x128xbf16, #tpu.memory_space<vmem>>, vector<128x128xbf16>
    %cst_179 = arith.constant dense<0.000000e+00> : vector<8x128xf32>
    %209 = tpu.matmul %207, %208, %cst_179 {dimension_numbers = #tpu.dot_dimension_numbers<[1], [0], [0], [1], [0, 0, 1, 1], [], []>} : vector<8x128xbf16>, vector<128x128xbf16>, vector<8x128xf32> -> vector<8x128xf32>
    %210 = arith.addf %205, %209 : vector<8x128xf32>
    %c42 = arith.constant 42 : index
    %c0_180 = arith.constant 0 : index
    %211 = vector.load %arg19[%c42, %c0_180] : memref<104x128xf32, #tpu.memory_space<vmem>>, vector<8x128xf32>
    %212 = arith.truncf %211 : vector<8x128xf32> to vector<8x128xbf16>
    %c1920_181 = arith.constant 1920 : index
    %c0_182 = arith.constant 0 : index
    %213 = vector.load %arg8[%c1920_181, %c0_182] : memref<2048x128xbf16, #tpu.memory_space<vmem>>, vector<128x128xbf16>
    %cst_183 = arith.constant dense<0.000000e+00> : vector<8x128xf32>
    %214 = tpu.matmul %212, %213, %cst_183 {dimension_numbers = #tpu.dot_dimension_numbers<[1], [0], [0], [1], [0, 0, 1, 1], [], []>} : vector<8x128xbf16>, vector<128x128xbf16>, vector<8x128xf32> -> vector<8x128xf32>
    %215 = arith.addf %210, %214 : vector<8x128xf32>
    %c0_184 = arith.constant 0 : index
    %c0_185 = arith.constant 0 : index
    %216 = vector.load %arg9[%c0_184, %c0_185] : memref<1x128xf32, #tpu.memory_space<vmem>>, vector<1x128xf32>
    %217 = vector.broadcast %216 : vector<1x128xf32> to vector<8x128xf32>
    %218 = arith.addf %215, %217 : vector<8x128xf32>
    %cst_186 = arith.constant 0.000000e+00 : f32
    %219 = vector.broadcast %cst_186 : f32 to vector<8x128xf32>
    %220 = arith.maximumf %218, %219 : vector<8x128xf32>
    %221 = arith.truncf %220 : vector<8x128xf32> to vector<8x128xbf16>
    %c0_187 = arith.constant 0 : index
    %c0_188 = arith.constant 0 : index
    %222 = vector.load %arg1[%c0_187, %c0_188] : memref<8x128xbf16, #tpu.memory_space<vmem>>, vector<8x128xbf16>
    %c0_189 = arith.constant 0 : index
    %c0_190 = arith.constant 0 : index
    %223 = vector.load %arg10[%c0_189, %c0_190] : memref<128x128xbf16, #tpu.memory_space<vmem>>, vector<128x128xbf16>
    %c0_191 = arith.constant 0 : index
    %c0_192 = arith.constant 0 : index
    %224 = vector.load %arg11[%c0_191, %c0_192] : memref<1x128xf32, #tpu.memory_space<vmem>>, vector<1x128xf32>
    %cst_193 = arith.constant dense<0.000000e+00> : vector<8x128xf32>
    %225 = tpu.matmul %222, %223, %cst_193 {dimension_numbers = #tpu.dot_dimension_numbers<[1], [0], [0], [1], [0, 0, 1, 1], [], []>} : vector<8x128xbf16>, vector<128x128xbf16>, vector<8x128xf32> -> vector<8x128xf32>
    %226 = vector.broadcast %224 : vector<1x128xf32> to vector<8x128xf32>
    %227 = arith.addf %225, %226 : vector<8x128xf32>
    %cst_194 = arith.constant 0.000000e+00 : f32
    %228 = vector.broadcast %cst_194 : f32 to vector<8x128xf32>
    %229 = arith.maximumf %227, %228 : vector<8x128xf32>
    %230 = arith.truncf %229 : vector<8x128xf32> to vector<8x128xbf16>
    %c0_195 = arith.constant 0 : index
    %c0_196 = arith.constant 0 : index
    %231 = vector.load %arg12[%c0_195, %c0_196] : memref<128x128xbf16, #tpu.memory_space<vmem>>, vector<128x128xbf16>
    %c0_197 = arith.constant 0 : index
    %c0_198 = arith.constant 0 : index
    %232 = vector.load %arg13[%c0_197, %c0_198] : memref<1x128xf32, #tpu.memory_space<vmem>>, vector<1x128xf32>
    %cst_199 = arith.constant dense<0.000000e+00> : vector<8x128xf32>
    %233 = tpu.matmul %230, %231, %cst_199 {dimension_numbers = #tpu.dot_dimension_numbers<[1], [0], [0], [1], [0, 0, 1, 1], [], []>} : vector<8x128xbf16>, vector<128x128xbf16>, vector<8x128xf32> -> vector<8x128xf32>
    %234 = vector.broadcast %232 : vector<1x128xf32> to vector<8x128xf32>
    %235 = arith.addf %233, %234 : vector<8x128xf32>
    %cst_200 = arith.constant 0.000000e+00 : f32
    %236 = vector.broadcast %cst_200 : f32 to vector<8x128xf32>
    %237 = arith.maximumf %235, %236 : vector<8x128xf32>
    %238 = arith.truncf %237 : vector<8x128xf32> to vector<8x128xbf16>
    %c0_201 = arith.constant 0 : index
    %c0_202 = arith.constant 0 : index
    %239 = vector.load %arg14[%c0_201, %c0_202] : memref<128x128xbf16, #tpu.memory_space<vmem>>, vector<128x128xbf16>
    %cst_203 = arith.constant dense<0.000000e+00> : vector<8x128xf32>
    %240 = tpu.matmul %221, %239, %cst_203 {dimension_numbers = #tpu.dot_dimension_numbers<[1], [0], [0], [1], [0, 0, 1, 1], [], []>} : vector<8x128xbf16>, vector<128x128xbf16>, vector<8x128xf32> -> vector<8x128xf32>
    %c0_204 = arith.constant 0 : index
    %c0_205 = arith.constant 0 : index
    %241 = vector.load %arg15[%c0_204, %c0_205] : memref<128x128xbf16, #tpu.memory_space<vmem>>, vector<128x128xbf16>
    %cst_206 = arith.constant dense<0.000000e+00> : vector<8x128xf32>
    %242 = tpu.matmul %238, %241, %cst_206 {dimension_numbers = #tpu.dot_dimension_numbers<[1], [0], [0], [1], [0, 0, 1, 1], [], []>} : vector<8x128xbf16>, vector<128x128xbf16>, vector<8x128xf32> -> vector<8x128xf32>
    %243 = arith.addf %240, %242 : vector<8x128xf32>
    %c0_207 = arith.constant 0 : index
    %c0_208 = arith.constant 0 : index
    %244 = vector.load %arg16[%c0_207, %c0_208] : memref<1x128xf32, #tpu.memory_space<vmem>>, vector<1x128xf32>
    %245 = vector.broadcast %244 : vector<1x128xf32> to vector<8x128xf32>
    %246 = arith.addf %243, %245 : vector<8x128xf32>
    %cst_209 = arith.constant 0.000000e+00 : f32
    %247 = vector.broadcast %cst_209 : f32 to vector<8x128xf32>
    %248 = arith.maximumf %246, %247 : vector<8x128xf32>
    %c0_210 = arith.constant 0 : index
    %c0_211 = arith.constant 0 : index
    %249 = vector.load %arg17[%c0_210, %c0_211] : memref<8x128xf32, #tpu.memory_space<vmem>>, vector<8x128xf32>
    tpu.vector_store %arg17[%c0_210, %c0_211], %248 {strides = array<i32>} : memref<8x128xf32, #tpu.memory_space<vmem>>, vector<8x128xf32>,
    return
  }
}

</mosaic_0001>

<bundles_post_ra>
// kernel: nature_cat_encoder.1
= control target key start
LH: loop header
LB: loop body
LE: loop exit
PB: predicated region body
PF: predicated region fallthrough
CT: control target
= control target key end

     0   :  { %v11079_v0 = vmov 0   ;;  %v11080_v47 = vmov 0.0   ;;  %vm11081_vm0 = vmmov 0   ;;  %vm2000_vm1 = vcmask 1043456   ;;  %s14307_s2 = inlined_call_operand.vmem [shape: bf16[256,128], index: 2, kind: input, shape index: {}]   ;;  %s14308_s0 = inlined_call_operand.vmem [shape: bf16[1152,256], index: 0, kind: input, shape index: {}]   ;;  %s14309_s4 = inlined_call_operand.vmem [shape: bf16[2048,128], index: 4, kind: input, shape index: {}]   ;;  %s14310_s3 = inlined_call_operand.vmem [shape: f32[1,128], index: 3, kind: input, shape index: {}]   ;;  %s14311_s6 = inlined_call_operand.vmem [shape: bf16[1152,128], index: 6, kind: input, shape index: {}]   ;;  %s14312_s5 = inlined_call_operand.vmem [shape: f32[1,128], index: 5, kind: input, shape index: {}]   ;;  %s14313_s8 = inlined_call_operand.vmem [shape: bf16[2048,128], index: 8, kind: input, shape index: {}]   ;;  %s14314_s7 = inlined_call_operand.vmem [shape: f32[1,128], index: 7, kind: input, shape index: {}]   ;;  %s14315_s10 = inlined_call_operand.vmem [shape: bf16[128,128], index: 10, kind: input, shape index: {}]   ;;  %s14316_s1 = inlined_call_operand.vmem [shape: bf16[8,128], index: 1, kind: input, shape index: {}]   ;;  %s14317_s12 = inlined_call_operand.vmem [shape: bf16[128,128], index: 12, kind: input, shape index: {}]   ;;  %s14318_s14 = inlined_call_operand.vmem [shape: bf16[128,128], index: 14, kind: input, shape index: {}]   ;;  %s14319_s15 = inlined_call_operand.vmem [shape: bf16[128,128], index: 15, kind: input, shape index: {}]   ;;  %s14320_s11 = inlined_call_operand.vmem [shape: f32[1,128], index: 11, kind: input, shape index: {}]   ;;  %s14321_s9 = inlined_call_operand.vmem [shape: f32[1,128], index: 9, kind: input, shape index: {}]   ;;  %s14322_s13 = inlined_call_operand.vmem [shape: f32[1,128], index: 13, kind: input, shape index: {}]   ;;  %s14323_s16 = inlined_call_operand.vmem [shape: f32[1,128], index: 16, kind: input, shape index: {}]   ;;  %s14324_s17 = inlined_call_operand.vmem [shape: f32[8,128], index: 17, kind: output, shape index: {}]  }
   0x1   :  { %14327 = sst [smem:[#allocation4_spill]] %s14307_s2  ;;  %1056 = vmatprep.subr.bf16.mxu0 %v11079_v0  ;;  %v10568_v46 = vld [vmem:[%s14309_s4 + $0x40] sm:$0xff]   ;;  %9174 = vmatprep.subr.bf16.mxu1 %v11080_v47  ;;  %4522 = vst [vmem:[#allocation3 + $0x48] sm:$0xff] %v11080_v47  ;;  %4523 = vst [vmem:[#allocation3 + $0x50] sm:$0xff] %v11080_v47  ;;  %v10569_v48 = vld [vmem:[%s14309_s4 + $0x48] sm:$0xff]  }
   0x2   :  { %14328 = sst [smem:[#allocation5_spill]] %s14308_s0  ;;  %s14329_s26 = sld [smem:[#allocation4_spill]]  ;;  %4524 = vst [vmem:[#allocation3 + $0x58] sm:$0xff] %v11080_v47  ;;  %4525 = vst [vmem:[#allocation3 + $0x60] sm:$0xff] %v11080_v47  ;;  %9175 = vmatpush3.bf16.msra.mxu1 %v10568_v46  ;;  %v10573_v51 = vld [vmem:[%s14309_s4 + $0x50] sm:$0xff]   ;;  %v10574_v52 = vld [vmem:[%s14309_s4 + $0x58] sm:$0xff]   ;;  %9190 = vmatprep.mubr.msk.bf16.mxu1 %vm11081_vm0, %v11080_v47 }
   0x3   :  { %s14330_s22 = sld [smem:[#allocation5_spill]]  ;;  %9176 = vmatprep.subr.bf16.mxu1 %v11080_v47  ;;  %v10578_v55 = vld [vmem:[%s14309_s4 + $0x60] sm:$0xff]   ;;  %v10579_v56 = vld [vmem:[%s14309_s4 + $0x68] sm:$0xff]   ;;  %v10580_v59 = vld [vmem:[%s14309_s4 + $0x70] sm:$0xff]  }
   0x4   :  { %v10581_v61 = vld [vmem:[%s14309_s4 + $0x78] sm:$0xff]  }
   0x6   :  { %9177 = vmatpush3.bf16.msra.mxu1 %v10569_v48 }
   0x7   :  { %9178 = vmatprep.subr.bf16.mxu1 %v11080_v47 }
   0x8   :  { %v10477_v1 = vld [vmem:[%s14329_s26] sm:$0xff]   ;;  %v10478_v2 = vld [vmem:[%s14329_s26 + $0x8] sm:$0xff]   ;;  %v10479_v3 = vld [vmem:[%s14329_s26 + $0x10] sm:$0xff]  }
   0x9   :  { %1057 = vmatpush1.bf16.msra.mxu0 %v10477_v1  ;;  %v10480_v4 = vld [vmem:[%s14329_s26 + $0x18] sm:$0xff]   ;;  %v10481_v5 = vld [vmem:[%s14329_s26 + $0x20] sm:$0xff]   ;;  %v10482_v7 = vld [vmem:[%s14329_s26 + $0x28] sm:$0xff]  }
   0xa   :  { %1058 = vmatprep.subr.bf16.mxu0 %v11079_v0  ;;  %v10495_v6 = vld [vmem:[%s14330_s22 + $0x4] ss:$8 sps:$4 sm:$0xff]   ;;  %v10483_v8 = vld [vmem:[%s14329_s26 + $0x30] sm:$0xff]   ;;  %v10484_v9 = vld [vmem:[%s14329_s26 + $0x38] sm:$0xff]   ;;  %9179 = vmatpush3.bf16.msra.mxu1 %v10573_v51 }
   0xb   :  { %1088 = vmatprep.mubr.bf16.mxu0 %v10495_v6  ;;  %v10485_v10 = vld [vmem:[%s14329_s26 + $0x40] sm:$0xff]   ;;  %v10486_v11 = vld [vmem:[%s14329_s26 + $0x48] sm:$0xff]   ;;  %v10487_v12 = vld [vmem:[%s14329_s26 + $0x50] sm:$0xff]   ;;  %9180 = vmatprep.subr.bf16.mxu1 %v11080_v47 }
   0xc   :  { %v10488_v13 = vld [vmem:[%s14329_s26 + $0x58] sm:$0xff]   ;;  %v10489_v14 = vld [vmem:[%s14329_s26 + $0x60] sm:$0xff]   ;;  %v10490_v15 = vld [vmem:[%s14329_s26 + $0x68] sm:$0xff]  }
   0xd   :  { %1059 = vmatpush1.bf16.msra.mxu0 %v10478_v2  ;;  %v10491_v16 = vld [vmem:[%s14329_s26 + $0x70] sm:$0xff]   ;;  %v10492_v17 = vld [vmem:[%s14329_s26 + $0x78] sm:$0xff]   ;;  %v10493_v18 = vld [vmem:[%s14330_s22] ss:$8 sps:$4 sm:$0xff]  }
   0xe   :  { %1060 = vmatprep.subr.bf16.mxu0 %v11079_v0  ;;  %v10496_v19 = vld [vmem:[%s14330_s22 + $0x14] ss:$8 sps:$4 sm:$0xff]   ;;  %v10498_v20 = vld [vmem:[%s14330_s22 + $0x10] ss:$8 sps:$4 sm:$0xff]   ;;  %v10499_v21 = vld [vmem:[%s14330_s22 + $0x24] ss:$8 sps:$4 sm:$0xff]   ;;  %9181 = vmatpush3.bf16.msra.mxu1 %v10574_v52 }
   0xf   :  { %v10501_v22 = vld [vmem:[%s14330_s22 + $0x20] ss:$8 sps:$4 sm:$0xff]   ;;  %v10502_v23 = vld [vmem:[%s14330_s22 + $0x34] ss:$8 sps:$4 sm:$0xff]   ;;  %v10504_v24 = vld [vmem:[%s14330_s22 + $0x30] ss:$8 sps:$4 sm:$0xff]   ;;  %9182 = vmatprep.subr.bf16.mxu1 %v11080_v47 }
  0x10   :  { %v10505_v25 = vld [vmem:[%s14330_s22 + $0x44] ss:$8 sps:$4 sm:$0xff]   ;;  %v10507_v26 = vld [vmem:[%s14330_s22 + $0x40] ss:$8 sps:$4 sm:$0xff]   ;;  %v10508_v27 = vld [vmem:[%s14330_s22 + $0x54] ss:$8 sps:$4 sm:$0xff]  }
  0x11   :  { %1061 = vmatpush1.bf16.msra.mxu0 %v10479_v3  ;;  %v10510_v28 = vld [vmem:[%s14330_s22 + $0x50] ss:$8 sps:$4 sm:$0xff]   ;;  %v10511_v29 = vld [vmem:[%s14330_s22 + $0x64] ss:$8 sps:$4 sm:$0xff]   ;;  %v10513_v30 = vld [vmem:[%s14330_s22 + $0x60] ss:$8 sps:$4 sm:$0xff]  }
  0x12   :  { %1062 = vmatprep.subr.bf16.mxu0 %v11079_v0  ;;  %v10514_v31 = vld [vmem:[%s14330_s22 + $0x74] ss:$8 sps:$4 sm:$0xff]   ;;  %v10516_v32 = vld [vmem:[%s14330_s22 + $0x70] ss:$8 sps:$4 sm:$0xff]   ;;  %v10517_v33 = vld [vmem:[%s14330_s22 + $0x84] ss:$8 sps:$4 sm:$0xff]   ;;  %9183 = vmatpush3.bf16.msra.mxu1 %v10578_v55 }
  0x13   :  { %v10519_v34 = vld [vmem:[%s14330_s22 + $0x80] ss:$8 sps:$4 sm:$0xff]   ;;  %v10520_v35 = vld [vmem:[%s14330_s22 + $0x94] ss:$8 sps:$4 sm:$0xff]   ;;  %v10522_v36 = vld [vmem:[%s14330_s22 + $0x90] ss:$8 sps:$4 sm:$0xff]   ;;  %9184 = vmatprep.subr.bf16.mxu1 %v11080_v47 }
  0x14   :  { %v10523_v37 = vld [vmem:[%s14330_s22 + $0xa4] ss:$8 sps:$4 sm:$0xff]   ;;  %v10525_v38 = vld [vmem:[%s14330_s22 + $0xa0] ss:$8 sps:$4 sm:$0xff]   ;;  %v10526_v39 = vld [vmem:[%s14330_s22 + $0xb4] ss:$8 sps:$4 sm:$0xff]  }
  0x15   :  { %1063 = vmatpush1.bf16.msra.mxu0 %v10480_v4  ;;  %v10528_v40 = vld [vmem:[%s14330_s22 + $0xb0] ss:$8 sps:$4 sm:$0xff]   ;;  %v10529_v41 = vld [vmem:[%s14330_s22 + $0xc4] ss:$8 sps:$4 sm:$0xff]   ;;  %v10531_v42 = vld [vmem:[%s14330_s22 + $0xc0] ss:$8 sps:$4 sm:$0xff]  }
  0x16   :  { %1064 = vmatprep.subr.bf16.mxu0 %v11079_v0  ;;  %v10532_v43 = vld [vmem:[%s14330_s22 + $0xd4] ss:$8 sps:$4 sm:$0xff]   ;;  %v10534_v44 = vld [vmem:[%s14330_s22 + $0xd0] ss:$8 sps:$4 sm:$0xff]   ;;  %v10535_v45 = vld [vmem:[%s14330_s22 + $0xe4] ss:$8 sps:$4 sm:$0xff]   ;;  %9185 = vmatpush3.bf16.msra.mxu1 %v10579_v56 }
  0x17   :  { %v10537_v49 = vld [vmem:[%s14330_s22 + $0xe0] ss:$8 sps:$4 sm:$0xff]   ;;  %v10538_v50 = vld [vmem:[%s14330_s22 + $0xf4] ss:$8 sps:$4 sm:$0xff]   ;;  %v10540_v53 = vld [vmem:[%s14330_s22 + $0xf0] ss:$8 sps:$4 sm:$0xff]   ;;  %9186 = vmatprep.subr.bf16.mxu1 %v11080_v47 }
  0x18   :  { %v10541_v54 = vld [vmem:[%s14330_s22 + $0x104] ss:$8 sps:$4 sm:$0xff]   ;;  %v10543_v57 = vld [vmem:[%s14330_s22 + $0x100] ss:$8 sps:$4 sm:$0xff]   ;;  %v10544_v58 = vld [vmem:[%s14330_s22 + $0x114] ss:$8 sps:$4 sm:$0xff]  }
  0x19   :  { %1065 = vmatpush1.bf16.msra.mxu0 %v10481_v5  ;;  %v10546_v60 = vld [vmem:[%s14330_s22 + $0x110] ss:$8 sps:$4 sm:$0xff]   ;;  %v10547_v62 = vld [vmem:[%s14330_s22 + $0x124] ss:$8 sps:$4 sm:$0xff]   ;;  %v10549_v63 = vld [vmem:[%s14330_s22 + $0x120] ss:$8 sps:$4 sm:$0xff]  }
  0x1a   :  { %1066 = vmatprep.subr.bf16.mxu0 %v11079_v0  ;;  %9187 = vmatpush3.bf16.msra.mxu1 %v10580_v59  ;;  %v10552_v1 = vld [vmem:[%s14330_s22 + $0x130] ss:$8 sps:$4 sm:$0xff]   ;;  %v10553_v2 = vld [vmem:[%s14330_s22 + $0x144] ss:$8 sps:$4 sm:$0xff]   ;;  %v10555_v3 = vld [vmem:[%s14330_s22 + $0x140] ss:$8 sps:$4 sm:$0xff]  }
  0x1b   :  { %9188 = vmatprep.subr.bf16.mxu1 %v11080_v47  ;;  %v10556_v4 = vld [vmem:[%s14330_s22 + $0x154] ss:$8 sps:$4 sm:$0xff]   ;;  %v10558_v5 = vld [vmem:[%s14330_s22 + $0x150] ss:$8 sps:$4 sm:$0xff]   ;;  %v10559_v6 = vld [vmem:[%s14330_s22 + $0x164] ss:$8 sps:$4 sm:$0xff]  }
  0x1c   :  { %v10598_v55 = vld [vmem:[%s14330_s22 + $0x1e0] ss:$8 sps:$4 sm:$0xff]  }
  0x1d   :  { %1067 = vmatpush1.bf16.msra.mxu0 %v10482_v7  ;;  %v10561_v7 = vld [vmem:[%s14330_s22 + $0x160] ss:$8 sps:$4 sm:$0xff]  }
  0x1e   :  { %1068 = vmatprep.subr.bf16.mxu0 %v11079_v0  ;;  %9189 = vmatpush3.bf16.msra.mxu1 %v10581_v61 }
  0x1f   :  { %9210 = vmatprep.subr.bf16.mxu1 %v11080_v47 }
  0x21   :  { %1069 = vmatpush1.bf16.msra.mxu0 %v10483_v8  ;;  %v10562_v8 = vld [vmem:[%s14330_s22 + $0x174] ss:$8 sps:$4 sm:$0xff]  }
  0x22   :  { %1070 = vmatprep.subr.bf16.mxu0 %v11079_v0 }
  0x25   :  { %1071 = vmatpush1.bf16.msra.mxu0 %v10484_v9  ;;  %v10564_v9 = vld [vmem:[%s14330_s22 + $0x170] ss:$8 sps:$4 sm:$0xff]  }
  0x26   :  { %1072 = vmatprep.subr.bf16.mxu0 %v11079_v0 }
  0x29   :  { %1073 = vmatpush1.bf16.msra.mxu0 %v10485_v10  ;;  %v10565_v10 = vld [vmem:[%s14330_s22 + $0x184] ss:$8 sps:$4 sm:$0xff]  }
  0x2a   :  { %1074 = vmatprep.subr.bf16.mxu0 %v11079_v0 }
  0x2d   :  { %1075 = vmatpush1.bf16.msra.mxu0 %v10486_v11  ;;  %v10567_v11 = vld [vmem:[%s14330_s22 + $0x180] ss:$8 sps:$4 sm:$0xff]  }
  0x2e   :  { %1076 = vmatprep.subr.bf16.mxu0 %v11079_v0 }
  0x31   :  { %1077 = vmatpush1.bf16.msra.mxu0 %v10487_v12  ;;  %v10570_v12 = vld [vmem:[%s14330_s22 + $0x194] ss:$8 sps:$4 sm:$0xff]  }
  0x32   :  { %1078 = vmatprep.subr.bf16.mxu0 %v11079_v0 }
  0x35   :  { %1079 = vmatpush1.bf16.msra.mxu0 %v10488_v13  ;;  %v10572_v13 = vld [vmem:[%s14330_s22 + $0x190] ss:$8 sps:$4 sm:$0xff]  }
  0x36   :  { %1080 = vmatprep.subr.bf16.mxu0 %v11079_v0 }
  0x39   :  { %1081 = vmatpush1.bf16.msra.mxu0 %v10489_v14  ;;  %v10575_v14 = vld [vmem:[%s14330_s22 + $0x1a4] ss:$8 sps:$4 sm:$0xff]  }
  0x3a   :  { %1082 = vmatprep.subr.bf16.mxu0 %v11079_v0 }
  0x3d   :  { %1083 = vmatpush1.bf16.msra.mxu0 %v10490_v15  ;;  %v10577_v15 = vld [vmem:[%s14330_s22 + $0x1a0] ss:$8 sps:$4 sm:$0xff]  }
  0x3e   :  { %1084 = vmatprep.subr.bf16.mxu0 %v11079_v0 }
  0x41   :  { %1085 = vmatpush1.bf16.msra.mxu0 %v10491_v16  ;;  %v10582_v16 = vld [vmem:[%s14330_s22 + $0x1b4] ss:$8 sps:$4 sm:$0xff]  }
  0x42   :  { %1086 = vmatprep.subr.bf16.mxu0 %v11079_v0  ;;  %v10550_v0 = vld [vmem:[%s14330_s22 + $0x134] ss:$8 sps:$4 sm:$0xff]  }
  0x45   :  { %1087 = vmatpush1.bf16.msra.mxu0 %v10492_v17  ;;  %v11428_v17 = vld [vmem:[%s14310_s3] ss:$0 sm:$0xff] }
  0x46   :  { %9750 = vmatprep.subr.bf16.mxu0 %v11080_v47 }
  0x48   :  { %1089 = vmatmul.mubr.bf16.vlgmr.msra.gmra.mrb[0].mxu0 %v10493_v18 }
  0x49   :  { %1096 = vmatprep.mubr.bf16.mxu0 %v10496_v19 }
  0x50   :  { %1097 = vmatmul.mubr.bf16.gmra.mrb[4].mxu0 %v10498_v20 }
  0x51   :  { %1104 = vmatprep.mubr.bf16.mxu0 %v10499_v21  ;;  %v10584_v21 = vld [vmem:[%s14330_s22 + $0x1b0] ss:$8 sps:$4 sm:$0xff]  }
  0x58   :  { %1105 = vmatmul.mubr.bf16.gmra.mrb[8].mxu0 %v10501_v22 }
  0x59   :  { %1112 = vmatprep.mubr.bf16.mxu0 %v10502_v23  ;;  %v10587_v23 = vld [vmem:[%s14330_s22 + $0x1c4] ss:$8 sps:$4 sm:$0xff]  }
  0x60   :  { %1113 = vmatmul.mubr.bf16.gmra.mrb[12].mxu0 %v10504_v24 }
  0x61   :  { %1120 = vmatprep.mubr.bf16.mxu0 %v10505_v25 }
  0x68   :  { %1121 = vmatmul.mubr.bf16.gmra.mrb[16].mxu0 %v10507_v26 }
  0x69   :  { %1128 = vmatprep.mubr.bf16.mxu0 %v10508_v27 }
  0x70   :  { %1129 = vmatmul.mubr.bf16.gmra.mrb[20].mxu0 %v10510_v28 }
  0x71   :  { %1136 = vmatprep.mubr.bf16.mxu0 %v10511_v29 }
  0x78   :  { %1137 = vmatmul.mubr.bf16.gmra.mrb[24].mxu0 %v10513_v30 }
  0x79   :  { %1144 = vmatprep.mubr.bf16.mxu0 %v10514_v31 }
  0x80   :  { %1145 = vmatmul.mubr.bf16.gmra.mrb[28].mxu0 %v10516_v32  ;;  %v10589_v32 = vld [vmem:[%s14330_s22 + $0x1c0] ss:$8 sps:$4 sm:$0xff]  }
  0x81   :  { %1152 = vmatprep.mubr.bf16.mxu0 %v10517_v33 }
  0x88   :  { %1153 = vmatmul.mubr.bf16.gmra.mrb[32].mxu0 %v10519_v34  ;;  %v10591_v34 = vld [vmem:[%s14330_s22 + $0x1d4] ss:$8 sps:$4 sm:$0xff]  }
  0x89   :  { %1160 = vmatprep.mubr.bf16.mxu0 %v10520_v35 }
  0x90   :  { %1161 = vmatmul.mubr.bf16.gmra.mrb[36].mxu0 %v10522_v36 }
  0x91   :  { %1168 = vmatprep.mubr.bf16.mxu0 %v10523_v37 }
  0x98   :  { %1169 = vmatmul.mubr.bf16.gmra.mrb[40].mxu0 %v10525_v38 }
  0x99   :  { %1176 = vmatprep.mubr.bf16.mxu0 %v10526_v39 }
  0xa0   :  { %1177 = vmatmul.mubr.bf16.gmra.mrb[44].mxu0 %v10528_v40 }
  0xa1   :  { %1184 = vmatprep.mubr.bf16.mxu0 %v10529_v41 }
  0xa8   :  { %1185 = vmatmul.mubr.bf16.gmra.mrb[48].mxu0 %v10531_v42 }
  0xa9   :  { %1192 = vmatprep.mubr.bf16.mxu0 %v10532_v43  ;;  %v10593_v43 = vld [vmem:[%s14330_s22 + $0x1d0] ss:$8 sps:$4 sm:$0xff]  }
  0xb0   :  { %1193 = vmatmul.mubr.bf16.gmra.mrb[52].mxu0 %v10534_v44 }
  0xb1   :  { %1200 = vmatprep.mubr.bf16.mxu0 %v10535_v45  ;;  %v10596_v45 = vld [vmem:[%s14330_s22 + $0x1e4] ss:$8 sps:$4 sm:$0xff]  }
  0xb8   :  { %1201 = vmatmul.mubr.bf16.gmra.mrb[56].mxu0 %v10537_v49 }
  0xb9   :  { %1208 = vmatprep.mubr.bf16.mxu0 %v10538_v50 }
  0xc0   :  { %1209 = vmatmul.mubr.bf16.gmra.mrb[60].mxu0 %v10540_v53 }
  0xc1   :  { %1216 = vmatprep.mubr.bf16.mxu0 %v10541_v54 }
  0xc8   :  { %1217 = vmatmul.mubr.bf16.gmra.mrb[64].mxu0 %v10543_v57  ;;  %v10600_v57 = vld [vmem:[%s14330_s22 + $0x1f4] ss:$8 sps:$4 sm:$0xff]  }
  0xc9   :  { %1224 = vmatprep.mubr.bf16.mxu0 %v10544_v58 }
  0xd0   :  { %1225 = vmatmul.mubr.bf16.gmra.mrb[68].mxu0 %v10546_v60 }
  0xd1   :  { %1232 = vmatprep.mubr.bf16.mxu0 %v10547_v62 }
  0xd8   :  { %1233 = vmatmul.mubr.bf16.gmra.mrb[72].mxu0 %v10549_v63 }
  0xd9   :  { %1240 = vmatprep.mubr.bf16.mxu0 %v10550_v0 }
  0xe0   :  { %1241 = vmatmul.mubr.bf16.gmra.mrb[76].mxu0 %v10552_v1 }
  0xe1   :  { %1248 = vmatprep.mubr.bf16.mxu0 %v10553_v2  ;;  %v10603_v2 = vld [vmem:[%s14330_s22 + $0x1f0] ss:$8 sps:$4 sm:$0xff]  }
  0xe8   :  { %1249 = vmatmul.mubr.bf16.gmra.mrb[80].mxu0 %v10555_v3 }
  0xe9   :  { %1256 = vmatprep.mubr.bf16.mxu0 %v10556_v4  ;;  %v10605_v4 = vld [vmem:[%s14330_s22 + $0x204] ss:$8 sps:$4 sm:$0xff]  }
  0xf0   :  { %1257 = vmatmul.mubr.bf16.gmra.mrb[84].mxu0 %v10558_v5 }
  0xf1   :  { %1264 = vmatprep.mubr.bf16.mxu0 %v10559_v6 }
  0xf8   :  { %1265 = vmatmul.mubr.bf16.gmra.mrb[88].mxu0 %v10561_v7 }
  0xf9   :  { %1272 = vmatprep.mubr.bf16.mxu0 %v10562_v8 }
 0x100   :  { %1273 = vmatmul.mubr.bf16.gmra.mrb[92].mxu0 %v10564_v9 }
 0x101   :  { %1280 = vmatprep.mubr.bf16.mxu0 %v10565_v10 }
 0x108   :  { %1281 = vmatmul.mubr.bf16.gmra.mrb[96].mxu0 %v10567_v11 }
 0x109   :  { %1288 = vmatprep.mubr.bf16.mxu0 %v10570_v12 }
 0x110   :  { %1289 = vmatmul.mubr.bf16.gmra.mrb[100].mxu0 %v10572_v13  ;;  %v10607_v13 = vld [vmem:[%s14330_s22 + $0x200] ss:$8 sps:$4 sm:$0xff]  }
 0x111   :  { %1296 = vmatprep.mubr.bf16.mxu0 %v10575_v14 }
 0x118   :  { %1297 = vmatmul.mubr.bf16.gmra.mrb[104].mxu0 %v10577_v15  ;;  %v10610_v15 = vld [vmem:[%s14330_s22 + $0x214] ss:$8 sps:$4 sm:$0xff]  }
 0x119   :  { %1304 = vmatprep.mubr.bf16.mxu0 %v10582_v16 }
 0x11b   :  { %v1090_v18 = vpop.f32.mrb[0].mxu0 }
 0x11c   :  { %v1091_v19 = vadd.f32 %v11428_v17, %v1090_v18  ;;  %v1092_v20 = vpop.f32.mrb[1].mxu0 }
 0x11d   :  { %v1093_v22 = vpop.f32.mrb[2].mxu0 }
 0x11e   :  { %v1094_v24 = vadd.f32 %v11428_v17, %v1093_v22  ;;  %v1095_v25 = vpop.f32.mrb[3].mxu0  ;;  %v1665_v26 = vmax.f32 %v1091_v19, 0.0 }
 0x120   :  { %v1666_v27 = vmax.f32 %v1094_v24, 0.0  ;;  %1305 = vmatmul.mubr.bf16.gmra.mrb[108].mxu0 %v10584_v21 }
 0x121   :  { %1312 = vmatprep.mubr.bf16.mxu0 %v10587_v23 }
 0x122   :  { %v11438_v28 = vpack.c.bf16 %v1666_v27, %v1665_v26 }
 0x123   :  { %v1098_v29 = vpop.f32.mrb[4].mxu0 }
 0x124   :  { %v1099_v30 = vadd.f32 %v11428_v17, %v1098_v29  ;;  %v1100_v31 = vpop.f32.mrb[5].mxu0  ;;  %v10585_v29 = vld [vmem:[%s14309_s4] sm:$0xff]  }
 0x125   :  { %v1101_v33 = vpop.f32.mrb[6].mxu0  ;;  %v10612_v31 = vld [vmem:[%s14330_s22 + $0x210] ss:$8 sps:$4 sm:$0xff]  }
 0x126   :  { %v1102_v35 = vadd.f32 %v11428_v17, %v1101_v33  ;;  %v1103_v36 = vpop.f32.mrb[7].mxu0  ;;  %v1667_v37 = vmax.f32 %v1099_v30, 0.0 }
 0x128   :  { %v1668_v38 = vmax.f32 %v1102_v35, 0.0  ;;  %1313 = vmatmul.mubr.bf16.gmra.mrb[112].mxu0 %v10589_v32  ;;  %v10614_v35 = vld [vmem:[%s14330_s22 + $0x224] ss:$8 sps:$4 sm:$0xff]  }
 0x129   :  { %1320 = vmatprep.mubr.bf16.mxu0 %v10591_v34 }
 0x12a   :  { %v11448_v39 = vpack.c.bf16 %v1668_v38, %v1667_v37  ;;  %v10586_v38 = vld [vmem:[%s14309_s4 + $0x8] sm:$0xff]  }
 0x12b   :  { %v1106_v40 = vpop.f32.mrb[8].mxu0 }
 0x12c   :  { %v1107_v41 = vadd.f32 %v11428_v17, %v1106_v40  ;;  %v1108_v42 = vpop.f32.mrb[9].mxu0 }
 0x12d   :  { %v1109_v44 = vpop.f32.mrb[10].mxu0 }
 0x12e   :  { %v1110_v46 = vadd.f32 %v11428_v17, %v1109_v44  ;;  %v1111_v48 = vpop.f32.mrb[11].mxu0  ;;  %v1669_v49 = vmax.f32 %v1107_v41, 0.0 }
 0x12f   :  { %v10616_v48 = vld [vmem:[%s14330_s22 + $0x220] ss:$8 sps:$4 sm:$0xff]  }
 0x130   :  { %v1670_v50 = vmax.f32 %v1110_v46, 0.0  ;;  %1321 = vmatmul.mubr.bf16.gmra.mrb[116].mxu0 %v10593_v43 }
 0x131   :  { %1328 = vmatprep.mubr.bf16.mxu0 %v10596_v45  ;;  %v10590_v45 = vld [vmem:[%s14309_s4 + $0x10] sm:$0xff]  }
 0x132   :  { %v11458_v51 = vpack.c.bf16 %v1670_v50, %v1669_v49 }
 0x133   :  { %v1114_v52 = vpop.f32.mrb[12].mxu0 }
 0x134   :  { %v1115_v53 = vadd.f32 %v11428_v17, %v1114_v52  ;;  %v1116_v54 = vpop.f32.mrb[13].mxu0 }
 0x135   :  { %v1117_v56 = vpop.f32.mrb[14].mxu0 }
 0x136   :  { %v1118_v58 = vadd.f32 %v11428_v17, %v1117_v56  ;;  %v1119_v59 = vpop.f32.mrb[15].mxu0  ;;  %v1671_v60 = vmax.f32 %v1115_v53, 0.0  ;;  %v10619_v53 = vld [vmem:[%s14330_s22 + $0x234] ss:$8 sps:$4 sm:$0xff]  }
 0x137   :  { %v10594_v56 = vld [vmem:[%s14309_s4 + $0x18] sm:$0xff]  }
 0x138   :  { %v1672_v61 = vmax.f32 %v1118_v58, 0.0  ;;  %1329 = vmatmul.mubr.bf16.gmra.mrb[120].mxu0 %v10598_v55 }
 0x139   :  { %1336 = vmatprep.mubr.bf16.mxu0 %v10600_v57 }
 0x13a   :  { %v11468_v62 = vpack.c.bf16 %v1672_v61, %v1671_v60 }
 0x13b   :  { %v1122_v63 = vpop.f32.mrb[16].mxu0 }
 0x13c   :  { %v1123_v0 = vadd.f32 %v11428_v17, %v1122_v63  ;;  %v1124_v1 = vpop.f32.mrb[17].mxu0  ;;  %v10595_v63 = vld [vmem:[%s14309_s4 + $0x20] sm:$0xff]  }
 0x13d   :  { %v1125_v3 = vpop.f32.mrb[18].mxu0  ;;  %v10621_v1 = vld [vmem:[%s14330_s22 + $0x230] ss:$8 sps:$4 sm:$0xff]  }
 0x13e   :  { %v1126_v5 = vadd.f32 %v11428_v17, %v1125_v3  ;;  %v1127_v6 = vpop.f32.mrb[19].mxu0  ;;  %v1673_v7 = vmax.f32 %v1123_v0, 0.0 }
 0x140   :  { %v1674_v8 = vmax.f32 %v1126_v5, 0.0  ;;  %1337 = vmatmul.mubr.bf16.gmra.mrb[124].mxu0 %v10603_v2  ;;  %v10625_v5 = vld [vmem:[%s14330_s22 + $0x244] ss:$8 sps:$4 sm:$0xff]  }
 0x141   :  { %1344 = vmatprep.mubr.bf16.mxu0 %v10605_v4 }
 0x142   :  { %v1813_v9 = vpack.c.bf16 %v1674_v8, %v1673_v7  ;;  %v10599_v8 = vld [vmem:[%s14309_s4 + $0x28] sm:$0xff]  }
 0x143   :  { %v1130_v10 = vpop.f32.mrb[20].mxu0 }
 0x144   :  { %1885 = vst [vmem:[#allocation2 + $0x20] sm:$0xff] %v1813_v9  ;;  %v1131_v11 = vadd.f32 %v11428_v17, %v1130_v10  ;;  %v1132_v12 = vpop.f32.mrb[21].mxu0 }
 0x145   :  { %v1133_v14 = vpop.f32.mrb[22].mxu0  ;;  %v10602_v12 = vld [vmem:[%s14309_s4 + $0x30] sm:$0xff]  }
 0x146   :  { %v1134_v16 = vadd.f32 %v11428_v17, %v1133_v14  ;;  %v1135_v18 = vpop.f32.mrb[23].mxu0  ;;  %v1675_v19 = vmax.f32 %v1131_v11, 0.0 }
 0x148   :  { %v1676_v20 = vmax.f32 %v1134_v16, 0.0  ;;  %1345 = vmatmul.mubr.bf16.gmra.mrb[128].mxu0 %v10607_v13  ;;  %v10627_v16 = vld [vmem:[%s14330_s22 + $0x240] ss:$8 sps:$4 sm:$0xff]  }
 0x149   :  { %1352 = vmatprep.mubr.bf16.mxu0 %v10610_v15 }
 0x14a   :  { %v1814_v21 = vpack.c.bf16 %v1676_v20, %v1675_v19 }
 0x14b   :  { %v1138_v22 = vpop.f32.mrb[24].mxu0  ;;  %v1974_v23 = vld [vmem:[#allocation2 + $0x20] sm:$0xf0] }
 0x14c   :  { %v1139_v24 = vadd.f32 %v11428_v17, %v1138_v22  ;;  %v1140_v25 = vpop.f32.mrb[25].mxu0  ;;  %v2001_v26 = vrot.slane %v1974_v23, 4  ;;  %v2002_v27 = vrot.slane %v1814_v21, 4  ;;  %v10630_v22 = vld [vmem:[%s14330_s22 + $0x254] ss:$8 sps:$4 sm:$0xff]   ;;  %v11555_v23 = vld [vmem:[#allocation3 + $0x48] sm:$0xff] }
 0x14d   :  { %v1141_v30 = vpop.f32.mrb[26].mxu0 }
 0x14e   :  { %v1142_v32 = vadd.f32 %v11428_v17, %v1141_v30  ;;  %v1143_v33 = vpop.f32.mrb[27].mxu0  ;;  %v2003_v34 = vsel %vm2000_vm1, %v2001_v26, %v2002_v27  ;;  %v1677_v36 = vmax.f32 %v1139_v24, 0.0 }
 0x14f   :  { %9191 = vmatmul.mubr.bf16.vlgmr.msra.gmra.mrb[0].mxu1 %v2003_v34 }
 0x150   :  { %v1678_v37 = vmax.f32 %v1142_v32, 0.0  ;;  %9211 = vmatpush3.bf16.msra.mxu1 %v10585_v29  ;;  %9194 = vmatprep.mubr.msk.bf16.mxu1 %vm11081_vm0, %v11080_v47 }
 0x151   :  { %9212 = vmatprep.subr.bf16.mxu1 %v11080_v47  ;;  %1353 = vmatmul.mubr.bf16.gmra.mrb[132].mxu0 %v10612_v31  ;;  %v10632_v31 = vld [vmem:[%s14330_s22 + $0x250] ss:$8 sps:$4 sm:$0xff]  }
 0x152   :  { %v1815_v40 = vpack.c.bf16 %v1678_v37, %v1677_v36  ;;  %1360 = vmatprep.mubr.bf16.mxu0 %v10614_v35  ;;  %v10634_v35 = vld [vmem:[%s14330_s22 + $0x264] ss:$8 sps:$4 sm:$0xff]  }
 0x153   :  { %v1146_v41 = vpop.f32.mrb[28].mxu0 }
 0x154   :  { %v1147_v42 = vadd.f32 %v11428_v17, %v1146_v41  ;;  %v1148_v43 = vpop.f32.mrb[29].mxu0  ;;  %9213 = vmatpush3.bf16.msra.mxu1 %v10586_v38  ;;  %v2004_v44 = vrot.slane %v1815_v40, 4  ;;  %v10608_v40 = vld [vmem:[%s14309_s4 + $0x80] sm:$0xff]  }
 0x155   :  { %v1149_v46 = vpop.f32.mrb[30].mxu0  ;;  %9214 = vmatprep.subr.bf16.mxu1 %v11080_v47 }
 0x156   :  { %v1150_v49 = vadd.f32 %v11428_v17, %v1149_v46  ;;  %v1151_v50 = vpop.f32.mrb[31].mxu0  ;;  %v2005_v52 = vsel %vm2000_vm1, %v2002_v27, %v2004_v44  ;;  %v1679_v54 = vmax.f32 %v1147_v42, 0.0 }
 0x157   :  { %9195 = vmatmul.mubr.bf16.gmra.mrb[4].mxu1 %v2005_v52  ;;  %v10609_v50 = vld [vmem:[%s14309_s4 + $0x88] sm:$0xff]  }
 0x158   :  { %v1680_v55 = vmax.f32 %v1150_v49, 0.0  ;;  %9215 = vmatpush3.bf16.msra.mxu1 %v10590_v45  ;;  %9198 = vmatprep.mubr.msk.bf16.mxu1 %vm11081_vm0, %v11080_v47  ;;  %v10639_v49 = vld [vmem:[%s14330_s22 + $0x274] ss:$8 sps:$4 sm:$0xff]  }
 0x159   :  { %9216 = vmatprep.subr.bf16.mxu1 %v11080_v47  ;;  %1361 = vmatmul.mubr.bf16.gmra.mrb[136].mxu0 %v10616_v48 }
 0x15a   :  { %v1816_v57 = vpack.c.bf16 %v1680_v55, %v1679_v54  ;;  %1368 = vmatprep.mubr.bf16.mxu0 %v10619_v53 }
 0x15b   :  { %v1154_v58 = vpop.f32.mrb[32].mxu0 }
 0x15c   :  { %v1155_v59 = vadd.f32 %v11428_v17, %v1154_v58  ;;  %v1156_v60 = vpop.f32.mrb[33].mxu0  ;;  %9217 = vmatpush3.bf16.msra.mxu1 %v10594_v56  ;;  %v2006_v61 = vrot.slane %v1816_v57, 4  ;;  %v10641_v58 = vld [vmem:[%s14330_s22 + $0x270] ss:$8 sps:$4 sm:$0xff]  }
 0x15d   :  { %v1157_v0 = vpop.f32.mrb[34].mxu0  ;;  %9218 = vmatprep.subr.bf16.mxu1 %v11080_v47 }
 0x15e   :  { %v1158_v2 = vadd.f32 %v11428_v17, %v1157_v0  ;;  %v1159_v3 = vpop.f32.mrb[35].mxu0  ;;  %v2007_v4 = vsel %vm2000_vm1, %v2004_v44, %v2006_v61  ;;  %v1681_v6 = vmax.f32 %v1155_v59, 0.0  ;;  %v10636_v44 = vld [vmem:[%s14330_s22 + $0x260] ss:$8 sps:$4 sm:$0xff]   ;;  %v10617_v0 = vld [vmem:[%s14309_s4 + $0x98] sm:$0xff]  }
 0x15f   :  { %9199 = vmatmul.mubr.bf16.gmra.mrb[8].mxu1 %v2007_v4 }
 0x160   :  { %v1682_v7 = vmax.f32 %v1158_v2, 0.0  ;;  %9219 = vmatpush3.bf16.msra.mxu1 %v10595_v63  ;;  %9202 = vmatprep.mubr.msk.bf16.mxu1 %vm11081_vm0, %v11080_v47  ;;  %v10643_v63 = vld [vmem:[%s14330_s22 + $0x284] ss:$8 sps:$4 sm:$0xff]  }
 0x161   :  { %9220 = vmatprep.subr.bf16.mxu1 %v11080_v47  ;;  %1369 = vmatmul.mubr.bf16.gmra.mrb[140].mxu0 %v10621_v1 }
 0x162   :  { %v1817_v9 = vpack.c.bf16 %v1682_v7, %v1681_v6  ;;  %1376 = vmatprep.mubr.bf16.mxu0 %v10625_v5  ;;  %v10646_v7 = vld [vmem:[%s14330_s22 + $0x280] ss:$8 sps:$4 sm:$0xff]  }
 0x163   :  { %v1162_v10 = vpop.f32.mrb[36].mxu0 }
 0x164   :  { %v2008_v11 = vrot.slane %v1817_v9, 4  ;;  %9221 = vmatpush3.bf16.msra.mxu1 %v10599_v8  ;;  %v1163_v13 = vadd.f32 %v11428_v17, %v1162_v10  ;;  %v1164_v14 = vpop.f32.mrb[37].mxu0 }
 0x165   :  { %9222 = vmatprep.subr.bf16.mxu1 %v11080_v47  ;;  %v1165_v15 = vpop.f32.mrb[38].mxu0  ;;  %v10604_v47 = vld [vmem:[%s14309_s4 + $0x38] sm:$0xff]  }
 0x166   :  { %v2009_v18 = vsel %vm2000_vm1, %v2006_v61, %v2008_v11  ;;  %v1683_v19 = vmax.f32 %v1163_v13, 0.0  ;;  %v1166_v20 = vadd.f32 %v11428_v17, %v1165_v15  ;;  %v1167_v21 = vpop.f32.mrb[39].mxu0 }
 0x167   :  { %9203 = vmatmul.mubr.bf16.gmra.mrb[12].mxu1 %v2009_v18 }
 0x168   :  { %9223 = vmatpush3.bf16.msra.mxu1 %v10602_v12  ;;  %9206 = vmatprep.mubr.msk.bf16.mxu1 %vm11081_vm0, %v11555_v23  ;;  %v1684_v24 = vmax.f32 %v1166_v20, 0.0  ;;  %v10622_v12 = vld [vmem:[%s14309_s4 + $0xa8] sm:$0xff]   ;;  %v10650_v20 = vld [vmem:[%s14330_s22 + $0x290] ss:$8 sps:$4 sm:$0xff]  }
 0x169   :  { %9224 = vmatprep.subr.bf16.mxu1 %v11555_v23  ;;  %1377 = vmatmul.mubr.bf16.gmra.mrb[144].mxu0 %v10627_v16 }
 0x16a   :  { %v11563_v25 = vpack.c.bf16 %v1684_v24, %v1683_v19  ;;  %1384 = vmatprep.mubr.bf16.mxu0 %v10630_v22  ;;  %v10653_v24 = vld [vmem:[%s14330_s22 + $0x2a4] ss:$8 sps:$4 sm:$0xff]  }
 0x16b   :  { %v1170_v26 = vpop.f32.mrb[40].mxu0 }
 0x16c   :  { %9225 = vmatpush3.bf16.msra.mxu1 %v10604_v47  ;;  %v1171_v27 = vadd.f32 %v11428_v17, %v1170_v26  ;;  %v1172_v29 = vpop.f32.mrb[41].mxu0  ;;  %v10624_v26 = vld [vmem:[%s14309_s4 + $0xb8] sm:$0xff]  }
 0x16d   :  { %9246 = vmatprep.subr.bf16.mxu1 %v11555_v23  ;;  %v1173_v30 = vpop.f32.mrb[42].mxu0 }
 0x16e   :  { %v1685_v32 = vmax.f32 %v1171_v27, 0.0  ;;  %v1174_v33 = vadd.f32 %v11428_v17, %v1173_v30  ;;  %v1175_v34 = vpop.f32.mrb[43].mxu0 }
 0x16f   :  { %9207 = vmatmul.mubr.bf16.gmra.mrb[16].mxu1 %v2008_v11  ;;  %v10648_v11 = vld [vmem:[%s14330_s22 + $0x294] ss:$8 sps:$4 sm:$0xff]   ;;  %v1957_v34 = vld [vmem:[#allocation2 + $0x20] sm:$0xf] }
 0x170   :  { %9226 = vmatprep.mubr.msk.bf16.mxu1 %vm11081_vm0, %v11555_v23  ;;  %v1686_v36 = vmax.f32 %v1174_v33, 0.0  ;;  %v10655_v33 = vld [vmem:[%s14330_s22 + $0x2a0] ss:$8 sps:$4 sm:$0xff]  }
 0x171   :  { %1385 = vmatmul.mubr.bf16.gmra.mrb[148].mxu0 %v10632_v31 }
 0x172   :  { %v11576_v37 = vpack.c.bf16 %v1686_v36, %v1685_v32  ;;  %1392 = vmatprep.mubr.bf16.mxu0 %v10634_v35 }
 0x173   :  { %v1178_v38 = vpop.f32.mrb[44].mxu0 }
 0x174   :  { %v1179_v41 = vadd.f32 %v11428_v17, %v1178_v38  ;;  %v1180_v42 = vpop.f32.mrb[45].mxu0 }
 0x175   :  { %v1181_v43 = vpop.f32.mrb[46].mxu0 }
 0x176   :  { %v1687_v45 = vmax.f32 %v1179_v41, 0.0  ;;  %v1182_v46 = vadd.f32 %v11428_v17, %v1181_v43  ;;  %v1183_v48 = vpop.f32.mrb[47].mxu0 }
 0x177   :  { %9227 = vmatmul.mubr.bf16.vlgmr.msra.gmra.mrb[20].mxu1 %v11438_v28  ;;  %v10613_v28 = vld [vmem:[%s14309_s4 + $0x90] sm:$0xff]  }
 0x178   :  { %9247 = vmatpush3.bf16.msra.mxu1 %v10608_v40  ;;  %9230 = vmatprep.mubr.msk.bf16.mxu1 %vm11081_vm0, %v11555_v23  ;;  %v1688_v52 = vmax.f32 %v1182_v46, 0.0  ;;  %v10657_v40 = vld [vmem:[%s14330_s22 + $0x2b4] ss:$8 sps:$4 sm:$0xff]  }
 0x179   :  { %9248 = vmatprep.subr.bf16.mxu1 %v11555_v23  ;;  %1393 = vmatmul.mubr.bf16.gmra.mrb[152].mxu0 %v10636_v44  ;;  %v10628_v44 = vld [vmem:[%s14309_s4 + $0xc0] sm:$0xff]  }
 0x17a   :  { %v11596_v53 = vpack.c.bf16 %v1688_v52, %v1687_v45  ;;  %1400 = vmatprep.mubr.bf16.mxu0 %v10639_v49  ;;  %v10659_v52 = vld [vmem:[%s14330_s22 + $0x2b0] ss:$8 sps:$4 sm:$0xff]  }
 0x17b   :  { %v1186_v54 = vpop.f32.mrb[48].mxu0 }
 0x17c   :  { %9249 = vmatpush3.bf16.msra.mxu1 %v10609_v50  ;;  %v1187_v55 = vadd.f32 %v11428_v17, %v1186_v54  ;;  %v1188_v56 = vpop.f32.mrb[49].mxu0 }
 0x17d   :  { %9250 = vmatprep.subr.bf16.mxu1 %v11555_v23  ;;  %v1189_v57 = vpop.f32.mrb[50].mxu0 }
 0x17e   :  { %v1689_v59 = vmax.f32 %v1187_v55, 0.0  ;;  %v1190_v60 = vadd.f32 %v11428_v17, %v1189_v57  ;;  %v1191_v61 = vpop.f32.mrb[51].mxu0  ;;  %v10662_v57 = vld [vmem:[%s14330_s22 + $0x2c4] ss:$8 sps:$4 sm:$0xff]  }
 0x17f   :  { %9231 = vmatmul.mubr.bf16.gmra.mrb[24].mxu1 %v11448_v39  ;;  %v10618_v39 = vld [vmem:[%s14309_s4 + $0xa0] sm:$0xff]  }
 0x180   :  { %9251 = vmatpush3.bf16.msra.mxu1 %v10613_v28  ;;  %9234 = vmatprep.mubr.msk.bf16.mxu1 %vm11081_vm0, %v11555_v23  ;;  %v1690_v1 = vmax.f32 %v1190_v60, 0.0 }
 0x181   :  { %9252 = vmatprep.subr.bf16.mxu1 %v11555_v23  ;;  %1401 = vmatmul.mubr.bf16.gmra.mrb[156].mxu0 %v10641_v58  ;;  %v10629_v58 = vld [vmem:[%s14309_s4 + $0xc8] sm:$0xff]  }
 0x182   :  { %v11617_v2 = vpack.c.bf16 %v1690_v1, %v1689_v59  ;;  %1408 = vmatprep.mubr.bf16.mxu0 %v10643_v63 }
 0x183   :  { %v1194_v3 = vpop.f32.mrb[52].mxu0 }
 0x184   :  { %9253 = vmatpush3.bf16.msra.mxu1 %v10617_v0  ;;  %v1195_v4 = vadd.f32 %v11428_v17, %v1194_v3  ;;  %v1196_v5 = vpop.f32.mrb[53].mxu0 }
 0x185   :  { %9254 = vmatprep.subr.bf16.mxu1 %v11555_v23  ;;  %v1197_v6 = vpop.f32.mrb[54].mxu0 }
 0x186   :  { %v1691_v8 = vmax.f32 %v1195_v4, 0.0  ;;  %v1198_v9 = vadd.f32 %v11428_v17, %v1197_v6  ;;  %v1199_v10 = vpop.f32.mrb[55].mxu0 }
 0x187   :  { %9235 = vmatmul.mubr.bf16.gmra.mrb[28].mxu1 %v11458_v51  ;;  %v10623_v51 = vld [vmem:[%s14309_s4 + $0xb0] sm:$0xff]  }
 0x188   :  { %9255 = vmatpush3.bf16.msra.mxu1 %v10618_v39  ;;  %9238 = vmatprep.mubr.msk.bf16.mxu1 %vm11081_vm0, %v11555_v23  ;;  %v1692_v13 = vmax.f32 %v1198_v9, 0.0  ;;  %v10664_v39 = vld [vmem:[%s14330_s22 + $0x2c0] ss:$8 sps:$4 sm:$0xff]   ;;  %v10637_v9 = vld [vmem:[%s14309_s4 + $0xd8] sm:$0xff]  }
 0x189   :  { %9256 = vmatprep.subr.bf16.mxu1 %v11555_v23  ;;  %1409 = vmatmul.mubr.bf16.gmra.mrb[160].mxu0 %v10646_v7 }
 0x18a   :  { %v1822_v14 = vpack.c.bf16 %v1692_v13, %v1691_v8  ;;  %1416 = vmatprep.mubr.bf16.mxu0 %v10648_v11  ;;  %v10668_v8 = vld [vmem:[%s14330_s22 + $0x2d4] ss:$8 sps:$4 sm:$0xff]  }
 0x18b   :  { %v1202_v15 = vpop.f32.mrb[56].mxu0 }
 0x18c   :  { %9257 = vmatpush3.bf16.msra.mxu1 %v10622_v12  ;;  %1894 = vst [vmem:[#allocation2 + $0x68] sm:$0xff] %v1822_v14  ;;  %v1203_v16 = vadd.f32 %v11428_v17, %v1202_v15  ;;  %v1204_v18 = vpop.f32.mrb[57].mxu0 }
 0x18d   :  { %9258 = vmatprep.subr.bf16.mxu1 %v11555_v23  ;;  %v1205_v19 = vpop.f32.mrb[58].mxu0 }
 0x18e   :  { %v1693_v21 = vmax.f32 %v1203_v16, 0.0  ;;  %v1206_v22 = vadd.f32 %v11428_v17, %v1205_v19  ;;  %v1207_v47 = vpop.f32.mrb[59].mxu0  ;;  %v10670_v16 = vld [vmem:[%s14330_s22 + $0x2d0] ss:$8 sps:$4 sm:$0xff]  }
 0x18f   :  { %9239 = vmatmul.mubr.bf16.gmra.mrb[32].mxu1 %v11468_v62  ;;  %v10642_v47 = vld [vmem:[%s14309_s4 + $0xe8] sm:$0xff]  }
 0x190   :  { %9259 = vmatpush3.bf16.msra.mxu1 %v10623_v51  ;;  %9242 = vmatprep.mubr.msk.bf16.mxu1 %vm11081_vm0, %v11555_v23  ;;  %v1694_v27 = vmax.f32 %v1206_v22, 0.0  ;;  %v10673_v22 = vld [vmem:[%s14330_s22 + $0x2e4] ss:$8 sps:$4 sm:$0xff]  }
 0x191   :  { %9260 = vmatprep.subr.bf16.mxu1 %v11555_v23  ;;  %1417 = vmatmul.mubr.bf16.gmra.mrb[164].mxu0 %v10650_v20 }
 0x192   :  { %v11657_v29 = vpack.c.bf16 %v1694_v27, %v1693_v21  ;;  %1424 = vmatprep.mubr.bf16.mxu0 %v10653_v24 }
 0x193   :  { %v1210_v30 = vpop.f32.mrb[60].mxu0 }
 0x194   :  { %9261 = vmatpush3.bf16.msra.mxu1 %v10624_v26  ;;  %v1211_v31 = vadd.f32 %v11428_v17, %v1210_v30  ;;  %v1212_v62 = vpop.f32.mrb[61].mxu0  ;;  %v2432_v48 = vrot.slane %v11657_v29, 4 }
 0x195   :  { %9282 = vmatprep.subr.bf16.mxu1 %v11555_v23  ;;  %v1213_v32 = vpop.f32.mrb[62].mxu0 }
 0x196   :  { %v1695_v35 = vmax.f32 %v1211_v31, 0.0  ;;  %v1214_v36 = vadd.f32 %v11428_v17, %v1213_v32  ;;  %v1215_v38 = vpop.f32.mrb[63].mxu0  ;;  %v10675_v32 = vld [vmem:[%s14330_s22 + $0x2e0] ss:$8 sps:$4 sm:$0xff]  }
 0x197   :  { %9243 = vmatmul.mubr.bf16.gmra.mrb[36].mxu1 %v1957_v34  ;;  %v10647_v38 = vld [vmem:[%s14309_s4 + $0xf8] sm:$0xff]  }
 0x198   :  { %9262 = vmatprep.mubr.msk.bf16.mxu1 %vm11081_vm0, %v11555_v23  ;;  %v1696_v41 = vmax.f32 %v1214_v36, 0.0  ;;  %v10677_v36 = vld [vmem:[%s14330_s22 + $0x2f4] ss:$8 sps:$4 sm:$0xff]  }
 0x199   :  { %1425 = vmatmul.mubr.bf16.gmra.mrb[168].mxu0 %v10655_v33 }
 0x19a   :  { %v1824_v42 = vpack.c.bf16 %v1696_v41, %v1695_v35  ;;  %1432 = vmatprep.mubr.bf16.mxu0 %v10657_v40 }
 0x19b   :  { %v1218_v43 = vpop.f32.mrb[64].mxu0 }
 0x19c   :  { %v1219_v45 = vadd.f32 %v11428_v17, %v1218_v43  ;;  %v1220_v46 = vpop.f32.mrb[65].mxu0  ;;  %v2434_v49 = vrot.slane %v1824_v42, 4 }
 0x19d   :  { %v1221_v50 = vpop.f32.mrb[66].mxu0  ;;  %v2259_v46 = vld [vmem:[#allocation2 + $0x68] sm:$0xf] }
 0x19e   :  { %v1697_v54 = vmax.f32 %v1219_v45, 0.0  ;;  %v1222_v28 = vadd.f32 %v11428_v17, %v1221_v50  ;;  %v1223_v55 = vpop.f32.mrb[67].mxu0  ;;  %v11682_v56 = vsel %vm2000_vm1, %v2432_v48, %v2434_v49  ;;  %v10679_v45 = vld [vmem:[%s14330_s22 + $0x2f0] ss:$8 sps:$4 sm:$0xff]  }
 0x19f   :  { %9263 = vmatmul.mubr.bf16.vlgmr.msra.gmra.mrb[40].mxu1 %v11563_v25  ;;  %v10633_v25 = vld [vmem:[%s14309_s4 + $0xd0] sm:$0xff]  }
 0x1a0   :  { %9283 = vmatpush3.bf16.msra.mxu1 %v10628_v44  ;;  %9266 = vmatprep.mubr.msk.bf16.mxu1 %vm11081_vm0, %v11555_v23  ;;  %v1698_v59 = vmax.f32 %v1222_v28, 0.0  ;;  %v2405_v28 = vld [vmem:[#allocation2 + $0x68] sm:$0xf0] }
 0x1a1   :  { %9284 = vmatprep.subr.bf16.mxu1 %v11555_v23  ;;  %1433 = vmatmul.mubr.bf16.gmra.mrb[172].mxu0 %v10659_v52 }
 0x1a2   :  { %v1825_v60 = vpack.c.bf16 %v1698_v59, %v1697_v54  ;;  %1440 = vmatprep.mubr.bf16.mxu0 %v10662_v57  ;;  %v10682_v54 = vld [vmem:[%s14330_s22 + $0x304] ss:$8 sps:$4 sm:$0xff]   ;;  %v2431_v57 = vrot.slane %v2405_v28, 4 }
 0x1a3   :  { %v1226_v61 = vpop.f32.mrb[68].mxu0 }
 0x1a4   :  { %9285 = vmatpush3.bf16.msra.mxu1 %v10629_v58  ;;  %v1227_v63 = vadd.f32 %v11428_v17, %v1226_v61  ;;  %v1228_v0 = vpop.f32.mrb[69].mxu0  ;;  %v2436_v1 = vrot.slane %v1825_v60, 4  ;;  %v10651_v60 = vld [vmem:[%s14309_s4 + $0x100] sm:$0xff]  }
 0x1a5   :  { %9286 = vmatprep.subr.bf16.mxu1 %v11555_v23  ;;  %v1229_v3 = vpop.f32.mrb[70].mxu0  ;;  %v10684_v0 = vld [vmem:[%s14330_s22 + $0x300] ss:$8 sps:$4 sm:$0xff]  }
 0x1a6   :  { %v1699_v4 = vmax.f32 %v1227_v63, 0.0  ;;  %v1230_v5 = vadd.f32 %v11428_v17, %v1229_v3  ;;  %v1231_v6 = vpop.f32.mrb[71].mxu0  ;;  %v11704_v7 = vsel %vm2000_vm1, %v2434_v49, %v2436_v1 }
 0x1a7   :  { %9267 = vmatmul.mubr.bf16.gmra.mrb[44].mxu1 %v11576_v37  ;;  %v10638_v37 = vld [vmem:[%s14309_s4 + $0xe0] sm:$0xff]   ;;  %v10652_v6 = vld [vmem:[%s14309_s4 + $0x108] sm:$0xff]  }
 0x1a8   :  { %9287 = vmatpush3.bf16.msra.mxu1 %v10633_v25  ;;  %9270 = vmatprep.mubr.msk.bf16.mxu1 %vm11081_vm0, %v11555_v23  ;;  %v1700_v10 = vmax.f32 %v1230_v5, 0.0  ;;  %v10686_v5 = vld [vmem:[%s14330_s22 + $0x314] ss:$8 sps:$4 sm:$0xff]  }
 0x1a9   :  { %9288 = vmatprep.subr.bf16.mxu1 %v11555_v23  ;;  %1441 = vmatmul.mubr.bf16.gmra.mrb[176].mxu0 %v10664_v39 }
 0x1aa   :  { %v11716_v11 = vpack.c.bf16 %v1700_v10, %v1699_v4  ;;  %1448 = vmatprep.mubr.bf16.mxu0 %v10668_v8 }
 0x1ab   :  { %v1234_v12 = vpop.f32.mrb[72].mxu0 }
 0x1ac   :  { %9289 = vmatpush3.bf16.msra.mxu1 %v10637_v9  ;;  %v1235_v13 = vadd.f32 %v11428_v17, %v1234_v12  ;;  %v1236_v14 = vpop.f32.mrb[73].mxu0  ;;  %v2438_v15 = vrot.slane %v11716_v11, 4  ;;  %v10656_v9 = vld [vmem:[%s14309_s4 + $0x110] sm:$0xff]  }
 0x1ad   :  { %9290 = vmatprep.subr.bf16.mxu1 %v11555_v23  ;;  %v1237_v51 = vpop.f32.mrb[74].mxu0  ;;  %v10707_v11 = vld [vmem:[%s14330_s22 + $0x350] ss:$8 sps:$4 sm:$0xff]  }
 0x1ae   :  { %v1701_v18 = vmax.f32 %v1235_v13, 0.0  ;;  %v1238_v19 = vadd.f32 %v11428_v17, %v1237_v51  ;;  %v1239_v20 = vpop.f32.mrb[75].mxu0  ;;  %v11731_v21 = vsel %vm2000_vm1, %v2436_v1, %v2438_v15  ;;  %v2433_v1 = vsel %vm2000_vm1, %v2431_v57, %v2432_v48  ;;  %v10689_v13 = vld [vmem:[%s14330_s22 + $0x310] ss:$8 sps:$4 sm:$0xff]  }
 0x1af   :  { %9271 = vmatmul.mubr.bf16.gmra.mrb[48].mxu1 %v11596_v53  ;;  %v10645_v53 = vld [vmem:[%s14309_s4 + $0xf0] sm:$0xff]  }
 0x1b0   :  { %9291 = vmatpush3.bf16.msra.mxu1 %v10638_v37  ;;  %9274 = vmatprep.mubr.msk.bf16.mxu1 %vm11081_vm0, %v11555_v23  ;;  %v1702_v24 = vmax.f32 %v1238_v19, 0.0  ;;  %v10660_v19 = vld [vmem:[%s14309_s4 + $0x118] sm:$0xff]  }
 0x1b1   :  { %9292 = vmatprep.subr.bf16.mxu1 %v11555_v23  ;;  %1449 = vmatmul.mubr.bf16.gmra.mrb[180].mxu0 %v10670_v16 }
 0x1b2   :  { %v11743_v26 = vpack.c.bf16 %v1702_v24, %v1701_v18  ;;  %1456 = vmatprep.mubr.bf16.mxu0 %v10673_v22  ;;  %v10691_v18 = vld [vmem:[%s14330_s22 + $0x324] ss:$8 sps:$4 sm:$0xff]  }
 0x1b3   :  { %v1242_v27 = vpop.f32.mrb[76].mxu0 }
 0x1b4   :  { %9293 = vmatpush3.bf16.msra.mxu1 %v10642_v47  ;;  %v1243_v30 = vadd.f32 %v11428_v17, %v1242_v27  ;;  %v1244_v31 = vpop.f32.mrb[77].mxu0  ;;  %v10661_v47 = vld [vmem:[%s14309_s4 + $0x120] sm:$0xff]  }
 0x1b5   :  { %9294 = vmatprep.subr.bf16.mxu1 %v11555_v23  ;;  %v1245_v62 = vpop.f32.mrb[78].mxu0  ;;  %v10693_v31 = vld [vmem:[%s14330_s22 + $0x320] ss:$8 sps:$4 sm:$0xff]  }
 0x1b6   :  { %v1703_v33 = vmax.f32 %v1243_v30, 0.0  ;;  %v1246_v34 = vadd.f32 %v11428_v17, %v1245_v62  ;;  %v1247_v35 = vpop.f32.mrb[79].mxu0  ;;  %v10696_v62 = vld [vmem:[%s14330_s22 + $0x334] ss:$8 sps:$4 sm:$0xff]  }
 0x1b7   :  { %9275 = vmatmul.mubr.bf16.gmra.mrb[52].mxu1 %v11617_v2  ;;  %v10665_v35 = vld [vmem:[%s14309_s4 + $0x128] sm:$0xff]  }
 0x1b8   :  { %9295 = vmatpush3.bf16.msra.mxu1 %v10645_v53  ;;  %9278 = vmatprep.mubr.msk.bf16.mxu1 %vm11081_vm0, %v11555_v23  ;;  %v1704_v40 = vmax.f32 %v1246_v34, 0.0  ;;  %v10725_v53 = vld [vmem:[%s14311_s6 + $0x40] sm:$0xff]  }
 0x1b9   :  { %9296 = vmatprep.subr.bf16.mxu1 %v11555_v23  ;;  %1457 = vmatmul.mubr.bf16.gmra.mrb[184].mxu0 %v10675_v32 }
 0x1ba   :  { %v11764_v41 = vpack.c.bf16 %v1704_v40, %v1703_v33  ;;  %1464 = vmatprep.mubr.bf16.mxu0 %v10677_v36  ;;  %9751 = vmatpush3.bf16.msra.mxu0 %v10725_v53  ;;  %v10716_v53 = vld [vmem:[%s14330_s22 + $0x374] ss:$8 sps:$4 sm:$0xff]  }
 0x1bb   :  { %v1250_v42 = vpop.f32.mrb[80].mxu0  ;;  %9752 = vmatprep.subr.bf16.mxu0 %v11555_v23 }
 0x1bc   :  { %9297 = vmatpush3.bf16.msra.mxu1 %v10647_v38  ;;  %v1251_v43 = vadd.f32 %v11428_v17, %v1250_v42  ;;  %v1252_v2 = vpop.f32.mrb[81].mxu0 }
 0x1bd   :  { %9318 = vmatprep.subr.bf16.mxu1 %v11555_v23  ;;  %v1253_v44 = vpop.f32.mrb[82].mxu0 }
 0x1be   :  { %v1705_v49 = vmax.f32 %v1251_v43, 0.0  ;;  %v1254_v50 = vadd.f32 %v11428_v17, %v1253_v44  ;;  %v1255_v52 = vpop.f32.mrb[83].mxu0  ;;  %v10698_v44 = vld [vmem:[%s14330_s22 + $0x330] ss:$8 sps:$4 sm:$0xff]  }
 0x1bf   :  { %9279 = vmatmul.mubr.bf16.gmra.mrb[56].mxu1 %v2259_v46  ;;  %v10667_v52 = vld [vmem:[%s14309_s4 + $0x138] sm:$0xff]  }
 0x1c0   :  { %9298 = vmatprep.mubr.msk.bf16.mxu1 %vm11081_vm0, %v11555_v23  ;;  %v1706_v55 = vmax.f32 %v1254_v50, 0.0 }
 0x1c1   :  { %1465 = vmatmul.mubr.bf16.gmra.mrb[188].mxu0 %v10679_v45  ;;  %v10700_v45 = vld [vmem:[%s14330_s22 + $0x344] ss:$8 sps:$4 sm:$0xff]  }
 0x1c2   :  { %v11777_v58 = vpack.c.bf16 %v1706_v55, %v1705_v49  ;;  %1472 = vmatprep.mubr.bf16.mxu0 %v10682_v54  ;;  %v11859_v49 = vld [vmem:[%s14310_s3] ss:$0 sm:$0xff] }
 0x1c3   :  { %v1258_v59 = vpop.f32.mrb[84].mxu0 }
 0x1c4   :  { %v1259_v61 = vadd.f32 %v11428_v17, %v1258_v59  ;;  %v1260_v25 = vpop.f32.mrb[85].mxu0 }
 0x1c5   :  { %v1261_v63 = vpop.f32.mrb[86].mxu0  ;;  %v10702_v25 = vld [vmem:[%s14330_s22 + $0x340] ss:$8 sps:$4 sm:$0xff]  }
 0x1c6   :  { %v1707_v3 = vmax.f32 %v1259_v61, 0.0  ;;  %v1262_v39 = vadd.f32 %v11428_v17, %v1261_v63  ;;  %v1263_v4 = vpop.f32.mrb[87].mxu0  ;;  %v10705_v63 = vld [vmem:[%s14330_s22 + $0x354] ss:$8 sps:$4 sm:$0xff]  }
 0x1c7   :  { %9299 = vmatmul.mubr.bf16.vlgmr.msra.gmra.mrb[60].mxu1 %v2433_v1 }
 0x1c8   :  { %9319 = vmatpush3.bf16.msra.mxu1 %v10651_v60  ;;  %9302 = vmatprep.mubr.msk.bf16.mxu1 %vm11081_vm0, %v11555_v23  ;;  %v1708_v29 = vmax.f32 %v1262_v39, 0.0 }
 0x1c9   :  { %9320 = vmatprep.subr.bf16.mxu1 %v11555_v23  ;;  %1473 = vmatmul.mubr.bf16.gmra.mrb[192].mxu0 %v10684_v0 }
 0x1ca   :  { %v11799_v48 = vpack.c.bf16 %v1708_v29, %v1707_v3  ;;  %1480 = vmatprep.mubr.bf16.mxu0 %v10686_v5  ;;  %v10671_v29 = vld [vmem:[%s14309_s4 + $0x140] sm:$0xff]  }
 0x1cb   :  { %v1266_v8 = vpop.f32.mrb[88].mxu0 }
 0x1cc   :  { %9321 = vmatpush3.bf16.msra.mxu1 %v10652_v6  ;;  %v1267_v10 = vadd.f32 %v11428_v17, %v1266_v8  ;;  %v1268_v12 = vpop.f32.mrb[89].mxu0 }
 0x1cd   :  { %9322 = vmatprep.subr.bf16.mxu1 %v11555_v23  ;;  %v1269_v37 = vpop.f32.mrb[90].mxu0  ;;  %v10711_v12 = vld [vmem:[%s14330_s22 + $0x364] ss:$8 sps:$4 sm:$0xff]  }
 0x1ce   :  { %v1709_v14 = vmax.f32 %v1267_v10, 0.0  ;;  %v1270_v51 = vadd.f32 %v11428_v17, %v1269_v37  ;;  %v1271_v16 = vpop.f32.mrb[91].mxu0 }
 0x1cf   :  { %9303 = vmatmul.mubr.bf16.gmra.mrb[64].mxu1 %v11682_v56  ;;  %v10672_v16 = vld [vmem:[%s14309_s4 + $0x148] sm:$0xff]  }
 0x1d0   :  { %9323 = vmatpush3.bf16.msra.mxu1 %v10656_v9  ;;  %9306 = vmatprep.mubr.msk.bf16.mxu1 %vm11081_vm0, %v11555_v23  ;;  %v1710_v20 = vmax.f32 %v1270_v51, 0.0 }
 0x1d1   :  { %9324 = vmatprep.subr.bf16.mxu1 %v11555_v23  ;;  %1481 = vmatmul.mubr.bf16.gmra.mrb[196].mxu0 %v10689_v13 }
 0x1d2   :  { %v1831_v22 = vpack.c.bf16 %v1710_v20, %v1709_v14  ;;  %1488 = vmatprep.mubr.bf16.mxu0 %v10691_v18  ;;  %v10676_v20 = vld [vmem:[%s14309_s4 + $0x150] sm:$0xff]  }
 0x1d3   :  { %v1274_v24 = vpop.f32.mrb[92].mxu0 }
 0x1d4   :  { %9325 = vmatpush3.bf16.msra.mxu1 %v10660_v19  ;;  %1903 = vst [vmem:[#allocation2 + $0xb0] sm:$0xff] %v1831_v22  ;;  %v1275_v56 = vadd.f32 %v11428_v17, %v1274_v24  ;;  %v1276_v27 = vpop.f32.mrb[93].mxu0 }
 0x1d5   :  { %9326 = vmatprep.subr.bf16.mxu1 %v11555_v23  ;;  %v1277_v30 = vpop.f32.mrb[94].mxu0  ;;  %v10713_v27 = vld [vmem:[%s14330_s22 + $0x360] ss:$8 sps:$4 sm:$0xff]  }
 0x1d6   :  { %v1711_v32 = vmax.f32 %v1275_v56, 0.0  ;;  %v1278_v33 = vadd.f32 %v11428_v17, %v1277_v30  ;;  %v1279_v34 = vpop.f32.mrb[95].mxu0 }
 0x1d7   :  { %9307 = vmatmul.mubr.bf16.gmra.mrb[68].mxu1 %v11704_v7  ;;  %v10666_v7 = vld [vmem:[%s14309_s4 + $0x130] sm:$0xff]  }
 0x1d8   :  { %9327 = vmatpush3.bf16.msra.mxu1 %v10661_v47  ;;  %9310 = vmatprep.mubr.msk.bf16.mxu1 %vm11081_vm0, %v11555_v23  ;;  %v1712_v36 = vmax.f32 %v1278_v33, 0.0  ;;  %v10680_v33 = vld [vmem:[%s14309_s4 + $0x158] sm:$0xff]  }
 0x1d9   :  { %9328 = vmatprep.subr.bf16.mxu1 %v11555_v23  ;;  %1489 = vmatmul.mubr.bf16.gmra.mrb[200].mxu0 %v10693_v31 }
 0x1da   :  { %v11843_v38 = vpack.c.bf16 %v1712_v36, %v1711_v32  ;;  %1496 = vmatprep.mubr.bf16.mxu0 %v10696_v62 }
 0x1db   :  { %v1282_v40 = vpop.f32.mrb[96].mxu0 }
 0x1dc   :  { %9329 = vmatpush3.bf16.msra.mxu1 %v10665_v35  ;;  %v1283_v42 = vadd.f32 %v11428_v17, %v1282_v40  ;;  %v1284_v43 = vpop.f32.mrb[97].mxu0  ;;  %v2751_v57 = vrot.slane %v11843_v38, 4 }
 0x1dd   :  { %9330 = vmatprep.subr.bf16.mxu1 %v11555_v23  ;;  %v1285_v2 = vpop.f32.mrb[98].mxu0  ;;  %v10718_v43 = vld [vmem:[%s14330_s22 + $0x370] ss:$8 sps:$4 sm:$0xff]  }
 0x1de   :  { %v1713_v46 = vmax.f32 %v1283_v42, 0.0  ;;  %v1286_v17 = vadd.f32 %v11859_v49, %v1285_v2  ;;  %v1287_v50 = vpop.f32.mrb[99].mxu0  ;;  %v10720_v2 = vld [vmem:[%s14330_s22 + $0x384] ss:$8 sps:$4 sm:$0xff]  }
 0x1df   :  { %9311 = vmatmul.mubr.bf16.gmra.mrb[72].mxu1 %v11731_v21 }
 0x1e0   :  { %9331 = vmatpush3.bf16.msra.mxu1 %v10666_v7  ;;  %9314 = vmatprep.mubr.msk.bf16.mxu1 %vm11081_vm0, %v11555_v23  ;;  %v1714_v54 = vmax.f32 %v1286_v17, 0.0  ;;  %v10685_v17 = vld [vmem:[%s14309_s4 + $0x168] sm:$0xff]  }
 0x1e1   :  { %9332 = vmatprep.subr.bf16.mxu1 %v11555_v23  ;;  %1497 = vmatmul.mubr.bf16.gmra.mrb[204].mxu0 %v10698_v44 }
 0x1e2   :  { %v1833_v28 = vpack.c.bf16 %v1714_v54, %v1713_v46  ;;  %1504 = vmatprep.mubr.bf16.mxu0 %v10700_v45 }
 0x1e3   :  { %v1290_v55 = vpop.f32.mrb[100].mxu0 }
 0x1e4   :  { %9333 = vmatpush3.bf16.msra.mxu1 %v10667_v52  ;;  %v1291_v21 = vadd.f32 %v11859_v49, %v1290_v55  ;;  %v1292_v59 = vpop.f32.mrb[101].mxu0  ;;  %v2753_v60 = vrot.slane %v1833_v28, 4  ;;  %v10688_v28 = vld [vmem:[%s14309_s4 + $0x170] sm:$0xff]  }
 0x1e5   :  { %9354 = vmatprep.subr.bf16.mxu1 %v11555_v23  ;;  %v1293_v61 = vpop.f32.mrb[102].mxu0  ;;  %v11969_v59 = vld [vmem:[#allocation3 + $0x48] sm:$0xff] }
 0x1e6   :  { %v1715_v0 = vmax.f32 %v1291_v21, 0.0  ;;  %v1294_v1 = vadd.f32 %v11859_v49, %v1293_v61  ;;  %v1295_v3 = vpop.f32.mrb[103].mxu0  ;;  %v11882_v39 = vsel %vm2000_vm1, %v2751_v57, %v2753_v60 }
 0x1e7   :  { %9315 = vmatmul.mubr.bf16.gmra.mrb[76].mxu1 %v2438_v15 }
 0x1e8   :  { %9334 = vmatprep.mubr.msk.bf16.mxu1 %vm11081_vm0, %v11555_v23  ;;  %v1716_v4 = vmax.f32 %v1294_v1, 0.0 }
 0x1e9   :  { %1505 = vmatmul.mubr.bf16.gmra.mrb[208].mxu0 %v10702_v25 }
 0x1ea   :  { %v1834_v5 = vpack.c.bf16 %v1716_v4, %v1715_v0  ;;  %1512 = vmatprep.mubr.bf16.mxu0 %v10705_v63  ;;  %v10690_v0 = vld [vmem:[%s14309_s4 + $0x178] sm:$0xff]  }
 0x1eb   :  { %v1298_v6 = vpop.f32.mrb[104].mxu0 }
 0x1ec   :  { %v1299_v8 = vadd.f32 %v11859_v49, %v1298_v6  ;;  %v1300_v9 = vpop.f32.mrb[105].mxu0  ;;  %v2755_v10 = vrot.slane %v1834_v5, 4  ;;  %v2578_v5 = vld [vmem:[#allocation2 + $0xb0] sm:$0xf] }
 0x1ed   :  { %v1301_v15 = vpop.f32.mrb[106].mxu0 }
 0x1ee   :  { %v1717_v37 = vmax.f32 %v1299_v8, 0.0  ;;  %v1302_v13 = vadd.f32 %v11859_v49, %v1301_v15  ;;  %v1303_v14 = vpop.f32.mrb[107].mxu0  ;;  %v11900_v51 = vsel %vm2000_vm1, %v2753_v60, %v2755_v10  ;;  %v2724_v8 = vld [vmem:[#allocation2 + $0xb0] sm:$0xf0] }
 0x1ef   :  { %9335 = vmatmul.mubr.bf16.vlgmr.msra.gmra.mrb[80].mxu1 %v11743_v26 }
 0x1f0   :  { %9355 = vmatpush3.bf16.msra.mxu1 %v10671_v29  ;;  %9338 = vmatprep.mubr.msk.bf16.mxu1 %vm11081_vm0, %v11555_v23  ;;  %v1718_v18 = vmax.f32 %v1302_v13, 0.0 }
 0x1f1   :  { %9356 = vmatprep.subr.bf16.mxu1 %v11555_v23  ;;  %1513 = vmatmul.mubr.bf16.gmra.mrb[212].mxu0 %v10707_v11 }
 0x1f2   :  { %v11909_v19 = vpack.c.bf16 %v1718_v18, %v1717_v37  ;;  %1520 = vmatprep.mubr.bf16.mxu0 %v10711_v12  ;;  %v2750_v37 = vrot.slane %v2724_v8, 4  ;;  %v10694_v18 = vld [vmem:[%s14309_s4 + $0x180] sm:$0xff]  }
 0x1f3   :  { %v1306_v26 = vpop.f32.mrb[108].mxu0 }
 0x1f4   :  { %9357 = vmatpush3.bf16.msra.mxu1 %v10672_v16  ;;  %v1307_v22 = vadd.f32 %v11859_v49, %v1306_v26  ;;  %v1308_v47 = vpop.f32.mrb[109].mxu0  ;;  %v2757_v24 = vrot.slane %v11909_v19, 4 }
 0x1f5   :  { %9358 = vmatprep.subr.bf16.mxu1 %v11555_v23  ;;  %v1309_v56 = vpop.f32.mrb[110].mxu0  ;;  %v10735_v47 = vld [vmem:[%s14330_s22 + $0x3b4] ss:$8 sps:$4 sm:$0xff]  }
 0x1f6   :  { %v1719_v30 = vmax.f32 %v1307_v22, 0.0  ;;  %v1310_v31 = vadd.f32 %v11859_v49, %v1309_v56  ;;  %v1311_v62 = vpop.f32.mrb[111].mxu0  ;;  %v11927_v32 = vsel %vm2000_vm1, %v2755_v10, %v2757_v24  ;;  %v10730_v10 = vld [vmem:[%s14330_s22 + $0x3a4] ss:$8 sps:$4 sm:$0xff]   ;;  %v10733_v22 = vld [vmem:[%s14330_s22 + $0x3a0] ss:$8 sps:$4 sm:$0xff]  }
 0x1f7   :  { %9339 = vmatmul.mubr.bf16.gmra.mrb[84].mxu1 %v11764_v41  ;;  %v10681_v41 = vld [vmem:[%s14309_s4 + $0x160] sm:$0xff]   ;;  %v10695_v62 = vld [vmem:[%s14309_s4 + $0x188] sm:$0xff]  }
 0x1f8   :  { %9359 = vmatpush3.bf16.msra.mxu1 %v10676_v20  ;;  %9342 = vmatprep.mubr.msk.bf16.mxu1 %vm11081_vm0, %v11555_v23  ;;  %v1720_v34 = vmax.f32 %v1310_v31, 0.0 }
 0x1f9   :  { %9360 = vmatprep.subr.bf16.mxu1 %v11555_v23  ;;  %1521 = vmatmul.mubr.bf16.gmra.mrb[216].mxu0 %v10713_v27  ;;  %v2752_v27 = vsel %vm2000_vm1, %v2750_v37, %v2751_v57 }
 0x1fa   :  { %v11936_v35 = vpack.c.bf16 %v1720_v34, %v1719_v30  ;;  %1528 = vmatprep.mubr.bf16.mxu0 %v10716_v53  ;;  %v10764_v34 = vld [vmem:[%s14311_s6 + $0x48] sm:$0xff]  }
 0x1fb   :  { %v1314_v36 = vpop.f32.mrb[112].mxu0  ;;  %9753 = vmatpush3.bf16.msra.mxu0 %v10764_v34 }
 0x1fc   :  { %9361 = vmatpush3.bf16.msra.mxu1 %v10680_v33  ;;  %v1315_v40 = vadd.f32 %v11859_v49, %v1314_v36  ;;  %v1316_v7 = vpop.f32.mrb[113].mxu0  ;;  %v10699_v36 = vld [vmem:[%s14309_s4 + $0x190] sm:$0xff]   ;;  %9754 = vmatprep.subr.bf16.mxu0 %v11969_v59 }
 0x1fd   :  { %9362 = vmatprep.subr.bf16.mxu1 %v11555_v23  ;;  %v1317_v42 = vpop.f32.mrb[114].mxu0 }
 0x1fe   :  { %v1721_v44 = vmax.f32 %v1315_v40, 0.0  ;;  %v1318_v45 = vadd.f32 %v11859_v49, %v1317_v42  ;;  %v1319_v46 = vpop.f32.mrb[115].mxu0  ;;  %v10737_v42 = vld [vmem:[%s14330_s22 + $0x3b0] ss:$8 sps:$4 sm:$0xff]  }
 0x1ff   :  { %9343 = vmatmul.mubr.bf16.gmra.mrb[88].mxu1 %v11777_v58  ;;  %v10722_v58 = vld [vmem:[%s14330_s22 + $0x380] ss:$8 sps:$4 sm:$0xff]   ;;  %v10703_v46 = vld [vmem:[%s14309_s4 + $0x198] sm:$0xff]  }
 0x200   :  { %9363 = vmatpush3.bf16.msra.mxu1 %v10681_v41  ;;  %9346 = vmatprep.mubr.msk.bf16.mxu1 %vm11081_vm0, %v11555_v23  ;;  %v1722_v50 = vmax.f32 %v1318_v45, 0.0  ;;  %v10740_v45 = vld [vmem:[%s14330_s22 + $0x3c4] ss:$8 sps:$4 sm:$0xff]  }
 0x201   :  { %9364 = vmatprep.subr.bf16.mxu1 %v11555_v23  ;;  %1529 = vmatmul.mubr.bf16.gmra.mrb[220].mxu0 %v10718_v43  ;;  %v10726_v23 = vld [vmem:[%s14330_s22 + $0x394] ss:$8 sps:$4 sm:$0xff]  }
 0x202   :  { %v11957_v52 = vpack.c.bf16 %v1722_v50, %v1721_v44  ;;  %1536 = vmatprep.mubr.bf16.mxu0 %v10720_v2 }
 0x203   :  { %v1322_v54 = vpop.f32.mrb[116].mxu0 }
 0x204   :  { %9365 = vmatpush3.bf16.msra.mxu1 %v10685_v17  ;;  %v1323_v55 = vadd.f32 %v11859_v49, %v1322_v54  ;;  %v1324_v21 = vpop.f32.mrb[117].mxu0 }
 0x205   :  { %9366 = vmatprep.subr.bf16.mxu1 %v11969_v59  ;;  %v1325_v60 = vpop.f32.mrb[118].mxu0 }
 0x206   :  { %v1723_v61 = vmax.f32 %v1323_v55, 0.0  ;;  %v1326_v25 = vadd.f32 %v11859_v49, %v1325_v60  ;;  %v1327_v63 = vpop.f32.mrb[119].mxu0 }
 0x207   :  { %9347 = vmatmul.mubr.bf16.gmra.mrb[92].mxu1 %v11799_v48  ;;  %v10728_v48 = vld [vmem:[%s14330_s22 + $0x390] ss:$8 sps:$4 sm:$0xff]   ;;  %v10744_v63 = vld [vmem:[%s14330_s22 + $0x3d4] ss:$8 sps:$4 sm:$0xff]  }
 0x208   :  { %9367 = vmatpush3.bf16.msra.mxu1 %v10688_v28  ;;  %9350 = vmatprep.mubr.msk.bf16.mxu1 %vm11081_vm0, %v11969_v59  ;;  %v1724_v1 = vmax.f32 %v1326_v25, 0.0 }
 0x209   :  { %9368 = vmatprep.subr.bf16.mxu1 %v11969_v59  ;;  %1537 = vmatmul.mubr.bf16.gmra.mrb[224].mxu0 %v10722_v58 }
 0x20a   :  { %v11980_v3 = vpack.c.bf16 %v1724_v1, %v1723_v61  ;;  %1544 = vmatprep.mubr.bf16.mxu0 %v10726_v23  ;;  %v10742_v61 = vld [vmem:[%s14330_s22 + $0x3c0] ss:$8 sps:$4 sm:$0xff]  }
 0x20b   :  { %v1330_v4 = vpop.f32.mrb[120].mxu0 }
 0x20c   :  { %9369 = vmatpush3.bf16.msra.mxu1 %v10690_v0  ;;  %v1331_v6 = vadd.f32 %v11859_v49, %v1330_v4  ;;  %v1332_v29 = vpop.f32.mrb[121].mxu0 }
 0x20d   :  { %9390 = vmatprep.subr.bf16.mxu1 %v11969_v59  ;;  %v1333_v9 = vpop.f32.mrb[122].mxu0 }
 0x20e   :  { %v1725_v11 = vmax.f32 %v1331_v6, 0.0  ;;  %v1334_v15 = vadd.f32 %v11859_v49, %v1333_v9  ;;  %v1335_v12 = vpop.f32.mrb[123].mxu0  ;;  %v10709_v9 = vld [vmem:[%s14309_s4 + $0x1b0] sm:$0xff]  }
 0x20f   :  { %9351 = vmatmul.mubr.bf16.gmra.mrb[96].mxu1 %v2578_v5 }
 0x210   :  { %9370 = vmatprep.mubr.msk.bf16.mxu1 %vm11081_vm0, %v11969_v59  ;;  %v1726_v13 = vmax.f32 %v1334_v15, 0.0 }
 0x211   :  { %1545 = vmatmul.mubr.bf16.gmra.mrb[228].mxu0 %v10728_v48  ;;  %v10708_v48 = vld [vmem:[%s14309_s4 + $0x1a8] sm:$0xff]  }
 0x212   :  { %v11993_v14 = vpack.c.bf16 %v1726_v13, %v1725_v11  ;;  %1552 = vmatprep.mubr.bf16.mxu0 %v10730_v10 }
 0x213   :  { %v1338_v16 = vpop.f32.mrb[124].mxu0 }
 0x214   :  { %v1339_v20 = vadd.f32 %v11859_v49, %v1338_v16  ;;  %v1340_v26 = vpop.f32.mrb[125].mxu0  ;;  %v10746_v16 = vld [vmem:[%s14330_s22 + $0x3d0] ss:$8 sps:$4 sm:$0xff]  }
 0x215   :  { %v1341_v56 = vpop.f32.mrb[126].mxu0 }
 0x216   :  { %v1727_v53 = vmax.f32 %v1339_v20, 0.0  ;;  %v1342_v30 = vadd.f32 %v11859_v49, %v1341_v56  ;;  %v1343_v31 = vpop.f32.mrb[127].mxu0  ;;  %v10749_v20 = vld [vmem:[%s14330_s22 + $0x3e4] ss:$8 sps:$4 sm:$0xff]  }
 0x217   :  { %9371 = vmatmul.mubr.bf16.vlgmr.msra.gmra.mrb[100].mxu1 %v2752_v27  ;;  %v10710_v27 = vld [vmem:[%s14309_s4 + $0x1b8] sm:$0xff]  }
 0x218   :  { %9391 = vmatpush3.bf16.msra.mxu1 %v10694_v18  ;;  %9374 = vmatprep.mubr.msk.bf16.mxu1 %vm11081_vm0, %v11969_v59  ;;  %v1728_v33 = vmax.f32 %v1342_v30, 0.0 }
 0x219   :  { %9392 = vmatprep.subr.bf16.mxu1 %v11969_v59  ;;  %1553 = vmatmul.mubr.bf16.gmra.mrb[232].mxu0 %v10733_v22 }
 0x21a   :  { %v1840_v38 = vpack.c.bf16 %v1728_v33, %v1727_v53  ;;  %1560 = vmatprep.mubr.bf16.mxu0 %v10735_v47 }
 0x21b   :  { %v1346_v57 = vpop.f32.mrb[128].mxu0 }
 0x21c   :  { %9393 = vmatpush3.bf16.msra.mxu1 %v10695_v62  ;;  %1912 = vst [vmem:[#allocation2 + $0xf8] sm:$0xff] %v1840_v38  ;;  %v1347_v41 = vadd.f32 %v11859_v49, %v1346_v57  ;;  %v1348_v40 = vpop.f32.mrb[129].mxu0 }
 0x21d   :  { %9394 = vmatprep.subr.bf16.mxu1 %v11969_v59  ;;  %v1349_v7 = vpop.f32.mrb[130].mxu0 }
 0x21e   :  { %v1729_v43 = vmax.f32 %v1347_v41, 0.0  ;;  %v1350_v2 = vadd.f32 %v11859_v49, %v1349_v7  ;;  %v1351_v44 = vpop.f32.mrb[131].mxu0  ;;  %v10751_v41 = vld [vmem:[%s14330_s22 + $0x3e0] ss:$8 sps:$4 sm:$0xff]   ;;  %v10755_v7 = vld [vmem:[%s14330_s22 + $0x3f4] ss:$8 sps:$4 sm:$0xff]  }
 0x21f   :  { %9375 = vmatmul.mubr.bf16.gmra.mrb[104].mxu1 %v11882_v39  ;;  %v10704_v39 = vld [vmem:[%s14309_s4 + $0x1a0] sm:$0xff]  }
 0x220   :  { %9395 = vmatpush3.bf16.msra.mxu1 %v10699_v36  ;;  %9378 = vmatprep.mubr.msk.bf16.mxu1 %vm11081_vm0, %v11969_v59  ;;  %v1730_v17 = vmax.f32 %v1350_v2, 0.0 }
 0x221   :  { %9396 = vmatprep.subr.bf16.mxu1 %v11969_v59  ;;  %1561 = vmatmul.mubr.bf16.gmra.mrb[236].mxu0 %v10737_v42 }
 0x222   :  { %v12038_v50 = vpop.f32.mrb[0].mxu1  ;;  %v12040_v54 = vpack.c.bf16 %v1730_v17, %v1729_v43  ;;  %1568 = vmatprep.mubr.bf16.mxu0 %v10740_v45 }
 0x223   :  { %v9192_v58 = vpop.f32.mrb[1].mxu1 }
 0x224   :  { %v12042_v28 = vpop.f32.mrb[2].mxu1  ;;  %9397 = vmatpush3.bf16.msra.mxu1 %v10703_v46  ;;  %v1354_v55 = vpop.f32.mrb[132].mxu0  ;;  %v3070_v37 = vrot.slane %v12040_v54, 4 }
 0x225   :  { %v9193_v21 = vpop.f32.mrb[3].mxu1  ;;  %9398 = vmatprep.subr.bf16.mxu1 %v11969_v59  ;;  %v1355_v23 = vadd.f32 %v11859_v49, %v1354_v55  ;;  %v1356_v60 = vpop.f32.mrb[133].mxu0 }
 0x226   :  { %v1357_v25 = vpop.f32.mrb[134].mxu0 }
 0x227   :  { %9379 = vmatmul.mubr.bf16.gmra.mrb[108].mxu1 %v11900_v51  ;;  %v1731_v0 = vmax.f32 %v1355_v23, 0.0  ;;  %v1358_v1 = vadd.f32 %v11859_v49, %v1357_v25  ;;  %v1359_v4 = vpop.f32.mrb[135].mxu0 }
 0x228   :  { %9399 = vmatpush3.bf16.msra.mxu1 %v10704_v39  ;;  %9382 = vmatprep.mubr.msk.bf16.mxu1 %vm11081_vm0, %v11969_v59 }
 0x229   :  { %9400 = vmatprep.subr.bf16.mxu1 %v11969_v59  ;;  %v1732_v5 = vmax.f32 %v1358_v1, 0.0  ;;  %1569 = vmatmul.mubr.bf16.gmra.mrb[240].mxu0 %v10742_v61  ;;  %v10757_v61 = vld [vmem:[%s14330_s22 + $0x3f0] ss:$8 sps:$4 sm:$0xff]  }
 0x22a   :  { %v12063_v6 = vpop.f32.mrb[4].mxu1  ;;  %1576 = vmatprep.mubr.bf16.mxu0 %v10744_v63  ;;  %v10762_v63 = vld [vmem:[%s14330_s22 + $0x404] ss:$8 sps:$4 sm:$0xff]  }
 0x22b   :  { %v9196_v51 = vpop.f32.mrb[5].mxu1  ;;  %v1842_v29 = vpack.c.bf16 %v1732_v5, %v1731_v0  ;;  %v10715_v5 = vld [vmem:[%s14309_s4 + $0x1c8] sm:$0xff]  }
 0x22c   :  { %v12065_v8 = vpop.f32.mrb[6].mxu1  ;;  %9401 = vmatpush3.bf16.msra.mxu1 %v10708_v48  ;;  %v1362_v10 = vpop.f32.mrb[136].mxu0 }
 0x22d   :  { %v9197_v11 = vpop.f32.mrb[7].mxu1  ;;  %9402 = vmatprep.subr.bf16.mxu1 %v11969_v59  ;;  %v1363_v15 = vadd.f32 %v11859_v49, %v1362_v10  ;;  %v1364_v12 = vpop.f32.mrb[137].mxu0  ;;  %v3072_v13 = vrot.slane %v1842_v29, 4 }
 0x22e   :  { %v1365_v18 = vpop.f32.mrb[138].mxu0  ;;  %v10719_v11 = vld [vmem:[%s14309_s4 + $0x1d0] sm:$0xff]  }
 0x22f   :  { %9383 = vmatmul.mubr.bf16.gmra.mrb[112].mxu1 %v11927_v32  ;;  %v1733_v26 = vmax.f32 %v1363_v15, 0.0  ;;  %v1366_v22 = vadd.f32 %v11859_v49, %v1365_v18  ;;  %v1367_v47 = vpop.f32.mrb[139].mxu0  ;;  %v12084_v56 = vsel %vm2000_vm1, %v3070_v37, %v3072_v13  ;;  %v10760_v18 = vld [vmem:[%s14330_s22 + $0x400] ss:$8 sps:$4 sm:$0xff]  }
 0x230   :  { %9403 = vmatpush3.bf16.msra.mxu1 %v10709_v9  ;;  %9386 = vmatprep.mubr.msk.bf16.mxu1 %vm11081_vm0, %v11969_v59 }
 0x231   :  { %9404 = vmatprep.subr.bf16.mxu1 %v11969_v59  ;;  %v1734_v32 = vmax.f32 %v1366_v22, 0.0  ;;  %1577 = vmatmul.mubr.bf16.gmra.mrb[244].mxu0 %v10746_v16 }
 0x232   :  { %v12092_v53 = vpop.f32.mrb[8].mxu1  ;;  %1584 = vmatprep.mubr.bf16.mxu0 %v10749_v20 }
 0x233   :  { %v9200_v30 = vpop.f32.mrb[9].mxu1  ;;  %v1843_v31 = vpack.c.bf16 %v1734_v32, %v1733_v26  ;;  %v10767_v26 = vld [vmem:[%s14330_s22 + $0x414] ss:$8 sps:$4 sm:$0xff]  }
 0x234   :  { %v12094_v62 = vpop.f32.mrb[10].mxu1  ;;  %9405 = vmatpush3.bf16.msra.mxu1 %v10710_v27  ;;  %v1370_v33 = vpop.f32.mrb[140].mxu0  ;;  %v10723_v32 = vld [vmem:[%s14309_s4 + $0x1d8] sm:$0xff]  }
 0x235   :  { %v9201_v38 = vpop.f32.mrb[11].mxu1  ;;  %9426 = vmatprep.subr.bf16.mxu1 %v11969_v59  ;;  %v1371_v57 = vadd.f32 %v11859_v49, %v1370_v33  ;;  %v1372_v34 = vpop.f32.mrb[141].mxu0  ;;  %v3074_v36 = vrot.slane %v1843_v31, 4 }
 0x236   :  { %v1373_v40 = vpop.f32.mrb[142].mxu0  ;;  %v10724_v34 = vld [vmem:[%s14309_s4 + $0x1e0] sm:$0xff]  }
 0x237   :  { %9387 = vmatmul.mubr.bf16.gmra.mrb[116].mxu1 %v2757_v24  ;;  %v1735_v42 = vmax.f32 %v1371_v57, 0.0  ;;  %v1374_v43 = vadd.f32 %v11859_v49, %v1373_v40  ;;  %v1375_v2 = vpop.f32.mrb[143].mxu0  ;;  %v12108_v44 = vsel %vm2000_vm1, %v3072_v13, %v3074_v36  ;;  %v10714_v24 = vld [vmem:[%s14309_s4 + $0x1c0] sm:$0xff]  }
 0x238   :  { %9406 = vmatprep.mubr.msk.bf16.mxu1 %vm11081_vm0, %v11969_v59  ;;  %v10772_v2 = vld [vmem:[%s14330_s22 + $0x424] ss:$8 sps:$4 sm:$0xff]  }
 0x239   :  { %v1736_v45 = vmax.f32 %v1374_v43, 0.0  ;;  %1585 = vmatmul.mubr.bf16.gmra.mrb[248].mxu0 %v10751_v41 }
 0x23a   :  { %v12112_v46 = vpop.f32.mrb[12].mxu1  ;;  %1592 = vmatprep.mubr.bf16.mxu0 %v10755_v7 }
 0x23b   :  { %v9204_v17 = vpop.f32.mrb[13].mxu1  ;;  %v12114_v58 = vpack.c.bf16 %v1736_v45, %v1735_v42  ;;  %v10765_v42 = vld [vmem:[%s14330_s22 + $0x410] ss:$8 sps:$4 sm:$0xff]  }
 0x23c   :  { %v12116_v19 = vpop.f32.mrb[14].mxu1  ;;  %v1378_v39 = vpop.f32.mrb[144].mxu0 }
 0x23d   :  { %v9205_v55 = vpop.f32.mrb[15].mxu1  ;;  %v1379_v21 = vadd.f32 %v11859_v49, %v1378_v39  ;;  %v1380_v23 = vpop.f32.mrb[145].mxu0  ;;  %v3076_v60 = vrot.slane %v12114_v58, 4 }
 0x23e   :  { %v1381_v25 = vpop.f32.mrb[146].mxu0 }
 0x23f   :  { %9407 = vmatmul.mubr.bf16.vlgmr.msra.gmra.mrb[120].mxu1 %v11936_v35  ;;  %v1737_v0 = vmax.f32 %v1379_v21, 0.0  ;;  %v1382_v1 = vadd.f32 %v11859_v49, %v1381_v25  ;;  %v1383_v4 = vpop.f32.mrb[147].mxu0  ;;  %v12134_v48 = vsel %vm2000_vm1, %v3074_v36, %v3076_v60  ;;  %v10732_v25 = vld [vmem:[%s14309_s4 + $0x1f0] sm:$0xff]  }
 0x240   :  { %9427 = vmatpush3.bf16.msra.mxu1 %v10714_v24  ;;  %9410 = vmatprep.mubr.msk.bf16.mxu1 %vm11081_vm0, %v11969_v59  ;;  %v10729_v24 = vld [vmem:[%s14309_s4 + $0x1e8] sm:$0xff]  }
 0x241   :  { %9428 = vmatprep.subr.bf16.mxu1 %v11969_v59  ;;  %v1738_v35 = vmax.f32 %v1382_v1, 0.0  ;;  %1593 = vmatmul.mubr.bf16.gmra.mrb[252].mxu0 %v10757_v61 }
 0x242   :  { %v12142_v51 = vpop.f32.mrb[16].mxu1  ;;  %1600 = vmatprep.mubr.bf16.mxu0 %v10762_v63 }
 0x243   :  { %v9208_v29 = vpop.f32.mrb[17].mxu1  ;;  %v12144_v9 = vpack.c.bf16 %v1738_v35, %v1737_v0 }
 0x244   :  { %v2132_v10 = vpop.f32.mrb[18].mxu1  ;;  %9429 = vmatpush3.bf16.msra.mxu1 %v10715_v5  ;;  %v1386_v15 = vpop.f32.mrb[148].mxu0  ;;  %v10770_v5 = vld [vmem:[%s14330_s22 + $0x420] ss:$8 sps:$4 sm:$0xff]   ;;  %v10776_v29 = vld [vmem:[%s14330_s22 + $0x434] ss:$8 sps:$4 sm:$0xff]  }
 0x245   :  { %v9209_v12 = vpop.f32.mrb[19].mxu1  ;;  %9430 = vmatprep.subr.bf16.mxu1 %v11969_v59  ;;  %v1387_v13 = vadd.f32 %v11859_v49, %v1386_v15  ;;  %v1388_v16 = vpop.f32.mrb[149].mxu0  ;;  %v10734_v15 = vld [vmem:[%s14309_s4 + $0x1f8] sm:$0xff]  }
 0x246   :  { %v1389_v20 = vpop.f32.mrb[150].mxu0 }
 0x247   :  { %9411 = vmatmul.mubr.bf16.gmra.mrb[124].mxu1 %v11957_v52  ;;  %v1739_v22 = vmax.f32 %v1387_v13, 0.0  ;;  %v1390_v47 = vadd.f32 %v11859_v49, %v1389_v20  ;;  %v1391_v27 = vpop.f32.mrb[151].mxu0 }
 0x248   :  { %9431 = vmatpush3.bf16.msra.mxu1 %v10719_v11  ;;  %9414 = vmatprep.mubr.msk.bf16.mxu1 %vm11081_vm0, %v11969_v59 }
 0x249   :  { %9432 = vmatprep.subr.bf16.mxu1 %v11969_v59  ;;  %v1740_v30 = vmax.f32 %v1390_v47, 0.0  ;;  %1601 = vmatmul.mubr.bf16.gmra.mrb[0].mxu0 %v10760_v18  ;;  %v12231_v47 = vld [vmem:[%s14310_s3] ss:$0 sm:$0xff] }
 0x24a   :  { %v2217_v31 = vpop.f32.mrb[20].mxu1  ;;  %1608 = vmatprep.mubr.bf16.mxu0 %v10767_v26 }
 0x24b   :  { %v12166_v52 = vadd.f32 %v2217_v31, %v12038_v50  ;;  %v9228_v33 = vpop.f32.mrb[21].mxu1  ;;  %v12168_v38 = vpack.c.bf16 %v1740_v30, %v1739_v22  ;;  %v2897_v30 = vld [vmem:[#allocation2 + $0xf8] sm:$0xf] }
 0x24c   :  { %v2220_v57 = vpop.f32.mrb[22].mxu1  ;;  %9433 = vmatpush3.bf16.msra.mxu1 %v10723_v32  ;;  %v1394_v36 = vpop.f32.mrb[152].mxu0  ;;  %v10774_v32 = vld [vmem:[%s14330_s22 + $0x430] ss:$8 sps:$4 sm:$0xff]   ;;  %v3043_v33 = vld [vmem:[#allocation2 + $0xf8] sm:$0xf0] }
 0x24d   :  { %v12174_v41 = vadd.f32 %v2220_v57, %v12042_v28  ;;  %v9229_v40 = vpop.f32.mrb[23].mxu1  ;;  %9434 = vmatprep.subr.bf16.mxu1 %v11969_v59  ;;  %v1395_v7 = vadd.f32 %v11859_v49, %v1394_v36  ;;  %v1396_v50 = vpop.f32.mrb[153].mxu0 }
 0x24e   :  { %v1397_v43 = vpop.f32.mrb[154].mxu0  ;;  %v3069_v50 = vrot.slane %v3043_v33, 4 }
 0x24f   :  { %9415 = vmatmul.mubr.bf16.gmra.mrb[128].mxu1 %v11980_v3  ;;  %v1741_v45 = vmax.f32 %v1395_v7, 0.0  ;;  %v1398_v28 = vadd.f32 %v11859_v49, %v1397_v43  ;;  %v1399_v17 = vpop.f32.mrb[155].mxu0 }
 0x250   :  { %9435 = vmatpush3.bf16.msra.mxu1 %v10724_v34  ;;  %9418 = vmatprep.mubr.msk.bf16.mxu1 %vm11081_vm0, %v11969_v59  ;;  %v10738_v17 = vld [vmem:[%s14309_s4 + $0x200] sm:$0xff]  }
 0x251   :  { %9436 = vmatprep.subr.bf16.mxu1 %v11969_v59  ;;  %v1742_v39 = vmax.f32 %v1398_v28, 0.0  ;;  %1609 = vmatmul.mubr.bf16.gmra.mrb[4].mxu0 %v10765_v42 }
 0x252   :  { %v2225_v55 = vpop.f32.mrb[24].mxu1  ;;  %1616 = vmatprep.mubr.bf16.mxu0 %v10772_v2 }
 0x253   :  { %v12193_v3 = vadd.f32 %v2225_v55, %v12063_v6  ;;  %v9232_v21 = vpop.f32.mrb[25].mxu1  ;;  %v12195_v23 = vpack.c.bf16 %v1742_v39, %v1741_v45  ;;  %v10800_v45 = vld [vmem:[%s14311_s6 + $0x50] sm:$0xff]  }
 0x254   :  { %v2228_v61 = vpop.f32.mrb[26].mxu1  ;;  %9437 = vmatpush3.bf16.msra.mxu1 %v10729_v24  ;;  %v1402_v63 = vpop.f32.mrb[156].mxu0  ;;  %9755 = vmatpush3.bf16.msra.mxu0 %v10800_v45  ;;  %v10788_v45 = vld [vmem:[%s14330_s22 + $0x460] ss:$8 sps:$4 sm:$0xff]  }
 0x255   :  { %v12201_v0 = vadd.f32 %v2228_v61, %v12065_v8  ;;  %v9233_v1 = vpop.f32.mrb[27].mxu1  ;;  %9438 = vmatprep.subr.bf16.mxu1 %v11969_v59  ;;  %v1403_v4 = vadd.f32 %v11859_v49, %v1402_v63  ;;  %v1404_v6 = vpop.f32.mrb[157].mxu0  ;;  %v10779_v61 = vld [vmem:[%s14330_s22 + $0x440] ss:$8 sps:$4 sm:$0xff]   ;;  %9756 = vmatprep.subr.bf16.mxu0 %v11969_v59 }
 0x256   :  { %v1405_v35 = vpop.f32.mrb[158].mxu0 }
 0x257   :  { %9419 = vmatmul.mubr.bf16.gmra.mrb[132].mxu1 %v11993_v14  ;;  %v1743_v10 = vmax.f32 %v1403_v4, 0.0  ;;  %v1406_v8 = vadd.f32 %v11859_v49, %v1405_v35  ;;  %v1407_v11 = vpop.f32.mrb[159].mxu0 }
 0x258   :  { %9439 = vmatpush3.bf16.msra.mxu1 %v10732_v25  ;;  %9422 = vmatprep.mubr.msk.bf16.mxu1 %vm11081_vm0, %v11969_v59  ;;  %v3071_v25 = vsel %vm2000_vm1, %v3069_v50, %v3070_v37  ;;  %v10743_v11 = vld [vmem:[%s14309_s4 + $0x210] sm:$0xff]  }
 0x259   :  { %9440 = vmatprep.subr.bf16.mxu1 %v11969_v59  ;;  %v1744_v12 = vmax.f32 %v1406_v8, 0.0  ;;  %1617 = vmatmul.mubr.bf16.gmra.mrb[8].mxu0 %v10770_v5  ;;  %v10739_v5 = vld [vmem:[%s14309_s4 + $0x208] sm:$0xff]  }
 0x25a   :  { %v2233_v13 = vpop.f32.mrb[28].mxu1  ;;  %1624 = vmatprep.mubr.bf16.mxu0 %v10776_v29 }
 0x25b   :  { %v12220_v14 = vadd.f32 %v2233_v13, %v12092_v53  ;;  %v9236_v16 = vpop.f32.mrb[29].mxu1  ;;  %v12222_v49 = vpack.c.bf16 %v1744_v12, %v1743_v10 }
 0x25c   :  { %v2236_v18 = vpop.f32.mrb[30].mxu1  ;;  %9441 = vmatpush3.bf16.msra.mxu1 %v10734_v15  ;;  %v1410_v20 = vpop.f32.mrb[160].mxu0 }
 0x25d   :  { %v12225_v26 = vadd.f32 %v2236_v18, %v12094_v62  ;;  %v9237_v22 = vpop.f32.mrb[31].mxu1  ;;  %9462 = vmatprep.subr.bf16.mxu1 %v11969_v59  ;;  %v1411_v53 = vadd.f32 %v12231_v47, %v1410_v20  ;;  %v1412_v27 = vpop.f32.mrb[161].mxu0  ;;  %v10781_v62 = vld [vmem:[%s14330_s22 + $0x444] ss:$8 sps:$4 sm:$0xff]  }
 0x25e   :  { %v1413_v31 = vpop.f32.mrb[162].mxu0  ;;  %v10790_v20 = vld [vmem:[%s14330_s22 + $0x464] ss:$8 sps:$4 sm:$0xff]  }
 0x25f   :  { %9423 = vmatmul.mubr.bf16.gmra.mrb[136].mxu1 %v2897_v30  ;;  %v1745_v57 = vmax.f32 %v1411_v53, 0.0  ;;  %v1414_v34 = vadd.f32 %v12231_v47, %v1413_v31  ;;  %v1415_v36 = vpop.f32.mrb[163].mxu0 }
 0x260   :  { %9442 = vmatprep.mubr.msk.bf16.mxu1 %vm11081_vm0, %v11969_v59 }
 0x261   :  { %v1746_v40 = vmax.f32 %v1414_v34, 0.0  ;;  %1625 = vmatmul.mubr.bf16.gmra.mrb[12].mxu0 %v10774_v32  ;;  %v10747_v32 = vld [vmem:[%s14309_s4 + $0x218] sm:$0xff]   ;;  %v10748_v34 = vld [vmem:[%s14309_s4 + $0x220] sm:$0xff]  }
 0x262   :  { %v2241_v7 = vpop.f32.mrb[32].mxu1  ;;  %1632 = vmatprep.mubr.bf16.mxu0 %v10781_v62 }
 0x263   :  { %v12244_v42 = vadd.f32 %v2241_v7, %v12112_v46  ;;  %v9240_v43 = vpop.f32.mrb[33].mxu1  ;;  %v1849_v2 = vpack.c.bf16 %v1746_v40, %v1745_v57 }
 0x264   :  { %v2244_v28 = vpop.f32.mrb[34].mxu1  ;;  %v1418_v24 = vpop.f32.mrb[164].mxu0 }
 0x265   :  { %v12253_v39 = vadd.f32 %v2244_v28, %v12116_v19  ;;  %v9241_v55 = vpop.f32.mrb[35].mxu1  ;;  %1921 = vst [vmem:[#allocation2 + $0x140] sm:$0xff] %v1849_v2  ;;  %v1419_v46 = vadd.f32 %v12231_v47, %v1418_v24  ;;  %v1420_v21 = vpop.f32.mrb[165].mxu0  ;;  %v10786_v19 = vld [vmem:[%s14330_s22 + $0x454] ss:$8 sps:$4 sm:$0xff]  }
 0x266   :  { %v1421_v63 = vpop.f32.mrb[166].mxu0  ;;  %v10752_v21 = vld [vmem:[%s14309_s4 + $0x228] sm:$0xff]  }
 0x267   :  { %9443 = vmatmul.mubr.bf16.vlgmr.msra.gmra.mrb[140].mxu1 %v3071_v25  ;;  %v1747_v1 = vmax.f32 %v1419_v46, 0.0  ;;  %v1422_v4 = vadd.f32 %v12231_v47, %v1421_v63  ;;  %v1423_v6 = vpop.f32.mrb[167].mxu0 }
 0x268   :  { %9463 = vmatpush3.bf16.msra.mxu1 %v10738_v17  ;;  %9446 = vmatprep.mubr.msk.bf16.mxu1 %vm11081_vm0, %v11969_v59  ;;  %v10795_v17 = vld [vmem:[%s14330_s22 + $0x474] ss:$8 sps:$4 sm:$0xff]  }
 0x269   :  { %9464 = vmatprep.subr.bf16.mxu1 %v11969_v59  ;;  %v1748_v54 = vmax.f32 %v1422_v4, 0.0  ;;  %1633 = vmatmul.mubr.bf16.gmra.mrb[16].mxu0 %v10779_v61  ;;  %v10753_v4 = vld [vmem:[%s14309_s4 + $0x230] sm:$0xff]  }
 0x26a   :  { %v2249_v37 = vpop.f32.mrb[36].mxu1  ;;  %1640 = vmatprep.mubr.bf16.mxu0 %v10786_v19 }
 0x26b   :  { %v12274_v35 = vadd.f32 %v2249_v37, %v12142_v51  ;;  %v9244_v29 = vpop.f32.mrb[37].mxu1  ;;  %v12276_v10 = vpack.c.bf16 %v1748_v54, %v1747_v1  ;;  %v10784_v51 = vld [vmem:[%s14330_s22 + $0x450] ss:$8 sps:$4 sm:$0xff]  }
 0x26c   :  { %v2252_v8 = vpop.f32.mrb[38].mxu1  ;;  %9465 = vmatpush3.bf16.msra.mxu1 %v10739_v5  ;;  %v1426_v15 = vpop.f32.mrb[168].mxu0 }
 0x26d   :  { %v9245_v12 = vpop.f32.mrb[39].mxu1  ;;  %9466 = vmatprep.subr.bf16.mxu1 %v11969_v59  ;;  %v1427_v13 = vadd.f32 %v12231_v47, %v1426_v15  ;;  %v1428_v16 = vpop.f32.mrb[169].mxu0  ;;  %v10793_v8 = vld [vmem:[%s14330_s22 + $0x470] ss:$8 sps:$4 sm:$0xff]  }
 0x26e   :  { %v1429_v18 = vpop.f32.mrb[170].mxu0  ;;  %v10754_v16 = vld [vmem:[%s14309_s4 + $0x238] sm:$0xff]  }
 0x26f   :  { %9447 = vmatmul.mubr.bf16.gmra.mrb[144].mxu1 %v12084_v56  ;;  %v1749_v22 = vmax.f32 %v1427_v13, 0.0  ;;  %v1430_v53 = vadd.f32 %v12231_v47, %v1429_v18  ;;  %v1431_v27 = vpop.f32.mrb[171].mxu0 }
 0x270   :  { %9467 = vmatpush3.bf16.msra.mxu1 %v10743_v11  ;;  %9450 = vmatprep.mubr.msk.bf16.mxu1 %vm11081_vm0, %v11969_v59 }
 0x271   :  { %9468 = vmatprep.subr.bf16.mxu1 %v11969_v59  ;;  %v1750_v30 = vmax.f32 %v1430_v53, 0.0  ;;  %1641 = vmatmul.mubr.bf16.gmra.mrb[20].mxu0 %v10784_v51 }
 0x272   :  { %v2358_v31 = vpop.f32.mrb[40].mxu1  ;;  %1648 = vmatprep.mubr.bf16.mxu0 %v10790_v20 }
 0x273   :  { %v12298_v56 = vadd.f32 %v2358_v31, %v12166_v52  ;;  %v9264_v62 = vpop.f32.mrb[41].mxu1  ;;  %v1851_v33 = vpack.c.bf16 %v1750_v30, %v1749_v22  ;;  %v3389_v52 = vrot.slane %v12276_v10, 4 }
 0x274   :  { %v2361_v57 = vpop.f32.mrb[42].mxu1  ;;  %9469 = vmatpush3.bf16.msra.mxu1 %v10747_v32  ;;  %v1434_v36 = vpop.f32.mrb[172].mxu0 }
 0x275   :  { %v12304_v40 = vadd.f32 %v2361_v57, %v12174_v41  ;;  %v9265_v7 = vpop.f32.mrb[43].mxu1  ;;  %9470 = vmatprep.subr.bf16.mxu1 %v11969_v59  ;;  %v1435_v50 = vadd.f32 %v12231_v47, %v1434_v36  ;;  %v1436_v43 = vpop.f32.mrb[173].mxu0  ;;  %v3391_v2 = vrot.slane %v1851_v33, 4 }
 0x276   :  { %v1437_v28 = vpop.f32.mrb[174].mxu0 }
 0x277   :  { %9451 = vmatmul.mubr.bf16.gmra.mrb[148].mxu1 %v12108_v44  ;;  %v1751_v41 = vmax.f32 %v1435_v50, 0.0  ;;  %v1438_v24 = vadd.f32 %v12231_v47, %v1437_v28  ;;  %v1439_v55 = vpop.f32.mrb[175].mxu0  ;;  %v12320_v46 = vsel %vm2000_vm1, %v3389_v52, %v3391_v2 }
 0x278   :  { %9471 = vmatpush3.bf16.msra.mxu1 %v10748_v34  ;;  %9454 = vmatprep.mubr.msk.bf16.mxu1 %vm11081_vm0, %v11969_v59 }
 0x279   :  { %9472 = vmatprep.subr.bf16.mxu1 %v11969_v59  ;;  %v1752_v44 = vmax.f32 %v1438_v24, 0.0  ;;  %1649 = vmatmul.mubr.bf16.gmra.mrb[24].mxu0 %v10788_v45  ;;  %v10758_v45 = vld [vmem:[%s14309_s4 + $0x240] sm:$0xff]  }
 0x27a   :  { %v2366_v61 = vpop.f32.mrb[44].mxu1  ;;  %1656 = vmatprep.mubr.bf16.mxu0 %v10795_v17 }
 0x27b   :  { %v12329_v25 = vadd.f32 %v2366_v61, %v12193_v3  ;;  %v9268_v63 = vpop.f32.mrb[45].mxu1  ;;  %v1852_v19 = vpack.c.bf16 %v1752_v44, %v1751_v41 }
 0x27c   :  { %v2369_v1 = vpop.f32.mrb[46].mxu1  ;;  %9473 = vmatpush3.bf16.msra.mxu1 %v10752_v21  ;;  %v1442_v6 = vpop.f32.mrb[176].mxu0  ;;  %v10759_v63 = vld [vmem:[%s14309_s4 + $0x248] sm:$0xff]  }
 0x27d   :  { %v12335_v5 = vadd.f32 %v2369_v1, %v12201_v0  ;;  %v9269_v54 = vpop.f32.mrb[47].mxu1  ;;  %9474 = vmatprep.subr.bf16.mxu1 %v11969_v59  ;;  %v1443_v37 = vadd.f32 %v12231_v47, %v1442_v6  ;;  %v1444_v29 = vpop.f32.mrb[177].mxu0  ;;  %v3393_v3 = vrot.slane %v1852_v19, 4 }
 0x27e   :  { %v1445_v11 = vpop.f32.mrb[178].mxu0  ;;  %v10763_v54 = vld [vmem:[%s14309_s4 + $0x250] sm:$0xff]  }
 0x27f   :  { %9455 = vmatmul.mubr.bf16.gmra.mrb[152].mxu1 %v12134_v48  ;;  %v1753_v15 = vmax.f32 %v1443_v37, 0.0  ;;  %v1446_v12 = vadd.f32 %v12231_v47, %v1445_v11  ;;  %v1447_v13 = vpop.f32.mrb[179].mxu0  ;;  %v12345_v0 = vsel %vm2000_vm1, %v3391_v2, %v3393_v3 }
 0x280   :  { %9475 = vmatpush3.bf16.msra.mxu1 %v10753_v4  ;;  %9458 = vmatprep.mubr.msk.bf16.mxu1 %vm11081_vm0, %v11969_v59  ;;  %v10768_v13 = vld [vmem:[%s14309_s4 + $0x258] sm:$0xff]  }
 0x281   :  { %9476 = vmatprep.subr.bf16.mxu1 %v11969_v59  ;;  %v1754_v51 = vmax.f32 %v1446_v12, 0.0  ;;  %1657 = vmatmul.mubr.bf16.gmra.mrb[28].mxu0 %v10793_v8 }
 0x282   :  { %v2374_v48 = vpop.f32.mrb[48].mxu1  ;;  %9766 = vmatprep.mubr.msk.bf16.mxu0 %vm11081_vm0, %v11969_v59 }
 0x283   :  { %v12356_v18 = vadd.f32 %v2374_v48, %v12220_v14  ;;  %v9272_v20 = vpop.f32.mrb[49].mxu1  ;;  %v12358_v22 = vpack.c.bf16 %v1754_v51, %v1753_v15 }
 0x284   :  { %v2377_v53 = vpop.f32.mrb[50].mxu1  ;;  %9477 = vmatpush3.bf16.msra.mxu1 %v10754_v16  ;;  %v1450_v27 = vpop.f32.mrb[180].mxu0 }
 0x285   :  { %v12361_v32 = vadd.f32 %v2377_v53, %v12225_v26  ;;  %v9273_v30 = vpop.f32.mrb[51].mxu1  ;;  %9498 = vmatprep.subr.bf16.mxu1 %v11969_v59  ;;  %v1451_v31 = vadd.f32 %v12231_v47, %v1450_v27  ;;  %v1452_v62 = vpop.f32.mrb[181].mxu0  ;;  %v3395_v33 = vrot.slane %v12358_v22, 4  ;;  %v10769_v27 = vld [vmem:[%s14309_s4 + $0x260] sm:$0xff]  }
 0x286   :  { %v1453_v57 = vpop.f32.mrb[182].mxu0  ;;  %v10799_v22 = vld [vmem:[%s14309_s4 + $0x2c0] sm:$0xff]  }
 0x287   :  { %9459 = vmatmul.mubr.bf16.gmra.mrb[156].mxu1 %v3076_v60  ;;  %v1755_v14 = vmax.f32 %v1451_v31, 0.0  ;;  %v1454_v34 = vadd.f32 %v12231_v47, %v1453_v57  ;;  %v1455_v36 = vpop.f32.mrb[183].mxu0  ;;  %v12372_v26 = vsel %vm2000_vm1, %v3393_v3, %v3395_v33  ;;  %v12404_v3 = vld [vmem:[#allocation3 + $0x48] sm:$0xff] }
 0x288   :  { %9478 = vmatprep.mubr.msk.bf16.mxu1 %vm11081_vm0, %v11969_v59 }
 0x289   :  { %v1756_v7 = vmax.f32 %v1454_v34, 0.0 }
 0x28a   :  { %v2382_v50 = vpop.f32.mrb[52].mxu1 }
 0x28b   :  { %v12377_v43 = vadd.f32 %v2382_v50, %v12244_v42  ;;  %v9276_v2 = vpop.f32.mrb[53].mxu1  ;;  %v12379_v58 = vpack.c.bf16 %v1756_v7, %v1755_v14 }
 0x28c   :  { %v2385_v60 = vpop.f32.mrb[54].mxu1  ;;  %v1458_v28 = vpop.f32.mrb[184].mxu0 }
 0x28d   :  { %v12385_v17 = vadd.f32 %v2385_v60, %v12253_v39  ;;  %v9277_v41 = vpop.f32.mrb[55].mxu1  ;;  %v1459_v24 = vadd.f32 %v12231_v47, %v1458_v28  ;;  %v1460_v55 = vpop.f32.mrb[185].mxu0 }
 0x28e   :  { %v1461_v21 = vpop.f32.mrb[186].mxu0  ;;  %v10777_v41 = vld [vmem:[%s14309_s4 + $0x270] sm:$0xff]  }
 0x28f   :  { %9479 = vmatmul.mubr.bf16.vlgmr.msra.gmra.mrb[160].mxu1 %v12144_v9  ;;  %v1757_v42 = vmax.f32 %v1459_v24, 0.0  ;;  %v1462_v44 = vadd.f32 %v12231_v47, %v1461_v21  ;;  %v1463_v61 = vpop.f32.mrb[187].mxu0 }
 0x290   :  { %9499 = vmatpush3.bf16.msra.mxu1 %v10758_v45  ;;  %9482 = vmatprep.mubr.msk.bf16.mxu1 %vm11081_vm0, %v11969_v59 }
 0x291   :  { %9500 = vmatprep.subr.bf16.mxu1 %v11969_v59  ;;  %v1758_v39 = vmax.f32 %v1462_v44, 0.0 }
 0x292   :  { %v2390_v19 = vpop.f32.mrb[56].mxu1 }
 0x293   :  { %v12397_v1 = vadd.f32 %v2390_v19, %v12274_v35  ;;  %v9280_v9 = vpop.f32.mrb[57].mxu1  ;;  %v12399_v4 = vpack.c.bf16 %v1758_v39, %v1757_v42 }
 0x294   :  { %v2393_v6 = vpop.f32.mrb[58].mxu1  ;;  %9501 = vmatpush3.bf16.msra.mxu1 %v10759_v63  ;;  %v1466_v37 = vpop.f32.mrb[188].mxu0 }
 0x295   :  { %v9281_v29 = vpop.f32.mrb[59].mxu1  ;;  %9502 = vmatprep.subr.bf16.mxu1 %v12404_v3  ;;  %v1467_v59 = vadd.f32 %v12231_v47, %v1466_v37  ;;  %v1468_v8 = vpop.f32.mrb[189].mxu0  ;;  %v10816_v37 = vld [vmem:[%s14311_s6 + $0x58] sm:$0xff]  }
 0x296   :  { %v1469_v35 = vpop.f32.mrb[190].mxu0  ;;  %9757 = vmatpush3.bf16.msra.mxu0 %v10816_v37 }
 0x297   :  { %9483 = vmatmul.mubr.bf16.gmra.mrb[164].mxu1 %v12168_v38  ;;  %v1759_v11 = vmax.f32 %v1467_v59, 0.0  ;;  %v1470_v15 = vadd.f32 %v12231_v47, %v1469_v35  ;;  %v1471_v12 = vpop.f32.mrb[191].mxu0  ;;  %9758 = vmatprep.subr.bf16.mxu0 %v12404_v3 }
 0x298   :  { %9503 = vmatpush3.bf16.msra.mxu1 %v10763_v54  ;;  %9486 = vmatprep.mubr.msk.bf16.mxu1 %vm11081_vm0, %v12404_v3 }
 0x299   :  { %9504 = vmatprep.subr.bf16.mxu1 %v12404_v3  ;;  %v1760_v16 = vmax.f32 %v1470_v15, 0.0  ;;  %v3216_v15 = vld [vmem:[#allocation2 + $0x140] sm:$0xf] }
 0x29a   :  { %v2527_v51 = vpop.f32.mrb[60].mxu1 }
 0x29b   :  { %v12417_v48 = vadd.f32 %v2527_v51, %v12298_v56  ;;  %v9300_v38 = vpop.f32.mrb[61].mxu1  ;;  %v12419_v20 = vpack.c.bf16 %v1760_v16, %v1759_v11 }
 0x29c   :  { %v2530_v53 = vpop.f32.mrb[62].mxu1  ;;  %9505 = vmatpush3.bf16.msra.mxu1 %v10768_v13  ;;  %v1474_v30 = vpop.f32.mrb[192].mxu0  ;;  %v3362_v13 = vld [vmem:[#allocation2 + $0x140] sm:$0xf0] }
 0x29d   :  { %v12425_v31 = vadd.f32 %v2530_v53, %v12304_v40  ;;  %v9301_v62 = vpop.f32.mrb[63].mxu1  ;;  %9506 = vmatprep.subr.bf16.mxu1 %v12404_v3  ;;  %v1475_v57 = vadd.f32 %v12231_v47, %v1474_v30  ;;  %v1476_v56 = vpop.f32.mrb[193].mxu0  ;;  %v10773_v40 = vld [vmem:[%s14309_s4 + $0x268] sm:$0xff]  }
 0x29e   :  { %v1477_v14 = vpop.f32.mrb[194].mxu0 }
 0x29f   :  { %9487 = vmatmul.mubr.bf16.gmra.mrb[168].mxu1 %v12195_v23  ;;  %v1761_v34 = vmax.f32 %v1475_v57, 0.0  ;;  %v1478_v36 = vadd.f32 %v12231_v47, %v1477_v14  ;;  %v1479_v7 = vpop.f32.mrb[195].mxu0  ;;  %v10782_v14 = vld [vmem:[%s14309_s4 + $0x280] sm:$0xff]  }
 0x2a0   :  { %9507 = vmatpush3.bf16.msra.mxu1 %v10769_v27  ;;  %9490 = vmatprep.mubr.msk.bf16.mxu1 %vm11081_vm0, %v12404_v3  ;;  %v3388_v27 = vrot.slane %v3362_v13, 4  ;;  %v10792_v13 = vld [vmem:[%s14309_s4 + $0x2a0] sm:$0xff]  }
 0x2a1   :  { %9508 = vmatprep.subr.bf16.mxu1 %v12404_v3  ;;  %v1762_v50 = vmax.f32 %v1478_v36, 0.0 }
 0x2a2   :  { %v2535_v2 = vpop.f32.mrb[64].mxu1 }
 0x2a3   :  { %v12438_v60 = vadd.f32 %v2535_v2, %v12329_v25  ;;  %v9304_v23 = vpop.f32.mrb[65].mxu1  ;;  %v12440_v45 = vpack.c.bf16 %v1762_v50, %v1761_v34 }
 0x2a4   :  { %v2538_v28 = vpop.f32.mrb[66].mxu1  ;;  %9509 = vmatpush3.bf16.msra.mxu1 %v10773_v40  ;;  %v1482_v24 = vpop.f32.mrb[196].mxu0 }
 0x2a5   :  { %v12446_v55 = vadd.f32 %v2538_v28, %v12335_v5  ;;  %v9305_v21 = vpop.f32.mrb[67].mxu1  ;;  %9510 = vmatprep.subr.bf16.mxu1 %v12404_v3  ;;  %v1483_v42 = vadd.f32 %v12231_v47, %v1482_v24  ;;  %v1484_v25 = vpop.f32.mrb[197].mxu0  ;;  %v10778_v5 = vld [vmem:[%s14309_s4 + $0x278] sm:$0xff]  }
 0x2a6   :  { %v1485_v44 = vpop.f32.mrb[198].mxu0 }
 0x2a7   :  { %9491 = vmatmul.mubr.bf16.gmra.mrb[172].mxu1 %v12222_v49  ;;  %v1763_v61 = vmax.f32 %v1483_v42, 0.0  ;;  %v1486_v63 = vadd.f32 %v12231_v47, %v1485_v44  ;;  %v1487_v39 = vpop.f32.mrb[199].mxu0  ;;  %v10787_v44 = vld [vmem:[%s14309_s4 + $0x290] sm:$0xff]  }
 0x2a8   :  { %9511 = vmatpush3.bf16.msra.mxu1 %v10777_v41  ;;  %9494 = vmatprep.mubr.msk.bf16.mxu1 %vm11081_vm0, %v12404_v3 }
 0x2a9   :  { %9512 = vmatprep.subr.bf16.mxu1 %v12404_v3  ;;  %v1764_v19 = vmax.f32 %v1486_v63, 0.0 }
 0x2aa   :  { %v2543_v9 = vpop.f32.mrb[68].mxu1 }
 0x2ab   :  { %v12459_v6 = vadd.f32 %v2543_v9, %v12356_v18  ;;  %v9308_v49 = vpop.f32.mrb[69].mxu1  ;;  %v1858_v54 = vpack.c.bf16 %v1764_v19, %v1763_v61 }
 0x2ac   :  { %v2546_v29 = vpop.f32.mrb[70].mxu1  ;;  %9513 = vmatpush3.bf16.msra.mxu1 %v10778_v5  ;;  %v1490_v59 = vpop.f32.mrb[200].mxu0 }
 0x2ad   :  { %v12465_v8 = vadd.f32 %v2546_v29, %v12361_v32  ;;  %v9309_v35 = vpop.f32.mrb[71].mxu1  ;;  %9534 = vmatprep.subr.bf16.mxu1 %v12404_v3  ;;  %1930 = vst [vmem:[#allocation2 + $0x188] sm:$0xff] %v1858_v54  ;;  %v1491_v11 = vadd.f32 %v12231_v47, %v1490_v59  ;;  %v1492_v18 = vpop.f32.mrb[201].mxu0  ;;  %v10791_v59 = vld [vmem:[%s14309_s4 + $0x298] sm:$0xff]  }
 0x2ae   :  { %v1493_v12 = vpop.f32.mrb[202].mxu0 }
 0x2af   :  { %9495 = vmatmul.mubr.bf16.gmra.mrb[176].mxu1 %v3216_v15  ;;  %v1765_v16 = vmax.f32 %v1491_v11, 0.0  ;;  %v1494_v51 = vadd.f32 %v12231_v47, %v1493_v12  ;;  %v1495_v38 = vpop.f32.mrb[203].mxu0 }
 0x2b0   :  { %9514 = vmatprep.mubr.msk.bf16.mxu1 %vm11081_vm0, %v12404_v3 }
 0x2b1   :  { %v1766_v32 = vmax.f32 %v1494_v51, 0.0 }
 0x2b2   :  { %v2551_v53 = vpop.f32.mrb[72].mxu1 }
 0x2b3   :  { %v12474_v30 = vadd.f32 %v2551_v53, %v12377_v43  ;;  %v9312_v62 = vpop.f32.mrb[73].mxu1  ;;  %v12476_v57 = vpack.c.bf16 %v1766_v32, %v1765_v16  ;;  %v3390_v43 = vsel %vm2000_vm1, %v3388_v27, %v3389_v52 }
 0x2b4   :  { %v2554_v56 = vpop.f32.mrb[74].mxu1  ;;  %v1498_v34 = vpop.f32.mrb[204].mxu0 }
 0x2b5   :  { %v12482_v36 = vadd.f32 %v2554_v56, %v12385_v17  ;;  %v9313_v7 = vpop.f32.mrb[75].mxu1  ;;  %v1499_v40 = vadd.f32 %v12231_v47, %v1498_v34  ;;  %v1500_v50 = vpop.f32.mrb[205].mxu0  ;;  %v10783_v17 = vld [vmem:[%s14309_s4 + $0x288] sm:$0xff]   ;;  %v3708_v19 = vrot.slane %v12476_v57, 4 }
 0x2b6   :  { %v1501_v2 = vpop.f32.mrb[206].mxu0 }
 0x2b7   :  { %9515 = vmatmul.mubr.bf16.vlgmr.msra.gmra.mrb[180].mxu1 %v3390_v43  ;;  %v1767_v23 = vmax.f32 %v1499_v40, 0.0  ;;  %v1502_v28 = vadd.f32 %v12231_v47, %v1501_v2  ;;  %v1503_v41 = vpop.f32.mrb[207].mxu0 }
 0x2b8   :  { %9535 = vmatpush3.bf16.msra.mxu1 %v10782_v14  ;;  %9518 = vmatprep.mubr.msk.bf16.mxu1 %vm11081_vm0, %v12404_v3 }
 0x2b9   :  { %9536 = vmatprep.subr.bf16.mxu1 %v12404_v3  ;;  %v1768_v24 = vmax.f32 %v1502_v28, 0.0 }
 0x2ba   :  { %v2559_v10 = vpop.f32.mrb[76].mxu1 }
 0x2bb   :  { %v12496_v52 = vadd.f32 %v2559_v10, %v12397_v1  ;;  %v9316_v21 = vpop.f32.mrb[77].mxu1  ;;  %v1860_v42 = vpack.c.bf16 %v1768_v24, %v1767_v23  ;;  %v10797_v23 = vld [vmem:[%s14309_s4 + $0x2b0] sm:$0xff]  }
 0x2bc   :  { %v2562_v25 = vpop.f32.mrb[78].mxu1  ;;  %9537 = vmatpush3.bf16.msra.mxu1 %v10783_v17  ;;  %v1506_v61 = vpop.f32.mrb[208].mxu0 }
 0x2bd   :  { %v9317_v63 = vpop.f32.mrb[79].mxu1  ;;  %9538 = vmatprep.subr.bf16.mxu1 %v12404_v3  ;;  %v1507_v39 = vadd.f32 %v12231_v47, %v1506_v61  ;;  %v1508_v5 = vpop.f32.mrb[209].mxu0  ;;  %v3710_v9 = vrot.slane %v1860_v42, 4  ;;  %v10798_v61 = vld [vmem:[%s14309_s4 + $0x2b8] sm:$0xff]  }
 0x2be   :  { %v1509_v1 = vpop.f32.mrb[210].mxu0 }
 0x2bf   :  { %9519 = vmatmul.mubr.bf16.gmra.mrb[184].mxu1 %v12320_v46  ;;  %v1769_v49 = vmax.f32 %v1507_v39, 0.0  ;;  %v1510_v54 = vadd.f32 %v12231_v47, %v1509_v1  ;;  %v1511_v37 = vpop.f32.mrb[211].mxu0  ;;  %v12509_v29 = vsel %vm2000_vm1, %v3708_v19, %v3710_v9 }
 0x2c0   :  { %9539 = vmatpush3.bf16.msra.mxu1 %v10787_v44  ;;  %9522 = vmatprep.mubr.msk.bf16.mxu1 %vm11081_vm0, %v12404_v3 }
 0x2c1   :  { %9540 = vmatprep.subr.bf16.mxu1 %v12404_v3  ;;  %v1770_v46 = vmax.f32 %v1510_v54, 0.0 }
 0x2c2   :  { %v2677_v35 = vpop.f32.mrb[80].mxu1 }
 0x2c3   :  { %v12518_v11 = vadd.f32 %v2677_v35, %v12417_v48  ;;  %v9336_v18 = vpop.f32.mrb[81].mxu1  ;;  %v1861_v15 = vpack.c.bf16 %v1770_v46, %v1769_v49 }
 0x2c4   :  { %v2680_v12 = vpop.f32.mrb[82].mxu1  ;;  %9541 = vmatpush3.bf16.msra.mxu1 %v10791_v59  ;;  %v1514_v16 = vpop.f32.mrb[212].mxu0 }
 0x2c5   :  { %v12524_v51 = vadd.f32 %v2680_v12, %v12425_v31  ;;  %v9337_v38 = vpop.f32.mrb[83].mxu1  ;;  %9542 = vmatprep.subr.bf16.mxu1 %v12404_v3  ;;  %v1515_v32 = vadd.f32 %v12231_v47, %v1514_v16  ;;  %v1516_v53 = vpop.f32.mrb[213].mxu0  ;;  %v3712_v48 = vrot.slane %v1861_v15, 4  ;;  %v10796_v31 = vld [vmem:[%s14309_s4 + $0x2a8] sm:$0xff]  }
 0x2c6   :  { %v1517_v27 = vpop.f32.mrb[214].mxu0 }
 0x2c7   :  { %9523 = vmatmul.mubr.bf16.gmra.mrb[188].mxu1 %v12345_v0  ;;  %v1771_v62 = vmax.f32 %v1515_v32, 0.0  ;;  %v1518_v56 = vadd.f32 %v12231_v47, %v1517_v27  ;;  %v1519_v14 = vpop.f32.mrb[215].mxu0  ;;  %v12531_v34 = vsel %vm2000_vm1, %v3710_v9, %v3712_v48 }
 0x2c8   :  { %9543 = vmatpush3.bf16.msra.mxu1 %v10792_v13  ;;  %9526 = vmatprep.mubr.msk.bf16.mxu1 %vm11081_vm0, %v12404_v3 }
 0x2c9   :  { %9544 = vmatprep.subr.bf16.mxu1 %v12404_v3  ;;  %v1772_v7 = vmax.f32 %v1518_v56, 0.0 }
 0x2ca   :  { %v2685_v40 = vpop.f32.mrb[84].mxu1 }
 0x2cb   :  { %v12540_v0 = vadd.f32 %v2685_v40, %v12438_v60  ;;  %v9340_v50 = vpop.f32.mrb[85].mxu1  ;;  %v12542_v43 = vpack.c.bf16 %v1772_v7, %v1771_v62  ;;  %v10801_v7 = vld [vmem:[%s14309_s4 + $0x2c8] sm:$0xff]  }
 0x2cc   :  { %v2688_v2 = vpop.f32.mrb[86].mxu1  ;;  %9545 = vmatpush3.bf16.msra.mxu1 %v10796_v31  ;;  %v1522_v28 = vpop.f32.mrb[216].mxu0 }
 0x2cd   :  { %v12548_v41 = vadd.f32 %v2688_v2, %v12446_v55  ;;  %v9341_v17 = vpop.f32.mrb[87].mxu1  ;;  %9546 = vmatprep.subr.bf16.mxu1 %v12404_v3  ;;  %v1523_v24 = vadd.f32 %v12231_v47, %v1522_v28  ;;  %v1524_v60 = vpop.f32.mrb[217].mxu0  ;;  %v3714_v10 = vrot.slane %v12542_v43, 4  ;;  %v10802_v28 = vld [vmem:[%s14309_s4 + $0x2d0] sm:$0xff]   ;;  %v10817_v43 = vld [vmem:[%s14309_s4 + $0x340] sm:$0xff]  }
 0x2ce   :  { %v1525_v21 = vpop.f32.mrb[218].mxu0 }
 0x2cf   :  { %9527 = vmatmul.mubr.bf16.gmra.mrb[192].mxu1 %v12372_v26  ;;  %v1773_v42 = vmax.f32 %v1523_v24, 0.0  ;;  %v1526_v25 = vadd.f32 %v12231_v47, %v1525_v21  ;;  %v1527_v44 = vpop.f32.mrb[219].mxu0  ;;  %v12558_v55 = vsel %vm2000_vm1, %v3712_v48, %v3714_v10 }
 0x2d0   :  { %9547 = vmatpush3.bf16.msra.mxu1 %v10797_v23  ;;  %9530 = vmatprep.mubr.msk.bf16.mxu1 %vm11081_vm0, %v12404_v3 }
 0x2d1   :  { %9548 = vmatprep.subr.bf16.mxu1 %v12404_v3  ;;  %v1774_v26 = vmax.f32 %v1526_v25, 0.0 }
 0x2d2   :  { %v2693_v63 = vpop.f32.mrb[88].mxu1 }
 0x2d3   :  { %v12567_v39 = vadd.f32 %v2693_v63, %v12459_v6  ;;  %v9344_v5 = vpop.f32.mrb[89].mxu1  ;;  %v12569_v9 = vpack.c.bf16 %v1774_v26, %v1773_v42 }
 0x2d4   :  { %v2696_v1 = vpop.f32.mrb[90].mxu1  ;;  %9549 = vmatpush3.bf16.msra.mxu1 %v10798_v61  ;;  %v1530_v49 = vpop.f32.mrb[220].mxu0  ;;  %v10803_v61 = vld [vmem:[%s14309_s4 + $0x2d8] sm:$0xff]  }
 0x2d5   :  { %v12572_v54 = vadd.f32 %v2696_v1, %v12465_v8  ;;  %v9345_v37 = vpop.f32.mrb[91].mxu1  ;;  %9570 = vmatprep.subr.bf16.mxu1 %v12404_v3  ;;  %v1531_v59 = vadd.f32 %v12231_v47, %v1530_v49  ;;  %v1532_v46 = vpop.f32.mrb[221].mxu0 }
 0x2d6   :  { %v1533_v35 = vpop.f32.mrb[222].mxu0  ;;  %v10804_v37 = vld [vmem:[%s14309_s4 + $0x2e0] sm:$0xff]  }
 0x2d7   :  { %9531 = vmatmul.mubr.bf16.gmra.mrb[196].mxu1 %v3395_v33  ;;  %v1775_v6 = vmax.f32 %v1531_v59, 0.0  ;;  %v1534_v18 = vadd.f32 %v12231_v47, %v1533_v35  ;;  %v1535_v15 = vpop.f32.mrb[223].mxu0 }
 0x2d8   :  { %9550 = vmatprep.mubr.msk.bf16.mxu1 %vm11081_vm0, %v12404_v3 }
 0x2d9   :  { %v1776_v12 = vmax.f32 %v1534_v18, 0.0 }
 0x2da   :  { %v2701_v8 = vpop.f32.mrb[92].mxu1 }
 0x2db   :  { %v12582_v13 = vadd.f32 %v2701_v8, %v12474_v30  ;;  %v9348_v16 = vpop.f32.mrb[93].mxu1  ;;  %v12584_v38 = vpack.c.bf16 %v1776_v12, %v1775_v6 }
 0x2dc   :  { %v2704_v32 = vpop.f32.mrb[94].mxu1  ;;  %v1538_v33 = vpop.f32.mrb[224].mxu0 }
 0x2dd   :  { %v12590_v53 = vadd.f32 %v2704_v32, %v12482_v36  ;;  %v9349_v48 = vpop.f32.mrb[95].mxu1  ;;  %v1539_v27 = vadd.f32 %v12231_v47, %v1538_v33  ;;  %v1540_v62 = vpop.f32.mrb[225].mxu0 }
 0x2de   :  { %v1541_v56 = vpop.f32.mrb[226].mxu0  ;;  %v10831_v48 = vld [vmem:[%s14311_s6 + $0x60] sm:$0xff]   ;;  %v10806_v62 = vld [vmem:[%s14309_s4 + $0x2f0] sm:$0xff]  }
 0x2df   :  { %9551 = vmatmul.mubr.bf16.vlgmr.msra.gmra.mrb[200].mxu1 %v12379_v58  ;;  %v1777_v30 = vmax.f32 %v1539_v27, 0.0  ;;  %v1542_v14 = vadd.f32 %v12231_v47, %v1541_v56  ;;  %v1543_v31 = vpop.f32.mrb[227].mxu0  ;;  %9759 = vmatpush3.bf16.msra.mxu0 %v10831_v48 }
 0x2e0   :  { %9571 = vmatpush3.bf16.msra.mxu1 %v10799_v22  ;;  %9554 = vmatprep.mubr.msk.bf16.mxu1 %vm11081_vm0, %v12404_v3 }
 0x2e1   :  { %9572 = vmatprep.subr.bf16.mxu1 %v12404_v3  ;;  %v1778_v36 = vmax.f32 %v1542_v14, 0.0  ;;  %9760 = vmatprep.subr.bf16.mxu0 %v12404_v3 }
 0x2e2   :  { %v2709_v40 = vpop.f32.mrb[96].mxu1 }
 0x2e3   :  { %v12602_v50 = vadd.f32 %v2709_v40, %v12496_v52  ;;  %v9352_v58 = vpop.f32.mrb[97].mxu1  ;;  %v12604_v2 = vpack.c.bf16 %v1778_v36, %v1777_v30 }
 0x2e4   :  { %v2712_v23 = vpop.f32.mrb[98].mxu1  ;;  %9573 = vmatpush3.bf16.msra.mxu1 %v10801_v7  ;;  %v1546_v17 = vpop.f32.mrb[228].mxu0 }
 0x2e5   :  { %v9353_v24 = vpop.f32.mrb[99].mxu1  ;;  %9574 = vmatprep.subr.bf16.mxu1 %v12404_v3  ;;  %v1547_v60 = vadd.f32 %v12231_v47, %v1546_v17  ;;  %v1548_v21 = vpop.f32.mrb[229].mxu0 }
 0x2e6   :  { %v1549_v42 = vpop.f32.mrb[230].mxu0 }
 0x2e7   :  { %9555 = vmatmul.mubr.bf16.gmra.mrb[204].mxu1 %v12399_v4  ;;  %v1779_v52 = vmax.f32 %v1547_v60, 0.0  ;;  %v1550_v25 = vadd.f32 %v12231_v47, %v1549_v42  ;;  %v1551_v44 = vpop.f32.mrb[231].mxu0 }
 0x2e8   :  { %9575 = vmatpush3.bf16.msra.mxu1 %v10802_v28  ;;  %9558 = vmatprep.mubr.msk.bf16.mxu1 %vm11081_vm0, %v12404_v3 }
 0x2e9   :  { %9576 = vmatprep.subr.bf16.mxu1 %v12404_v3  ;;  %v1780_v26 = vmax.f32 %v1550_v25, 0.0 }
 0x2ea   :  { %v2846_v63 = vpop.f32.mrb[100].mxu1 }
 0x2eb   :  { %v12620_v5 = vadd.f32 %v2846_v63, %v12518_v11  ;;  %v9372_v4 = vpop.f32.mrb[101].mxu1  ;;  %v12622_v1 = vpack.c.bf16 %v1780_v26, %v1779_v52 }
 0x2ec   :  { %v2849_v49 = vpop.f32.mrb[102].mxu1  ;;  %9577 = vmatpush3.bf16.msra.mxu1 %v10803_v61  ;;  %v1554_v59 = vpop.f32.mrb[232].mxu0  ;;  %v3535_v61 = vld [vmem:[#allocation2 + $0x188] sm:$0xf] }
 0x2ed   :  { %v12628_v46 = vadd.f32 %v2849_v49, %v12524_v51  ;;  %v9373_v35 = vpop.f32.mrb[103].mxu1  ;;  %9578 = vmatprep.subr.bf16.mxu1 %v12404_v3  ;;  %v1555_v6 = vadd.f32 %v12231_v47, %v1554_v59  ;;  %v1556_v11 = vpop.f32.mrb[233].mxu0  ;;  %v10805_v51 = vld [vmem:[%s14309_s4 + $0x2e8] sm:$0xff]  }
 0x2ee   :  { %v1557_v18 = vpop.f32.mrb[234].mxu0 }
 0x2ef   :  { %9559 = vmatmul.mubr.bf16.gmra.mrb[208].mxu1 %v12419_v20  ;;  %v1781_v15 = vmax.f32 %v1555_v6, 0.0  ;;  %v1558_v12 = vadd.f32 %v12231_v47, %v1557_v18  ;;  %v1559_v8 = vpop.f32.mrb[235].mxu0 }
 0x2f0   :  { %9579 = vmatpush3.bf16.msra.mxu1 %v10804_v37  ;;  %9562 = vmatprep.mubr.msk.bf16.mxu1 %vm11081_vm0, %v12404_v3 }
 0x2f1   :  { %9580 = vmatprep.subr.bf16.mxu1 %v12404_v3  ;;  %v1782_v16 = vmax.f32 %v1558_v12, 0.0 }
 0x2f2   :  { %v2854_v32 = vpop.f32.mrb[104].mxu1 }
 0x2f3   :  { %v12641_v22 = vadd.f32 %v2854_v32, %v12540_v0  ;;  %v9376_v20 = vpop.f32.mrb[105].mxu1  ;;  %v1867_v33 = vpack.c.bf16 %v1782_v16, %v1781_v15  ;;  %v10808_v15 = vld [vmem:[%s14309_s4 + $0x300] sm:$0xff]  }
 0x2f4   :  { %v2857_v27 = vpop.f32.mrb[106].mxu1  ;;  %9581 = vmatpush3.bf16.msra.mxu1 %v10805_v51  ;;  %v1562_v56 = vpop.f32.mrb[236].mxu0  ;;  %v12688_v51 = vld [vmem:[%s14310_s3] ss:$0 sm:$0xff] }
 0x2f5   :  { %v12650_v30 = vadd.f32 %v2857_v27, %v12548_v41  ;;  %v9377_v14 = vpop.f32.mrb[107].mxu1  ;;  %9582 = vmatprep.subr.bf16.mxu1 %v12404_v3  ;;  %1939 = vst [vmem:[#allocation2 + $0x1d0] sm:$0xff] %v1867_v33  ;;  %v1563_v0 = vadd.f32 %v12231_v47, %v1562_v56  ;;  %v1564_v31 = vpop.f32.mrb[237].mxu0  ;;  %v10807_v41 = vld [vmem:[%s14309_s4 + $0x2f8] sm:$0xff]  }
 0x2f6   :  { %v1565_v7 = vpop.f32.mrb[238].mxu0  ;;  %v10809_v14 = vld [vmem:[%s14309_s4 + $0x308] sm:$0xff]  }
 0x2f7   :  { %9563 = vmatmul.mubr.bf16.gmra.mrb[212].mxu1 %v12440_v45  ;;  %v1783_v36 = vmax.f32 %v1563_v0, 0.0  ;;  %v1566_v40 = vadd.f32 %v12231_v47, %v1565_v7  ;;  %v1567_v58 = vpop.f32.mrb[239].mxu0 }
 0x2f8   :  { %9583 = vmatpush3.bf16.msra.mxu1 %v10806_v62  ;;  %9566 = vmatprep.mubr.msk.bf16.mxu1 %vm11081_vm0, %v12404_v3 }
 0x2f9   :  { %9584 = vmatprep.subr.bf16.mxu1 %v12404_v3  ;;  %v1784_v23 = vmax.f32 %v1566_v40, 0.0  ;;  %v10810_v40 = vld [vmem:[%s14309_s4 + $0x310] sm:$0xff]  }
 0x2fa   :  { %v2862_v28 = vpop.f32.mrb[108].mxu1 }
 0x2fb   :  { %v12664_v17 = vadd.f32 %v2862_v28, %v12567_v39  ;;  %v9380_v45 = vpop.f32.mrb[109].mxu1  ;;  %v12666_v24 = vpack.c.bf16 %v1784_v23, %v1783_v36  ;;  %v3681_v39 = vld [vmem:[#allocation2 + $0x188] sm:$0xf0] }
 0x2fc   :  { %v2865_v60 = vpop.f32.mrb[110].mxu1  ;;  %9585 = vmatpush3.bf16.msra.mxu1 %v10807_v41  ;;  %v1570_v21 = vpop.f32.mrb[240].mxu0  ;;  %v3707_v59 = vrot.slane %v3681_v39, 4 }
 0x2fd   :  { %v12669_v42 = vadd.f32 %v2865_v60, %v12572_v54  ;;  %v9381_v52 = vpop.f32.mrb[111].mxu1  ;;  %9606 = vmatprep.subr.bf16.mxu1 %v12404_v3  ;;  %v1571_v25 = vadd.f32 %v12231_v47, %v1570_v21  ;;  %v1572_v44 = vpop.f32.mrb[241].mxu0  ;;  %v4027_v32 = vrot.slane %v12666_v24, 4 }
 0x2fe   :  { %v1573_v26 = vpop.f32.mrb[242].mxu0  ;;  %v3709_v33 = vsel %vm2000_vm1, %v3707_v59, %v3708_v19  ;;  %v10811_v44 = vld [vmem:[%s14309_s4 + $0x318] sm:$0xff]  }
 0x2ff   :  { %9567 = vmatmul.mubr.bf16.gmra.mrb[216].mxu1 %v3535_v61  ;;  %v1785_v63 = vmax.f32 %v1571_v25, 0.0  ;;  %v1574_v4 = vadd.f32 %v12231_v47, %v1573_v26  ;;  %v1575_v49 = vpop.f32.mrb[243].mxu0 }
 0x300   :  { %9586 = vmatprep.mubr.msk.bf16.mxu1 %vm11081_vm0, %v12404_v3  ;;  %v10812_v49 = vld [vmem:[%s14309_s4 + $0x320] sm:$0xff]  }
 0x301   :  { %v1786_v37 = vmax.f32 %v1574_v4, 0.0 }
 0x302   :  { %v2870_v54 = vpop.f32.mrb[112].mxu1 }
 0x303   :  { %v12677_v35 = vadd.f32 %v2870_v54, %v12582_v13  ;;  %v9384_v6 = vpop.f32.mrb[113].mxu1  ;;  %v1869_v11 = vpack.c.bf16 %v1786_v37, %v1785_v63 }
 0x304   :  { %v2873_v18 = vpop.f32.mrb[114].mxu1  ;;  %v1578_v12 = vpop.f32.mrb[244].mxu0 }
 0x305   :  { %v12683_v47 = vadd.f32 %v2873_v18, %v12590_v53  ;;  %v9385_v8 = vpop.f32.mrb[115].mxu1  ;;  %v1579_v13 = vadd.f32 %v12688_v51, %v1578_v12  ;;  %v1580_v16 = vpop.f32.mrb[245].mxu0  ;;  %v4029_v20 = vrot.slane %v1869_v11, 4 }
 0x306   :  { %v1581_v48 = vpop.f32.mrb[246].mxu0 }
 0x307   :  { %9587 = vmatmul.mubr.bf16.vlgmr.msra.gmra.mrb[220].mxu1 %v3709_v33  ;;  %v1787_v53 = vmax.f32 %v1579_v13, 0.0  ;;  %v1582_v27 = vadd.f32 %v12688_v51, %v1581_v48  ;;  %v1583_v62 = vpop.f32.mrb[247].mxu0  ;;  %v12699_v56 = vsel %vm2000_vm1, %v4027_v32, %v4029_v20  ;;  %v10813_v13 = vld [vmem:[%s14309_s4 + $0x328] sm:$0xff]  }
 0x308   :  { %9607 = vmatpush3.bf16.msra.mxu1 %v10808_v15  ;;  %9590 = vmatprep.mubr.msk.bf16.mxu1 %vm11081_vm0, %v12404_v3 }
 0x309   :  { %9608 = vmatprep.subr.bf16.mxu1 %v12404_v3  ;;  %v1788_v57 = vmax.f32 %v1582_v27, 0.0  ;;  %v10814_v27 = vld [vmem:[%s14309_s4 + $0x330] sm:$0xff]  }
 0x30a   :  { %v2878_v19 = vpop.f32.mrb[116].mxu1 }
 0x30b   :  { %v12708_v0 = vadd.f32 %v2878_v19, %v12602_v50  ;;  %v9388_v31 = vpop.f32.mrb[117].mxu1  ;;  %v1870_v7 = vpack.c.bf16 %v1788_v57, %v1787_v53 }
 0x30c   :  { %v2881_v36 = vpop.f32.mrb[118].mxu1  ;;  %9609 = vmatpush3.bf16.msra.mxu1 %v10809_v14  ;;  %v1586_v58 = vpop.f32.mrb[248].mxu0 }
 0x30d   :  { %v9389_v41 = vpop.f32.mrb[119].mxu1  ;;  %9610 = vmatprep.subr.bf16.mxu1 %v12404_v3  ;;  %v1587_v23 = vadd.f32 %v12688_v51, %v1586_v58  ;;  %v1588_v28 = vpop.f32.mrb[249].mxu0  ;;  %v4031_v45 = vrot.slane %v1870_v7, 4 }
 0x30e   :  { %v1589_v60 = vpop.f32.mrb[250].mxu0 }
 0x30f   :  { %9591 = vmatmul.mubr.bf16.gmra.mrb[224].mxu1 %v12509_v29  ;;  %v1789_v50 = vmax.f32 %v1587_v23, 0.0  ;;  %v1590_v21 = vadd.f32 %v12688_v51, %v1589_v60  ;;  %v1591_v52 = vpop.f32.mrb[251].mxu0  ;;  %v12718_v25 = vsel %vm2000_vm1, %v4029_v20, %v4031_v45 }
 0x310   :  { %9611 = vmatpush3.bf16.msra.mxu1 %v10810_v40  ;;  %9594 = vmatprep.mubr.msk.bf16.mxu1 %vm11081_vm0, %v12404_v3 }
 0x311   :  { %9612 = vmatprep.subr.bf16.mxu1 %v12404_v3  ;;  %v1790_v61 = vmax.f32 %v1590_v21, 0.0 }
 0x312   :  { %v2996_v26 = vpop.f32.mrb[120].mxu1 }
 0x313   :  { %v12727_v29 = vadd.f32 %v2996_v26, %v12620_v5  ;;  %v9408_v39 = vpop.f32.mrb[121].mxu1  ;;  %v12729_v63 = vpack.c.bf16 %v1790_v61, %v1789_v50 }
 0x314   :  { %v2999_v4 = vpop.f32.mrb[122].mxu1  ;;  %9613 = vmatpush3.bf16.msra.mxu1 %v10811_v44  ;;  %v1594_v37 = vpop.f32.mrb[252].mxu0 }
 0x315   :  { %v12735_v54 = vadd.f32 %v2999_v4, %v12628_v46  ;;  %v9409_v59 = vpop.f32.mrb[123].mxu1  ;;  %9614 = vmatprep.subr.bf16.mxu1 %v12404_v3  ;;  %v1595_v6 = vadd.f32 %v12688_v51, %v1594_v37  ;;  %v1596_v5 = vpop.f32.mrb[253].mxu0  ;;  %v4033_v11 = vrot.slane %v12729_v63, 4  ;;  %v10835_v63 = vld [vmem:[%s14309_s4 + $0x3c8] sm:$0xff]  }
 0x316   :  { %v1597_v18 = vpop.f32.mrb[254].mxu0 }
 0x317   :  { %9595 = vmatmul.mubr.bf16.gmra.mrb[228].mxu1 %v12531_v34  ;;  %v1791_v15 = vmax.f32 %v1595_v6, 0.0  ;;  %v1598_v12 = vadd.f32 %v12688_v51, %v1597_v18  ;;  %v1599_v8 = vpop.f32.mrb[255].mxu0  ;;  %v12745_v46 = vsel %vm2000_vm1, %v4031_v45, %v4033_v11 }
 0x318   :  { %9615 = vmatpush3.bf16.msra.mxu1 %v10812_v49  ;;  %9598 = vmatprep.mubr.msk.bf16.mxu1 %vm11081_vm0, %v12404_v3 }
 0x319   :  { %9616 = vmatprep.subr.bf16.mxu1 %v12404_v3  ;;  %v1792_v34 = vmax.f32 %v1598_v12, 0.0 }
 0x31a   :  { %v3004_v16 = vpop.f32.mrb[124].mxu1 }
 0x31b   :  { %v12754_v20 = vadd.f32 %v3004_v16, %v12641_v22  ;;  %v9412_v33 = vpop.f32.mrb[125].mxu1  ;;  %v12756_v48 = vpack.c.bf16 %v1792_v34, %v1791_v15  ;;  %v10818_v16 = vld [vmem:[%s14309_s4 + $0x348] sm:$0xff]  }
 0x31c   :  { %v3007_v53 = vpop.f32.mrb[126].mxu1  ;;  %9617 = vmatpush3.bf16.msra.mxu1 %v10813_v13  ;;  %v1602_v62 = vpop.f32.mrb[0].mxu0 }
 0x31d   :  { %v12762_v14 = vadd.f32 %v3007_v53, %v12650_v30  ;;  %v9413_v57 = vpop.f32.mrb[127].mxu1  ;;  %9618 = vmatprep.subr.bf16.mxu1 %v12404_v3  ;;  %v1603_v19 = vadd.f32 %v12688_v51, %v1602_v62  ;;  %v1604_v22 = vpop.f32.mrb[1].mxu0  ;;  %v10815_v30 = vld [vmem:[%s14309_s4 + $0x338] sm:$0xff]  }
 0x31e   :  { %v1605_v31 = vpop.f32.mrb[2].mxu0  ;;  %v10819_v57 = vld [vmem:[%s14309_s4 + $0x350] sm:$0xff]  }
 0x31f   :  { %9599 = vmatmul.mubr.bf16.gmra.mrb[232].mxu1 %v12558_v55  ;;  %v1793_v7 = vmax.f32 %v1603_v19, 0.0  ;;  %v1606_v36 = vadd.f32 %v12688_v51, %v1605_v31  ;;  %v1607_v40 = vpop.f32.mrb[3].mxu0 }
 0x320   :  { %9619 = vmatpush3.bf16.msra.mxu1 %v10814_v27  ;;  %9602 = vmatprep.mubr.msk.bf16.mxu1 %vm11081_vm0, %v12404_v3 }
 0x321   :  { %9620 = vmatprep.subr.bf16.mxu1 %v12404_v3  ;;  %v1794_v58 = vmax.f32 %v1606_v36, 0.0 }
 0x322   :  { %v3012_v41 = vpop.f32.mrb[128].mxu1 }
 0x323   :  { %v12775_v23 = vadd.f32 %v3012_v41, %v12664_v17  ;;  %v9416_v55 = vpop.f32.mrb[129].mxu1  ;;  %v12777_v28 = vpack.c.bf16 %v1794_v58, %v1793_v7  ;;  %v10820_v58 = vld [vmem:[%s14309_s4 + $0x358] sm:$0xff]  }
 0x324   :  { %v3015_v45 = vpop.f32.mrb[130].mxu1  ;;  %9621 = vmatpush3.bf16.msra.mxu1 %v10815_v30  ;;  %v1610_v60 = vpop.f32.mrb[4].mxu0 }
 0x325   :  { %v12780_v50 = vadd.f32 %v3015_v45, %v12669_v42  ;;  %v9417_v21 = vpop.f32.mrb[131].mxu1  ;;  %9642 = vmatprep.subr.bf16.mxu1 %v12404_v3  ;;  %v1611_v52 = vadd.f32 %v12688_v51, %v1610_v60  ;;  %v1612_v44 = vpop.f32.mrb[5].mxu0 }
 0x326   :  { %v1613_v61 = vpop.f32.mrb[6].mxu0  ;;  %v10842_v21 = vld [vmem:[%s14311_s6 + $0x68] sm:$0xff]   ;;  %v10821_v44 = vld [vmem:[%s14309_s4 + $0x360] sm:$0xff]  }
 0x327   :  { %9603 = vmatmul.mubr.bf16.gmra.mrb[236].mxu1 %v3714_v10  ;;  %v1795_v17 = vmax.f32 %v1611_v52, 0.0  ;;  %v1614_v26 = vadd.f32 %v12688_v51, %v1613_v61  ;;  %v1615_v39 = vpop.f32.mrb[7].mxu0  ;;  %9761 = vmatpush3.bf16.msra.mxu0 %v10842_v21 }
 0x328   :  { %9622 = vmatprep.mubr.msk.bf16.mxu1 %vm11081_vm0, %v12404_v3  ;;  %9762 = vmatprep.subr.bf16.mxu0 %v12404_v3 }
 0x329   :  { %v1796_v4 = vmax.f32 %v1614_v26, 0.0 }
 0x32a   :  { %v3020_v42 = vpop.f32.mrb[132].mxu1 }
 0x32b   :  { %v12790_v49 = vadd.f32 %v3020_v42, %v12677_v35  ;;  %v9420_v37 = vpop.f32.mrb[133].mxu1  ;;  %v12792_v59 = vpack.c.bf16 %v1796_v4, %v1795_v17 }
 0x32c   :  { %v3023_v6 = vpop.f32.mrb[134].mxu1  ;;  %v1618_v10 = vpop.f32.mrb[8].mxu0 }
 0x32d   :  { %v12798_v5 = vadd.f32 %v3023_v6, %v12683_v47  ;;  %v9421_v18 = vpop.f32.mrb[135].mxu1  ;;  %v1619_v15 = vadd.f32 %v12688_v51, %v1618_v10  ;;  %v1620_v12 = vpop.f32.mrb[9].mxu0 }
 0x32e   :  { %v1621_v8 = vpop.f32.mrb[10].mxu0 }
 0x32f   :  { %9623 = vmatmul.mubr.bf16.vlgmr.msra.gmra.mrb[240].mxu1 %v12569_v9  ;;  %v1797_v35 = vmax.f32 %v1619_v15, 0.0  ;;  %v1622_v13 = vadd.f32 %v12688_v51, %v1621_v8  ;;  %v1623_v34 = vpop.f32.mrb[11].mxu0  ;;  %v10823_v8 = vld [vmem:[%s14309_s4 + $0x370] sm:$0xff]  }
 0x330   :  { %9643 = vmatpush3.bf16.msra.mxu1 %v10817_v43  ;;  %9626 = vmatprep.mubr.msk.bf16.mxu1 %vm11081_vm0, %v12404_v3  ;;  %v10822_v43 = vld [vmem:[%s14309_s4 + $0x368] sm:$0xff]  }
 0x331   :  { %9644 = vmatprep.subr.bf16.mxu1 %v12404_v3  ;;  %v1798_v47 = vmax.f32 %v1622_v13, 0.0 }
 0x332   :  { %v3028_v33 = vpop.f32.mrb[136].mxu1 }
 0x333   :  { %v12810_v53 = vadd.f32 %v3028_v33, %v12708_v0  ;;  %v9424_v9 = vpop.f32.mrb[137].mxu1  ;;  %v12812_v27 = vpack.c.bf16 %v1798_v47, %v1797_v35 }
 0x334   :  { %v3031_v62 = vpop.f32.mrb[138].mxu1  ;;  %9645 = vmatpush3.bf16.msra.mxu1 %v10818_v16  ;;  %v1626_v19 = vpop.f32.mrb[12].mxu0 }
 0x335   :  { %v9425_v22 = vpop.f32.mrb[139].mxu1  ;;  %9646 = vmatprep.subr.bf16.mxu1 %v12404_v3  ;;  %v1627_v31 = vadd.f32 %v12688_v51, %v1626_v19  ;;  %v1628_v7 = vpop.f32.mrb[13].mxu0 }
 0x336   :  { %v1629_v36 = vpop.f32.mrb[14].mxu0 }
 0x337   :  { %9627 = vmatmul.mubr.bf16.gmra.mrb[244].mxu1 %v12584_v38  ;;  %v1799_v0 = vmax.f32 %v1627_v31, 0.0  ;;  %v1630_v40 = vadd.f32 %v12688_v51, %v1629_v36  ;;  %v1631_v30 = vpop.f32.mrb[15].mxu0 }
 0x338   :  { %9647 = vmatpush3.bf16.msra.mxu1 %v10819_v57  ;;  %9630 = vmatprep.mubr.msk.bf16.mxu1 %vm11081_vm0, %v12404_v3 }
 0x339   :  { %9648 = vmatprep.subr.bf16.mxu1 %v12404_v3  ;;  %v1800_v41 = vmax.f32 %v1630_v40, 0.0 }
 0x33a   :  { %v3165_v55 = vpop.f32.mrb[140].mxu1 }
 0x33b   :  { %v12828_v45 = vadd.f32 %v3165_v55, %v12727_v29  ;;  %v9444_v38 = vpop.f32.mrb[141].mxu1  ;;  %v1876_v60 = vpack.c.bf16 %v1800_v41, %v1799_v0 }
 0x33c   :  { %v3168_v52 = vpop.f32.mrb[142].mxu1  ;;  %9649 = vmatpush3.bf16.msra.mxu1 %v10820_v58  ;;  %v1634_v61 = vpop.f32.mrb[16].mxu0  ;;  %v3854_v38 = vld [vmem:[#allocation2 + $0x1d0] sm:$0xf] }
 0x33d   :  { %v12837_v17 = vadd.f32 %v3168_v52, %v12735_v54  ;;  %v9445_v26 = vpop.f32.mrb[143].mxu1  ;;  %9650 = vmatprep.subr.bf16.mxu1 %v12404_v3  ;;  %1948 = vst [vmem:[#allocation2 + $0x218] sm:$0xff] %v1876_v60  ;;  %v1635_v29 = vadd.f32 %v12688_v51, %v1634_v61  ;;  %v1636_v39 = vpop.f32.mrb[17].mxu0  ;;  %v12844_v54 = vld [vmem:[#allocation3 + $0x48] sm:$0xff]  ;;  %v4000_v60 = vld [vmem:[#allocation2 + $0x1d0] sm:$0xf0] }
 0x33e   :  { %v1637_v4 = vpop.f32.mrb[18].mxu0 }
 0x33f   :  { %9631 = vmatmul.mubr.bf16.gmra.mrb[248].mxu1 %v12604_v2  ;;  %v1801_v42 = vmax.f32 %v1635_v29, 0.0  ;;  %v1638_v37 = vadd.f32 %v12688_v51, %v1637_v4  ;;  %v1639_v6 = vpop.f32.mrb[19].mxu0  ;;  %v4026_v29 = vrot.slane %v4000_v60, 4 }
 0x340   :  { %9651 = vmatpush3.bf16.msra.mxu1 %v10821_v44  ;;  %9634 = vmatprep.mubr.msk.bf16.mxu1 %vm11081_vm0, %v12844_v54  ;;  %v10825_v6 = vld [vmem:[%s14309_s4 + $0x380] sm:$0xff]  }
 0x341   :  { %9652 = vmatprep.subr.bf16.mxu1 %v12844_v54  ;;  %v1802_v10 = vmax.f32 %v1638_v37, 0.0 }
 0x342   :  { %v3173_v3 = vpop.f32.mrb[144].mxu1 }
 0x343   :  { %v12853_v2 = vadd.f32 %v3173_v3, %v12754_v20  ;;  %v9448_v18 = vpop.f32.mrb[145].mxu1  ;;  %v12855_v15 = vpack.c.bf16 %v1802_v10, %v1801_v42 }
 0x344   :  { %v3176_v12 = vpop.f32.mrb[146].mxu1  ;;  %9653 = vmatpush3.bf16.msra.mxu1 %v10822_v43  ;;  %v1642_v35 = vpop.f32.mrb[20].mxu0 }
 0x345   :  { %v12861_v13 = vadd.f32 %v3176_v12, %v12762_v14  ;;  %v9449_v34 = vpop.f32.mrb[147].mxu1  ;;  %9654 = vmatprep.subr.bf16.mxu1 %v12844_v54  ;;  %v1643_v16 = vadd.f32 %v12688_v51, %v1642_v35  ;;  %v1644_v20 = vpop.f32.mrb[21].mxu0  ;;  %v10824_v14 = vld [vmem:[%s14309_s4 + $0x378] sm:$0xff]   ;;  %v4346_v41 = vrot.slane %v12855_v15, 4 }
 0x346   :  { %v1645_v47 = vpop.f32.mrb[22].mxu0 }
 0x347   :  { %9635 = vmatmul.mubr.bf16.gmra.mrb[252].mxu1 %v12622_v1  ;;  %v1803_v33 = vmax.f32 %v1643_v16, 0.0  ;;  %v1646_v9 = vadd.f32 %v12688_v51, %v1645_v47  ;;  %v1647_v62 = vpop.f32.mrb[23].mxu0 }
 0x348   :  { %9655 = vmatpush3.bf16.msra.mxu1 %v10823_v8  ;;  %9638 = vmatprep.mubr.msk.bf16.mxu1 %vm11081_vm0, %v12844_v54 }
 0x349   :  { %9656 = vmatprep.subr.bf16.mxu1 %v12844_v54  ;;  %v1804_v57 = vmax.f32 %v1646_v9, 0.0 }
 0x34a   :  { %v3181_v19 = vpop.f32.mrb[148].mxu1 }
 0x34b   :  { %v12874_v22 = vadd.f32 %v3181_v19, %v12775_v23  ;;  %v9452_v1 = vpop.f32.mrb[149].mxu1  ;;  %v1878_v31 = vpack.c.bf16 %v1804_v57, %v1803_v33 }
 0x34c   :  { %v3184_v7 = vpop.f32.mrb[150].mxu1  ;;  %9657 = vmatpush3.bf16.msra.mxu1 %v10824_v14  ;;  %v1650_v36 = vpop.f32.mrb[24].mxu0  ;;  %v10827_v14 = vld [vmem:[%s14309_s4 + $0x390] sm:$0xff]   ;;  %v10828_v1 = vld [vmem:[%s14309_s4 + $0x398] sm:$0xff]  }
 0x34d   :  { %v12877_v0 = vadd.f32 %v3184_v7, %v12780_v50  ;;  %v9453_v40 = vpop.f32.mrb[151].mxu1  ;;  %9678 = vmatprep.subr.bf16.mxu1 %v12844_v54  ;;  %v1651_v30 = vadd.f32 %v12688_v51, %v1650_v36  ;;  %v1652_v58 = vpop.f32.mrb[25].mxu0  ;;  %v4348_v55 = vrot.slane %v1878_v31, 4 }
 0x34e   :  { %v1653_v23 = vpop.f32.mrb[26].mxu0  ;;  %v10829_v40 = vld [vmem:[%s14309_s4 + $0x3a0] sm:$0xff]  }
 0x34f   :  { %9639 = vmatmul.mubr.bf16.gmra.mrb[0].mxu1 %v3854_v38  ;;  %v1805_v21 = vmax.f32 %v1651_v30, 0.0  ;;  %v1654_v52 = vadd.f32 %v12688_v51, %v1653_v23  ;;  %v1655_v44 = vpop.f32.mrb[27].mxu0  ;;  %v12886_v50 = vsel %vm2000_vm1, %v4346_v41, %v4348_v55 }
 0x350   :  { %9658 = vmatprep.mubr.msk.bf16.mxu1 %vm11081_vm0, %v12844_v54 }
 0x351   :  { %v1806_v61 = vmax.f32 %v1654_v52, 0.0 }
 0x352   :  { %v3189_v26 = vpop.f32.mrb[152].mxu1 }
 0x353   :  { %v12891_v39 = vadd.f32 %v3189_v26, %v12790_v49  ;;  %v9456_v4 = vpop.f32.mrb[153].mxu1  ;;  %v1879_v42 = vpack.c.bf16 %v1806_v61, %v1805_v21  ;;  %v4028_v49 = vsel %vm2000_vm1, %v4026_v29, %v4027_v32 }
 0x354   :  { %v3192_v37 = vpop.f32.mrb[154].mxu1  ;;  %v1658_v43 = vpop.f32.mrb[28].mxu0 }
 0x355   :  { %v12897_v10 = vadd.f32 %v3192_v37, %v12798_v5  ;;  %v9457_v3 = vpop.f32.mrb[155].mxu1  ;;  %v1659_v18 = vadd.f32 %v12688_v51, %v1658_v43  ;;  %v1660_v12 = vpop.f32.mrb[29].mxu0  ;;  %v4350_v8 = vrot.slane %v1879_v42, 4  ;;  %v10826_v5 = vld [vmem:[%s14309_s4 + $0x388] sm:$0xff]   ;;  %v10834_v37 = vld [vmem:[%s14309_s4 + $0x3c0] sm:$0xff]  }
 0x356   :  { %v1661_v35 = vpop.f32.mrb[30].mxu0  ;;  %v10836_v3 = vld [vmem:[%s14309_s4 + $0x3d0] sm:$0xff]   ;;  %v10837_v12 = vld [vmem:[%s14309_s4 + $0x3d8] sm:$0xff]  }
 0x357   :  { %9659 = vmatmul.mubr.bf16.vlgmr.msra.gmra.mrb[4].mxu1 %v4028_v49  ;;  %v1807_v34 = vmax.f32 %v1659_v18, 0.0  ;;  %v1662_v16 = vadd.f32 %v12688_v51, %v1661_v35  ;;  %v1663_v20 = vpop.f32.mrb[31].mxu0  ;;  %v12905_v47 = vsel %vm2000_vm1, %v4348_v55, %v4350_v8 }
 0x358   :  { %9679 = vmatpush3.bf16.msra.mxu1 %v10825_v6  ;;  %9662 = vmatprep.mubr.msk.bf16.mxu1 %vm11081_vm0, %v12844_v54 }
 0x359   :  { %9680 = vmatprep.subr.bf16.mxu1 %v12844_v54  ;;  %v1808_v24 = vmax.f32 %v1662_v16, 0.0 }
 0x35a   :  { %v3197_v32 = vpop.f32.mrb[156].mxu1 }
 0x35b   :  { %v12914_v33 = vadd.f32 %v3197_v32, %v12810_v53  ;;  %v9460_v51 = vpop.f32.mrb[157].mxu1  ;;  %v12916_v9 = vpack.c.bf16 %v1808_v24, %v1807_v34 }
 0x35c   :  { %v3200_v62 = vpop.f32.mrb[158].mxu1  ;;  %9681 = vmatpush3.bf16.msra.mxu1 %v10826_v5  ;;  %v10839_v5 = vld [vmem:[%s14309_s4 + $0x3e8] sm:$0xff]  }
 0x35d   :  { %v9461_v57 = vpop.f32.mrb[159].mxu1  ;;  %9682 = vmatprep.subr.bf16.mxu1 %v12844_v54  ;;  %v4352_v19 = vrot.slane %v12916_v9, 4 }
 0x35e   :  { %v10841_v57 = vld [vmem:[%s14309_s4 + $0x3f8] sm:$0xff]  }
 0x35f   :  { %9663 = vmatmul.mubr.bf16.gmra.mrb[8].mxu1 %v12699_v56  ;;  %v12927_v53 = vsel %vm2000_vm1, %v4350_v8, %v4352_v19 }
 0x360   :  { %9683 = vmatpush3.bf16.msra.mxu1 %v10827_v14  ;;  %9666 = vmatprep.mubr.msk.bf16.mxu1 %vm11081_vm0, %v12844_v54 }
 0x361   :  { %9684 = vmatprep.subr.bf16.mxu1 %v12844_v54 }
 0x362   :  { %v3315_v31 = vpop.f32.mrb[160].mxu1 }
 0x363   :  { %v12936_v7 = vadd.f32 %v3315_v31, %v12828_v45  ;;  %v9480_v56 = vpop.f32.mrb[161].mxu1  ;;  %v10830_v45 = vld [vmem:[%s14309_s4 + $0x3a8] sm:$0xff]  }
 0x364   :  { %v3318_v36 = vpop.f32.mrb[162].mxu1  ;;  %9685 = vmatpush3.bf16.msra.mxu1 %v10828_v1 }
 0x365   :  { %v12942_v30 = vadd.f32 %v3318_v36, %v12837_v17  ;;  %v9481_v58 = vpop.f32.mrb[163].mxu1  ;;  %9686 = vmatprep.subr.bf16.mxu1 %v12844_v54 }
 0x367   :  { %9667 = vmatmul.mubr.bf16.gmra.mrb[12].mxu1 %v12718_v25  ;;  %v10832_v25 = vld [vmem:[%s14309_s4 + $0x3b0] sm:$0xff]  }
 0x368   :  { %9687 = vmatpush3.bf16.msra.mxu1 %v10829_v40  ;;  %9670 = vmatprep.mubr.msk.bf16.mxu1 %vm11081_vm0, %v12844_v54 }
 0x369   :  { %9688 = vmatprep.subr.bf16.mxu1 %v12844_v54 }
 0x36a   :  { %v3323_v55 = vpop.f32.mrb[164].mxu1 }
 0x36b   :  { %v9484_v38 = vpop.f32.mrb[165].mxu1  ;;  %v12953_v17 = vadd.f32 %v3323_v55, %v12853_v2  ;;  %v10833_v2 = vld [vmem:[%s14309_s4 + $0x3b8] sm:$0xff]  }
 0x36c   :  { %v3326_v23 = vpop.f32.mrb[166].mxu1  ;;  %9689 = vmatpush3.bf16.msra.mxu1 %v10830_v45 }
 0x36d   :  { %v9485_v60 = vpop.f32.mrb[167].mxu1  ;;  %9690 = vmatprep.subr.bf16.mxu1 %v12844_v54  ;;  %v12960_v21 = vadd.f32 %v3326_v23, %v12861_v13 }
 0x36f   :  { %9671 = vmatmul.mubr.bf16.gmra.mrb[16].mxu1 %v12745_v46 }
 0x370   :  { %9691 = vmatpush3.bf16.msra.mxu1 %v10832_v25  ;;  %9674 = vmatprep.mubr.msk.bf16.mxu1 %vm11081_vm0, %v12844_v54 }
 0x371   :  { %9692 = vmatprep.subr.bf16.mxu1 %v12844_v54 }
 0x372   :  { %v3331_v52 = vpop.f32.mrb[168].mxu1 }
 0x373   :  { %v9488_v44 = vpop.f32.mrb[169].mxu1  ;;  %v12970_v61 = vadd.f32 %v3331_v52, %v12874_v22 }
 0x374   :  { %v3334_v26 = vpop.f32.mrb[170].mxu1  ;;  %9693 = vmatpush3.bf16.msra.mxu1 %v10833_v2 }
 0x375   :  { %v9489_v13 = vpop.f32.mrb[171].mxu1  ;;  %9714 = vmatprep.subr.bf16.mxu1 %v12844_v54  ;;  %v12974_v46 = vadd.f32 %v3334_v26, %v12877_v0 }
 0x377   :  { %9675 = vmatmul.mubr.bf16.gmra.mrb[20].mxu1 %v4033_v11 }
 0x378   :  { %9694 = vmatprep.mubr.msk.bf16.mxu1 %vm11081_vm0, %v12844_v54 }
 0x37a   :  { %v3339_v29 = vpop.f32.mrb[172].mxu1 }
 0x37b   :  { %v9492_v4 = vpop.f32.mrb[173].mxu1  ;;  %v12981_v42 = vadd.f32 %v3339_v29, %v12891_v39 }
 0x37c   :  { %v3342_v22 = vpop.f32.mrb[174].mxu1 }
 0x37d   :  { %v9493_v6 = vpop.f32.mrb[175].mxu1  ;;  %v12987_v0 = vadd.f32 %v3342_v22, %v12897_v10  ;;  %v10843_v10 = vld [vmem:[%s14311_s6 + $0x70] sm:$0xff]  }
 0x37e   :  { %9763 = vmatpush3.bf16.msra.mxu0 %v10843_v10 }
 0x37f   :  { %9695 = vmatmul.mubr.bf16.vlgmr.msra.gmra.mrb[24].mxu1 %v12756_v48  ;;  %9764 = vmatprep.subr.bf16.mxu0 %v12844_v54 }
 0x380   :  { %9715 = vmatpush3.bf16.msra.mxu1 %v10834_v37  ;;  %9698 = vmatprep.mubr.msk.bf16.mxu1 %vm11081_vm0, %v12844_v54 }
 0x381   :  { %9716 = vmatprep.subr.bf16.mxu1 %v12844_v54 }
 0x382   :  { %v3347_v11 = vpop.f32.mrb[176].mxu1 }
 0x383   :  { %v9496_v39 = vpop.f32.mrb[177].mxu1  ;;  %v12997_v43 = vadd.f32 %v3347_v11, %v12914_v33 }
 0x384   :  { %v3350_v48 = vpop.f32.mrb[178].mxu1  ;;  %9717 = vmatpush3.bf16.msra.mxu1 %v10835_v63 }
 0x385   :  { %v9497_v18 = vpop.f32.mrb[179].mxu1  ;;  %9718 = vmatprep.subr.bf16.mxu1 %v12844_v54 }
 0x387   :  { %9699 = vmatmul.mubr.bf16.gmra.mrb[28].mxu1 %v12777_v28  ;;  %v10838_v28 = vld [vmem:[%s14309_s4 + $0x3e0] sm:$0xff]  }
 0x388   :  { %9719 = vmatpush3.bf16.msra.mxu1 %v10836_v3  ;;  %9702 = vmatprep.mubr.msk.bf16.mxu1 %vm11081_vm0, %v12844_v54 }
 0x389   :  { %9720 = vmatprep.subr.bf16.mxu1 %v12844_v54 }
 0x38a   :  { %v3484_v8 = vpop.f32.mrb[180].mxu1 }
 0x38b   :  { %v9516_v49 = vpop.f32.mrb[181].mxu1  ;;  %v3522_v35 = vadd.f32 %v3484_v8, %v12936_v7 }
 0x38c   :  { %v3487_v34 = vpop.f32.mrb[182].mxu1  ;;  %9721 = vmatpush3.bf16.msra.mxu1 %v10837_v12 }
 0x38d   :  { %v9517_v16 = vpop.f32.mrb[183].mxu1  ;;  %9722 = vmatprep.subr.bf16.mxu1 %v12844_v54  ;;  %v3523_v20 = vadd.f32 %v3487_v34, %v12942_v30  ;;  %v4319_v30 = vld [vmem:[#allocation2 + $0x218] sm:$0xf0] }
 0x38e   :  { %v4345_v45 = vrot.slane %v4319_v30, 4 }
 0x38f   :  { %9703 = vmatmul.mubr.bf16.gmra.mrb[32].mxu1 %v12792_v59  ;;  %v10840_v59 = vld [vmem:[%s14309_s4 + $0x3f0] sm:$0xff]  }
 0x390   :  { %9723 = vmatpush3.bf16.msra.mxu1 %v10838_v28  ;;  %9706 = vmatprep.mubr.msk.bf16.mxu1 %vm11081_vm0, %v12844_v54  ;;  %v4347_v60 = vsel %vm2000_vm1, %v4345_v45, %v4346_v41  ;;  %v10848_v45 = vld [vmem:[%s14311_s6 + $0x18] sm:$0xff]  }
 0x391   :  { %9724 = vmatprep.subr.bf16.mxu1 %v12844_v54 }
 0x392   :  { %v3492_v24 = vpop.f32.mrb[184].mxu1 }
 0x393   :  { %v3524_v32 = vadd.f32 %v3492_v24, %v12953_v17  ;;  %v9520_v33 = vpop.f32.mrb[185].mxu1 }
 0x394   :  { %v3495_v51 = vpop.f32.mrb[186].mxu1  ;;  %9725 = vmatpush3.bf16.msra.mxu1 %v10839_v5 }
 0x395   :  { %v3525_v62 = vadd.f32 %v3495_v51, %v12960_v21  ;;  %v9521_v14 = vpop.f32.mrb[187].mxu1  ;;  %9726 = vmatprep.subr.bf16.mxu1 %v12844_v54 }
 0x396   :  { %v10845_v14 = vld [vmem:[%s14311_s6] sm:$0xff]  }
 0x397   :  { %9707 = vmatmul.mubr.bf16.gmra.mrb[36].mxu1 %v12812_v27  ;;  %v4173_v27 = vld [vmem:[#allocation2 + $0x218] sm:$0xf] }
 0x398   :  { %9727 = vmatpush3.bf16.msra.mxu1 %v10840_v59  ;;  %9710 = vmatprep.mubr.msk.bf16.mxu1 %vm11081_vm0, %v12844_v54 }
 0x399   :  { %9728 = vmatprep.subr.bf16.mxu1 %v12844_v54 }
 0x39a   :  { %v3500_v1 = vpop.f32.mrb[188].mxu1 }
 0x39b   :  { %v3526_v31 = vadd.f32 %v3500_v1, %v12970_v61  ;;  %v9524_v7 = vpop.f32.mrb[189].mxu1 }
 0x39c   :  { %v3503_v56 = vpop.f32.mrb[190].mxu1  ;;  %9729 = vmatpush3.bf16.msra.mxu1 %v10841_v57 }
 0x39d   :  { %v3527_v36 = vadd.f32 %v3503_v56, %v12974_v46  ;;  %v9525_v40 = vpop.f32.mrb[191].mxu1  ;;  %9786 = vmatprep.subr.bf16.mxu1 %v12844_v54 }
 0x39f   :  { %9711 = vmatmul.mubr.bf16.gmra.mrb[40].mxu1 %v4173_v27  ;;  %v10847_v27 = vld [vmem:[%s14311_s6 + $0x10] sm:$0xff]  }
 0x3a0   :  { %9730 = vmatprep.mubr.msk.bf16.mxu1 %vm11081_vm0, %v12844_v54 }
 0x3a2   :  { %v3508_v58 = vpop.f32.mrb[192].mxu1 }
 0x3a3   :  { %v3528_v55 = vadd.f32 %v3508_v58, %v12981_v42  ;;  %v9528_v38 = vpop.f32.mrb[193].mxu1 }
 0x3a4   :  { %v3511_v17 = vpop.f32.mrb[194].mxu1 }
 0x3a5   :  { %v3529_v23 = vadd.f32 %v3511_v17, %v12987_v0  ;;  %v9529_v25 = vpop.f32.mrb[195].mxu1 }
 0x3a6   :  { %v10849_v25 = vld [vmem:[%s14311_s6 + $0x20] sm:$0xff]  }
 0x3a7   :  { %9731 = vmatmul.mubr.bf16.vlgmr.msra.gmra.mrb[44].mxu1 %v4347_v60 }
 0x3a8   :  { %9734 = vmatprep.mubr.msk.bf16.mxu1 %vm11081_vm0, %v12844_v54  ;;  %9787 = vmatpush3.bf16.msra.mxu1 %v10845_v14 }
 0x3a9   :  { %9788 = vmatprep.subr.bf16.mxu1 %v12844_v54 }
 0x3aa   :  { %v3516_v21 = vpop.f32.mrb[196].mxu1 }
 0x3ab   :  { %v3530_v2 = vadd.f32 %v3516_v21, %v12997_v43  ;;  %v9532_v52 = vpop.f32.mrb[197].mxu1 }
 0x3ac   :  { %v3519_v44 = vpop.f32.mrb[198].mxu1 }
 0x3ad   :  { %v9533_v61 = vpop.f32.mrb[199].mxu1 }
 0x3af   :  { %9735 = vmatmul.mubr.bf16.gmra.mrb[48].mxu1 %v12886_v50 }
 0x3b0   :  { %9738 = vmatprep.mubr.msk.bf16.mxu1 %vm11081_vm0, %v12844_v54 }
 0x3b2   :  { %v3634_v26 = vpop.f32.mrb[200].mxu1 }
 0x3b3   :  { %v3672_v13 = vadd.f32 %v3634_v26, %v3522_v35  ;;  %v9552_v15 = vpop.f32.mrb[201].mxu1 }
 0x3b4   :  { %v3637_v46 = vpop.f32.mrb[202].mxu1 }
 0x3b5   :  { %v3673_v41 = vadd.f32 %v3637_v46, %v3523_v20  ;;  %v9553_v29 = vpop.f32.mrb[203].mxu1  ;;  %v10852_v46 = vld [vmem:[%s14311_s6 + $0x38] sm:$0xff]  }
 0x3b7   :  { %9739 = vmatmul.mubr.bf16.gmra.mrb[52].mxu1 %v12905_v47 }
 0x3b8   :  { %9742 = vmatprep.mubr.msk.bf16.mxu1 %vm11081_vm0, %v12844_v54 }
 0x3ba   :  { %v3642_v4 = vpop.f32.mrb[204].mxu1 }
 0x3bb   :  { %v3674_v42 = vadd.f32 %v3642_v4, %v3524_v32  ;;  %v9556_v22 = vpop.f32.mrb[205].mxu1 }
 0x3bc   :  { %v3645_v37 = vpop.f32.mrb[206].mxu1 }
 0x3bd   :  { %v3675_v6 = vadd.f32 %v3645_v37, %v3525_v62  ;;  %v9557_v50 = vpop.f32.mrb[207].mxu1 }
 0x3bf   :  { %9743 = vmatmul.mubr.bf16.gmra.mrb[56].mxu1 %v12927_v53  ;;  %v10844_v53 = vld [vmem:[%s14311_s6 + $0x78] sm:$0xff]  }
 0x3c0   :  { %9746 = vmatprep.mubr.msk.bf16.mxu1 %vm11081_vm0, %v12844_v54  ;;  %9765 = vmatpush3.bf16.msra.mxu0 %v10844_v53 }
 0x3c1   :  { %9822 = vmatprep.subr.bf16.mxu0 %v12844_v54 }
 0x3c2   :  { %v3650_v0 = vpop.f32.mrb[208].mxu1 }
 0x3c3   :  { %v3676_v63 = vadd.f32 %v3650_v0, %v3526_v31  ;;  %v9560_v11 = vpop.f32.mrb[209].mxu1  ;;  %v10846_v31 = vld [vmem:[%s14311_s6 + $0x8] sm:$0xff]  }
 0x3c4   :  { %v3653_v39 = vpop.f32.mrb[210].mxu1  ;;  %9789 = vmatpush3.bf16.msra.mxu1 %v10846_v31 }
 0x3c5   :  { %v3677_v43 = vadd.f32 %v3653_v39, %v3527_v36  ;;  %v9561_v47 = vpop.f32.mrb[211].mxu1  ;;  %9790 = vmatprep.subr.bf16.mxu1 %v12844_v54 }
 0x3c7   :  { %9747 = vmatmul.mubr.bf16.gmra.mrb[60].mxu1 %v4352_v19 }
 0x3c8   :  { %9802 = vmatprep.mubr.msk.bf16.mxu1 %vm11081_vm0, %v12844_v54  ;;  %9791 = vmatpush3.bf16.msra.mxu1 %v10847_v27 }
 0x3c9   :  { %9792 = vmatprep.subr.bf16.mxu1 %v12844_v54 }
 0x3ca   :  { %v3658_v10 = vpop.f32.mrb[212].mxu1 }
 0x3cb   :  { %v3678_v48 = vadd.f32 %v3658_v10, %v3528_v55  ;;  %v9564_v3 = vpop.f32.mrb[213].mxu1 }
 0x3cc   :  { %v3661_v18 = vpop.f32.mrb[214].mxu1  ;;  %9793 = vmatpush3.bf16.msra.mxu1 %v10848_v45 }
 0x3cd   :  { %v3679_v12 = vadd.f32 %v3661_v18, %v3529_v23  ;;  %v9565_v8 = vpop.f32.mrb[215].mxu1  ;;  %9794 = vmatprep.subr.bf16.mxu1 %v12844_v54 }
 0x3d0   :  { %9795 = vmatpush3.bf16.msra.mxu1 %v10849_v25 }
 0x3d1   :  { %9796 = vmatprep.subr.bf16.mxu1 %v12844_v54 }
 0x3d2   :  { %v3666_v49 = vpop.f32.mrb[216].mxu1 }
 0x3d3   :  { %v3680_v35 = vadd.f32 %v3666_v49, %v3530_v2  ;;  %v9568_v9 = vpop.f32.mrb[217].mxu1  ;;  %v10850_v2 = vld [vmem:[%s14311_s6 + $0x28] sm:$0xff]  }
 0x3d4   :  { %v3669_v19 = vpop.f32.mrb[218].mxu1  ;;  %9797 = vmatpush3.bf16.msra.mxu1 %v10850_v2 }
 0x3d5   :  { %v9569_v34 = vpop.f32.mrb[219].mxu1  ;;  %9798 = vmatprep.subr.bf16.mxu1 %v12844_v54 }
 0x3da   :  { %v3803_v28 = vpop.f32.mrb[220].mxu1 }
 0x3db   :  { %v3841_v16 = vadd.f32 %v3803_v28, %v3672_v13  ;;  %v9588_v20 = vpop.f32.mrb[221].mxu1  ;;  %v10851_v13 = vld [vmem:[%s14311_s6 + $0x30] sm:$0xff]  }
 0x3dc   :  { %v3806_v5 = vpop.f32.mrb[222].mxu1  ;;  %9799 = vmatpush3.bf16.msra.mxu1 %v10851_v13 }
 0x3dd   :  { %v3842_v24 = vadd.f32 %v3806_v5, %v3673_v41  ;;  %v9589_v32 = vpop.f32.mrb[223].mxu1  ;;  %9800 = vmatprep.subr.bf16.mxu1 %v12844_v54 }
 0x3e0   :  { %9801 = vmatpush3.bf16.msra.mxu1 %v10852_v46 }
 0x3e1   :  { %9858 = vmatprep.subr.bf16.mxu1 %v12844_v54 }
 0x3e2   :  { %v3811_v33 = vpop.f32.mrb[224].mxu1 }
 0x3e3   :  { %v3843_v51 = vadd.f32 %v3811_v33, %v3674_v42  ;;  %v9592_v59 = vpop.f32.mrb[225].mxu1 }
 0x3e4   :  { %v3814_v62 = vpop.f32.mrb[226].mxu1 }
 0x3e5   :  { %v3844_v57 = vadd.f32 %v3814_v62, %v3675_v6  ;;  %v9593_v1 = vpop.f32.mrb[227].mxu1 }
 0x3ea   :  { %v3819_v7 = vpop.f32.mrb[228].mxu1 }
 0x3eb   :  { %v3845_v56 = vadd.f32 %v3819_v7, %v3676_v63  ;;  %v9596_v36 = vpop.f32.mrb[229].mxu1 }
 0x3ec   :  { %v3822_v40 = vpop.f32.mrb[230].mxu1 }
 0x3ed   :  { %v3846_v30 = vadd.f32 %v3822_v40, %v3677_v43  ;;  %v9597_v58 = vpop.f32.mrb[231].mxu1 }
 0x3f2   :  { %v3827_v55 = vpop.f32.mrb[232].mxu1 }
 0x3f3   :  { %v3847_v38 = vadd.f32 %v3827_v55, %v3678_v48  ;;  %v9600_v17 = vpop.f32.mrb[233].mxu1 }
 0x3f4   :  { %v3830_v23 = vpop.f32.mrb[234].mxu1 }
 0x3f5   :  { %v3848_v60 = vadd.f32 %v3830_v23, %v3679_v12  ;;  %v9601_v21 = vpop.f32.mrb[235].mxu1 }
 0x3fa   :  { %v3835_v52 = vpop.f32.mrb[236].mxu1 }
 0x3fb   :  { %v3849_v44 = vadd.f32 %v3835_v52, %v3680_v35  ;;  %v9604_v61 = vpop.f32.mrb[237].mxu1 }
 0x3fc   :  { %v3838_v26 = vpop.f32.mrb[238].mxu1 }
 0x3fd   :  { %v9605_v15 = vpop.f32.mrb[239].mxu1 }
 0x402   :  { %v3953_v41 = vpop.f32.mrb[240].mxu1 }
 0x403   :  { %v3991_v29 = vadd.f32 %v3953_v41, %v3841_v16  ;;  %v9624_v4 = vpop.f32.mrb[241].mxu1 }
 0x404   :  { %v3956_v42 = vpop.f32.mrb[242].mxu1 }
 0x405   :  { %v3992_v22 = vadd.f32 %v3956_v42, %v3842_v24  ;;  %v9625_v37 = vpop.f32.mrb[243].mxu1 }
 0x40a   :  { %v3961_v6 = vpop.f32.mrb[244].mxu1 }
 0x40b   :  { %v3993_v50 = vadd.f32 %v3961_v6, %v3843_v51  ;;  %v9628_v0 = vpop.f32.mrb[245].mxu1 }
 0x40c   :  { %v3964_v63 = vpop.f32.mrb[246].mxu1 }
 0x40d   :  { %v3994_v11 = vadd.f32 %v3964_v63, %v3844_v57  ;;  %v9629_v39 = vpop.f32.mrb[247].mxu1 }
 0x412   :  { %v3969_v43 = vpop.f32.mrb[248].mxu1 }
 0x413   :  { %v3995_v47 = vadd.f32 %v3969_v43, %v3845_v56  ;;  %v9632_v10 = vpop.f32.mrb[249].mxu1 }
 0x414   :  { %v3972_v48 = vpop.f32.mrb[250].mxu1 }
 0x415   :  { %v3996_v3 = vadd.f32 %v3972_v48, %v3846_v30  ;;  %v9633_v53 = vpop.f32.mrb[251].mxu1 }
 0x41a   :  { %v3977_v18 = vpop.f32.mrb[252].mxu1 }
 0x41b   :  { %v3997_v12 = vadd.f32 %v3977_v18, %v3847_v38  ;;  %v9636_v8 = vpop.f32.mrb[253].mxu1 }
 0x41c   :  { %v3980_v49 = vpop.f32.mrb[254].mxu1 }
 0x41d   :  { %v3998_v35 = vadd.f32 %v3980_v49, %v3848_v60  ;;  %v9637_v9 = vpop.f32.mrb[255].mxu1 }
 0x422   :  { %v3985_v19 = vpop.f32.mrb[0].mxu1 }
 0x423   :  { %v3999_v34 = vadd.f32 %v3985_v19, %v3849_v44  ;;  %v9640_v28 = vpop.f32.mrb[1].mxu1 }
 0x424   :  { %v3988_v16 = vpop.f32.mrb[2].mxu1 }
 0x425   :  { %v9641_v20 = vpop.f32.mrb[3].mxu1 }
 0x42a   :  { %v4122_v5 = vpop.f32.mrb[4].mxu1 }
 0x42b   :  { %v4160_v24 = vadd.f32 %v4122_v5, %v3991_v29  ;;  %v9660_v32 = vpop.f32.mrb[5].mxu1 }
 0x42c   :  { %v4125_v33 = vpop.f32.mrb[6].mxu1 }
 0x42d   :  { %v4161_v51 = vadd.f32 %v4125_v33, %v3992_v22  ;;  %v9661_v59 = vpop.f32.mrb[7].mxu1 }
 0x432   :  { %v4130_v62 = vpop.f32.mrb[8].mxu1 }
 0x433   :  { %v4162_v14 = vadd.f32 %v4130_v62, %v3993_v50  ;;  %v9664_v57 = vpop.f32.mrb[9].mxu1 }
 0x434   :  { %v4133_v1 = vpop.f32.mrb[10].mxu1 }
 0x435   :  { %v4163_v31 = vadd.f32 %v4133_v1, %v3994_v11  ;;  %v9665_v7 = vpop.f32.mrb[11].mxu1 }
 0x43a   :  { %v4138_v56 = vpop.f32.mrb[12].mxu1 }
 0x43b   :  { %v4164_v36 = vadd.f32 %v4138_v56, %v3995_v47  ;;  %v9668_v40 = vpop.f32.mrb[13].mxu1 }
 0x43c   :  { %v4141_v27 = vpop.f32.mrb[14].mxu1 }
 0x43d   :  { %v4165_v30 = vadd.f32 %v4141_v27, %v3996_v3  ;;  %v9669_v58 = vpop.f32.mrb[15].mxu1  ;;  %v10856_v27 = vld [vmem:[%s14311_s6 + $0xc8] sm:$0xff]  }
 0x442   :  { %v4146_v45 = vpop.f32.mrb[16].mxu1 }
 0x443   :  { %v4166_v55 = vadd.f32 %v4146_v45, %v3997_v12  ;;  %v9672_v38 = vpop.f32.mrb[17].mxu1 }
 0x444   :  { %v4149_v17 = vpop.f32.mrb[18].mxu1  ;;  %v10858_v38 = vld [vmem:[%s14311_s6 + $0xd0] sm:$0xff]  }
 0x445   :  { %v4167_v23 = vadd.f32 %v4149_v17, %v3998_v35  ;;  %v9673_v25 = vpop.f32.mrb[19].mxu1 }
 0x44a   :  { %v4154_v60 = vpop.f32.mrb[20].mxu1 }
 0x44b   :  { %v4168_v21 = vadd.f32 %v4154_v60, %v3999_v34  ;;  %v9676_v2 = vpop.f32.mrb[21].mxu1  ;;  %v13111_v34 = vld [vmem:[%s14312_s5] ss:$0 sm:$0xff] }
 0x44c   :  { %v4157_v52 = vpop.f32.mrb[22].mxu1 }
 0x44d   :  { %v9677_v44 = vpop.f32.mrb[23].mxu1 }
 0x44e   :  { %v10860_v44 = vld [vmem:[%s14311_s6 + $0xd8] sm:$0xff]  }
 0x452   :  { %v4272_v61 = vpop.f32.mrb[24].mxu1 }
 0x453   :  { %v4310_v26 = vadd.f32 %v4272_v61, %v4160_v24  ;;  %v9696_v13 = vpop.f32.mrb[25].mxu1 }
 0x454   :  { %v4275_v15 = vpop.f32.mrb[26].mxu1 }
 0x455   :  { %v4311_v46 = vadd.f32 %v4275_v15, %v4161_v51  ;;  %v9697_v41 = vpop.f32.mrb[27].mxu1 }
 0x45a   :  { %v4280_v29 = vpop.f32.mrb[28].mxu1 }
 0x45b   :  { %v4312_v4 = vadd.f32 %v4280_v29, %v4162_v14  ;;  %v9700_v42 = vpop.f32.mrb[29].mxu1  ;;  %v10854_v14 = vld [vmem:[%s14311_s6 + $0xc0] sm:$0xff]  }
 0x45c   :  { %v4283_v22 = vpop.f32.mrb[30].mxu1 }
 0x45d   :  { %v4313_v37 = vadd.f32 %v4283_v22, %v4163_v31  ;;  %v9701_v6 = vpop.f32.mrb[31].mxu1 }
 0x462   :  { %v4288_v50 = vpop.f32.mrb[32].mxu1 }
 0x463   :  { %v4314_v0 = vadd.f32 %v4288_v50, %v4164_v36  ;;  %v9704_v63 = vpop.f32.mrb[33].mxu1  ;;  %v10861_v50 = vld [vmem:[%s14311_s6 + $0xe0] sm:$0xff]  }
 0x464   :  { %v4291_v11 = vpop.f32.mrb[34].mxu1  ;;  %v10855_v63 = vld [vmem:[%s14311_s6 + $0x88] sm:$0xff]  }
 0x465   :  { %v4315_v39 = vadd.f32 %v4291_v11, %v4165_v30  ;;  %v9705_v43 = vpop.f32.mrb[35].mxu1 }
 0x46a   :  { %v4296_v47 = vpop.f32.mrb[36].mxu1 }
 0x46b   :  { %v13102_v10 = vadd.f32 %v4296_v47, %v4166_v55  ;;  %v9708_v48 = vpop.f32.mrb[37].mxu1 }
 0x46c   :  { %v4299_v3 = vpop.f32.mrb[38].mxu1 }
 0x46d   :  { %v13104_v53 = vadd.f32 %v4299_v3, %v4167_v23  ;;  %v9709_v18 = vpop.f32.mrb[39].mxu1 }
 0x472   :  { %v4304_v12 = vpop.f32.mrb[40].mxu1 }
 0x473   :  { %v13106_v8 = vadd.f32 %v4304_v12, %v4168_v21  ;;  %v9712_v49 = vpop.f32.mrb[41].mxu1 }
 0x474   :  { %v4307_v35 = vpop.f32.mrb[42].mxu1 }
 0x475   :  { %v9713_v9 = vpop.f32.mrb[43].mxu1 }
 0x476   :  { %v10863_v9 = vld [vmem:[%s14311_s6 + $0xe8] sm:$0xff]  }
 0x47a   :  { %v4441_v19 = vpop.f32.mrb[44].mxu1 }
 0x47b   :  { %v4479_v28 = vadd.f32 %v4441_v19, %v4310_v26  ;;  %v9732_v16 = vpop.f32.mrb[45].mxu1 }
 0x47c   :  { %v4444_v20 = vpop.f32.mrb[46].mxu1 }
 0x47d   :  { %v4495_v5 = vadd.f32 %v13111_v34, %v4479_v28  ;;  %v4480_v24 = vadd.f32 %v4444_v20, %v4311_v46  ;;  %v9733_v32 = vpop.f32.mrb[47].mxu1  ;;  %v10853_v46 = vld [vmem:[%s14311_s6 + $0x80] sm:$0xff]  }
 0x47f   :  { %v4504_v33 = vmax.f32 %v4495_v5, 0.0  ;;  %v4496_v51 = vadd.f32 %v13111_v34, %v4480_v24  ;;  %v10859_v5 = vld [vmem:[%s14311_s6 + $0x98] sm:$0xff]  }
 0x481   :  { %4513 = vst [vmem:[#allocation3] sm:$0xff] %v4504_v33  ;;  %v4505_v59 = vmax.f32 %v4496_v51, 0.0 }
 0x482   :  { %v4449_v62 = vpop.f32.mrb[48].mxu1 }
 0x483   :  { %4514 = vst [vmem:[#allocation3 + $0x8] sm:$0xff] %v4505_v59  ;;  %v4535_v57 = vpack.c.bf16 %v4505_v59, %v4504_v33  ;;  %v4481_v1 = vadd.f32 %v4449_v62, %v4312_v4  ;;  %v9736_v31 = vpop.f32.mrb[49].mxu1  ;;  %v10862_v59 = vld [vmem:[%s14311_s6 + $0xa0] sm:$0xff]  }
 0x484   :  { %v4452_v7 = vpop.f32.mrb[50].mxu1  ;;  %v10864_v31 = vld [vmem:[%s14311_s6 + $0xa8] sm:$0xff]  }
 0x485   :  { %v4497_v56 = vadd.f32 %v13111_v34, %v4481_v1  ;;  %v4482_v36 = vadd.f32 %v4452_v7, %v4313_v37  ;;  %v9737_v40 = vpop.f32.mrb[51].mxu1  ;;  %9803 = vmatmul.mubr.bf16.vlgmr.msra.gmra.mrb[64].mxu1 %v4535_v57  ;;  %v10866_v7 = vld [vmem:[%s14311_s6 + $0xb0] sm:$0xff]  }
 0x486   :  { %9806 = vmatprep.mubr.msk.bf16.mxu1 %vm11081_vm0, %v12844_v54  ;;  %9859 = vmatpush3.bf16.msra.mxu1 %v10854_v14  ;;  %v13227_v14 = vld [vmem:[#allocation3 + $0x48] sm:$0xff] }
 0x487   :  { %v4506_v30 = vmax.f32 %v4497_v56, 0.0  ;;  %v4498_v58 = vadd.f32 %v13111_v34, %v4482_v36  ;;  %9860 = vmatprep.subr.bf16.mxu1 %v12844_v54 }
 0x489   :  { %4515 = vst [vmem:[#allocation3 + $0x10] sm:$0xff] %v4506_v30  ;;  %v13126_v45 = vmax.f32 %v4498_v58, 0.0  ;;  %v10870_v58 = vld [vmem:[%s14311_s6 + $0x140] sm:$0xff]  }
 0x48a   :  { %v4457_v55 = vpop.f32.mrb[52].mxu1  ;;  %9861 = vmatpush3.bf16.msra.mxu1 %v10856_v27  ;;  %v4556_v13 = vld [vmem:[#allocation3 + $0x2] sm:$0xff] }
 0x48b   :  { %4516 = vst [vmem:[#allocation3 + $0x18] sm:$0xff] %v13126_v45  ;;  %v13133_v17 = vpack.c.bf16 %v13126_v45, %v4506_v30  ;;  %v4483_v23 = vadd.f32 %v4457_v55, %v4314_v0  ;;  %v9740_v25 = vpop.f32.mrb[53].mxu1  ;;  %9862 = vmatprep.subr.bf16.mxu1 %v12844_v54 }
 0x48c   :  { %v4460_v60 = vpop.f32.mrb[54].mxu1  ;;  %v10872_v25 = vld [vmem:[%s14311_s6 + $0x148] sm:$0xff]  }
 0x48d   :  { %v4499_v21 = vadd.f32 %v13111_v34, %v4483_v23  ;;  %v4484_v2 = vadd.f32 %v4460_v60, %v4315_v39  ;;  %v9741_v52 = vpop.f32.mrb[55].mxu1  ;;  %9807 = vmatmul.mubr.bf16.gmra.mrb[68].mxu1 %v13133_v17 }
 0x48e   :  { %9810 = vmatprep.mubr.msk.bf16.mxu1 %vm11081_vm0, %v12844_v54  ;;  %9863 = vmatpush3.bf16.msra.mxu1 %v10858_v38  ;;  %v10868_v38 = vld [vmem:[%s14311_s6 + $0xb8] sm:$0xff]   ;;  %v10874_v52 = vld [vmem:[%s14311_s6 + $0x150] sm:$0xff]  }
 0x48f   :  { %v13143_v61 = vmax.f32 %v4499_v21, 0.0  ;;  %v4500_v26 = vadd.f32 %v13111_v34, %v4484_v2  ;;  %9864 = vmatprep.subr.bf16.mxu1 %v12844_v54 }
 0x490   :  { %v4557_v15 = vld [vmem:[#allocation3 + $0xa] sm:$0xff] }
 0x491   :  { %v4565_v41 = vpack.c.bf16 %v4557_v15, %v4556_v13  ;;  %4517 = vst [vmem:[#allocation3 + $0x20] sm:$0xff] %v13143_v61  ;;  %v5471_v29 = vpack.c.bf16 %v13143_v61, %v13126_v45  ;;  %v13153_v4 = vmax.f32 %v4500_v26, 0.0  ;;  %v4827_v30 = vld [vmem:[#allocation3 + $0xc] sm:$0xff]  ;;  %v10876_v26 = vld [vmem:[%s14311_s6 + $0x158] sm:$0xff]   ;;  %v4826_v13 = vld [vmem:[#allocation3 + $0x4] sm:$0xff] }
 0x492   :  { %v4465_v42 = vpop.f32.mrb[56].mxu1  ;;  %9865 = vmatpush3.bf16.msra.mxu1 %v10860_v44  ;;  %v4558_v3 = vld [vmem:[#allocation3 + $0x12] sm:$0xff]  ;;  %v10869_v15 = vld [vmem:[%s14311_s6 + $0x100] sm:$0xff]  }
 0x493   :  { %4518 = vst [vmem:[#allocation3 + $0x28] sm:$0xff] %v13153_v4  ;;  %v4485_v22 = vadd.f32 %v4465_v42, %v13102_v10  ;;  %v9744_v37 = vpop.f32.mrb[57].mxu1  ;;  %9767 = vmatmul.mubr.bf16.vlgmr.msra.gmra.mrb[32].mxu0 %v4565_v41  ;;  %v13159_v6 = vpack.c.bf16 %v13153_v4, %v13143_v61  ;;  %9866 = vmatprep.subr.bf16.mxu1 %v12844_v54  ;;  %v13250_v56 = vld [vmem:[#allocation3 + $0x14] sm:$0xff] }
 0x494   :  { %9823 = vmatpush3.bf16.msra.mxu0 %v10853_v46  ;;  %v4468_v0 = vpop.f32.mrb[58].mxu1  ;;  %9770 = vmatprep.mubr.msk.bf16.mxu0 %vm11081_vm0, %v12844_v54  ;;  %v4994_v55 = vpack.c.bf16 %v13250_v56, %v4827_v30  ;;  %v4835_v41 = vpack.c.bf16 %v4827_v30, %v4826_v13  ;;  %v10894_v13 = vld [vmem:[%s14311_s6 + $0x1a0] sm:$0xff]   ;;  %v5628_v45 = vld [vmem:[#allocation3 + $0x52] sm:$0xff] }
 0x495   :  { %v4501_v11 = vadd.f32 %v13111_v34, %v4485_v22  ;;  %v4486_v39 = vadd.f32 %v4468_v0, %v13104_v53  ;;  %v9745_v43 = vpop.f32.mrb[59].mxu1  ;;  %9824 = vmatprep.subr.bf16.mxu0 %v12844_v54  ;;  %9811 = vmatmul.mubr.bf16.gmra.mrb[72].mxu1 %v13159_v6  ;;  %v10857_v53 = vld [vmem:[%s14311_s6 + $0x90] sm:$0xff]   ;;  %v10877_v22 = vld [vmem:[%s14311_s6 + $0x160] sm:$0xff]   ;;  %v10879_v0 = vld [vmem:[%s14311_s6 + $0x168] sm:$0xff]  }
 0x496   :  { %9814 = vmatprep.mubr.msk.bf16.mxu1 %vm11081_vm0, %v12844_v54  ;;  %9867 = vmatpush3.bf16.msra.mxu1 %v10861_v50  ;;  %v10871_v50 = vld [vmem:[%s14311_s6 + $0x108] sm:$0xff]   ;;  %v10903_v61 = vld [vmem:[%s14311_s6 + $0x210] sm:$0xff]  }
 0x497   :  { %v13176_v47 = vmax.f32 %v4501_v11, 0.0  ;;  %v4502_v10 = vadd.f32 %v13111_v34, %v4486_v39  ;;  %9868 = vmatprep.subr.bf16.mxu1 %v12844_v54 }
 0x498   :  { %v13179_v48 = vld [vmem:[#allocation3 + $0x1a] sm:$0xff]  ;;  %9825 = vmatpush3.bf16.msra.mxu0 %v10855_v63  ;;  %v10873_v63 = vld [vmem:[%s14311_s6 + $0x110] sm:$0xff]  }
 0x499   :  { %4519 = vst [vmem:[#allocation3 + $0x30] sm:$0xff] %v13176_v47  ;;  %v13186_v18 = vmax.f32 %v4502_v10, 0.0  ;;  %v4566_v12 = vpack.c.bf16 %v13179_v48, %v4558_v3  ;;  %9826 = vmatprep.subr.bf16.mxu0 %v12844_v54  ;;  %v5472_v49 = vpack.c.bf16 %v13176_v47, %v13153_v4  ;;  %v5780_v2 = vld [vmem:[#allocation3 + $0x1c] sm:$0xff]  ;;  %v10881_v10 = vld [vmem:[%s14311_s6 + $0x170] sm:$0xff]  }
 0x49a   :  { %v4473_v35 = vpop.f32.mrb[60].mxu1  ;;  %9869 = vmatpush3.bf16.msra.mxu1 %v10863_v9  ;;  %v13217_v51 = vld [vmem:[#allocation3 + $0x22] sm:$0xff]  ;;  %v4836_v43 = vpack.c.bf16 %v5780_v2, %v13250_v56 }
 0x49b   :  { %4520 = vst [vmem:[#allocation3 + $0x38] sm:$0xff] %v13186_v18  ;;  %v4487_v19 = vadd.f32 %v4473_v35, %v13106_v8  ;;  %v9748_v28 = vpop.f32.mrb[61].mxu1  ;;  %9771 = vmatmul.mubr.bf16.gmra.mrb[36].mxu0 %v4566_v12  ;;  %v13199_v16 = vpack.c.bf16 %v13186_v18, %v13176_v47  ;;  %v10865_v8 = vld [vmem:[%s14311_s6 + $0xf0] sm:$0xff]   ;;  %9870 = vmatprep.subr.bf16.mxu1 %v12844_v54  ;;  %v5781_v60 = vld [vmem:[#allocation3 + $0x24] sm:$0xff]  ;;  %v10883_v35 = vld [vmem:[%s14311_s6 + $0x178] sm:$0xff]  }
 0x49c   :  { %v4476_v20 = vpop.f32.mrb[62].mxu1  ;;  %9827 = vmatpush3.bf16.msra.mxu0 %v10857_v53  ;;  %9774 = vmatprep.mubr.msk.bf16.mxu0 %vm11081_vm0, %v12844_v54  ;;  %v13283_v44 = vpack.c.bf16 %v5781_v60, %v5780_v2  ;;  %v10875_v53 = vld [vmem:[%s14311_s6 + $0x118] sm:$0xff]   ;;  %v13337_v12 = vld [vmem:[#allocation3 + $0x4c] sm:$0xff]  ;;  %v10878_v9 = vld [vmem:[%s14311_s6 + $0x120] sm:$0xff]  }
 0x49d   :  { %v4503_v24 = vadd.f32 %v13111_v34, %v4487_v19  ;;  %v9749_v32 = vpop.f32.mrb[63].mxu1  ;;  %9828 = vmatprep.subr.bf16.mxu0 %v12844_v54  ;;  %9815 = vmatmul.mubr.bf16.gmra.mrb[76].mxu1 %v13199_v16  ;;  %v4998_v28 = vpack.c.bf16 %v13337_v12, %v13337_v12  ;;  %v10880_v20 = vld [vmem:[%s14311_s6 + $0x128] sm:$0xff]   ;;  %v10905_v4 = vld [vmem:[%s14311_s6 + $0x220] sm:$0xff]  }
 0x49e   :  { %9818 = vmatprep.mubr.msk.bf16.mxu1 %vm11081_vm0, %v12844_v54  ;;  %9871 = vmatpush3.bf16.msra.mxu1 %v10865_v8  ;;  %v10867_v54 = vld [vmem:[%s14311_s6 + $0xf8] sm:$0xff]   ;;  %v10886_v32 = vld [vmem:[%s14311_s6 + $0x1c0] sm:$0xff]  }
 0x49f   :  { %v13214_v33 = vmax.f32 %v4503_v24, 0.0  ;;  %9872 = vmatprep.subr.bf16.mxu1 %v13227_v14  ;;  %v10884_v8 = vld [vmem:[%s14311_s6 + $0x138] sm:$0xff]   ;;  %v5147_v30 = vld [vmem:[#allocation3 + $0x26] sm:$0xff] }
 0x4a0   :  { %9829 = vmatpush3.bf16.msra.mxu0 %v10859_v5  ;;  %v13219_v34 = vld [vmem:[#allocation3 + $0x2a] sm:$0xff] }
 0x4a1   :  { %4521 = vst [vmem:[#allocation3 + $0x40] sm:$0xff] %v13214_v33  ;;  %v4567_v62 = vpack.c.bf16 %v13219_v34, %v13217_v51  ;;  %9830 = vmatprep.subr.bf16.mxu0 %v13227_v14  ;;  %v5473_v57 = vpack.c.bf16 %v13214_v33, %v13186_v18  ;;  %v4539_v1 = vpack.c.bf16 %v13214_v33, %v13214_v33  ;;  %v4989_v42 = vld [vmem:[#allocation3 + $0x2c] sm:$0xff] }
 0x4a2   :  { %9873 = vmatpush3.bf16.msra.mxu1 %v10867_v54  ;;  %v13252_v36 = vld [vmem:[#allocation3 + $0x32] sm:$0xff]  ;;  %v4837_v19 = vpack.c.bf16 %v4989_v42, %v5781_v60  ;;  %v5315_v60 = vpack.c.bf16 %v13227_v14, %v13214_v33 }
 0x4a3   :  { %9775 = vmatmul.mubr.bf16.gmra.mrb[40].mxu0 %v4567_v62  ;;  %9930 = vmatprep.subr.bf16.mxu1 %v13227_v14  ;;  %v4990_v46 = vld [vmem:[#allocation3 + $0x34] sm:$0xff] }
 0x4a4   :  { %9831 = vmatpush3.bf16.msra.mxu0 %v10862_v59  ;;  %9778 = vmatprep.mubr.msk.bf16.mxu0 %vm11081_vm0, %v13227_v14  ;;  %v13301_v37 = vpack.c.bf16 %v4990_v46, %v4989_v42  ;;  %v10882_v5 = vld [vmem:[%s14311_s6 + $0x130] sm:$0xff]   ;;  %v10888_v59 = vld [vmem:[%s14311_s6 + $0x1c8] sm:$0xff]   ;;  %v10908_v33 = vld [vmem:[%s14311_s6 + $0x238] sm:$0xff]  }
 0x4a5   :  { %9832 = vmatprep.subr.bf16.mxu0 %v13227_v14  ;;  %9819 = vmatmul.mubr.bf16.gmra.mrb[80].mxu1 %v4539_v1  ;;  %v10890_v54 = vld [vmem:[%s14311_s6 + $0x1d0] sm:$0xff]   ;;  %v10892_v1 = vld [vmem:[%s14311_s6 + $0x1d8] sm:$0xff]  }
 0x4a6   :  { %9874 = vmatprep.mubr.msk.bf16.mxu1 %vm11081_vm0, %v13227_v14  ;;  %v5149_v2 = vld [vmem:[#allocation3 + $0x36] sm:$0xff] }
 0x4a7   :  { %v10907_v18 = vld [vmem:[%s14311_s6 + $0x230] sm:$0xff]  }
 0x4a8   :  { %v13254_v40 = vld [vmem:[#allocation3 + $0x3a] sm:$0xff]  ;;  %9833 = vmatpush3.bf16.msra.mxu0 %v10864_v31  ;;  %v13269_v23 = vld [vmem:[#allocation3 + $0x42] sm:$0xff]  ;;  %v5144_v31 = vld [vmem:[#allocation3 + $0xe] sm:$0xff] }
 0x4a9   :  { %v4568_v27 = vpack.c.bf16 %v13254_v40, %v13252_v36  ;;  %9834 = vmatprep.subr.bf16.mxu0 %v13227_v14  ;;  %v4569_v21 = vpack.c.bf16 %v13269_v23, %v13269_v23  ;;  %v4991_v11 = vld [vmem:[#allocation3 + $0x3c] sm:$0xff]  ;;  %v4992_v39 = vld [vmem:[#allocation3 + $0x44] sm:$0xff] }
 0x4aa   :  { %v13325_v3 = vpack.c.bf16 %v4992_v39, %v4991_v11  ;;  %v4838_v24 = vpack.c.bf16 %v4991_v11, %v4990_v46  ;;  %v4839_v62 = vpack.c.bf16 %v4992_v39, %v4992_v39  ;;  %v13440_v46 = vpack.c.bf16 %v13227_v14, %v13227_v14  ;;  %v5150_v42 = vld [vmem:[#allocation3 + $0x3e] sm:$0xff]  ;;  %v5152_v11 = vld [vmem:[#allocation3 + $0x4e] sm:$0xff] }
 0x4ab   :  { %9779 = vmatmul.mubr.bf16.gmra.mrb[44].mxu0 %v4568_v27  ;;  %v10887_v27 = vld [vmem:[%s14311_s6 + $0x188] sm:$0xff]   ;;  %v10900_v39 = vld [vmem:[%s14311_s6 + $0x1b8] sm:$0xff]  }
 0x4ac   :  { %9835 = vmatpush3.bf16.msra.mxu0 %v10866_v7  ;;  %9782 = vmatprep.mubr.msk.bf16.mxu0 %vm11081_vm0, %v13227_v14  ;;  %v10885_v7 = vld [vmem:[%s14311_s6 + $0x180] sm:$0xff]  }
 0x4ad   :  { %9836 = vmatprep.subr.bf16.mxu0 %v13227_v14  ;;  %9875 = vmatmul.mubr.bf16.vlgmr.msra.gmra.mrb[84].mxu1 %v4994_v55  ;;  %v5146_v55 = vld [vmem:[#allocation3 + $0x1e] sm:$0xff] }
 0x4ae   :  { %9878 = vmatprep.mubr.msk.bf16.mxu1 %vm11081_vm0, %v13227_v14  ;;  %9931 = vmatpush3.bf16.msra.mxu1 %v10870_v58  ;;  %v10895_v58 = vld [vmem:[%s14311_s6 + $0x1e8] sm:$0xff]  }
 0x4af   :  { %9932 = vmatprep.subr.bf16.mxu1 %v13227_v14 }
 0x4b0   :  { %9837 = vmatpush3.bf16.msra.mxu0 %v10868_v38  ;;  %v10889_v38 = vld [vmem:[%s14311_s6 + $0x190] sm:$0xff]  }
 0x4b1   :  { %9894 = vmatprep.subr.bf16.mxu0 %v13227_v14 }
 0x4b2   :  { %9933 = vmatpush3.bf16.msra.mxu1 %v10872_v25  ;;  %v5154_v25 = vpack.c.bf16 %v5147_v30, %v5146_v55 }
 0x4b3   :  { %9783 = vmatmul.mubr.bf16.gmra.mrb[48].mxu0 %v4569_v21  ;;  %9934 = vmatprep.subr.bf16.mxu1 %v13227_v14  ;;  %v10891_v21 = vld [vmem:[%s14311_s6 + $0x198] sm:$0xff]  }
 0x4b4   :  { %9838 = vmatprep.mubr.msk.bf16.mxu0 %vm11081_vm0, %v13227_v14 }
 0x4b5   :  { %9879 = vmatmul.mubr.bf16.gmra.mrb[88].mxu1 %v13283_v44 }
 0x4b6   :  { %9882 = vmatprep.mubr.msk.bf16.mxu1 %vm11081_vm0, %v13227_v14  ;;  %9935 = vmatpush3.bf16.msra.mxu1 %v10874_v52  ;;  %v10899_v52 = vld [vmem:[%s14311_s6 + $0x1f8] sm:$0xff]  }
 0x4b7   :  { %9936 = vmatprep.subr.bf16.mxu1 %v13227_v14 }
 0x4ba   :  { %9937 = vmatpush3.bf16.msra.mxu1 %v10876_v26  ;;  %v5148_v26 = vld [vmem:[#allocation3 + $0x2e] sm:$0xff] }
 0x4bb   :  { %9839 = vmatmul.mubr.bf16.vlgmr.msra.gmra.mrb[52].mxu0 %v4835_v41  ;;  %9938 = vmatprep.subr.bf16.mxu1 %v13227_v14  ;;  %v10896_v41 = vld [vmem:[%s14311_s6 + $0x1a8] sm:$0xff]  }
 0x4bc   :  { %9895 = vmatpush3.bf16.msra.mxu0 %v10869_v15  ;;  %9842 = vmatprep.mubr.msk.bf16.mxu0 %vm11081_vm0, %v13227_v14  ;;  %v5155_v15 = vpack.c.bf16 %v5149_v2, %v5148_v26  ;;  %v10913_v2 = vld [vmem:[%s14313_s8 + $0x8] sm:$0xff]  }
 0x4bd   :  { %9896 = vmatprep.subr.bf16.mxu0 %v13227_v14  ;;  %9883 = vmatmul.mubr.bf16.gmra.mrb[92].mxu1 %v13301_v37 }
 0x4be   :  { %9886 = vmatprep.mubr.msk.bf16.mxu1 %vm11081_vm0, %v13227_v14  ;;  %9939 = vmatpush3.bf16.msra.mxu1 %v10877_v22  ;;  %v5151_v22 = vld [vmem:[#allocation3 + $0x46] sm:$0xff] }
 0x4bf   :  { %9940 = vmatprep.subr.bf16.mxu1 %v13227_v14 }
 0x4c0   :  { %9897 = vmatpush3.bf16.msra.mxu0 %v10871_v50  ;;  %v10898_v50 = vld [vmem:[%s14311_s6 + $0x1b0] sm:$0xff]  }
 0x4c1   :  { %9898 = vmatprep.subr.bf16.mxu0 %v13227_v14 }
 0x4c2   :  { %9941 = vmatpush3.bf16.msra.mxu1 %v10879_v0  ;;  %v5156_v0 = vpack.c.bf16 %v5151_v22, %v5150_v42 }
 0x4c3   :  { %9843 = vmatmul.mubr.bf16.gmra.mrb[56].mxu0 %v4836_v43  ;;  %9942 = vmatprep.subr.bf16.mxu1 %v13227_v14  ;;  %v5157_v43 = vpack.c.bf16 %v5152_v11, %v5152_v11 }
 0x4c4   :  { %9899 = vmatpush3.bf16.msra.mxu0 %v10873_v63  ;;  %9846 = vmatprep.mubr.msk.bf16.mxu0 %vm11081_vm0, %v13227_v14  ;;  %v5630_v63 = vpack.c.bf16 %v13217_v51, %v13179_v48  ;;  %v5631_v48 = vpack.c.bf16 %v13252_v36, %v13219_v34  ;;  %v10901_v51 = vld [vmem:[%s14311_s6 + $0x200] sm:$0xff]   ;;  %v10902_v34 = vld [vmem:[%s14311_s6 + $0x208] sm:$0xff]  }
 0x4c5   :  { %9900 = vmatprep.subr.bf16.mxu0 %v13227_v14  ;;  %9887 = vmatmul.mubr.bf16.gmra.mrb[96].mxu1 %v13325_v3  ;;  %v5627_v36 = vld [vmem:[#allocation3 + $0x4a] sm:$0xff] }
 0x4c6   :  { %9890 = vmatprep.mubr.msk.bf16.mxu1 %vm11081_vm0, %v13227_v14  ;;  %9943 = vmatpush3.bf16.msra.mxu1 %v10881_v10  ;;  %v5632_v10 = vpack.c.bf16 %v13269_v23, %v13254_v40  ;;  %v10904_v40 = vld [vmem:[%s14311_s6 + $0x218] sm:$0xff]  }
 0x4c7   :  { %9944 = vmatprep.subr.bf16.mxu1 %v13227_v14  ;;  %v5629_v23 = vld [vmem:[#allocation3 + $0x5a] sm:$0xff] }
 0x4c8   :  { %9901 = vmatpush3.bf16.msra.mxu0 %v10875_v53  ;;  %v5634_v47 = vpack.c.bf16 %v5629_v23, %v5629_v23 }
 0x4c9   :  { %9902 = vmatprep.subr.bf16.mxu0 %v13227_v14 }
 0x4ca   :  { %9945 = vmatpush3.bf16.msra.mxu1 %v10883_v35 }
 0x4cb   :  { %9847 = vmatmul.mubr.bf16.gmra.mrb[60].mxu0 %v4837_v19  ;;  %10002 = vmatprep.subr.bf16.mxu1 %v13227_v14 }
 0x4cc   :  { %9903 = vmatpush3.bf16.msra.mxu0 %v10878_v9  ;;  %9850 = vmatprep.mubr.msk.bf16.mxu0 %vm11081_vm0, %v13227_v14 }
 0x4cd   :  { %9904 = vmatprep.subr.bf16.mxu0 %v13227_v14  ;;  %9891 = vmatmul.mubr.bf16.gmra.mrb[100].mxu1 %v4998_v28 }
 0x4ce   :  { %9946 = vmatprep.mubr.msk.bf16.mxu1 %vm11081_vm0, %v13227_v14 }
 0x4d0   :  { %9905 = vmatpush3.bf16.msra.mxu0 %v10880_v20 }
 0x4d1   :  { %9906 = vmatprep.subr.bf16.mxu0 %v13227_v14 }
 0x4d3   :  { %9851 = vmatmul.mubr.bf16.gmra.mrb[64].mxu0 %v4838_v24 }
 0x4d4   :  { %9907 = vmatpush3.bf16.msra.mxu0 %v10882_v5  ;;  %9854 = vmatprep.mubr.msk.bf16.mxu0 %vm11081_vm0, %v13227_v14 }
 0x4d5   :  { %9908 = vmatprep.subr.bf16.mxu0 %v13227_v14  ;;  %9947 = vmatmul.mubr.bf16.vlgmr.msra.gmra.mrb[104].mxu1 %v13133_v17  ;;  %v5145_v17 = vld [vmem:[#allocation3 + $0x16] sm:$0xff] }
 0x4d6   :  { %9950 = vmatprep.mubr.msk.bf16.mxu1 %vm11081_vm0, %v13227_v14  ;;  %10003 = vmatpush3.bf16.msra.mxu1 %v10886_v32  ;;  %v5153_v56 = vpack.c.bf16 %v5145_v17, %v5144_v31 }
 0x4d7   :  { %10004 = vmatprep.subr.bf16.mxu1 %v13227_v14 }
 0x4d8   :  { %9909 = vmatpush3.bf16.msra.mxu0 %v10884_v8 }
 0x4d9   :  { %9966 = vmatprep.subr.bf16.mxu0 %v13227_v14 }
 0x4da   :  { %10005 = vmatpush3.bf16.msra.mxu1 %v10888_v59 }
 0x4db   :  { %9855 = vmatmul.mubr.bf16.gmra.mrb[68].mxu0 %v4839_v62  ;;  %10006 = vmatprep.subr.bf16.mxu1 %v13227_v14 }
 0x4dc   :  { %9910 = vmatprep.mubr.msk.bf16.mxu0 %vm11081_vm0, %v13227_v14 }
 0x4dd   :  { %9951 = vmatmul.mubr.bf16.gmra.mrb[108].mxu1 %v13159_v6  ;;  %v10893_v6 = vld [vmem:[%s14311_s6 + $0x1e0] sm:$0xff]  }
 0x4de   :  { %9954 = vmatprep.mubr.msk.bf16.mxu1 %vm11081_vm0, %v13227_v14  ;;  %10007 = vmatpush3.bf16.msra.mxu1 %v10890_v54 }
 0x4df   :  { %10008 = vmatprep.subr.bf16.mxu1 %v13227_v14 }
 0x4e2   :  { %10009 = vmatpush3.bf16.msra.mxu1 %v10892_v1 }
 0x4e3   :  { %9911 = vmatmul.mubr.bf16.vlgmr.msra.gmra.mrb[72].mxu0 %v5153_v56  ;;  %10010 = vmatprep.subr.bf16.mxu1 %v13227_v14 }
 0x4e4   :  { %9967 = vmatpush3.bf16.msra.mxu0 %v10885_v7  ;;  %9914 = vmatprep.mubr.msk.bf16.mxu0 %vm11081_vm0, %v13227_v14 }
 0x4e5   :  { %9968 = vmatprep.subr.bf16.mxu0 %v13227_v14  ;;  %9955 = vmatmul.mubr.bf16.gmra.mrb[112].mxu1 %v13199_v16  ;;  %v10897_v16 = vld [vmem:[%s14311_s6 + $0x1f0] sm:$0xff]  }
 0x4e6   :  { %9958 = vmatprep.mubr.msk.bf16.mxu1 %vm11081_vm0, %v13227_v14  ;;  %10011 = vmatpush3.bf16.msra.mxu1 %v10893_v6  ;;  %v10911_v6 = vld [vmem:[%s14313_s8] sm:$0xff]  }
 0x4e7   :  { %10012 = vmatprep.subr.bf16.mxu1 %v13227_v14 }
 0x4e8   :  { %9969 = vmatpush3.bf16.msra.mxu0 %v10887_v27 }
 0x4e9   :  { %9970 = vmatprep.subr.bf16.mxu0 %v13227_v14 }
 0x4ea   :  { %10013 = vmatpush3.bf16.msra.mxu1 %v10895_v58 }
 0x4eb   :  { %9915 = vmatmul.mubr.bf16.gmra.mrb[76].mxu0 %v5154_v25  ;;  %10014 = vmatprep.subr.bf16.mxu1 %v13227_v14 }
 0x4ec   :  { %9971 = vmatpush3.bf16.msra.mxu0 %v10889_v38  ;;  %9918 = vmatprep.mubr.msk.bf16.mxu0 %vm11081_vm0, %v13227_v14 }
 0x4ed   :  { %9972 = vmatprep.subr.bf16.mxu0 %v13227_v14  ;;  %9959 = vmatmul.mubr.bf16.gmra.mrb[116].mxu1 %v5315_v60  ;;  %v10909_v60 = vld [vmem:[%s14313_s8 + $0x40] sm:$0xff]  }
 0x4ee   :  { %9962 = vmatprep.mubr.msk.bf16.mxu1 %vm11081_vm0, %v13227_v14  ;;  %10015 = vmatpush3.bf16.msra.mxu1 %v10897_v16 }
 0x4ef   :  { %10016 = vmatprep.subr.bf16.mxu1 %v13227_v14 }
 0x4f0   :  { %9973 = vmatpush3.bf16.msra.mxu0 %v10891_v21 }
 0x4f1   :  { %9974 = vmatprep.subr.bf16.mxu0 %v13227_v14 }
 0x4f2   :  { %10017 = vmatpush3.bf16.msra.mxu1 %v10899_v52 }
 0x4f3   :  { %9919 = vmatmul.mubr.bf16.gmra.mrb[80].mxu0 %v5155_v15  ;;  %10074 = vmatprep.subr.bf16.mxu1 %v13227_v14 }
 0x4f4   :  { %9975 = vmatpush3.bf16.msra.mxu0 %v10894_v13  ;;  %9922 = vmatprep.mubr.msk.bf16.mxu0 %vm11081_vm0, %v13227_v14  ;;  %v10914_v13 = vld [vmem:[%s14313_s8 + $0x10] sm:$0xff]  }
 0x4f5   :  { %9976 = vmatprep.subr.bf16.mxu0 %v13227_v14  ;;  %9963 = vmatmul.mubr.bf16.gmra.mrb[120].mxu1 %v13440_v46 }
 0x4f6   :  { %10018 = vmatprep.mubr.msk.bf16.mxu1 %vm11081_vm0, %v13227_v14 }
 0x4f8   :  { %9977 = vmatpush3.bf16.msra.mxu0 %v10896_v41  ;;  %v10910_v41 = vld [vmem:[%s14313_s8 + $0x48] sm:$0xff]  }
 0x4f9   :  { %9978 = vmatprep.subr.bf16.mxu0 %v13227_v14 }
 0x4fb   :  { %9923 = vmatmul.mubr.bf16.gmra.mrb[84].mxu0 %v5156_v0 }
 0x4fc   :  { %9979 = vmatpush3.bf16.msra.mxu0 %v10898_v50  ;;  %9926 = vmatprep.mubr.msk.bf16.mxu0 %vm11081_vm0, %v13227_v14 }
 0x4fd   :  { %9980 = vmatprep.subr.bf16.mxu0 %v13227_v14  ;;  %10019 = vmatmul.mubr.bf16.vlgmr.msra.gmra.mrb[124].mxu1 %v5630_v63 }
 0x4fe   :  { %10022 = vmatprep.mubr.msk.bf16.mxu1 %vm11081_vm0, %v13227_v14  ;;  %10075 = vmatpush3.bf16.msra.mxu1 %v10909_v60 }
 0x4ff   :  { %10076 = vmatprep.subr.bf16.mxu1 %v13227_v14 }
 0x500   :  { %9981 = vmatpush3.bf16.msra.mxu0 %v10900_v39  ;;  %v10916_v39 = vld [vmem:[%s14313_s8 + $0x18] sm:$0xff]  }
 0x501   :  { %10038 = vmatprep.subr.bf16.mxu0 %v13227_v14 }
 0x502   :  { %10077 = vmatpush3.bf16.msra.mxu1 %v10910_v41 }
 0x503   :  { %9927 = vmatmul.mubr.bf16.gmra.mrb[88].mxu0 %v5157_v43  ;;  %10078 = vmatprep.subr.bf16.mxu1 %v13227_v14 }
 0x504   :  { %9982 = vmatprep.mubr.msk.bf16.mxu0 %vm11081_vm0, %v13227_v14 }
 0x505   :  { %10023 = vmatmul.mubr.bf16.gmra.mrb[128].mxu1 %v5631_v48  ;;  %v10912_v48 = vld [vmem:[%s14313_s8 + $0x50] sm:$0xff]  }
 0x506   :  { %10026 = vmatprep.mubr.msk.bf16.mxu1 %vm11081_vm0, %v13227_v14  ;;  %10079 = vmatpush3.bf16.msra.mxu1 %v10912_v48 }
 0x507   :  { %10080 = vmatprep.subr.bf16.mxu1 %v13227_v14 }
 0x50b   :  { %9983 = vmatmul.mubr.bf16.vlgmr.msra.gmra.mrb[92].mxu0 %v5471_v29  ;;  %v5633_v29 = vpack.c.bf16 %v5628_v45, %v5627_v36 }
 0x50c   :  { %10039 = vmatpush3.bf16.msra.mxu0 %v10901_v51  ;;  %9986 = vmatprep.mubr.msk.bf16.mxu0 %vm11081_vm0, %v13227_v14 }
 0x50d   :  { %10040 = vmatprep.subr.bf16.mxu0 %v13227_v14  ;;  %10027 = vmatmul.mubr.bf16.gmra.mrb[132].mxu1 %v5632_v10  ;;  %v10918_v10 = vld [vmem:[%s14313_s8 + $0x20] sm:$0xff]  }
 0x50e   :  { %10030 = vmatprep.mubr.msk.bf16.mxu1 %vm11081_vm0, %v13227_v14 }
 0x510   :  { %10041 = vmatpush3.bf16.msra.mxu0 %v10902_v34 }
 0x511   :  { %10042 = vmatprep.subr.bf16.mxu0 %v13227_v14 }
 0x513   :  { %9987 = vmatmul.mubr.bf16.gmra.mrb[96].mxu0 %v5472_v49  ;;  %v10906_v49 = vld [vmem:[%s14311_s6 + $0x228] sm:$0xff]  }
 0x514   :  { %10043 = vmatpush3.bf16.msra.mxu0 %v10903_v61  ;;  %9990 = vmatprep.mubr.msk.bf16.mxu0 %vm11081_vm0, %v13227_v14 }
 0x515   :  { %10044 = vmatprep.subr.bf16.mxu0 %v13227_v14  ;;  %10031 = vmatmul.mubr.bf16.gmra.mrb[136].mxu1 %v5633_v29 }
 0x516   :  { %10034 = vmatprep.mubr.msk.bf16.mxu1 %vm11081_vm0, %v13227_v14 }
 0x518   :  { %10045 = vmatpush3.bf16.msra.mxu0 %v10904_v40 }
 0x519   :  { %10046 = vmatprep.subr.bf16.mxu0 %v13227_v14 }
 0x51b   :  { %9991 = vmatmul.mubr.bf16.gmra.mrb[100].mxu0 %v5473_v57  ;;  %v5787_v57 = vld [vmem:[#allocation3 + $0x54] sm:$0xff] }
 0x51c   :  { %10047 = vmatpush3.bf16.msra.mxu0 %v10905_v4  ;;  %9994 = vmatprep.mubr.msk.bf16.mxu0 %vm11081_vm0, %v13227_v14  ;;  %v5792_v53 = vpack.c.bf16 %v5787_v57, %v13337_v12  ;;  %v10915_v4 = vld [vmem:[%s14313_s8 + $0x58] sm:$0xff]  }
 0x51d   :  { %10048 = vmatprep.subr.bf16.mxu0 %v13227_v14  ;;  %10035 = vmatmul.mubr.bf16.gmra.mrb[140].mxu1 %v5634_v47 }
 0x51e   :  { %10090 = vmatprep.mubr.msk.bf16.mxu1 %vm11081_vm0, %v13227_v14  ;;  %10081 = vmatpush3.bf16.msra.mxu1 %v10915_v4 }
 0x51f   :  { %10082 = vmatprep.subr.bf16.mxu1 %v13227_v14 }
 0x520   :  { %10049 = vmatpush3.bf16.msra.mxu0 %v10906_v49  ;;  %v10920_v49 = vld [vmem:[%s14313_s8 + $0x28] sm:$0xff]  }
 0x521   :  { %10050 = vmatprep.subr.bf16.mxu0 %v13227_v14 }
 0x523   :  { %9995 = vmatmul.mubr.bf16.gmra.mrb[104].mxu0 %v13440_v46 }
 0x524   :  { %10051 = vmatpush3.bf16.msra.mxu0 %v10907_v18  ;;  %9998 = vmatprep.mubr.msk.bf16.mxu0 %vm11081_vm0, %v13227_v14 }
 0x525   :  { %10052 = vmatprep.subr.bf16.mxu0 %v13227_v14 }
 0x528   :  { %10053 = vmatpush3.bf16.msra.mxu0 %v10908_v33  ;;  %v10917_v33 = vld [vmem:[%s14313_s8 + $0x60] sm:$0xff]  }
 0x529   :  { %10094 = vmatprep.subr.bf16.mxu0 %v13227_v14  ;;  %10083 = vmatpush3.bf16.msra.mxu1 %v10917_v33 }
 0x52a   :  { %10084 = vmatprep.subr.bf16.mxu1 %v13227_v14 }
 0x52b   :  { %9999 = vmatmul.mubr.bf16.gmra.mrb[108].mxu0 %v13440_v46 }
 0x52c   :  { %10054 = vmatprep.mubr.msk.bf16.mxu0 %vm11081_vm0, %v13227_v14 }
 0x533   :  { %10055 = vmatmul.mubr.bf16.vlgmr.msra.gmra.mrb[112].mxu0 %v13283_v44  ;;  %v5788_v44 = vld [vmem:[#allocation3 + $0x5c] sm:$0xff] }
 0x534   :  { %10058 = vmatprep.mubr.msk.bf16.mxu0 %vm11081_vm0, %v13227_v14  ;;  %v5793_v35 = vpack.c.bf16 %v5788_v44, %v5788_v44  ;;  %10095 = vmatpush3.bf16.msra.mxu0 %v10911_v6 }
 0x535   :  { %10096 = vmatprep.subr.bf16.mxu0 %v13227_v14 }
 0x538   :  { %10097 = vmatpush3.bf16.msra.mxu0 %v10913_v2 }
 0x539   :  { %10098 = vmatprep.subr.bf16.mxu0 %v13227_v14 }
 0x53b   :  { %10059 = vmatmul.mubr.bf16.gmra.mrb[116].mxu0 %v13301_v37 }
 0x53c   :  { %10062 = vmatprep.mubr.msk.bf16.mxu0 %vm11081_vm0, %v13227_v14  ;;  %10099 = vmatpush3.bf16.msra.mxu0 %v10914_v13 }
 0x53d   :  { %10100 = vmatprep.subr.bf16.mxu0 %v13227_v14 }
 0x540   :  { %10101 = vmatpush3.bf16.msra.mxu0 %v10916_v39 }
 0x541   :  { %10102 = vmatprep.subr.bf16.mxu0 %v13227_v14 }
 0x543   :  { %10063 = vmatmul.mubr.bf16.gmra.mrb[120].mxu0 %v13325_v3 }
 0x544   :  { %10066 = vmatprep.mubr.msk.bf16.mxu0 %vm11081_vm0, %v13227_v14  ;;  %10103 = vmatpush3.bf16.msra.mxu0 %v10918_v10 }
 0x545   :  { %10104 = vmatprep.subr.bf16.mxu0 %v13227_v14 }
 0x548   :  { %10105 = vmatpush3.bf16.msra.mxu0 %v10920_v49 }
 0x549   :  { %10106 = vmatprep.subr.bf16.mxu0 %v13227_v14 }
 0x54b   :  { %10067 = vmatmul.mubr.bf16.gmra.mrb[124].mxu0 %v5792_v53  ;;  %v10922_v53 = vld [vmem:[%s14313_s8 + $0x30] sm:$0xff]  }
 0x54c   :  { %10070 = vmatprep.mubr.msk.bf16.mxu0 %vm11081_vm0, %v13227_v14  ;;  %10107 = vmatpush3.bf16.msra.mxu0 %v10922_v53 }
 0x54d   :  { %10108 = vmatprep.subr.bf16.mxu0 %v13227_v14 }
 0x553   :  { %10071 = vmatmul.mubr.bf16.gmra.mrb[128].mxu0 %v5793_v35 }
 0x554   :  { %10110 = vmatprep.mubr.msk.bf16.mxu0 %vm11081_vm0, %v13227_v14 }
 0x558   :  { %v4788_v37 = vpop.f32.mrb[64].mxu1 }
 0x559   :  { %v9804_v9 = vpop.f32.mrb[65].mxu1 }
 0x55a   :  { %v4791_v19 = vpop.f32.mrb[66].mxu1 }
 0x55b   :  { %v9805_v3 = vpop.f32.mrb[67].mxu1 }
 0x560   :  { %v4796_v28 = vpop.f32.mrb[68].mxu1 }
 0x561   :  { %v9808_v20 = vpop.f32.mrb[69].mxu1 }
 0x562   :  { %v4799_v5 = vpop.f32.mrb[70].mxu1  ;;  %v10923_v20 = vld [vmem:[%s14313_s8 + $0x38] sm:$0xff]  }
 0x563   :  { %v9809_v24 = vpop.f32.mrb[71].mxu1  ;;  %10109 = vmatpush3.bf16.msra.mxu0 %v10923_v20 }
 0x564   :  { %v10919_v24 = vld [vmem:[%s14313_s8 + $0x68] sm:$0xff]   ;;  %10134 = vmatprep.subr.bf16.mxu0 %v13227_v14 }
 0x565   :  { %10085 = vmatpush3.bf16.msra.mxu1 %v10919_v24 }
 0x566   :  { %v4668_v32 = vpop.f32.mrb[32].mxu0  ;;  %10086 = vmatprep.subr.bf16.mxu1 %v13227_v14 }
 0x567   :  { %v13548_v12 = vadd.f32 %v4788_v37, %v4668_v32  ;;  %v9768_v8 = vpop.f32.mrb[33].mxu0 }
 0x568   :  { %v4671_v59 = vpop.f32.mrb[34].mxu0  ;;  %v4804_v62 = vpop.f32.mrb[72].mxu1 }
 0x569   :  { %v13550_v54 = vadd.f32 %v4791_v19, %v4671_v59  ;;  %v9769_v17 = vpop.f32.mrb[35].mxu0  ;;  %v9812_v1 = vpop.f32.mrb[73].mxu1 }
 0x56a   :  { %v4807_v31 = vpop.f32.mrb[74].mxu1  ;;  %v10921_v1 = vld [vmem:[%s14313_s8 + $0x70] sm:$0xff]  }
 0x56b   :  { %v9813_v7 = vpop.f32.mrb[75].mxu1  ;;  %10087 = vmatpush3.bf16.msra.mxu1 %v10921_v1 }
 0x56c   :  { %10088 = vmatprep.subr.bf16.mxu1 %v13227_v14 }
 0x56e   :  { %v4676_v56 = vpop.f32.mrb[36].mxu0 }
 0x56f   :  { %v13555_v27 = vadd.f32 %v4796_v28, %v4676_v56  ;;  %v9772_v30 = vpop.f32.mrb[37].mxu0 }
 0x570   :  { %v4679_v58 = vpop.f32.mrb[38].mxu0  ;;  %v4812_v55 = vpop.f32.mrb[76].mxu1 }
 0x571   :  { %v13557_v38 = vadd.f32 %v4799_v5, %v4679_v58  ;;  %v9773_v25 = vpop.f32.mrb[39].mxu0  ;;  %v9816_v16 = vpop.f32.mrb[77].mxu1 }
 0x572   :  { %v4815_v21 = vpop.f32.mrb[78].mxu1 }
 0x573   :  { %v9817_v52 = vpop.f32.mrb[79].mxu1 }
 0x576   :  { %v4684_v26 = vpop.f32.mrb[40].mxu0 }
 0x577   :  { %v13571_v15 = vadd.f32 %v4804_v62, %v4684_v26  ;;  %v9776_v46 = vpop.f32.mrb[41].mxu0 }
 0x578   :  { %v4687_v42 = vpop.f32.mrb[42].mxu0  ;;  %v4820_v22 = vpop.f32.mrb[80].mxu1 }
 0x579   :  { %v13576_v50 = vadd.f32 %v4807_v31, %v4687_v42  ;;  %v9777_v0 = vpop.f32.mrb[43].mxu0  ;;  %v9820_v63 = vpop.f32.mrb[81].mxu1 }
 0x57a   :  { %v4823_v11 = vpop.f32.mrb[82].mxu1 }
 0x57b   :  { %v9821_v43 = vpop.f32.mrb[83].mxu1 }
 0x57e   :  { %v4692_v51 = vpop.f32.mrb[44].mxu0 }
 0x57f   :  { %v13591_v34 = vadd.f32 %v4812_v55, %v4692_v51  ;;  %v9780_v36 = vpop.f32.mrb[45].mxu0 }
 0x580   :  { %v4695_v45 = vpop.f32.mrb[46].mxu0  ;;  %v5097_v61 = vpop.f32.mrb[84].mxu1 }
 0x581   :  { %v13593_v29 = vadd.f32 %v4815_v21, %v4695_v45  ;;  %v9781_v40 = vpop.f32.mrb[47].mxu0  ;;  %v9876_v23 = vpop.f32.mrb[85].mxu1 }
 0x582   :  { %v5100_v47 = vpop.f32.mrb[86].mxu1 }
 0x583   :  { %v9877_v18 = vpop.f32.mrb[87].mxu1 }
 0x586   :  { %v4700_v57 = vpop.f32.mrb[48].mxu0 }
 0x587   :  { %v13610_v44 = vadd.f32 %v4820_v22, %v4700_v57  ;;  %v9784_v35 = vpop.f32.mrb[49].mxu0 }
 0x588   :  { %v4703_v37 = vpop.f32.mrb[50].mxu0  ;;  %v5105_v9 = vpop.f32.mrb[88].mxu1 }
 0x589   :  { %v9785_v19 = vpop.f32.mrb[51].mxu0  ;;  %v9880_v3 = vpop.f32.mrb[89].mxu1 }
 0x58a   :  { %v5108_v28 = vpop.f32.mrb[90].mxu1 }
 0x58b   :  { %v9881_v5 = vpop.f32.mrb[91].mxu1 }
 0x58e   :  { %v4938_v32 = vpop.f32.mrb[52].mxu0 }
 0x58f   :  { %v4976_v8 = vadd.f32 %v4938_v32, %v13548_v12  ;;  %v9840_v59 = vpop.f32.mrb[53].mxu0  ;;  %v10924_v12 = vld [vmem:[%s14313_s8 + $0x78] sm:$0xff]  }
 0x590   :  { %v4941_v62 = vpop.f32.mrb[54].mxu0  ;;  %v5113_v17 = vpop.f32.mrb[92].mxu1  ;;  %10089 = vmatpush3.bf16.msra.mxu1 %v10924_v12 }
 0x591   :  { %v4977_v31 = vadd.f32 %v4941_v62, %v13550_v54  ;;  %v9841_v7 = vpop.f32.mrb[55].mxu0  ;;  %v9884_v56 = vpop.f32.mrb[93].mxu1  ;;  %v5135_v6 = vadd.f32 %v5097_v61, %v4976_v8  ;;  %10114 = vmatprep.subr.bf16.mxu1 %v13227_v14 }
 0x592   :  { %v5116_v30 = vpop.f32.mrb[94].mxu1 }
 0x593   :  { %v9885_v58 = vpop.f32.mrb[95].mxu1  ;;  %v5136_v55 = vadd.f32 %v5100_v47, %v4977_v31 }
 0x596   :  { %v4946_v25 = vpop.f32.mrb[56].mxu0 }
 0x597   :  { %v4978_v16 = vadd.f32 %v4946_v25, %v13555_v27  ;;  %v9844_v60 = vpop.f32.mrb[57].mxu0 }
 0x598   :  { %v4949_v54 = vpop.f32.mrb[58].mxu0  ;;  %v5121_v21 = vpop.f32.mrb[96].mxu1 }
 0x599   :  { %v4979_v2 = vadd.f32 %v4949_v54, %v13557_v38  ;;  %v9845_v52 = vpop.f32.mrb[59].mxu0  ;;  %v9888_v26 = vpop.f32.mrb[97].mxu1  ;;  %v5137_v13 = vadd.f32 %v5105_v9, %v4978_v16 }
 0x59a   :  { %v5124_v46 = vpop.f32.mrb[98].mxu1 }
 0x59b   :  { %v9889_v41 = vpop.f32.mrb[99].mxu1  ;;  %v5138_v42 = vadd.f32 %v5108_v28, %v4979_v2 }
 0x59e   :  { %v4954_v22 = vpop.f32.mrb[60].mxu0 }
 0x59f   :  { %v4980_v0 = vadd.f32 %v4954_v22, %v13571_v15  ;;  %v9848_v63 = vpop.f32.mrb[61].mxu0 }
 0x5a0   :  { %v4957_v11 = vpop.f32.mrb[62].mxu0  ;;  %v5129_v39 = vpop.f32.mrb[100].mxu1 }
 0x5a1   :  { %v4981_v27 = vadd.f32 %v4957_v11, %v13576_v50  ;;  %v9849_v43 = vpop.f32.mrb[63].mxu0  ;;  %v9892_v14 = vpop.f32.mrb[101].mxu1  ;;  %v5139_v48 = vadd.f32 %v5113_v17, %v4980_v0 }
 0x5a2   :  { %v5132_v51 = vpop.f32.mrb[102].mxu1 }
 0x5a3   :  { %v9893_v10 = vpop.f32.mrb[103].mxu1  ;;  %v5140_v38 = vadd.f32 %v5116_v30, %v4981_v27 }
 0x5a6   :  { %v4962_v36 = vpop.f32.mrb[64].mxu0 }
 0x5a7   :  { %v4982_v45 = vadd.f32 %v4962_v36, %v13591_v34  ;;  %v9852_v61 = vpop.f32.mrb[65].mxu0 }
 0x5a8   :  { %v4965_v40 = vpop.f32.mrb[66].mxu0  ;;  %v5415_v23 = vpop.f32.mrb[104].mxu1 }
 0x5a9   :  { %v4983_v4 = vadd.f32 %v4965_v40, %v13593_v29  ;;  %v9853_v15 = vpop.f32.mrb[67].mxu0  ;;  %v9948_v47 = vpop.f32.mrb[105].mxu1  ;;  %v5141_v49 = vadd.f32 %v5121_v21, %v4982_v45 }
 0x5aa   :  { %v5418_v18 = vpop.f32.mrb[106].mxu1 }
 0x5ab   :  { %v9949_v33 = vpop.f32.mrb[107].mxu1  ;;  %v5142_v50 = vadd.f32 %v5124_v46, %v4983_v4 }
 0x5ae   :  { %v4970_v57 = vpop.f32.mrb[68].mxu0 }
 0x5af   :  { %v4984_v53 = vadd.f32 %v4970_v57, %v13610_v44  ;;  %v9856_v35 = vpop.f32.mrb[69].mxu0 }
 0x5b0   :  { %v4973_v37 = vpop.f32.mrb[70].mxu0  ;;  %v5423_v9 = vpop.f32.mrb[108].mxu1 }
 0x5b1   :  { %v9857_v19 = vpop.f32.mrb[71].mxu0  ;;  %v9952_v3 = vpop.f32.mrb[109].mxu1  ;;  %v5143_v34 = vadd.f32 %v5129_v39, %v4984_v53 }
 0x5b2   :  { %v5426_v28 = vpop.f32.mrb[110].mxu1 }
 0x5b3   :  { %v9953_v20 = vpop.f32.mrb[111].mxu1 }
 0x5b6   :  { %v5256_v5 = vpop.f32.mrb[72].mxu0 }
 0x5b7   :  { %v5294_v24 = vadd.f32 %v5256_v5, %v5135_v6  ;;  %v9912_v29 = vpop.f32.mrb[73].mxu0 }
 0x5b8   :  { %v5259_v32 = vpop.f32.mrb[74].mxu0  ;;  %v5431_v8 = vpop.f32.mrb[112].mxu1 }
 0x5b9   :  { %v5295_v59 = vadd.f32 %v5259_v32, %v5136_v55  ;;  %v9913_v62 = vpop.f32.mrb[75].mxu0  ;;  %v9956_v17 = vpop.f32.mrb[113].mxu1  ;;  %v5453_v1 = vadd.f32 %v5415_v23, %v5294_v24 }
 0x5ba   :  { %v5434_v31 = vpop.f32.mrb[114].mxu1 }
 0x5bb   :  { %v9957_v7 = vpop.f32.mrb[115].mxu1  ;;  %v5454_v44 = vadd.f32 %v5418_v18, %v5295_v59 }
 0x5be   :  { %v5264_v56 = vpop.f32.mrb[76].mxu0 }
 0x5bf   :  { %v5296_v30 = vadd.f32 %v5264_v56, %v5137_v13  ;;  %v9916_v58 = vpop.f32.mrb[77].mxu0 }
 0x5c0   :  { %v5267_v12 = vpop.f32.mrb[78].mxu0  ;;  %v5439_v25 = vpop.f32.mrb[116].mxu1 }
 0x5c1   :  { %v5297_v16 = vadd.f32 %v5267_v12, %v5138_v42  ;;  %v9917_v60 = vpop.f32.mrb[79].mxu0  ;;  %v9960_v54 = vpop.f32.mrb[117].mxu1  ;;  %v5455_v21 = vadd.f32 %v5423_v9, %v5296_v30 }
 0x5c2   :  { %v5442_v6 = vpop.f32.mrb[118].mxu1 }
 0x5c3   :  { %v9961_v2 = vpop.f32.mrb[119].mxu1  ;;  %v5456_v52 = vadd.f32 %v5426_v28, %v5297_v16 }
 0x5c6   :  { %v5272_v26 = vpop.f32.mrb[80].mxu0 }
 0x5c7   :  { %v5298_v55 = vadd.f32 %v5272_v26, %v5139_v48  ;;  %v9920_v46 = vpop.f32.mrb[81].mxu0 }
 0x5c8   :  { %v5275_v41 = vpop.f32.mrb[82].mxu0  ;;  %v5447_v22 = vpop.f32.mrb[120].mxu1 }
 0x5c9   :  { %v5299_v0 = vadd.f32 %v5275_v41, %v5140_v38  ;;  %v9921_v63 = vpop.f32.mrb[83].mxu0  ;;  %v9964_v11 = vpop.f32.mrb[121].mxu1  ;;  %v5457_v39 = vadd.f32 %v5431_v8, %v5298_v55 }
 0x5ca   :  { %v5450_v13 = vpop.f32.mrb[122].mxu1 }
 0x5cb   :  { %v9965_v27 = vpop.f32.mrb[123].mxu1  ;;  %v5458_v43 = vadd.f32 %v5434_v31, %v5299_v0 }
 0x5ce   :  { %v5280_v14 = vpop.f32.mrb[84].mxu0 }
 0x5cf   :  { %v5300_v42 = vadd.f32 %v5280_v14, %v5141_v49  ;;  %v9924_v51 = vpop.f32.mrb[85].mxu0 }
 0x5d0   :  { %v5283_v10 = vpop.f32.mrb[86].mxu0  ;;  %v5733_v36 = vpop.f32.mrb[124].mxu1 }
 0x5d1   :  { %v5301_v45 = vadd.f32 %v5283_v10, %v5142_v50  ;;  %v9925_v61 = vpop.f32.mrb[87].mxu0  ;;  %v10020_v40 = vpop.f32.mrb[125].mxu1  ;;  %v5459_v23 = vadd.f32 %v5439_v25, %v5300_v42 }
 0x5d2   :  { %v5736_v48 = vpop.f32.mrb[126].mxu1 }
 0x5d3   :  { %v10021_v4 = vpop.f32.mrb[127].mxu1  ;;  %v5460_v15 = vadd.f32 %v5442_v6, %v5301_v45 }
 0x5d6   :  { %v5288_v47 = vpop.f32.mrb[88].mxu0 }
 0x5d7   :  { %v5302_v38 = vadd.f32 %v5288_v47, %v5143_v34  ;;  %v9928_v18 = vpop.f32.mrb[89].mxu0 }
 0x5d8   :  { %v5291_v33 = vpop.f32.mrb[90].mxu0  ;;  %v5741_v57 = vpop.f32.mrb[128].mxu1 }
 0x5d9   :  { %v9929_v53 = vpop.f32.mrb[91].mxu0  ;;  %v10024_v35 = vpop.f32.mrb[129].mxu1  ;;  %v5461_v37 = vadd.f32 %v5447_v22, %v5302_v38 }
 0x5da   :  { %v5744_v9 = vpop.f32.mrb[130].mxu1  ;;  %v10925_v35 = vld [vmem:[%s14313_s8 + $0xc0] sm:$0xff]  }
 0x5db   :  { %v10025_v49 = vpop.f32.mrb[131].mxu1 }
 0x5de   :  { %v5574_v19 = vpop.f32.mrb[92].mxu0 }
 0x5df   :  { %v5612_v3 = vadd.f32 %v5574_v19, %v5453_v1  ;;  %v9984_v28 = vpop.f32.mrb[93].mxu0 }
 0x5e0   :  { %v5577_v50 = vpop.f32.mrb[94].mxu0  ;;  %v5749_v20 = vpop.f32.mrb[132].mxu1 }
 0x5e1   :  { %v5613_v5 = vadd.f32 %v5577_v50, %v5454_v44  ;;  %v9985_v24 = vpop.f32.mrb[95].mxu0  ;;  %v10028_v29 = vpop.f32.mrb[133].mxu1  ;;  %v5771_v32 = vadd.f32 %v5733_v36, %v5612_v3  ;;  %v10927_v50 = vld [vmem:[%s14313_s8 + $0xc8] sm:$0xff]  }
 0x5e2   :  { %v5752_v8 = vpop.f32.mrb[134].mxu1 }
 0x5e3   :  { %v10029_v59 = vpop.f32.mrb[135].mxu1  ;;  %v5772_v34 = vadd.f32 %v5736_v48, %v5613_v5 }
 0x5e4   :  { %v10929_v59 = vld [vmem:[%s14313_s8 + $0xd0] sm:$0xff]  }
 0x5e6   :  { %v5582_v62 = vpop.f32.mrb[96].mxu0 }
 0x5e7   :  { %v5614_v17 = vadd.f32 %v5582_v62, %v5455_v21  ;;  %v9988_v31 = vpop.f32.mrb[97].mxu0 }
 0x5e8   :  { %v5585_v7 = vpop.f32.mrb[98].mxu0  ;;  %v5757_v56 = vpop.f32.mrb[136].mxu1  ;;  %v10926_v31 = vld [vmem:[%s14313_s8 + $0x80] sm:$0xff]  }
 0x5e9   :  { %v5615_v30 = vadd.f32 %v5585_v7, %v5456_v52  ;;  %v9989_v58 = vpop.f32.mrb[99].mxu0  ;;  %v10032_v12 = vpop.f32.mrb[137].mxu1  ;;  %v5773_v25 = vadd.f32 %v5741_v57, %v5614_v17 }
 0x5ea   :  { %v5760_v1 = vpop.f32.mrb[138].mxu1  ;;  %v10931_v12 = vld [vmem:[%s14313_s8 + $0xd8] sm:$0xff]  }
 0x5eb   :  { %v10033_v16 = vpop.f32.mrb[139].mxu1  ;;  %v5774_v60 = vadd.f32 %v5744_v9, %v5615_v30 }
 0x5ee   :  { %v5590_v54 = vpop.f32.mrb[100].mxu0 }
 0x5ef   :  { %v5616_v44 = vadd.f32 %v5590_v54, %v5457_v39  ;;  %v9992_v6 = vpop.f32.mrb[101].mxu0 }
 0x5f0   :  { %v5593_v2 = vpop.f32.mrb[102].mxu0  ;;  %v5765_v26 = vpop.f32.mrb[140].mxu1  ;;  %v10933_v6 = vld [vmem:[%s14313_s8 + $0xe0] sm:$0xff]  }
 0x5f1   :  { %v5617_v55 = vadd.f32 %v5593_v2, %v5458_v43  ;;  %v9993_v46 = vpop.f32.mrb[103].mxu0  ;;  %v5775_v41 = vadd.f32 %v5749_v20, %v5616_v44  ;;  %v10036_v22 = vpop.f32.mrb[141].mxu1  ;;  %v13660_v20 = vld [vmem:[#allocation3 + $0x48] sm:$0xff] }
 0x5f2   :  { %v5768_v21 = vpop.f32.mrb[142].mxu1 }
 0x5f3   :  { %v13639_v0 = vadd.f32 %v5752_v8, %v5617_v55  ;;  %v10037_v63 = vpop.f32.mrb[143].mxu1  ;;  %v10930_v55 = vld [vmem:[%s14313_s8 + $0x90] sm:$0xff]   ;;  %v10935_v21 = vld [vmem:[%s14313_s8 + $0xe8] sm:$0xff]  }
 0x5f6   :  { %v5598_v52 = vpop.f32.mrb[104].mxu0 }
 0x5f7   :  { %v5618_v11 = vadd.f32 %v5598_v52, %v5459_v23  ;;  %v9996_v13 = vpop.f32.mrb[105].mxu0  ;;  %v13650_v23 = vld [vmem:[%s14314_s7] ss:$0 sm:$0xff] }
 0x5f8   :  { %v5601_v27 = vpop.f32.mrb[106].mxu0 }
 0x5f9   :  { %v5619_v14 = vadd.f32 %v5601_v27, %v5460_v15  ;;  %v13641_v42 = vadd.f32 %v5757_v56, %v5618_v11  ;;  %v9997_v51 = vpop.f32.mrb[107].mxu0  ;;  %v10932_v11 = vld [vmem:[%s14313_s8 + $0x98] sm:$0xff]  }
 0x5fb   :  { %v13643_v39 = vadd.f32 %v5760_v1, %v5619_v14  ;;  %v10937_v14 = vld [vmem:[%s14313_s8 + $0xf0] sm:$0xff]  }
 0x5fe   :  { %v5606_v10 = vpop.f32.mrb[108].mxu0 }
 0x5ff   :  { %v5620_v36 = vadd.f32 %v5606_v10, %v5461_v37  ;;  %v10000_v43 = vpop.f32.mrb[109].mxu0 }
 0x600   :  { %v5609_v45 = vpop.f32.mrb[110].mxu0  ;;  %v10939_v43 = vld [vmem:[%s14313_s8 + $0xf8] sm:$0xff]  }
 0x601   :  { %v13645_v61 = vadd.f32 %v5765_v26, %v5620_v36  ;;  %v10001_v40 = vpop.f32.mrb[111].mxu0 }
 0x606   :  { %v5892_v48 = vpop.f32.mrb[112].mxu0 }
 0x607   :  { %v5930_v4 = vadd.f32 %v5892_v48, %v5771_v32  ;;  %v10056_v15 = vpop.f32.mrb[113].mxu0 }
 0x608   :  { %v5895_v47 = vpop.f32.mrb[114].mxu0 }
 0x609   :  { %v5946_v38 = vadd.f32 %v13650_v23, %v5930_v4  ;;  %v5931_v18 = vadd.f32 %v5895_v47, %v5772_v34  ;;  %v10057_v33 = vpop.f32.mrb[115].mxu0  ;;  %v10936_v4 = vld [vmem:[%s14313_s8 + $0xa8] sm:$0xff]   ;;  %v10941_v47 = vld [vmem:[%s14313_s8 + $0x140] sm:$0xff]  }
 0x60a   :  { %v10940_v33 = vld [vmem:[%s14313_s8 + $0xb8] sm:$0xff]  }
 0x60b   :  { %v5955_v57 = vmax.f32 %v5946_v38, 0.0  ;;  %v5947_v53 = vadd.f32 %v13650_v23, %v5931_v18  ;;  %v10943_v18 = vld [vmem:[%s14313_s8 + $0x148] sm:$0xff]  }
 0x60d   :  { %5964 = vst [vmem:[#allocation3] sm:$0xff] %v5955_v57  ;;  %v5956_v37 = vmax.f32 %v5947_v53, 0.0  ;;  %v5974_v9 = vpack.c.bf16 %v5955_v57, %v5955_v57  ;;  %v10945_v53 = vld [vmem:[%s14313_s8 + $0x150] sm:$0xff]  }
 0x60e   :  { %v5900_v49 = vpop.f32.mrb[116].mxu0 }
 0x60f   :  { %5965 = vst [vmem:[#allocation3 + $0x8] sm:$0xff] %v5956_v37  ;;  %v5932_v19 = vadd.f32 %v5900_v49, %v5773_v25  ;;  %v10060_v3 = vpop.f32.mrb[117].mxu0  ;;  %10111 = vmatmul.mubr.bf16.vlgmr.msra.gmra.mrb[132].mxu0 %v5974_v9  ;;  %v10947_v9 = vld [vmem:[%s14313_s8 + $0x158] sm:$0xff]   ;;  %v10944_v49 = vld [vmem:[%s14313_s8 + $0x108] sm:$0xff]  }
 0x610   :  { %v5903_v28 = vpop.f32.mrb[118].mxu0  ;;  %10135 = vmatpush3.bf16.msra.mxu0 %v10925_v35  ;;  %10150 = vmatprep.mubr.msk.bf16.mxu0 %vm11081_vm0, %v13660_v20  ;;  %v10942_v35 = vld [vmem:[%s14313_s8 + $0x100] sm:$0xff]   ;;  %v10946_v3 = vld [vmem:[%s14313_s8 + $0x110] sm:$0xff]  }
 0x611   :  { %v5948_v5 = vadd.f32 %v13650_v23, %v5932_v19  ;;  %v5933_v24 = vadd.f32 %v5903_v28, %v5774_v60  ;;  %v10061_v29 = vpop.f32.mrb[119].mxu0  ;;  %10136 = vmatprep.subr.bf16.mxu0 %v13660_v20  ;;  %v10928_v60 = vld [vmem:[%s14313_s8 + $0x88] sm:$0xff]   ;;  %v10949_v19 = vld [vmem:[%s14313_s8 + $0x160] sm:$0xff]  }
 0x612   :  { %v10951_v28 = vld [vmem:[%s14313_s8 + $0x168] sm:$0xff]   ;;  %v10955_v29 = vld [vmem:[%s14313_s8 + $0x178] sm:$0xff]  }
 0x613   :  { %v13666_v32 = vmax.f32 %v5948_v5, 0.0  ;;  %v5949_v8 = vadd.f32 %v13650_v23, %v5933_v24  ;;  %v10953_v5 = vld [vmem:[%s14313_s8 + $0x170] sm:$0xff]   ;;  %v10950_v24 = vld [vmem:[%s14313_s8 + $0x120] sm:$0xff]  }
 0x614   :  { %10137 = vmatpush3.bf16.msra.mxu0 %v10927_v50  ;;  %v10948_v50 = vld [vmem:[%s14313_s8 + $0x118] sm:$0xff]  }
 0x615   :  { %5966 = vst [vmem:[#allocation3 + $0x10] sm:$0xff] %v13666_v32  ;;  %v13673_v34 = vmax.f32 %v5949_v8, 0.0  ;;  %10138 = vmatprep.subr.bf16.mxu0 %v13660_v20  ;;  %v10952_v8 = vld [vmem:[%s14313_s8 + $0x128] sm:$0xff]  }
 0x616   :  { %v5908_v62 = vpop.f32.mrb[120].mxu0  ;;  %v5991_v17 = vld [vmem:[#allocation3 + $0x2] sm:$0xff] }
 0x617   :  { %5967 = vst [vmem:[#allocation3 + $0x18] sm:$0xff] %v13673_v34  ;;  %v5934_v7 = vadd.f32 %v5908_v62, %v5775_v41  ;;  %v10064_v56 = vpop.f32.mrb[121].mxu0  ;;  %v5992_v30 = vpack.c.bf16 %v5991_v17, %v5991_v17  ;;  %v6185_v57 = vld [vmem:[#allocation3 + $0x4] sm:$0xff] }
 0x618   :  { %v5911_v58 = vpop.f32.mrb[122].mxu0  ;;  %10139 = vmatpush3.bf16.msra.mxu0 %v10929_v59  ;;  %v6186_v37 = vpack.c.bf16 %v6185_v57, %v6185_v57  ;;  %v10957_v62 = vld [vmem:[%s14313_s8 + $0x1c0] sm:$0xff]   ;;  %v10956_v56 = vld [vmem:[%s14313_s8 + $0x138] sm:$0xff]  }
 0x619   :  { %v5950_v25 = vadd.f32 %v13650_v23, %v5934_v7  ;;  %v5935_v1 = vadd.f32 %v5911_v58, %v13639_v0  ;;  %v10065_v16 = vpop.f32.mrb[123].mxu0  ;;  %10091 = vmatmul.mubr.bf16.vlgmr.msra.gmra.mrb[144].mxu1 %v5992_v30  ;;  %10140 = vmatprep.subr.bf16.mxu0 %v13660_v20  ;;  %v10959_v7 = vld [vmem:[%s14313_s8 + $0x1c8] sm:$0xff]   ;;  %v10961_v58 = vld [vmem:[%s14313_s8 + $0x1d0] sm:$0xff]   ;;  %v10995_v57 = vld [vmem:[%s14313_s8 + $0x2d8] sm:$0xff]  }
 0x61a   :  { %10115 = vmatpush3.bf16.msra.mxu1 %v10926_v31  ;;  %10130 = vmatprep.mubr.msk.bf16.mxu1 %vm11081_vm0, %v13660_v20  ;;  %v10954_v31 = vld [vmem:[%s14313_s8 + $0x130] sm:$0xff]   ;;  %v10960_v16 = vld [vmem:[%s14313_s8 + $0x188] sm:$0xff]  }
 0x61b   :  { %v5959_v54 = vmax.f32 %v5950_v25, 0.0  ;;  %v5951_v44 = vadd.f32 %v13650_v23, %v5935_v1  ;;  %10116 = vmatprep.subr.bf16.mxu1 %v13660_v20  ;;  %v10963_v1 = vld [vmem:[%s14313_s8 + $0x1d8] sm:$0xff]  }
 0x61c   :  { %10141 = vmatpush3.bf16.msra.mxu0 %v10931_v12  ;;  %v6506_v59 = vld [vmem:[#allocation3 + $0xe] sm:$0xff]  ;;  %v10958_v12 = vld [vmem:[%s14313_s8 + $0x180] sm:$0xff]  }
 0x61d   :  { %5968 = vst [vmem:[#allocation3 + $0x20] sm:$0xff] %v5959_v54  ;;  %v5960_v2 = vmax.f32 %v5951_v44, 0.0  ;;  %10142 = vmatprep.subr.bf16.mxu0 %v13660_v20  ;;  %v6507_v17 = vpack.c.bf16 %v6506_v59, %v6506_v59  ;;  %v6399_v30 = vld [vmem:[#allocation3 + $0xc] sm:$0xff]  ;;  %v11004_v59 = vld [vmem:[%s14313_s8 + $0x2b8] sm:$0xff]  }
 0x61e   :  { %10117 = vmatpush3.bf16.msra.mxu1 %v10928_v60  ;;  %v5916_v26 = vpop.f32.mrb[124].mxu0  ;;  %v6400_v25 = vpack.c.bf16 %v6399_v30, %v6399_v30  ;;  %v10965_v60 = vld [vmem:[%s14313_s8 + $0x1e0] sm:$0xff]   ;;  %v10962_v54 = vld [vmem:[%s14313_s8 + $0x190] sm:$0xff]   ;;  %v10967_v44 = vld [vmem:[%s14313_s8 + $0x1e8] sm:$0xff]  }
 0x61f   :  { %5969 = vst [vmem:[#allocation3 + $0x28] sm:$0xff] %v5960_v2  ;;  %v5936_v46 = vadd.f32 %v5916_v26, %v13641_v42  ;;  %v10068_v41 = vpop.f32.mrb[125].mxu0  ;;  %10118 = vmatprep.subr.bf16.mxu1 %v13660_v20  ;;  %v10969_v2 = vld [vmem:[%s14313_s8 + $0x1f0] sm:$0xff]   ;;  %v10966_v26 = vld [vmem:[%s14313_s8 + $0x1a0] sm:$0xff]   ;;  %v11008_v30 = vld [vmem:[%s14313_s8 + $0x308] sm:$0xff]  }
 0x620   :  { %v5919_v22 = vpop.f32.mrb[126].mxu0  ;;  %10143 = vmatpush3.bf16.msra.mxu0 %v10933_v6  ;;  %v10964_v6 = vld [vmem:[%s14313_s8 + $0x198] sm:$0xff]  }
 0x621   :  { %v5952_v0 = vadd.f32 %v13650_v23, %v5936_v46  ;;  %v5937_v63 = vadd.f32 %v5919_v22, %v13643_v39  ;;  %v10069_v52 = vpop.f32.mrb[127].mxu0  ;;  %10144 = vmatprep.subr.bf16.mxu0 %v13660_v20  ;;  %v10934_v39 = vld [vmem:[%s14313_s8 + $0xa0] sm:$0xff]   ;;  %v10968_v46 = vld [vmem:[%s14313_s8 + $0x1a8] sm:$0xff]   ;;  %v6720_v41 = vld [vmem:[#allocation3 + $0x12] sm:$0xff] }
 0x622   :  { %10119 = vmatpush3.bf16.msra.mxu1 %v10930_v55  ;;  %v10971_v55 = vld [vmem:[%s14313_s8 + $0x1f8] sm:$0xff]   ;;  %v10973_v22 = vld [vmem:[%s14313_s8 + $0x240] sm:$0xff]  }
 0x623   :  { %v5961_v13 = vmax.f32 %v5952_v0, 0.0  ;;  %v5953_v27 = vadd.f32 %v13650_v23, %v5937_v63  ;;  %10120 = vmatprep.subr.bf16.mxu1 %v13660_v20  ;;  %v10970_v0 = vld [vmem:[%s14313_s8 + $0x1b0] sm:$0xff]   ;;  %v10975_v63 = vld [vmem:[%s14313_s8 + $0x248] sm:$0xff]   ;;  %v10972_v52 = vld [vmem:[%s14313_s8 + $0x1b8] sm:$0xff]  }
 0x624   :  { %10145 = vmatpush3.bf16.msra.mxu0 %v10935_v21  ;;  %v6721_v21 = vpack.c.bf16 %v6720_v41, %v6720_v41  ;;  %v11020_v41 = vld [vmem:[%s14313_s8 + $0x338] sm:$0xff]  }
 0x625   :  { %5970 = vst [vmem:[#allocation3 + $0x30] sm:$0xff] %v5961_v13  ;;  %v5962_v42 = vmax.f32 %v5953_v27, 0.0  ;;  %10146 = vmatprep.subr.bf16.mxu0 %v13660_v20  ;;  %v10974_v13 = vld [vmem:[%s14313_s8 + $0x200] sm:$0xff]   ;;  %v6614_v27 = vpack.c.bf16 %v13666_v32, %v13666_v32 }
 0x626   :  { %10121 = vmatpush3.bf16.msra.mxu1 %v10932_v11  ;;  %v5924_v51 = vpop.f32.mrb[128].mxu0  ;;  %v10977_v11 = vld [vmem:[%s14313_s8 + $0x250] sm:$0xff]   ;;  %v10981_v32 = vld [vmem:[%s14313_s8 + $0x260] sm:$0xff]  }
 0x627   :  { %5971 = vst [vmem:[#allocation3 + $0x38] sm:$0xff] %v5962_v42  ;;  %v5938_v10 = vadd.f32 %v5924_v51, %v13645_v61  ;;  %10122 = vmatprep.subr.bf16.mxu1 %v13660_v20  ;;  %v10072_v36 = vpop.f32.mrb[129].mxu0  ;;  %v6292_v61 = vld [vmem:[#allocation3 + $0x6] sm:$0xff]  ;;  %v10978_v51 = vld [vmem:[%s14313_s8 + $0x210] sm:$0xff]  }
 0x628   :  { %10147 = vmatpush3.bf16.msra.mxu0 %v10937_v14  ;;  %v5927_v45 = vpop.f32.mrb[130].mxu0  ;;  %v6293_v38 = vpack.c.bf16 %v6292_v61, %v6292_v61  ;;  %v10979_v14 = vld [vmem:[%s14313_s8 + $0x258] sm:$0xff]   ;;  %v10976_v42 = vld [vmem:[%s14313_s8 + $0x208] sm:$0xff]   ;;  %v10985_v36 = vld [vmem:[%s14313_s8 + $0x270] sm:$0xff]  }
 0x629   :  { %v5954_v40 = vadd.f32 %v13650_v23, %v5938_v10  ;;  %10148 = vmatprep.subr.bf16.mxu0 %v13660_v20  ;;  %v10073_v48 = vpop.f32.mrb[131].mxu0  ;;  %v10938_v23 = vld [vmem:[%s14313_s8 + $0xb0] sm:$0xff]   ;;  %v10980_v10 = vld [vmem:[%s14313_s8 + $0x218] sm:$0xff]  }
 0x62a   :  { %10123 = vmatpush3.bf16.msra.mxu1 %v10934_v39  ;;  %v10983_v39 = vld [vmem:[%s14313_s8 + $0x268] sm:$0xff]   ;;  %v10987_v45 = vld [vmem:[%s14313_s8 + $0x278] sm:$0xff]  }
 0x62b   :  { %v5963_v15 = vmax.f32 %v5954_v40, 0.0  ;;  %10124 = vmatprep.subr.bf16.mxu1 %v13660_v20  ;;  %v10984_v40 = vld [vmem:[%s14313_s8 + $0x228] sm:$0xff]   ;;  %v6934_v48 = vld [vmem:[#allocation3 + $0x1a] sm:$0xff] }
 0x62c   :  { %10149 = vmatpush3.bf16.msra.mxu0 %v10939_v43  ;;  %v10982_v43 = vld [vmem:[%s14313_s8 + $0x220] sm:$0xff]   ;;  %v6935_v61 = vpack.c.bf16 %v6934_v48, %v6934_v48  ;;  %v7576_v48 = vld [vmem:[#allocation3 + $0x2a] sm:$0xff] }
 0x62d   :  { %5972 = vst [vmem:[#allocation3 + $0x40] sm:$0xff] %v5963_v15  ;;  %10174 = vmatprep.subr.bf16.mxu0 %v13660_v20  ;;  %v10986_v15 = vld [vmem:[%s14313_s8 + $0x230] sm:$0xff]  }
 0x62e   :  { %10125 = vmatpush3.bf16.msra.mxu1 %v10936_v4  ;;  %v10989_v4 = vld [vmem:[%s14313_s8 + $0x2c0] sm:$0xff]  }
 0x62f   :  { %10126 = vmatprep.subr.bf16.mxu1 %v13660_v20  ;;  %10151 = vmatmul.mubr.bf16.vlgmr.msra.gmra.mrb[136].mxu0 %v6293_v38  ;;  %v10988_v38 = vld [vmem:[%s14313_s8 + $0x238] sm:$0xff]  }
 0x630   :  { %10175 = vmatpush3.bf16.msra.mxu0 %v10941_v47  ;;  %10190 = vmatprep.mubr.msk.bf16.mxu0 %vm11081_vm0, %v13660_v20  ;;  %v10991_v47 = vld [vmem:[%s14313_s8 + $0x2c8] sm:$0xff]  }
 0x631   :  { %10176 = vmatprep.subr.bf16.mxu0 %v13660_v20 }
 0x632   :  { %10127 = vmatpush3.bf16.msra.mxu1 %v10938_v23  ;;  %v10993_v23 = vld [vmem:[%s14313_s8 + $0x2d0] sm:$0xff]  }
 0x633   :  { %10128 = vmatprep.subr.bf16.mxu1 %v13660_v20 }
 0x634   :  { %10177 = vmatpush3.bf16.msra.mxu0 %v10943_v18  ;;  %v10990_v18 = vld [vmem:[%s14313_s8 + $0x280] sm:$0xff]  }
 0x635   :  { %10178 = vmatprep.subr.bf16.mxu0 %v13660_v20 }
 0x636   :  { %10129 = vmatpush3.bf16.msra.mxu1 %v10940_v33  ;;  %v6828_v33 = vpack.c.bf16 %v13673_v34, %v13673_v34  ;;  %v10997_v34 = vld [vmem:[%s14313_s8 + $0x2e0] sm:$0xff]  }
 0x637   :  { %10154 = vmatprep.subr.bf16.mxu1 %v13660_v20 }
 0x638   :  { %10179 = vmatpush3.bf16.msra.mxu0 %v10945_v53  ;;  %v10992_v53 = vld [vmem:[%s14313_s8 + $0x288] sm:$0xff]  }
 0x639   :  { %10131 = vmatmul.mubr.bf16.vlgmr.msra.gmra.mrb[148].mxu1 %v6186_v37  ;;  %10180 = vmatprep.subr.bf16.mxu0 %v13660_v20  ;;  %v10999_v37 = vld [vmem:[%s14313_s8 + $0x2e8] sm:$0xff]  }
 0x63a   :  { %10155 = vmatpush3.bf16.msra.mxu1 %v10942_v35  ;;  %10170 = vmatprep.mubr.msk.bf16.mxu1 %vm11081_vm0, %v13660_v20  ;;  %v10994_v35 = vld [vmem:[%s14313_s8 + $0x290] sm:$0xff]  }
 0x63b   :  { %10156 = vmatprep.subr.bf16.mxu1 %v13660_v20 }
 0x63c   :  { %10181 = vmatpush3.bf16.msra.mxu0 %v10947_v9  ;;  %v10996_v9 = vld [vmem:[%s14313_s8 + $0x298] sm:$0xff]  }
 0x63d   :  { %10182 = vmatprep.subr.bf16.mxu0 %v13660_v20 }
 0x63e   :  { %10157 = vmatpush3.bf16.msra.mxu1 %v10944_v49  ;;  %v11001_v49 = vld [vmem:[%s14313_s8 + $0x2f0] sm:$0xff]  }
 0x63f   :  { %10158 = vmatprep.subr.bf16.mxu1 %v13660_v20 }
 0x640   :  { %10183 = vmatpush3.bf16.msra.mxu0 %v10949_v19  ;;  %v10998_v19 = vld [vmem:[%s14313_s8 + $0x2a0] sm:$0xff]  }
 0x641   :  { %10184 = vmatprep.subr.bf16.mxu0 %v13660_v20 }
 0x642   :  { %10159 = vmatpush3.bf16.msra.mxu1 %v10946_v3  ;;  %v11003_v3 = vld [vmem:[%s14313_s8 + $0x2f8] sm:$0xff]  }
 0x643   :  { %10160 = vmatprep.subr.bf16.mxu1 %v13660_v20 }
 0x644   :  { %10185 = vmatpush3.bf16.msra.mxu0 %v10951_v28  ;;  %v11000_v28 = vld [vmem:[%s14313_s8 + $0x2a8] sm:$0xff]  }
 0x645   :  { %10186 = vmatprep.subr.bf16.mxu0 %v13660_v20 }
 0x646   :  { %10161 = vmatpush3.bf16.msra.mxu1 %v10948_v50  ;;  %v7148_v50 = vld [vmem:[#allocation3 + $0x1e] sm:$0xff] }
 0x647   :  { %10162 = vmatprep.subr.bf16.mxu1 %v13660_v20 }
 0x648   :  { %10187 = vmatpush3.bf16.msra.mxu0 %v10953_v5  ;;  %v11005_v5 = vld [vmem:[%s14313_s8 + $0x340] sm:$0xff]  }
 0x649   :  { %10188 = vmatprep.subr.bf16.mxu0 %v13660_v20 }
 0x64a   :  { %10163 = vmatpush3.bf16.msra.mxu1 %v10950_v24  ;;  %v7149_v24 = vpack.c.bf16 %v7148_v50, %v7148_v50  ;;  %v11041_v50 = vld [vmem:[%s14315_s10 + $0x20] sm:$0xff]  }
 0x64b   :  { %10164 = vmatprep.subr.bf16.mxu1 %v13660_v20 }
 0x64c   :  { %10189 = vmatpush3.bf16.msra.mxu0 %v10955_v29  ;;  %v11002_v29 = vld [vmem:[%s14313_s8 + $0x2b0] sm:$0xff]  }
 0x64d   :  { %10214 = vmatprep.subr.bf16.mxu0 %v13660_v20 }
 0x64e   :  { %10165 = vmatpush3.bf16.msra.mxu1 %v10952_v8  ;;  %v11007_v8 = vld [vmem:[%s14313_s8 + $0x348] sm:$0xff]  }
 0x64f   :  { %10166 = vmatprep.subr.bf16.mxu1 %v13660_v20  ;;  %10191 = vmatmul.mubr.bf16.vlgmr.msra.gmra.mrb[140].mxu0 %v6507_v17  ;;  %v11009_v17 = vld [vmem:[%s14313_s8 + $0x350] sm:$0xff]  }
 0x650   :  { %10215 = vmatpush3.bf16.msra.mxu0 %v10957_v62  ;;  %10230 = vmatprep.mubr.msk.bf16.mxu0 %vm11081_vm0, %v13660_v20  ;;  %v7041_v62 = vld [vmem:[#allocation3 + $0x1c] sm:$0xff] }
 0x651   :  { %10216 = vmatprep.subr.bf16.mxu0 %v13660_v20 }
 0x652   :  { %10167 = vmatpush3.bf16.msra.mxu1 %v10954_v31  ;;  %v11006_v31 = vld [vmem:[%s14313_s8 + $0x300] sm:$0xff]  }
 0x653   :  { %10168 = vmatprep.subr.bf16.mxu1 %v13660_v20 }
 0x654   :  { %10217 = vmatpush3.bf16.msra.mxu0 %v10959_v7  ;;  %v7042_v7 = vpack.c.bf16 %v7041_v62, %v7041_v62  ;;  %v11043_v62 = vld [vmem:[%s14315_s10 + $0x30] sm:$0xff]  }
 0x655   :  { %10218 = vmatprep.subr.bf16.mxu0 %v13660_v20 }
 0x656   :  { %10169 = vmatpush3.bf16.msra.mxu1 %v10956_v56  ;;  %v11011_v56 = vld [vmem:[%s14313_s8 + $0x358] sm:$0xff]  }
 0x657   :  { %10194 = vmatprep.subr.bf16.mxu1 %v13660_v20 }
 0x658   :  { %10219 = vmatpush3.bf16.msra.mxu0 %v10961_v58  ;;  %v11013_v58 = vld [vmem:[%s14313_s8 + $0x360] sm:$0xff]  }
 0x659   :  { %10171 = vmatmul.mubr.bf16.vlgmr.msra.gmra.mrb[152].mxu1 %v6400_v25  ;;  %10220 = vmatprep.subr.bf16.mxu0 %v13660_v20  ;;  %v11015_v25 = vld [vmem:[%s14313_s8 + $0x368] sm:$0xff]  }
 0x65a   :  { %10195 = vmatpush3.bf16.msra.mxu1 %v10958_v12  ;;  %10210 = vmatprep.mubr.msk.bf16.mxu1 %vm11081_vm0, %v13660_v20  ;;  %v11010_v12 = vld [vmem:[%s14313_s8 + $0x310] sm:$0xff]  }
 0x65b   :  { %10196 = vmatprep.subr.bf16.mxu1 %v13660_v20 }
 0x65c   :  { %10221 = vmatpush3.bf16.msra.mxu0 %v10963_v1  ;;  %v11012_v1 = vld [vmem:[%s14313_s8 + $0x318] sm:$0xff]  }
 0x65d   :  { %10222 = vmatprep.subr.bf16.mxu0 %v13660_v20 }
 0x65e   :  { %10197 = vmatpush3.bf16.msra.mxu1 %v10960_v16  ;;  %v11017_v16 = vld [vmem:[%s14313_s8 + $0x370] sm:$0xff]  }
 0x65f   :  { %10198 = vmatprep.subr.bf16.mxu1 %v13660_v20 }
 0x660   :  { %10223 = vmatpush3.bf16.msra.mxu0 %v10965_v60  ;;  %v11014_v60 = vld [vmem:[%s14313_s8 + $0x320] sm:$0xff]  }
 0x661   :  { %10224 = vmatprep.subr.bf16.mxu0 %v13660_v20 }
 0x662   :  { %10199 = vmatpush3.bf16.msra.mxu1 %v10962_v54  ;;  %v11019_v54 = vld [vmem:[%s14313_s8 + $0x378] sm:$0xff]  }
 0x663   :  { %10200 = vmatprep.subr.bf16.mxu1 %v13660_v20 }
 0x664   :  { %10225 = vmatpush3.bf16.msra.mxu0 %v10967_v44  ;;  %v11016_v44 = vld [vmem:[%s14313_s8 + $0x328] sm:$0xff]  }
 0x665   :  { %10226 = vmatprep.subr.bf16.mxu0 %v13660_v20 }
 0x666   :  { %10201 = vmatpush3.bf16.msra.mxu1 %v10964_v6  ;;  %v7362_v6 = vld [vmem:[#allocation3 + $0x26] sm:$0xff] }
 0x667   :  { %10202 = vmatprep.subr.bf16.mxu1 %v13660_v20 }
 0x668   :  { %10227 = vmatpush3.bf16.msra.mxu0 %v10969_v2  ;;  %v11021_v2 = vld [vmem:[%s14313_s8 + $0x3c0] sm:$0xff]  }
 0x669   :  { %10228 = vmatprep.subr.bf16.mxu0 %v13660_v20 }
 0x66a   :  { %10203 = vmatpush3.bf16.msra.mxu1 %v10966_v26  ;;  %v7363_v26 = vpack.c.bf16 %v7362_v6, %v7362_v6 }
 0x66b   :  { %10204 = vmatprep.subr.bf16.mxu1 %v13660_v20 }
 0x66c   :  { %10229 = vmatpush3.bf16.msra.mxu0 %v10971_v55  ;;  %v11018_v55 = vld [vmem:[%s14313_s8 + $0x330] sm:$0xff]  }
 0x66d   :  { %10254 = vmatprep.subr.bf16.mxu0 %v13660_v20 }
 0x66e   :  { %10205 = vmatpush3.bf16.msra.mxu1 %v10968_v46  ;;  %v11023_v46 = vld [vmem:[%s14313_s8 + $0x3c8] sm:$0xff]  }
 0x66f   :  { %10206 = vmatprep.subr.bf16.mxu1 %v13660_v20  ;;  %10231 = vmatmul.mubr.bf16.vlgmr.msra.gmra.mrb[144].mxu0 %v6721_v21  ;;  %v11025_v21 = vld [vmem:[%s14313_s8 + $0x3d0] sm:$0xff]  }
 0x670   :  { %10255 = vmatpush3.bf16.msra.mxu0 %v10973_v22  ;;  %10270 = vmatprep.mubr.msk.bf16.mxu0 %vm11081_vm0, %v13660_v20  ;;  %v7255_v22 = vld [vmem:[#allocation3 + $0x24] sm:$0xff] }
 0x671   :  { %10256 = vmatprep.subr.bf16.mxu0 %v13660_v20 }
 0x672   :  { %10207 = vmatpush3.bf16.msra.mxu1 %v10970_v0  ;;  %v11022_v0 = vld [vmem:[%s14313_s8 + $0x380] sm:$0xff]  }
 0x673   :  { %10208 = vmatprep.subr.bf16.mxu1 %v13660_v20 }
 0x674   :  { %10257 = vmatpush3.bf16.msra.mxu0 %v10975_v63  ;;  %v7256_v63 = vpack.c.bf16 %v7255_v22, %v7255_v22 }
 0x675   :  { %10258 = vmatprep.subr.bf16.mxu0 %v13660_v20 }
 0x676   :  { %10209 = vmatpush3.bf16.msra.mxu1 %v10972_v52  ;;  %v11027_v52 = vld [vmem:[%s14313_s8 + $0x3d8] sm:$0xff]  }
 0x677   :  { %10234 = vmatprep.subr.bf16.mxu1 %v13660_v20 }
 0x678   :  { %10259 = vmatpush3.bf16.msra.mxu0 %v10977_v11  ;;  %v11024_v11 = vld [vmem:[%s14313_s8 + $0x388] sm:$0xff]  }
 0x679   :  { %10211 = vmatmul.mubr.bf16.vlgmr.msra.gmra.mrb[156].mxu1 %v6614_v27  ;;  %10260 = vmatprep.subr.bf16.mxu0 %v13660_v20  ;;  %v11026_v27 = vld [vmem:[%s14313_s8 + $0x390] sm:$0xff]  }
 0x67a   :  { %10235 = vmatpush3.bf16.msra.mxu1 %v10974_v13  ;;  %10250 = vmatprep.mubr.msk.bf16.mxu1 %vm11081_vm0, %v13660_v20  ;;  %v11029_v13 = vld [vmem:[%s14313_s8 + $0x3e0] sm:$0xff]  }
 0x67b   :  { %10236 = vmatprep.subr.bf16.mxu1 %v13660_v20 }
 0x67c   :  { %10261 = vmatpush3.bf16.msra.mxu0 %v10979_v14  ;;  %v11031_v14 = vld [vmem:[%s14313_s8 + $0x3e8] sm:$0xff]  }
 0x67d   :  { %10262 = vmatprep.subr.bf16.mxu0 %v13660_v20 }
 0x67e   :  { %10237 = vmatpush3.bf16.msra.mxu1 %v10976_v42  ;;  %v11028_v42 = vld [vmem:[%s14313_s8 + $0x398] sm:$0xff]  }
 0x67f   :  { %10238 = vmatprep.subr.bf16.mxu1 %v13660_v20 }
 0x680   :  { %10263 = vmatpush3.bf16.msra.mxu0 %v10981_v32 }
 0x681   :  { %10264 = vmatprep.subr.bf16.mxu0 %v13660_v20 }
 0x682   :  { %10239 = vmatpush3.bf16.msra.mxu1 %v10978_v51 }
 0x683   :  { %10240 = vmatprep.subr.bf16.mxu1 %v13660_v20 }
 0x684   :  { %10265 = vmatpush3.bf16.msra.mxu0 %v10983_v39 }
 0x685   :  { %10266 = vmatprep.subr.bf16.mxu0 %v13660_v20 }
 0x686   :  { %10241 = vmatpush3.bf16.msra.mxu1 %v10980_v10  ;;  %v11033_v10 = vld [vmem:[%s14313_s8 + $0x3f0] sm:$0xff]  }
 0x687   :  { %10242 = vmatprep.subr.bf16.mxu1 %v13660_v20 }
 0x688   :  { %10267 = vmatpush3.bf16.msra.mxu0 %v10985_v36 }
 0x689   :  { %10268 = vmatprep.subr.bf16.mxu0 %v13660_v20 }
 0x68a   :  { %10243 = vmatpush3.bf16.msra.mxu1 %v10982_v43  ;;  %v11030_v43 = vld [vmem:[%s14313_s8 + $0x3a0] sm:$0xff]  }
 0x68b   :  { %10244 = vmatprep.subr.bf16.mxu1 %v13660_v20 }
 0x68c   :  { %10269 = vmatpush3.bf16.msra.mxu0 %v10987_v45  ;;  %v11035_v45 = vld [vmem:[%s14313_s8 + $0x3f8] sm:$0xff]  }
 0x68d   :  { %10294 = vmatprep.subr.bf16.mxu0 %v13660_v20 }
 0x68e   :  { %10245 = vmatpush3.bf16.msra.mxu1 %v10984_v40  ;;  %v11032_v40 = vld [vmem:[%s14313_s8 + $0x3a8] sm:$0xff]  }
 0x68f   :  { %10246 = vmatprep.subr.bf16.mxu1 %v13660_v20  ;;  %10271 = vmatmul.mubr.bf16.vlgmr.msra.gmra.mrb[148].mxu0 %v6935_v61 }
 0x690   :  { %10295 = vmatpush3.bf16.msra.mxu0 %v10989_v4  ;;  %10310 = vmatprep.mubr.msk.bf16.mxu0 %vm11081_vm0, %v13660_v20 }
 0x691   :  { %10296 = vmatprep.subr.bf16.mxu0 %v13660_v20 }
 0x692   :  { %10247 = vmatpush3.bf16.msra.mxu1 %v10986_v15 }
 0x693   :  { %10248 = vmatprep.subr.bf16.mxu1 %v13660_v20 }
 0x694   :  { %10297 = vmatpush3.bf16.msra.mxu0 %v10991_v47  ;;  %v7577_v47 = vpack.c.bf16 %v7576_v48, %v7576_v48 }
 0x695   :  { %10298 = vmatprep.subr.bf16.mxu0 %v13660_v20 }
 0x696   :  { %10249 = vmatpush3.bf16.msra.mxu1 %v10988_v38 }
 0x697   :  { %10274 = vmatprep.subr.bf16.mxu1 %v13660_v20 }
 0x698   :  { %10299 = vmatpush3.bf16.msra.mxu0 %v10993_v23  ;;  %v11034_v23 = vld [vmem:[%s14313_s8 + $0x3b0] sm:$0xff]  }
 0x699   :  { %10251 = vmatmul.mubr.bf16.vlgmr.msra.gmra.mrb[160].mxu1 %v6828_v33  ;;  %10300 = vmatprep.subr.bf16.mxu0 %v13660_v20  ;;  %v11036_v33 = vld [vmem:[%s14313_s8 + $0x3b8] sm:$0xff]  }
 0x69a   :  { %10275 = vmatpush3.bf16.msra.mxu1 %v10990_v18  ;;  %10290 = vmatprep.mubr.msk.bf16.mxu1 %vm11081_vm0, %v13660_v20 }
 0x69b   :  { %10276 = vmatprep.subr.bf16.mxu1 %v13660_v20 }
 0x69c   :  { %10301 = vmatpush3.bf16.msra.mxu0 %v10995_v57  ;;  %v7469_v57 = vld [vmem:[#allocation3 + $0x28] sm:$0xff] }
 0x69d   :  { %10302 = vmatprep.subr.bf16.mxu0 %v13660_v20 }
 0x69e   :  { %10277 = vmatpush3.bf16.msra.mxu1 %v10992_v53  ;;  %v11037_v53 = vld [vmem:[%s14315_s10] sm:$0xff]  }
 0x69f   :  { %10278 = vmatprep.subr.bf16.mxu1 %v13660_v20 }
 0x6a0   :  { %10303 = vmatpush3.bf16.msra.mxu0 %v10997_v34  ;;  %v7470_v34 = vpack.c.bf16 %v7469_v57, %v7469_v57 }
 0x6a1   :  { %10304 = vmatprep.subr.bf16.mxu0 %v13660_v20 }
 0x6a2   :  { %10279 = vmatpush3.bf16.msra.mxu1 %v10994_v35  ;;  %v11038_v35 = vld [vmem:[%s14315_s10 + $0x8] sm:$0xff]  }
 0x6a3   :  { %10280 = vmatprep.subr.bf16.mxu1 %v13660_v20 }
 0x6a4   :  { %10305 = vmatpush3.bf16.msra.mxu0 %v10999_v37  ;;  %v11039_v37 = vld [vmem:[%s14315_s10 + $0x10] sm:$0xff]  }
 0x6a5   :  { %10306 = vmatprep.subr.bf16.mxu0 %v13660_v20 }
 0x6a6   :  { %10281 = vmatpush3.bf16.msra.mxu1 %v10996_v9  ;;  %v11040_v9 = vld [vmem:[%s14315_s10 + $0x18] sm:$0xff]  }
 0x6a7   :  { %10282 = vmatprep.subr.bf16.mxu1 %v13660_v20 }
 0x6a8   :  { %10307 = vmatpush3.bf16.msra.mxu0 %v11001_v49 }
 0x6a9   :  { %10308 = vmatprep.subr.bf16.mxu0 %v13660_v20 }
 0x6aa   :  { %10283 = vmatpush3.bf16.msra.mxu1 %v10998_v19 }
 0x6ab   :  { %10284 = vmatprep.subr.bf16.mxu1 %v13660_v20 }
 0x6ac   :  { %10309 = vmatpush3.bf16.msra.mxu0 %v11003_v3 }
 0x6ad   :  { %10334 = vmatprep.subr.bf16.mxu0 %v13660_v20 }
 0x6ae   :  { %10285 = vmatpush3.bf16.msra.mxu1 %v11000_v28 }
 0x6af   :  { %10286 = vmatprep.subr.bf16.mxu1 %v13660_v20  ;;  %10311 = vmatmul.mubr.bf16.vlgmr.msra.gmra.mrb[152].mxu0 %v7149_v24 }
 0x6b0   :  { %10335 = vmatpush3.bf16.msra.mxu0 %v11005_v5  ;;  %10350 = vmatprep.mubr.msk.bf16.mxu0 %vm11081_vm0, %v13660_v20  ;;  %v11042_v5 = vld [vmem:[%s14315_s10 + $0x28] sm:$0xff]  }
 0x6b1   :  { %10336 = vmatprep.subr.bf16.mxu0 %v13660_v20 }
 0x6b2   :  { %10287 = vmatpush3.bf16.msra.mxu1 %v11002_v29 }
 0x6b3   :  { %10288 = vmatprep.subr.bf16.mxu1 %v13660_v20 }
 0x6b4   :  { %10337 = vmatpush3.bf16.msra.mxu0 %v11007_v8 }
 0x6b5   :  { %10338 = vmatprep.subr.bf16.mxu0 %v13660_v20 }
 0x6b6   :  { %10289 = vmatpush3.bf16.msra.mxu1 %v11004_v59 }
 0x6b7   :  { %10314 = vmatprep.subr.bf16.mxu1 %v13660_v20 }
 0x6b8   :  { %10339 = vmatpush3.bf16.msra.mxu0 %v11009_v17 }
 0x6b9   :  { %10291 = vmatmul.mubr.bf16.vlgmr.msra.gmra.mrb[164].mxu1 %v7042_v7  ;;  %10340 = vmatprep.subr.bf16.mxu0 %v13660_v20  ;;  %v11044_v7 = vld [vmem:[%s14315_s10 + $0x38] sm:$0xff]  }
 0x6ba   :  { %10315 = vmatpush3.bf16.msra.mxu1 %v11006_v31  ;;  %10330 = vmatprep.mubr.msk.bf16.mxu1 %vm11081_vm0, %v13660_v20 }
 0x6bb   :  { %10316 = vmatprep.subr.bf16.mxu1 %v13660_v20 }
 0x6bc   :  { %10341 = vmatpush3.bf16.msra.mxu0 %v11011_v56  ;;  %v7693_v56 = vld [vmem:[%s14316_s1] sm:$0xf] }
 0x6bd   :  { %10342 = vmatprep.subr.bf16.mxu0 %v13660_v20 }
 0x6be   :  { %10317 = vmatpush3.bf16.msra.mxu1 %v11008_v30 }
 0x6bf   :  { %10318 = vmatprep.subr.bf16.mxu1 %v13660_v20 }
 0x6c0   :  { %10343 = vmatpush3.bf16.msra.mxu0 %v11013_v58 }
 0x6c1   :  { %10344 = vmatprep.subr.bf16.mxu0 %v13660_v20 }
 0x6c2   :  { %10319 = vmatpush3.bf16.msra.mxu1 %v11010_v12 }
 0x6c3   :  { %10320 = vmatprep.subr.bf16.mxu1 %v13660_v20 }
 0x6c4   :  { %10345 = vmatpush3.bf16.msra.mxu0 %v11015_v25 }
 0x6c5   :  { %10346 = vmatprep.subr.bf16.mxu0 %v13660_v20 }
 0x6c6   :  { %10321 = vmatpush3.bf16.msra.mxu1 %v11012_v1 }
 0x6c7   :  { %10322 = vmatprep.subr.bf16.mxu1 %v13660_v20 }
 0x6c8   :  { %10347 = vmatpush3.bf16.msra.mxu0 %v11017_v16 }
 0x6c9   :  { %10348 = vmatprep.subr.bf16.mxu0 %v13660_v20 }
 0x6ca   :  { %10323 = vmatpush3.bf16.msra.mxu1 %v11014_v60 }
 0x6cb   :  { %10324 = vmatprep.subr.bf16.mxu1 %v13660_v20 }
 0x6cc   :  { %10349 = vmatpush3.bf16.msra.mxu0 %v11019_v54 }
 0x6cd   :  { %10374 = vmatprep.subr.bf16.mxu0 %v13660_v20 }
 0x6ce   :  { %10325 = vmatpush3.bf16.msra.mxu1 %v11016_v44 }
 0x6cf   :  { %10326 = vmatprep.subr.bf16.mxu1 %v13660_v20  ;;  %10351 = vmatmul.mubr.bf16.vlgmr.msra.gmra.mrb[156].mxu0 %v7363_v26 }
 0x6d0   :  { %10375 = vmatpush3.bf16.msra.mxu0 %v11021_v2  ;;  %10390 = vmatprep.mubr.msk.bf16.mxu0 %vm11081_vm0, %v13660_v20 }
 0x6d1   :  { %10376 = vmatprep.subr.bf16.mxu0 %v13660_v20 }
 0x6d2   :  { %10327 = vmatpush3.bf16.msra.mxu1 %v11018_v55 }
 0x6d3   :  { %10328 = vmatprep.subr.bf16.mxu1 %v13660_v20 }
 0x6d4   :  { %10377 = vmatpush3.bf16.msra.mxu0 %v11023_v46 }
 0x6d5   :  { %10378 = vmatprep.subr.bf16.mxu0 %v13660_v20 }
 0x6d6   :  { %10329 = vmatpush3.bf16.msra.mxu1 %v11020_v41 }
 0x6d7   :  { %10354 = vmatprep.subr.bf16.mxu1 %v13660_v20 }
 0x6d8   :  { %10379 = vmatpush3.bf16.msra.mxu0 %v11025_v21 }
 0x6d9   :  { %10331 = vmatmul.mubr.bf16.vlgmr.msra.gmra.mrb[168].mxu1 %v7256_v63  ;;  %10380 = vmatprep.subr.bf16.mxu0 %v13660_v20 }
 0x6da   :  { %10355 = vmatpush3.bf16.msra.mxu1 %v11022_v0  ;;  %10370 = vmatprep.mubr.msk.bf16.mxu1 %vm11081_vm0, %v13660_v20 }
 0x6db   :  { %10356 = vmatprep.subr.bf16.mxu1 %v13660_v20 }
 0x6dc   :  { %10381 = vmatpush3.bf16.msra.mxu0 %v11027_v52  ;;  %v11045_v52 = vld [vmem:[%s14317_s12] sm:$0xff]  }
 0x6dd   :  { %10382 = vmatprep.subr.bf16.mxu0 %v13660_v20 }
 0x6de   :  { %10357 = vmatpush3.bf16.msra.mxu1 %v11024_v11  ;;  %v14197_v11 = vld [vmem:[#allocation3 + $0x48] sm:$0xff] }
 0x6df   :  { %10358 = vmatprep.subr.bf16.mxu1 %v13660_v20 }
 0x6e0   :  { %10383 = vmatpush3.bf16.msra.mxu0 %v11029_v13  ;;  %v11046_v13 = vld [vmem:[%s14317_s12 + $0x8] sm:$0xff]  }
 0x6e1   :  { %10384 = vmatprep.subr.bf16.mxu0 %v13660_v20 }
 0x6e2   :  { %10359 = vmatpush3.bf16.msra.mxu1 %v11026_v27  ;;  %v6179_v32 = vpop.f32.mrb[132].mxu0  ;;  %v11047_v27 = vld [vmem:[%s14317_s12 + $0x10] sm:$0xff]  }
 0x6e3   :  { %10360 = vmatprep.subr.bf16.mxu1 %v13660_v20  ;;  %v10112_v51 = vpop.f32.mrb[133].mxu0 }
 0x6e4   :  { %10385 = vmatpush3.bf16.msra.mxu0 %v11031_v14  ;;  %v6182_v39 = vpop.f32.mrb[134].mxu0  ;;  %v11048_v14 = vld [vmem:[%s14317_s12 + $0x18] sm:$0xff]  }
 0x6e5   :  { %v10113_v36 = vpop.f32.mrb[135].mxu0  ;;  %10386 = vmatprep.subr.bf16.mxu0 %v13660_v20  ;;  %v11050_v39 = vld [vmem:[%s14317_s12 + $0x28] sm:$0xff]  }
 0x6e6   :  { %10361 = vmatpush3.bf16.msra.mxu1 %v11028_v42  ;;  %v11049_v42 = vld [vmem:[%s14317_s12 + $0x20] sm:$0xff]  }
 0x6e7   :  { %10362 = vmatprep.subr.bf16.mxu1 %v13660_v20 }
 0x6e8   :  { %10387 = vmatpush3.bf16.msra.mxu0 %v11033_v10 }
 0x6e9   :  { %10388 = vmatprep.subr.bf16.mxu0 %v13660_v20 }
 0x6ea   :  { %10363 = vmatpush3.bf16.msra.mxu1 %v11030_v43  ;;  %v11051_v43 = vld [vmem:[%s14317_s12 + $0x30] sm:$0xff]  }
 0x6eb   :  { %10364 = vmatprep.subr.bf16.mxu1 %v13660_v20 }
 0x6ec   :  { %v6091_v4 = vpop.f32.mrb[144].mxu1  ;;  %10389 = vmatpush3.bf16.msra.mxu0 %v11035_v45 }
 0x6ed   :  { %v6180_v61 = vadd.f32 %v6179_v32, %v6091_v4  ;;  %v10092_v15 = vpop.f32.mrb[145].mxu1  ;;  %10414 = vmatprep.subr.bf16.mxu0 %v13660_v20  ;;  %v11052_v4 = vld [vmem:[%s14317_s12 + $0x38] sm:$0xff]  }
 0x6ee   :  { %10365 = vmatpush3.bf16.msra.mxu1 %v11032_v40  ;;  %v6094_v38 = vpop.f32.mrb[146].mxu1 }
 0x6ef   :  { %v10093_v18 = vpop.f32.mrb[147].mxu1  ;;  %10366 = vmatprep.subr.bf16.mxu1 %v13660_v20  ;;  %10391 = vmatmul.mubr.bf16.vlgmr.msra.gmra.mrb[160].mxu0 %v7577_v47 }
 0x6f0   :  { %10430 = vmatprep.mubr.msk.bf16.mxu0 %vm11081_vm0, %v13660_v20  ;;  %10415 = vmatpush3.bf16.msra.mxu0 %v11045_v52  ;;  %v11054_v52 = vld [vmem:[%s14318_s14 + $0x8] sm:$0xff]  }
 0x6f1   :  { %10416 = vmatprep.subr.bf16.mxu0 %v14197_v11 }
 0x6f2   :  { %10367 = vmatpush3.bf16.msra.mxu1 %v11034_v23 }
 0x6f3   :  { %10368 = vmatprep.subr.bf16.mxu1 %v13660_v20 }
 0x6f4   :  { %10417 = vmatpush3.bf16.msra.mxu0 %v11046_v13  ;;  %v11055_v13 = vld [vmem:[%s14318_s14 + $0x10] sm:$0xff]  }
 0x6f5   :  { %10418 = vmatprep.subr.bf16.mxu0 %v14197_v11 }
 0x6f6   :  { %10369 = vmatpush3.bf16.msra.mxu1 %v11036_v33 }
 0x6f7   :  { %10394 = vmatprep.subr.bf16.mxu1 %v13660_v20 }
 0x6f8   :  { %10419 = vmatpush3.bf16.msra.mxu0 %v11047_v27  ;;  %v11056_v27 = vld [vmem:[%s14318_s14 + $0x18] sm:$0xff]  }
 0x6f9   :  { %10371 = vmatmul.mubr.bf16.vlgmr.msra.gmra.mrb[172].mxu1 %v7470_v34  ;;  %10420 = vmatprep.subr.bf16.mxu0 %v14197_v11 }
 0x6fa   :  { %10395 = vmatpush3.bf16.msra.mxu1 %v11037_v53  ;;  %10410 = vmatprep.mubr.msk.bf16.mxu1 %vm11081_vm0, %v13660_v20 }
 0x6fb   :  { %10396 = vmatprep.subr.bf16.mxu1 %v13660_v20 }
 0x6fc   :  { %10421 = vmatpush3.bf16.msra.mxu0 %v11048_v14  ;;  %v11057_v14 = vld [vmem:[%s14318_s14 + $0x20] sm:$0xff]  }
 0x6fd   :  { %10422 = vmatprep.subr.bf16.mxu0 %v14197_v11 }
 0x6fe   :  { %10397 = vmatpush3.bf16.msra.mxu1 %v11038_v35 }
 0x6ff   :  { %10398 = vmatprep.subr.bf16.mxu1 %v13660_v20 }
 0x700   :  { %10423 = vmatpush3.bf16.msra.mxu0 %v11049_v42  ;;  %v11058_v42 = vld [vmem:[%s14318_s14 + $0x28] sm:$0xff]  }
 0x701   :  { %10424 = vmatprep.subr.bf16.mxu0 %v14197_v11 }
 0x702   :  { %10399 = vmatpush3.bf16.msra.mxu1 %v11039_v37  ;;  %v6392_v49 = vpop.f32.mrb[136].mxu0 }
 0x703   :  { %10400 = vmatprep.subr.bf16.mxu1 %v13660_v20  ;;  %v10152_v19 = vpop.f32.mrb[137].mxu0 }
 0x704   :  { %v6395_v3 = vpop.f32.mrb[138].mxu0  ;;  %10425 = vmatpush3.bf16.msra.mxu0 %v11050_v39  ;;  %v11062_v19 = vld [vmem:[%s14319_s15 + $0x8] sm:$0xff]  }
 0x705   :  { %v10153_v28 = vpop.f32.mrb[139].mxu0  ;;  %10426 = vmatprep.subr.bf16.mxu0 %v14197_v11  ;;  %v11063_v3 = vld [vmem:[%s14319_s15 + $0x10] sm:$0xff]  }
 0x706   :  { %10401 = vmatpush3.bf16.msra.mxu1 %v11040_v9  ;;  %v11064_v28 = vld [vmem:[%s14319_s15 + $0x18] sm:$0xff]  }
 0x707   :  { %10402 = vmatprep.subr.bf16.mxu1 %v13660_v20 }
 0x708   :  { %10427 = vmatpush3.bf16.msra.mxu0 %v11051_v43 }
 0x709   :  { %10428 = vmatprep.subr.bf16.mxu0 %v14197_v11 }
 0x70a   :  { %10403 = vmatpush3.bf16.msra.mxu1 %v11041_v50 }
 0x70b   :  { %10404 = vmatprep.subr.bf16.mxu1 %v13660_v20 }
 0x70c   :  { %v6285_v24 = vpop.f32.mrb[148].mxu1  ;;  %10429 = vmatpush3.bf16.msra.mxu0 %v11052_v4 }
 0x70d   :  { %v6291_v29 = vadd.f32 %v6285_v24, %v6180_v61  ;;  %v10132_v8 = vpop.f32.mrb[149].mxu1  ;;  %10454 = vmatprep.subr.bf16.mxu0 %v14197_v11 }
 0x70e   :  { %v6288_v59 = vpop.f32.mrb[150].mxu1  ;;  %10405 = vmatpush3.bf16.msra.mxu1 %v11042_v5  ;;  %v11065_v5 = vld [vmem:[%s14319_s15 + $0x20] sm:$0xff]  }
 0x70f   :  { %v10133_v17 = vpop.f32.mrb[151].mxu1  ;;  %10406 = vmatprep.subr.bf16.mxu1 %v13660_v20  ;;  %v6398_v31 = vadd.f32 %v6392_v49, %v6291_v29  ;;  %v11061_v49 = vld [vmem:[%s14319_s15] sm:$0xff]   ;;  %v11066_v59 = vld [vmem:[%s14319_s15 + $0x28] sm:$0xff]  }
 0x712   :  { %10407 = vmatpush3.bf16.msra.mxu1 %v11043_v62 }
 0x713   :  { %10408 = vmatprep.subr.bf16.mxu1 %v13660_v20 }
 0x716   :  { %10409 = vmatpush3.bf16.msra.mxu1 %v11044_v7 }
 0x717   :  { %10434 = vmatprep.subr.bf16.mxu1 %v13660_v20 }
 0x719   :  { %10411 = vmatmul.mubr.bf16.vlgmr.msra.gmra.mrb[176].mxu1 %v7693_v56 }
 0x71a   :  { %10450 = vmatprep.mubr.msk.bf16.mxu1 %vm11081_vm0, %v13660_v20  ;;  %10435 = vmatpush3.bf16.msra.mxu1 %v11061_v49 }
 0x71b   :  { %10436 = vmatprep.subr.bf16.mxu1 %v14197_v11 }
 0x71e   :  { %10437 = vmatpush3.bf16.msra.mxu1 %v11062_v19 }
 0x71f   :  { %10438 = vmatprep.subr.bf16.mxu1 %v14197_v11 }
 0x722   :  { %v6606_v30 = vpop.f32.mrb[140].mxu0  ;;  %10439 = vmatpush3.bf16.msra.mxu1 %v11063_v3 }
 0x723   :  { %v10192_v58 = vpop.f32.mrb[141].mxu0  ;;  %10440 = vmatprep.subr.bf16.mxu1 %v14197_v11 }
 0x724   :  { %v6609_v12 = vpop.f32.mrb[142].mxu0 }
 0x725   :  { %v10193_v25 = vpop.f32.mrb[143].mxu0 }
 0x726   :  { %10441 = vmatpush3.bf16.msra.mxu1 %v11064_v28 }
 0x727   :  { %10442 = vmatprep.subr.bf16.mxu1 %v14197_v11 }
 0x72a   :  { %10443 = vmatpush3.bf16.msra.mxu1 %v11065_v5 }
 0x72b   :  { %10444 = vmatprep.subr.bf16.mxu1 %v14197_v11 }
 0x72c   :  { %v6499_v1 = vpop.f32.mrb[152].mxu1 }
 0x72d   :  { %v6505_v16 = vadd.f32 %v6499_v1, %v6398_v31  ;;  %v10172_v60 = vpop.f32.mrb[153].mxu1 }
 0x72e   :  { %v6502_v54 = vpop.f32.mrb[154].mxu1  ;;  %10445 = vmatpush3.bf16.msra.mxu1 %v11066_v59 }
 0x72f   :  { %v10173_v44 = vpop.f32.mrb[155].mxu1  ;;  %v6612_v6 = vadd.f32 %v6606_v30, %v6505_v16  ;;  %10446 = vmatprep.subr.bf16.mxu1 %v14197_v11 }
 0x742   :  { %v6820_v2 = vpop.f32.mrb[144].mxu0 }
 0x743   :  { %v10232_v26 = vpop.f32.mrb[145].mxu0 }
 0x744   :  { %v6823_v55 = vpop.f32.mrb[146].mxu0  ;;  %v8634_v26 = vld [vmem:[%s14320_s11] ss:$0 sm:$0xff] }
 0x745   :  { %v10233_v46 = vpop.f32.mrb[147].mxu0 }
 0x74c   :  { %v6713_v41 = vpop.f32.mrb[156].mxu1 }
 0x74d   :  { %v6719_v22 = vadd.f32 %v6713_v41, %v6612_v6  ;;  %v10212_v21 = vpop.f32.mrb[157].mxu1 }
 0x74e   :  { %v6716_v0 = vpop.f32.mrb[158].mxu1 }
 0x74f   :  { %v10213_v63 = vpop.f32.mrb[159].mxu1  ;;  %v6826_v20 = vadd.f32 %v6820_v2, %v6719_v22 }
 0x750   :  { %v11053_v63 = vld [vmem:[%s14318_s14] sm:$0xff]  }
 0x762   :  { %v7034_v32 = vpop.f32.mrb[148].mxu0 }
 0x763   :  { %v10272_v51 = vpop.f32.mrb[149].mxu0 }
 0x764   :  { %v7037_v10 = vpop.f32.mrb[150].mxu0  ;;  %v11059_v51 = vld [vmem:[%s14318_s14 + $0x30] sm:$0xff]  }
 0x765   :  { %v10273_v36 = vpop.f32.mrb[151].mxu0  ;;  %v11060_v10 = vld [vmem:[%s14318_s14 + $0x38] sm:$0xff]  }
 0x76c   :  { %v6927_v45 = vpop.f32.mrb[160].mxu1 }
 0x76d   :  { %v6933_v40 = vadd.f32 %v6927_v45, %v6826_v20  ;;  %v10252_v48 = vpop.f32.mrb[161].mxu1  ;;  %v11067_v45 = vld [vmem:[%s14319_s15 + $0x30] sm:$0xff]  }
 0x76e   :  { %v6930_v61 = vpop.f32.mrb[162].mxu1  ;;  %10447 = vmatpush3.bf16.msra.mxu1 %v11067_v45  ;;  %v8643_v48 = vld [vmem:[%s14322_s13] ss:$0 sm:$0xff] }
 0x76f   :  { %v10253_v15 = vpop.f32.mrb[163].mxu1  ;;  %v7040_v47 = vadd.f32 %v7034_v32, %v6933_v40  ;;  %v8633_v32 = vld [vmem:[%s14321_s9] ss:$0 sm:$0xff]  ;;  %10448 = vmatprep.subr.bf16.mxu1 %v14197_v11  ;;  %v11068_v40 = vld [vmem:[%s14319_s15 + $0x38] sm:$0xff]  }
 0x772   :  { %10449 = vmatpush3.bf16.msra.mxu1 %v11068_v40 }
 0x782   :  { %v7248_v38 = vpop.f32.mrb[152].mxu0 }
 0x783   :  { %v10312_v23 = vpop.f32.mrb[153].mxu0 }
 0x784   :  { %v7251_v18 = vpop.f32.mrb[154].mxu0 }
 0x785   :  { %v10313_v33 = vpop.f32.mrb[155].mxu0 }
 0x78c   :  { %v7141_v57 = vpop.f32.mrb[164].mxu1 }
 0x78d   :  { %v7147_v53 = vadd.f32 %v7141_v57, %v7040_v47  ;;  %v10292_v34 = vpop.f32.mrb[165].mxu1 }
 0x78e   :  { %v7144_v35 = vpop.f32.mrb[166].mxu1 }
 0x78f   :  { %v10293_v37 = vpop.f32.mrb[167].mxu1  ;;  %v7254_v9 = vadd.f32 %v7248_v38, %v7147_v53  ;;  %v8668_v35 = vld [vmem:[%s14323_s16] ss:$0 sm:$0xff] }
 0x7a2   :  { %v7462_v50 = vpop.f32.mrb[156].mxu0 }
 0x7a3   :  { %v10352_v24 = vpop.f32.mrb[157].mxu0 }
 0x7a4   :  { %v7465_v29 = vpop.f32.mrb[158].mxu0 }
 0x7a5   :  { %v10353_v8 = vpop.f32.mrb[159].mxu0 }
 0x7ac   :  { %v7355_v62 = vpop.f32.mrb[168].mxu1 }
 0x7ad   :  { %v7361_v17 = vadd.f32 %v7355_v62, %v7254_v9  ;;  %v10332_v31 = vpop.f32.mrb[169].mxu1 }
 0x7ae   :  { %v7358_v7 = vpop.f32.mrb[170].mxu1 }
 0x7af   :  { %v10333_v56 = vpop.f32.mrb[171].mxu1  ;;  %v7468_v30 = vadd.f32 %v7462_v50, %v7361_v17 }
 0x7c2   :  { %v7676_v58 = vpop.f32.mrb[160].mxu0 }
 0x7c3   :  { %v10392_v12 = vpop.f32.mrb[161].mxu0 }
 0x7c4   :  { %v7679_v25 = vpop.f32.mrb[162].mxu0 }
 0x7c5   :  { %v10393_v1 = vpop.f32.mrb[163].mxu0 }
 0x7cc   :  { %v7569_v16 = vpop.f32.mrb[172].mxu1 }
 0x7cd   :  { %v7575_v60 = vadd.f32 %v7569_v16, %v7468_v30  ;;  %v10372_v54 = vpop.f32.mrb[173].mxu1 }
 0x7ce   :  { %v7572_v44 = vpop.f32.mrb[174].mxu1 }
 0x7cf   :  { %v7682_v6 = vadd.f32 %v7676_v58, %v7575_v60  ;;  %v10373_v2 = vpop.f32.mrb[175].mxu1 }
 0x7d1   :  { %v7690_v39 = vadd.f32 %v8633_v32, %v7682_v6 }
 0x7d3   :  { %v7691_v36 = vmax.f32 %v7690_v39, 0.0 }
 0x7d5   :  { %v7692_v43 = vpack.c.bf16 %v7691_v36, %v7691_v36 }
 0x7ec   :  { %v7799_v55 = vpop.f32.mrb[176].mxu1 }
 0x7ed   :  { %v7800_v46 = vadd.f32 %v8634_v26, %v7799_v55  ;;  %v10412_v41 = vpop.f32.mrb[177].mxu1 }
 0x7ee   :  { %v7802_v22 = vpop.f32.mrb[178].mxu1 }
 0x7ef   :  { %v7805_v21 = vmax.f32 %v7800_v46, 0.0  ;;  %v10413_v0 = vpop.f32.mrb[179].mxu1 }
 0x7f1   :  { %v7806_v20 = vpack.c.bf16 %v7805_v21, %v7805_v21 }
 0x7f3   :  { %10431 = vmatmul.mubr.bf16.vlgmr.msra.gmra.mrb[164].mxu0 %v7806_v20 }
 0x7f4   :  { %10455 = vmatpush3.bf16.msra.mxu0 %v11053_v63  ;;  %10470 = vmatprep.mubr.msk.bf16.mxu0 %vm11081_vm0, %v14197_v11 }
 0x7f5   :  { %10456 = vmatprep.subr.bf16.mxu0 %v14197_v11 }
 0x7f8   :  { %10457 = vmatpush3.bf16.msra.mxu0 %v11054_v52 }
 0x7f9   :  { %10458 = vmatprep.subr.bf16.mxu0 %v14197_v11 }
 0x7fc   :  { %10459 = vmatpush3.bf16.msra.mxu0 %v11055_v13 }
 0x7fd   :  { %10460 = vmatprep.subr.bf16.mxu0 %v14197_v11 }
 0x800   :  { %10461 = vmatpush3.bf16.msra.mxu0 %v11056_v27 }
 0x801   :  { %10462 = vmatprep.subr.bf16.mxu0 %v14197_v11 }
 0x804   :  { %10463 = vmatpush3.bf16.msra.mxu0 %v11057_v14 }
 0x805   :  { %10464 = vmatprep.subr.bf16.mxu0 %v14197_v11 }
 0x808   :  { %10465 = vmatpush3.bf16.msra.mxu0 %v11058_v42 }
 0x809   :  { %10466 = vmatprep.subr.bf16.mxu0 %v14197_v11 }
 0x80c   :  { %10467 = vmatpush3.bf16.msra.mxu0 %v11059_v51 }
 0x80d   :  { %10468 = vmatprep.subr.bf16.mxu0 %v14197_v11 }
 0x810   :  { %10469 = vmatpush3.bf16.msra.mxu0 %v11060_v10 }
 0x813   :  { %10471 = vmatmul.mubr.bf16.vlgmr.msra.gmra.mrb[168].mxu0 %v7692_v43 }
 0x8c6   :  { %v7912_v4 = vpop.f32.mrb[164].mxu0 }
 0x8c7   :  { %v7913_v61 = vadd.f32 %v8643_v48, %v7912_v4  ;;  %v10432_v15 = vpop.f32.mrb[165].mxu0 }
 0x8c8   :  { %v7915_v47 = vpop.f32.mrb[166].mxu0 }
 0x8c9   :  { %v7918_v38 = vmax.f32 %v7913_v61, 0.0  ;;  %v10433_v23 = vpop.f32.mrb[167].mxu0 }
 0x8cb   :  { %v7919_v18 = vpack.c.bf16 %v7918_v38, %v7918_v38 }
 0x8cd   :  { %10451 = vmatmul.mubr.bf16.vlgmr.msra.gmra.mrb[180].mxu1 %v7919_v18 }
 0x8e6   :  { %v8122_v33 = vpop.f32.mrb[168].mxu0 }
 0x8e7   :  { %v10472_v57 = vpop.f32.mrb[169].mxu0 }
 0x8e8   :  { %v8125_v11 = vpop.f32.mrb[170].mxu0 }
 0x8e9   :  { %v10473_v53 = vpop.f32.mrb[171].mxu0 }
 0x9a0   :  { %v8034_v34 = vpop.f32.mrb[180].mxu1 }
 0x9a1   :  { %v8123_v37 = vadd.f32 %v8122_v33, %v8034_v34  ;;  %v10452_v9 = vpop.f32.mrb[181].mxu1 }
 0x9a2   :  { %v8037_v49 = vpop.f32.mrb[182].mxu1 }
 0x9a3   :  { %v8135_v19 = vadd.f32 %v8668_v35, %v8123_v37  ;;  %v10453_v3 = vpop.f32.mrb[183].mxu1 }
 0x9a5   :  { %v8136_v28 = vmax.f32 %v8135_v19, 0.0 }
 0x9a7   :  { %8137 = vst [vmem:[%s14324_s17] sm:$0xff] %v8136_v28 }

</bundles_post_ra>
